<compile_context>
chip_gen: v6e
topology: v6e:2x2x1
jax: 0.10.0
libtpu: 0.0.40
codegen_flags: <defaults>
</compile_context>

<pallas_src>
import math
from functools import partial

import numpy as np

import jax
import jax.numpy as jnp
from jax import lax
from jax.experimental import pallas as pl
from jax.experimental.pallas import tpu as pltpu

_VMEM = pl.BlockSpec(memory_space=pltpu.MemorySpace.VMEM)
_SMEM = pl.BlockSpec(memory_space=pltpu.MemorySpace.SMEM)
NEG_INF = -1e30
LN_EPS = 1e-5  # PyTorch LayerNorm default


# ----------------------------------------------------------------------------
# Host-side helpers (static, computed once at trace time)
# ----------------------------------------------------------------------------
def _block_mask(B, Tq, Tk, causal):
    """Additive mask for batch-folded attention: 0 where q-row and k-row belong
    to the same batch element (and, if causal, q_pos >= k_pos), else -1e30."""
    r = np.arange(B * Tq)
    c = np.arange(B * Tk)
    same = (r[:, None] // Tq) == (c[None, :] // Tk)
    if causal:
        same = same & ((r[:, None] % Tq) >= (c[None, :] % Tk))
    return jnp.asarray(np.where(same, 0.0, NEG_INF).astype(np.float32))


# ----------------------------------------------------------------------------
# The single fused kernel
# ----------------------------------------------------------------------------
def _gesam_forward_kernel(*refs, treedef, n_leaves, B, T, S, H, n_enc, n_dec):
    xdec_ref = refs[0]          # (B*T, Din)    VMEM
    timbre_ref = refs[1]        # (B, 2)        SMEM (scalar reads)
    pitch_ref = refs[2]         # (B, num_notes) VMEM
    leaves = refs[3:3 + n_leaves]
    out_ref = refs[3 + n_leaves]          # (B*T, Din) VMEM
    mem_ref = refs[4 + n_leaves]          # (B*S, D)   VMEM scratch
    p = jax.tree_util.tree_unflatten(treedef, leaves)

    f32 = jnp.float32
    D = p["in_dec"]["w"].shape[1]
    Dh = D // H
    scale = 1.0 / math.sqrt(Dh)

    # -------------------------- small building blocks -----------------------
    def ln(x, npr):
        g = npr["g"][...]
        b = npr["b"][...]
        mu = jnp.mean(x, axis=-1, keepdims=True)
        xc = x - mu
        var = jnp.mean(xc * xc, axis=-1, keepdims=True)
        return xc * lax.rsqrt(var + LN_EPS) * g + b

    def softmax(s):
        m = jnp.max(s, axis=-1, keepdims=True)
        e = jnp.exp(s - m)
        return e / jnp.sum(e, axis=-1, keepdims=True)   # exact division

    def mha(xq, xkv, ap, mask):
        # Full-width (N,D)@(D,D) projections (one matmul each).
        q = jnp.dot(xq, ap["wq"][...], preferred_element_type=f32) + ap["bq"][...]
        k = jnp.dot(xkv, ap["wk"][...], preferred_element_type=f32) + ap["bk"][...]
        v = jnp.dot(xkv, ap["wv"][...], preferred_element_type=f32) + ap["bv"][...]
        q = q * scale
        lane_q = lax.broadcasted_iota(jnp.int32, q.shape, 1)
        lane_v = lax.broadcasted_iota(jnp.int32, v.shape, 1)
        o = None
        for h in range(H):
            lo = h * Dh
            hi = lo + Dh
            # Zeroing non-head lanes of Q makes the full-width contraction
            # equal to the per-head (Dh) contraction; same trick on V makes
            # the P@V output land only in that head's lanes, so summing over
            # heads IS the concatenated multi-head output.
            qh = jnp.where((lane_q >= lo) & (lane_q < hi), q, 0.0)
            s = lax.dot_general(qh, k, (((1,), (1,)), ((), ())),
                                preferred_element_type=f32) + mask
            pa = softmax(s)
            vh = jnp.where((lane_v >= lo) & (lane_v < hi), v, 0.0)
            oh = jnp.dot(pa, vh, preferred_element_type=f32)
            o = oh if o is None else o + oh
        # Single full-width output projection on the (implicitly concatenated)
        # head outputs.
        return jnp.dot(o, ap["wo"][...], preferred_element_type=f32) + ap["bo"][...]

    def ffn(x, lp):
        h1 = jnp.dot(x, lp["ff1"]["w"][...],
                     preferred_element_type=f32) + lp["ff1"]["b"][...]
        h1 = jnp.maximum(h1, 0.0)
        return jnp.dot(h1, lp["ff2"]["w"][...],
                       preferred_element_type=f32) + lp["ff2"]["b"][...]

    # ------------------------ decoder input embedding ------------------------
    # (B*T, Din) @ (Din, D) + b + batch-tiled positional embedding
    xd = (jnp.dot(xdec_ref[...], p["in_dec"]["w"][...],
                  preferred_element_type=f32)
          + p["in_dec"]["b"][...] + p["pos_dec"][...])                 # (B*T, D)

    # --------------------------- encoder prologue ---------------------------
    # In-kernel argmax-as-one-hot (first-max tie break) @ note embedding table.
    pitch = pitch_ref[...]                                             # (B, N)
    n_notes = pitch.shape[1]
    pmax = jnp.max(pitch, axis=-1, keepdims=True)
    col = lax.broadcasted_iota(jnp.int32, pitch.shape, 1)
    cand = jnp.where(pitch >= pmax, col, n_notes)
    first = jnp.min(cand, axis=-1, keepdims=True)
    one_hot = (col == first).astype(f32)
    pitch_rows = jnp.dot(one_hot, p["note_emb"][...],
                         preferred_element_type=f32)                   # (B, D)

    w_t = p["in_enc_timbre"]["w"][...]                                 # (1, D)
    b_t = p["in_enc_timbre"]["b"][...]                                 # (1, D)
    pos_e = p["pos_enc"][...]                                          # (S, D)
    # One-time prologue assembly of the (B*S, D) encoder memory (tiny B loop,
    # static sublane slices into VMEM scratch; S == 3 = 2 timbre + 1 pitch).
    for b in range(B):
        base = b * S
        mem_ref[base + 0:base + 1, :] = timbre_ref[b, 0] * w_t + b_t + pos_e[0:1, :]
        mem_ref[base + 1:base + 2, :] = timbre_ref[b, 1] * w_t + b_t + pos_e[1:2, :]
        mem_ref[base + 2:base + 3, :] = pitch_rows[b:b + 1, :] + pos_e[2:3, :]
    mem = mem_ref[...]                                                 # (B*S, D)

    enc_mask = p["enc_mask"][...]
    dec_mask = p["dec_mask"][...]
    cross_mask = p["cross_mask"][...]

    # -------------------- encoder stack (post-norm) + final LN --------------
    x = mem
    for i in range(n_enc):
        lp = p["enc_layers"][i]
        x = ln(x + mha(x, x, lp["self_attn"], enc_mask), lp["norm1"])
        x = ln(x + ffn(x, lp), lp["norm2"])
    mem = ln(x, p["enc_norm"])

    # ------------------------------ decoder stack ---------------------------
    y = xd
    for i in range(n_dec):
        lp = p["dec_layers"][i]
        y = ln(y + mha(y, y, lp["self_attn"], dec_mask), lp["norm1"])
        y = ln(y + mha(y, mem, lp["cross_attn"], cross_mask), lp["norm2"])
        y = ln(y + ffn(y, lp), lp["norm3"])
    y = ln(y, p["dec_norm"])

    # --------------------- final output projection --------------------------
    out_ref[...] = (jnp.dot(y, p["out_proj"]["w"][...],
                            preferred_element_type=f32)
                    + p["out_proj"]["b"][...])


# ----------------------------------------------------------------------------
# Wrapper: one pallas_call for the whole forward pass
# ----------------------------------------------------------------------------
def gesam_transformer_forward(params, xdec, xenc, cfg):
    B, T, din = xdec.shape
    D = cfg["internal_dimension"]
    H = cfg["n_head"]
    S = 3  # encoder sequence: 2 timbre rows + 1 pitch row

    kparams = {
        "in_dec": params["in_dec"],
        "in_enc_timbre": params["in_enc_timbre"],
        "note_emb": params["note_emb"],
        "pos_dec": jnp.tile(params["posemb_dec"][:T], (B, 1)),   # (B*T, D)
        "pos_enc": params["posemb_enc"],                         # (S, D)
        "enc_layers": params["enc_layers"],
        "dec_layers": params["dec_layers"],
        "enc_norm": params["enc_norm"],
        "dec_norm": params["dec_norm"],
        "out_proj": params["out_proj"],
        "dec_mask": _block_mask(B, T, T, causal=True),
        "enc_mask": _block_mask(B, S, S, causal=False),
        "cross_mask": _block_mask(B, T, S, causal=False),
    }
    leaves, treedef = jax.tree_util.tree_flatten(kparams)
    n_leaves = len(leaves)

    xdec_flat = xdec.reshape(B * T, din)
    timbre = xenc[:, :2]                       # (B, 2) scalars -> SMEM
    pitch = xenc[:, 2:]                        # (B, num_notes) -> VMEM

    kernel = partial(_gesam_forward_kernel,
                     treedef=treedef, n_leaves=n_leaves,
                     B=B, T=T, S=S, H=H,
                     n_enc=cfg["n_layer_encoder"], n_dec=cfg["n_layer_decoder"])

    out_flat = pl.pallas_call(
        kernel,
        out_shape=jax.ShapeDtypeStruct((B * T, din), jnp.float32),
        in_specs=[_VMEM, _SMEM, _VMEM] + [_VMEM] * n_leaves,
        out_specs=_VMEM,
        scratch_shapes=[pltpu.VMEM((B * S, D), jnp.float32)],
    )(xdec_flat, timbre, pitch, *leaves)

    return out_flat.reshape(B, T, din)


# ----------------------------------------------------------------------------
# Parameter initialization (deterministic, synthetic), nn.Linear-style.
# Attention weights are kept full-width (D, D); no per-head pre-splitting.
# ----------------------------------------------------------------------------
def _dense_init(key, fan_in, fan_out):
    k1, k2 = jax.random.split(key)
    lim = 1.0 / math.sqrt(fan_in)
    w = jax.random.uniform(k1, (fan_in, fan_out), jnp.float32, -lim, lim)
    b = jax.random.uniform(k2, (1, fan_out), jnp.float32, -lim, lim)
    return {"w": w, "b": b}


def _mha_init(key, d):
    ks = jax.random.split(key, 4)
    q, k, v, o = (_dense_init(ks[i], d, d) for i in range(4))
    return {"wq": q["w"], "bq": q["b"], "wk": k["w"], "bk": k["b"],
            "wv": v["w"], "bv": v["b"], "wo": o["w"], "bo": o["b"]}


def _ln_init(d):
    return {"g": jnp.ones((1, d), jnp.float32),
            "b": jnp.zeros((1, d), jnp.float32)}


def _enc_layer_init(key, d, dff):
    ks = jax.random.split(key, 3)
    return {"self_attn": _mha_init(ks[0], d),
            "norm1": _ln_init(d),
            "ff1": _dense_init(ks[1], d, dff),
            "ff2": _dense_init(ks[2], dff, d),
            "norm2": _ln_init(d)}


def _dec_layer_init(key, d, dff):
    ks = jax.random.split(key, 4)
    return {"self_attn": _mha_init(ks[0], d),
            "norm1": _ln_init(d),
            "cross_attn": _mha_init(ks[1], d),
            "norm2": _ln_init(d),
            "ff1": _dense_init(ks[2], d, dff),
            "ff2": _dense_init(ks[3], dff, d),
            "norm3": _ln_init(d)}


def init_params(key, cfg):
    d = cfg["internal_dimension"]
    din = cfg["input_dimension"]
    dff = cfg["feedforward_dimension"]
    ks = jax.random.split(key, 6 + cfg["n_layer_encoder"] + cfg["n_layer_decoder"])
    i = 0
    params = {}
    params["in_dec"] = _dense_init(ks[i], din, d); i += 1
    params["in_enc_timbre"] = _dense_init(ks[i], 1, d); i += 1
    params["note_emb"] = jax.random.normal(ks[i], (cfg["num_notes"], d), jnp.float32); i += 1
    params["out_proj"] = _dense_init(ks[i], d, din); i += 1
    params["posemb_dec"] = jax.random.normal(ks[i], (cfg["block_size"], d), jnp.float32); i += 1
    params["posemb_enc"] = jax.random.normal(ks[i], (3, d), jnp.float32); i += 1
    params["enc_layers"] = []
    for _ in range(cfg["n_layer_encoder"]):
        params["enc_layers"].append(_enc_layer_init(ks[i], d, dff)); i += 1
    params["dec_layers"] = []
    for _ in range(cfg["n_layer_decoder"]):
        params["dec_layers"].append(_dec_layer_init(ks[i], d, dff)); i += 1
    params["enc_norm"] = _ln_init(d)
    params["dec_norm"] = _ln_init(d)
    return params


# ----------------------------------------------------------------------------
# Main
# ----------------------------------------------------------------------------
if __name__ == "__main__":
    cfg = dict(
        input_dimension=4,
        internal_dimension=32,
        n_head=4,
        n_layer_encoder=2,
        n_layer_decoder=2,
        dropout=0.0,
        feedforward_dimension=64,
        block_size=16,
        num_notes=8,
    )

    key = jax.random.PRNGKey(0)
    kp, kx, ke = jax.random.split(key, 3)
    params = init_params(kp, cfg)

    B, T = 2, 8
    xdec = jax.random.normal(kx, (B, T, cfg["input_dimension"]), jnp.float32)
    xenc = jax.random.normal(ke, (B, 2 + cfg["num_notes"]), jnp.float32)

    fwd = jax.jit(partial(gesam_transformer_forward, cfg=cfg))
    out = fwd(params, xdec, xenc)
    out = jax.block_until_ready(out)

    assert out.shape == (B, T, cfg["input_dimension"])
    assert bool(jnp.all(jnp.isfinite(out)))
    print("KERNEL_OK")
</pallas_src>

<mosaic_0001>
module attributes {stable_mosaic.version = 11 : i64} {
  func.func @_gesam_forward_kernel(%arg0: memref<16x4xf32, #tpu.memory_space<vmem>>, %arg1: memref<2x2xf32, #tpu.memory_space<smem>>, %arg2: memref<2x8xf32, #tpu.memory_space<vmem>>, %arg3: memref<16x6xf32, #tpu.memory_space<vmem>>, %arg4: memref<1x32xf32, #tpu.memory_space<vmem>>, %arg5: memref<1x32xf32, #tpu.memory_space<vmem>>, %arg6: memref<1x32xf32, #tpu.memory_space<vmem>>, %arg7: memref<1x32xf32, #tpu.memory_space<vmem>>, %arg8: memref<32x32xf32, #tpu.memory_space<vmem>>, %arg9: memref<32x32xf32, #tpu.memory_space<vmem>>, %arg10: memref<32x32xf32, #tpu.memory_space<vmem>>, %arg11: memref<32x32xf32, #tpu.memory_space<vmem>>, %arg12: memref<1x64xf32, #tpu.memory_space<vmem>>, %arg13: memref<32x64xf32, #tpu.memory_space<vmem>>, %arg14: memref<1x32xf32, #tpu.memory_space<vmem>>, %arg15: memref<64x32xf32, #tpu.memory_space<vmem>>, %arg16: memref<1x32xf32, #tpu.memory_space<vmem>>, %arg17: memref<1x32xf32, #tpu.memory_space<vmem>>, %arg18: memref<1x32xf32, #tpu.memory_space<vmem>>, %arg19: memref<1x32xf32, #tpu.memory_space<vmem>>, %arg20: memref<1x32xf32, #tpu.memory_space<vmem>>, %arg21: memref<1x32xf32, #tpu.memory_space<vmem>>, %arg22: memref<1x32xf32, #tpu.memory_space<vmem>>, %arg23: memref<1x32xf32, #tpu.memory_space<vmem>>, %arg24: memref<1x32xf32, #tpu.memory_space<vmem>>, %arg25: memref<1x32xf32, #tpu.memory_space<vmem>>, %arg26: memref<32x32xf32, #tpu.memory_space<vmem>>, %arg27: memref<32x32xf32, #tpu.memory_space<vmem>>, %arg28: memref<32x32xf32, #tpu.memory_space<vmem>>, %arg29: memref<32x32xf32, #tpu.memory_space<vmem>>, %arg30: memref<1x32xf32, #tpu.memory_space<vmem>>, %arg31: memref<1x32xf32, #tpu.memory_space<vmem>>, %arg32: memref<1x32xf32, #tpu.memory_space<vmem>>, %arg33: memref<1x32xf32, #tpu.memory_space<vmem>>, %arg34: memref<32x32xf32, #tpu.memory_space<vmem>>, %arg35: memref<32x32xf32, #tpu.memory_space<vmem>>, %arg36: memref<32x32xf32, #tpu.memory_space<vmem>>, %arg37: memref<32x32xf32, #tpu.memory_space<vmem>>, %arg38: memref<1x64xf32, #tpu.memory_space<vmem>>, %arg39: memref<32x64xf32, #tpu.memory_space<vmem>>, %arg40: memref<1x32xf32, #tpu.memory_space<vmem>>, %arg41: memref<64x32xf32, #tpu.memory_space<vmem>>, %arg42: memref<1x32xf32, #tpu.memory_space<vmem>>, %arg43: memref<1x32xf32, #tpu.memory_space<vmem>>, %arg44: memref<1x32xf32, #tpu.memory_space<vmem>>, %arg45: memref<1x32xf32, #tpu.memory_space<vmem>>, %arg46: memref<1x32xf32, #tpu.memory_space<vmem>>, %arg47: memref<1x32xf32, #tpu.memory_space<vmem>>, %arg48: memref<1x32xf32, #tpu.memory_space<vmem>>, %arg49: memref<1x32xf32, #tpu.memory_space<vmem>>, %arg50: memref<1x32xf32, #tpu.memory_space<vmem>>, %arg51: memref<1x32xf32, #tpu.memory_space<vmem>>, %arg52: memref<32x32xf32, #tpu.memory_space<vmem>>, %arg53: memref<32x32xf32, #tpu.memory_space<vmem>>, %arg54: memref<32x32xf32, #tpu.memory_space<vmem>>, %arg55: memref<32x32xf32, #tpu.memory_space<vmem>>, %arg56: memref<16x16xf32, #tpu.memory_space<vmem>>, %arg57: memref<1x32xf32, #tpu.memory_space<vmem>>, %arg58: memref<1x32xf32, #tpu.memory_space<vmem>>, %arg59: memref<1x64xf32, #tpu.memory_space<vmem>>, %arg60: memref<32x64xf32, #tpu.memory_space<vmem>>, %arg61: memref<1x32xf32, #tpu.memory_space<vmem>>, %arg62: memref<64x32xf32, #tpu.memory_space<vmem>>, %arg63: memref<1x32xf32, #tpu.memory_space<vmem>>, %arg64: memref<1x32xf32, #tpu.memory_space<vmem>>, %arg65: memref<1x32xf32, #tpu.memory_space<vmem>>, %arg66: memref<1x32xf32, #tpu.memory_space<vmem>>, %arg67: memref<1x32xf32, #tpu.memory_space<vmem>>, %arg68: memref<1x32xf32, #tpu.memory_space<vmem>>, %arg69: memref<1x32xf32, #tpu.memory_space<vmem>>, %arg70: memref<1x32xf32, #tpu.memory_space<vmem>>, %arg71: memref<32x32xf32, #tpu.memory_space<vmem>>, %arg72: memref<32x32xf32, #tpu.memory_space<vmem>>, %arg73: memref<32x32xf32, #tpu.memory_space<vmem>>, %arg74: memref<32x32xf32, #tpu.memory_space<vmem>>, %arg75: memref<1x64xf32, #tpu.memory_space<vmem>>, %arg76: memref<32x64xf32, #tpu.memory_space<vmem>>, %arg77: memref<1x32xf32, #tpu.memory_space<vmem>>, %arg78: memref<64x32xf32, #tpu.memory_space<vmem>>, %arg79: memref<1x32xf32, #tpu.memory_space<vmem>>, %arg80: memref<1x32xf32, #tpu.memory_space<vmem>>, %arg81: memref<1x32xf32, #tpu.memory_space<vmem>>, %arg82: memref<1x32xf32, #tpu.memory_space<vmem>>, %arg83: memref<1x32xf32, #tpu.memory_space<vmem>>, %arg84: memref<1x32xf32, #tpu.memory_space<vmem>>, %arg85: memref<1x32xf32, #tpu.memory_space<vmem>>, %arg86: memref<1x32xf32, #tpu.memory_space<vmem>>, %arg87: memref<32x32xf32, #tpu.memory_space<vmem>>, %arg88: memref<32x32xf32, #tpu.memory_space<vmem>>, %arg89: memref<32x32xf32, #tpu.memory_space<vmem>>, %arg90: memref<32x32xf32, #tpu.memory_space<vmem>>, %arg91: memref<6x6xf32, #tpu.memory_space<vmem>>, %arg92: memref<1x32xf32, #tpu.memory_space<vmem>>, %arg93: memref<1x32xf32, #tpu.memory_space<vmem>>, %arg94: memref<1x32xf32, #tpu.memory_space<vmem>>, %arg95: memref<4x32xf32, #tpu.memory_space<vmem>>, %arg96: memref<1x32xf32, #tpu.memory_space<vmem>>, %arg97: memref<1x32xf32, #tpu.memory_space<vmem>>, %arg98: memref<8x32xf32, #tpu.memory_space<vmem>>, %arg99: memref<1x4xf32, #tpu.memory_space<vmem>>, %arg100: memref<32x4xf32, #tpu.memory_space<vmem>>, %arg101: memref<16x32xf32, #tpu.memory_space<vmem>>, %arg102: memref<3x32xf32, #tpu.memory_space<vmem>>, %arg103: memref<16x4xf32, #tpu.memory_space<vmem>>, %arg104: memref<6x32xf32, #tpu.memory_space<vmem>>) attributes {dimension_semantics = [], scalar_prefetch = 0 : i64, scratch_operands = 1 : i64, tpu.core_type = #tpu.core_type<tc>} {
    %c0 = arith.constant 0 : index
    %c0_0 = arith.constant 0 : index
    %0 = vector.load %arg0[%c0, %c0_0] : memref<16x4xf32, #tpu.memory_space<vmem>>, vector<16x4xf32>
    %c0_1 = arith.constant 0 : index
    %c0_2 = arith.constant 0 : index
    %1 = vector.load %arg95[%c0_1, %c0_2] : memref<4x32xf32, #tpu.memory_space<vmem>>, vector<4x32xf32>
    %cst = arith.constant dense<0.000000e+00> : vector<16x32xf32>
    %2 = tpu.matmul %0, %1, %cst {dimension_numbers = #tpu.dot_dimension_numbers<[1], [0], [0], [1], [0, 0, 1, 1], [], []>} : vector<16x4xf32>, vector<4x32xf32>, vector<16x32xf32> -> vector<16x32xf32>
    %c0_3 = arith.constant 0 : index
    %c0_4 = arith.constant 0 : index
    %3 = vector.load %arg94[%c0_3, %c0_4] : memref<1x32xf32, #tpu.memory_space<vmem>>, vector<1x32xf32>
    %4 = vector.broadcast %3 : vector<1x32xf32> to vector<16x32xf32>
    %5 = arith.addf %2, %4 : vector<16x32xf32>
    %c0_5 = arith.constant 0 : index
    %c0_6 = arith.constant 0 : index
    %6 = vector.load %arg101[%c0_5, %c0_6] : memref<16x32xf32, #tpu.memory_space<vmem>>, vector<16x32xf32>
    %7 = arith.addf %5, %6 : vector<16x32xf32>
    %c0_7 = arith.constant 0 : index
    %c0_8 = arith.constant 0 : index
    %8 = vector.load %arg2[%c0_7, %c0_8] : memref<2x8xf32, #tpu.memory_space<vmem>>, vector<2x8xf32>
    %cst_9 = arith.constant dense<0xFF800000> : vector<2xf32>
    %9 = vector.multi_reduction <maximumf>, %8, %cst_9 [1] : vector<2x8xf32> to vector<2xf32>
    %10 = vector.shape_cast %9 : vector<2xf32> to vector<2x1xf32>
    %11 = tpu.iota {dimensions = array<i32: 1>} : vector<2x8xi32>
    %12 = vector.broadcast %10 : vector<2x1xf32> to vector<2x8xf32>
    %13 = arith.cmpf oge, %8, %12 : vector<2x8xf32>
    %c8_i32 = arith.constant 8 : i32
    %14 = vector.broadcast %c8_i32 : i32 to vector<2x8xi32>
    %15 = arith.select %13, %11, %14 : vector<2x8xi1>, vector<2x8xi32>
    %cst_10 = arith.constant dense<2147483647> : vector<2xi32>
    %16 = vector.multi_reduction <minsi>, %15, %cst_10 [1] : vector<2x8xi32> to vector<2xi32>
    %17 = vector.shape_cast %16 : vector<2xi32> to vector<2x1xi32>
    %18 = vector.broadcast %17 : vector<2x1xi32> to vector<2x8xi32>
    %19 = arith.cmpi eq, %11, %18 : vector<2x8xi32>
    %20 = arith.extui %19 : vector<2x8xi1> to vector<2x8xi32>
    %21 = arith.sitofp %20 : vector<2x8xi32> to vector<2x8xf32>
    %c0_11 = arith.constant 0 : index
    %c0_12 = arith.constant 0 : index
    %22 = vector.load %arg98[%c0_11, %c0_12] : memref<8x32xf32, #tpu.memory_space<vmem>>, vector<8x32xf32>
    %cst_13 = arith.constant dense<0.000000e+00> : vector<2x32xf32>
    %23 = tpu.matmul %21, %22, %cst_13 {dimension_numbers = #tpu.dot_dimension_numbers<[1], [0], [0], [1], [0, 0, 1, 1], [], []>} : vector<2x8xf32>, vector<8x32xf32>, vector<2x32xf32> -> vector<2x32xf32>
    %c0_14 = arith.constant 0 : index
    %c0_15 = arith.constant 0 : index
    %24 = vector.load %arg97[%c0_14, %c0_15] : memref<1x32xf32, #tpu.memory_space<vmem>>, vector<1x32xf32>
    %c0_16 = arith.constant 0 : index
    %c0_17 = arith.constant 0 : index
    %25 = vector.load %arg96[%c0_16, %c0_17] : memref<1x32xf32, #tpu.memory_space<vmem>>, vector<1x32xf32>
    %c0_18 = arith.constant 0 : index
    %c0_19 = arith.constant 0 : index
    %26 = vector.load %arg102[%c0_18, %c0_19] : memref<3x32xf32, #tpu.memory_space<vmem>>, vector<3x32xf32>
    %c0_20 = arith.constant 0 : index
    %c0_21 = arith.constant 0 : index
    %27 = memref.load %arg1[%c0_20, %c0_21] : memref<2x2xf32, #tpu.memory_space<smem>>
    %28 = vector.broadcast %27 : f32 to vector<1x32xf32>
    %29 = arith.mulf %28, %24 : vector<1x32xf32>
    %30 = arith.addf %29, %25 : vector<1x32xf32>
    %31 = vector.extract_strided_slice %26 {offsets = [0, 0], sizes = [1, 32], strides = [1, 1]} : vector<3x32xf32> to vector<1x32xf32>
    %32 = arith.addf %30, %31 : vector<1x32xf32>
    %c0_22 = arith.constant 0 : index
    %c0_23 = arith.constant 0 : index
    %33 = vector.load %arg104[%c0_22, %c0_23] : memref<6x32xf32, #tpu.memory_space<vmem>>, vector<1x32xf32>
    tpu.vector_store %arg104[%c0_22, %c0_23], %32 {strides = array<i32>} : memref<6x32xf32, #tpu.memory_space<vmem>>, vector<1x32xf32>,
    %c0_24 = arith.constant 0 : index
    %c1 = arith.constant 1 : index
    %34 = memref.load %arg1[%c0_24, %c1] : memref<2x2xf32, #tpu.memory_space<smem>>
    %35 = vector.broadcast %34 : f32 to vector<1x32xf32>
    %36 = arith.mulf %35, %24 : vector<1x32xf32>
    %37 = arith.addf %36, %25 : vector<1x32xf32>
    %38 = vector.extract_strided_slice %26 {offsets = [1, 0], sizes = [1, 32], strides = [1, 1]} : vector<3x32xf32> to vector<1x32xf32>
    %39 = arith.addf %37, %38 : vector<1x32xf32>
    %c1_25 = arith.constant 1 : index
    %c0_26 = arith.constant 0 : index
    %40 = vector.load %arg104[%c1_25, %c0_26] : memref<6x32xf32, #tpu.memory_space<vmem>>, vector<1x32xf32>
    tpu.vector_store %arg104[%c1_25, %c0_26], %39 {strides = array<i32>} : memref<6x32xf32, #tpu.memory_space<vmem>>, vector<1x32xf32>,
    %41 = vector.extract_strided_slice %23 {offsets = [0, 0], sizes = [1, 32], strides = [1, 1]} : vector<2x32xf32> to vector<1x32xf32>
    %42 = vector.extract_strided_slice %26 {offsets = [2, 0], sizes = [1, 32], strides = [1, 1]} : vector<3x32xf32> to vector<1x32xf32>
    %43 = arith.addf %41, %42 : vector<1x32xf32>
    %c2 = arith.constant 2 : index
    %c0_27 = arith.constant 0 : index
    %44 = vector.load %arg104[%c2, %c0_27] : memref<6x32xf32, #tpu.memory_space<vmem>>, vector<1x32xf32>
    tpu.vector_store %arg104[%c2, %c0_27], %43 {strides = array<i32>} : memref<6x32xf32, #tpu.memory_space<vmem>>, vector<1x32xf32>,
    %c1_28 = arith.constant 1 : index
    %c0_29 = arith.constant 0 : index
    %45 = memref.load %arg1[%c1_28, %c0_29] : memref<2x2xf32, #tpu.memory_space<smem>>
    %46 = vector.broadcast %45 : f32 to vector<1x32xf32>
    %47 = arith.mulf %46, %24 : vector<1x32xf32>
    %48 = arith.addf %47, %25 : vector<1x32xf32>
    %49 = vector.extract_strided_slice %26 {offsets = [0, 0], sizes = [1, 32], strides = [1, 1]} : vector<3x32xf32> to vector<1x32xf32>
    %50 = arith.addf %48, %49 : vector<1x32xf32>
    %c3 = arith.constant 3 : index
    %c0_30 = arith.constant 0 : index
    %51 = vector.load %arg104[%c3, %c0_30] : memref<6x32xf32, #tpu.memory_space<vmem>>, vector<1x32xf32>
    tpu.vector_store %arg104[%c3, %c0_30], %50 {strides = array<i32>} : memref<6x32xf32, #tpu.memory_space<vmem>>, vector<1x32xf32>,
    %c1_31 = arith.constant 1 : index
    %c1_32 = arith.constant 1 : index
    %52 = memref.load %arg1[%c1_31, %c1_32] : memref<2x2xf32, #tpu.memory_space<smem>>
    %53 = vector.broadcast %52 : f32 to vector<1x32xf32>
    %54 = arith.mulf %53, %24 : vector<1x32xf32>
    %55 = arith.addf %54, %25 : vector<1x32xf32>
    %56 = vector.extract_strided_slice %26 {offsets = [1, 0], sizes = [1, 32], strides = [1, 1]} : vector<3x32xf32> to vector<1x32xf32>
    %57 = arith.addf %55, %56 : vector<1x32xf32>
    %c4 = arith.constant 4 : index
    %c0_33 = arith.constant 0 : index
    %58 = vector.load %arg104[%c4, %c0_33] : memref<6x32xf32, #tpu.memory_space<vmem>>, vector<1x32xf32>
    tpu.vector_store %arg104[%c4, %c0_33], %57 {strides = array<i32>} : memref<6x32xf32, #tpu.memory_space<vmem>>, vector<1x32xf32>,
    %59 = vector.extract_strided_slice %23 {offsets = [1, 0], sizes = [1, 32], strides = [1, 1]} : vector<2x32xf32> to vector<1x32xf32>
    %60 = vector.extract_strided_slice %26 {offsets = [2, 0], sizes = [1, 32], strides = [1, 1]} : vector<3x32xf32> to vector<1x32xf32>
    %61 = arith.addf %59, %60 : vector<1x32xf32>
    %c5 = arith.constant 5 : index
    %c0_34 = arith.constant 0 : index
    %62 = vector.load %arg104[%c5, %c0_34] : memref<6x32xf32, #tpu.memory_space<vmem>>, vector<1x32xf32>
    tpu.vector_store %arg104[%c5, %c0_34], %61 {strides = array<i32>} : memref<6x32xf32, #tpu.memory_space<vmem>>, vector<1x32xf32>,
    %c0_35 = arith.constant 0 : index
    %c0_36 = arith.constant 0 : index
    %63 = vector.load %arg104[%c0_35, %c0_36] : memref<6x32xf32, #tpu.memory_space<vmem>>, vector<6x32xf32>
    %c0_37 = arith.constant 0 : index
    %c0_38 = arith.constant 0 : index
    %64 = vector.load %arg91[%c0_37, %c0_38] : memref<6x6xf32, #tpu.memory_space<vmem>>, vector<6x6xf32>
    %c0_39 = arith.constant 0 : index
    %c0_40 = arith.constant 0 : index
    %65 = vector.load %arg56[%c0_39, %c0_40] : memref<16x16xf32, #tpu.memory_space<vmem>>, vector<16x16xf32>
    %c0_41 = arith.constant 0 : index
    %c0_42 = arith.constant 0 : index
    %66 = vector.load %arg3[%c0_41, %c0_42] : memref<16x6xf32, #tpu.memory_space<vmem>>, vector<16x6xf32>
    %c0_43 = arith.constant 0 : index
    %c0_44 = arith.constant 0 : index
    %67 = vector.load %arg73[%c0_43, %c0_44] : memref<32x32xf32, #tpu.memory_space<vmem>>, vector<32x32xf32>
    %cst_45 = arith.constant dense<0.000000e+00> : vector<6x32xf32>
    %68 = tpu.matmul %63, %67, %cst_45 {dimension_numbers = #tpu.dot_dimension_numbers<[1], [0], [0], [1], [0, 0, 1, 1], [], []>} : vector<6x32xf32>, vector<32x32xf32>, vector<6x32xf32> -> vector<6x32xf32>
    %c0_46 = arith.constant 0 : index
    %c0_47 = arith.constant 0 : index
    %69 = vector.load %arg69[%c0_46, %c0_47] : memref<1x32xf32, #tpu.memory_space<vmem>>, vector<1x32xf32>
    %70 = vector.broadcast %69 : vector<1x32xf32> to vector<6x32xf32>
    %71 = arith.addf %68, %70 : vector<6x32xf32>
    %c0_48 = arith.constant 0 : index
    %c0_49 = arith.constant 0 : index
    %72 = vector.load %arg71[%c0_48, %c0_49] : memref<32x32xf32, #tpu.memory_space<vmem>>, vector<32x32xf32>
    %cst_50 = arith.constant dense<0.000000e+00> : vector<6x32xf32>
    %73 = tpu.matmul %63, %72, %cst_50 {dimension_numbers = #tpu.dot_dimension_numbers<[1], [0], [0], [1], [0, 0, 1, 1], [], []>} : vector<6x32xf32>, vector<32x32xf32>, vector<6x32xf32> -> vector<6x32xf32>
    %c0_51 = arith.constant 0 : index
    %c0_52 = arith.constant 0 : index
    %74 = vector.load %arg67[%c0_51, %c0_52] : memref<1x32xf32, #tpu.memory_space<vmem>>, vector<1x32xf32>
    %75 = vector.broadcast %74 : vector<1x32xf32> to vector<6x32xf32>
    %76 = arith.addf %73, %75 : vector<6x32xf32>
    %c0_53 = arith.constant 0 : index
    %c0_54 = arith.constant 0 : index
    %77 = vector.load %arg74[%c0_53, %c0_54] : memref<32x32xf32, #tpu.memory_space<vmem>>, vector<32x32xf32>
    %cst_55 = arith.constant dense<0.000000e+00> : vector<6x32xf32>
    %78 = tpu.matmul %63, %77, %cst_55 {dimension_numbers = #tpu.dot_dimension_numbers<[1], [0], [0], [1], [0, 0, 1, 1], [], []>} : vector<6x32xf32>, vector<32x32xf32>, vector<6x32xf32> -> vector<6x32xf32>
    %c0_56 = arith.constant 0 : index
    %c0_57 = arith.constant 0 : index
    %79 = vector.load %arg70[%c0_56, %c0_57] : memref<1x32xf32, #tpu.memory_space<vmem>>, vector<1x32xf32>
    %80 = vector.broadcast %79 : vector<1x32xf32> to vector<6x32xf32>
    %81 = arith.addf %78, %80 : vector<6x32xf32>
    %cst_58 = arith.constant 0.353553385 : f32
    %82 = vector.broadcast %cst_58 : f32 to vector<6x32xf32>
    %83 = arith.mulf %71, %82 : vector<6x32xf32>
    %84 = tpu.iota {dimensions = array<i32: 1>} : vector<6x32xi32>
    %85 = tpu.iota {dimensions = array<i32: 1>} : vector<6x32xi32>
    %c0_i32 = arith.constant 0 : i32
    %86 = vector.broadcast %c0_i32 : i32 to vector<6x32xi32>
    %87 = arith.cmpi sge, %84, %86 : vector<6x32xi32>
    %c8_i32_59 = arith.constant 8 : i32
    %88 = vector.broadcast %c8_i32_59 : i32 to vector<6x32xi32>
    %89 = arith.cmpi slt, %84, %88 : vector<6x32xi32>
    %90 = arith.andi %87, %89 : vector<6x32xi1>
    %cst_60 = arith.constant 0.000000e+00 : f32
    %91 = vector.broadcast %cst_60 : f32 to vector<6x32xf32>
    %92 = arith.select %90, %83, %91 : vector<6x32xi1>, vector<6x32xf32>
    %cst_61 = arith.constant dense<0.000000e+00> : vector<6x6xf32>
    %93 = tpu.matmul %92, %76, %cst_61 {dimension_numbers = #tpu.dot_dimension_numbers<[1], [1], [0], [0], [0, 0, 1, 0], [], []>} : vector<6x32xf32>, vector<6x32xf32>, vector<6x6xf32> -> vector<6x6xf32>
    %94 = arith.addf %93, %64 : vector<6x6xf32>
    %cst_62 = arith.constant dense<0xFF800000> : vector<6xf32>
    %95 = vector.multi_reduction <maximumf>, %94, %cst_62 [1] : vector<6x6xf32> to vector<6xf32>
    %96 = vector.shape_cast %95 : vector<6xf32> to vector<6x1xf32>
    %97 = vector.broadcast %96 : vector<6x1xf32> to vector<6x6xf32>
    %98 = arith.subf %94, %97 : vector<6x6xf32>
    %99 = math.exp %98 : vector<6x6xf32>
    %cst_63 = arith.constant dense<0.000000e+00> : vector<6xf32>
    %100 = vector.multi_reduction <add>, %99, %cst_63 [1] : vector<6x6xf32> to vector<6xf32>
    %101 = vector.shape_cast %100 : vector<6xf32> to vector<6x1xf32>
    %102 = vector.broadcast %101 : vector<6x1xf32> to vector<6x6xf32>
    %103 = arith.divf %99, %102 : vector<6x6xf32>
    %c0_i32_64 = arith.constant 0 : i32
    %104 = vector.broadcast %c0_i32_64 : i32 to vector<6x32xi32>
    %105 = arith.cmpi sge, %85, %104 : vector<6x32xi32>
    %c8_i32_65 = arith.constant 8 : i32
    %106 = vector.broadcast %c8_i32_65 : i32 to vector<6x32xi32>
    %107 = arith.cmpi slt, %85, %106 : vector<6x32xi32>
    %108 = arith.andi %105, %107 : vector<6x32xi1>
    %cst_66 = arith.constant 0.000000e+00 : f32
    %109 = vector.broadcast %cst_66 : f32 to vector<6x32xf32>
    %110 = arith.select %108, %81, %109 : vector<6x32xi1>, vector<6x32xf32>
    %cst_67 = arith.constant dense<0.000000e+00> : vector<6x32xf32>
    %111 = tpu.matmul %103, %110, %cst_67 {dimension_numbers = #tpu.dot_dimension_numbers<[1], [0], [0], [1], [0, 0, 1, 1], [], []>} : vector<6x6xf32>, vector<6x32xf32>, vector<6x32xf32> -> vector<6x32xf32>
    %c8_i32_68 = arith.constant 8 : i32
    %112 = vector.broadcast %c8_i32_68 : i32 to vector<6x32xi32>
    %113 = arith.cmpi sge, %84, %112 : vector<6x32xi32>
    %c16_i32 = arith.constant 16 : i32
    %114 = vector.broadcast %c16_i32 : i32 to vector<6x32xi32>
    %115 = arith.cmpi slt, %84, %114 : vector<6x32xi32>
    %116 = arith.andi %113, %115 : vector<6x32xi1>
    %cst_69 = arith.constant 0.000000e+00 : f32
    %117 = vector.broadcast %cst_69 : f32 to vector<6x32xf32>
    %118 = arith.select %116, %83, %117 : vector<6x32xi1>, vector<6x32xf32>
    %cst_70 = arith.constant dense<0.000000e+00> : vector<6x6xf32>
    %119 = tpu.matmul %118, %76, %cst_70 {dimension_numbers = #tpu.dot_dimension_numbers<[1], [1], [0], [0], [0, 0, 1, 0], [], []>} : vector<6x32xf32>, vector<6x32xf32>, vector<6x6xf32> -> vector<6x6xf32>
    %120 = arith.addf %119, %64 : vector<6x6xf32>
    %cst_71 = arith.constant dense<0xFF800000> : vector<6xf32>
    %121 = vector.multi_reduction <maximumf>, %120, %cst_71 [1] : vector<6x6xf32> to vector<6xf32>
    %122 = vector.shape_cast %121 : vector<6xf32> to vector<6x1xf32>
    %123 = vector.broadcast %122 : vector<6x1xf32> to vector<6x6xf32>
    %124 = arith.subf %120, %123 : vector<6x6xf32>
    %125 = math.exp %124 : vector<6x6xf32>
    %cst_72 = arith.constant dense<0.000000e+00> : vector<6xf32>
    %126 = vector.multi_reduction <add>, %125, %cst_72 [1] : vector<6x6xf32> to vector<6xf32>
    %127 = vector.shape_cast %126 : vector<6xf32> to vector<6x1xf32>
    %128 = vector.broadcast %127 : vector<6x1xf32> to vector<6x6xf32>
    %129 = arith.divf %125, %128 : vector<6x6xf32>
    %c8_i32_73 = arith.constant 8 : i32
    %130 = vector.broadcast %c8_i32_73 : i32 to vector<6x32xi32>
    %131 = arith.cmpi sge, %85, %130 : vector<6x32xi32>
    %c16_i32_74 = arith.constant 16 : i32
    %132 = vector.broadcast %c16_i32_74 : i32 to vector<6x32xi32>
    %133 = arith.cmpi slt, %85, %132 : vector<6x32xi32>
    %134 = arith.andi %131, %133 : vector<6x32xi1>
    %cst_75 = arith.constant 0.000000e+00 : f32
    %135 = vector.broadcast %cst_75 : f32 to vector<6x32xf32>
    %136 = arith.select %134, %81, %135 : vector<6x32xi1>, vector<6x32xf32>
    %cst_76 = arith.constant dense<0.000000e+00> : vector<6x32xf32>
    %137 = tpu.matmul %129, %136, %cst_76 {dimension_numbers = #tpu.dot_dimension_numbers<[1], [0], [0], [1], [0, 0, 1, 1], [], []>} : vector<6x6xf32>, vector<6x32xf32>, vector<6x32xf32> -> vector<6x32xf32>
    %138 = arith.addf %111, %137 : vector<6x32xf32>
    %c16_i32_77 = arith.constant 16 : i32
    %139 = vector.broadcast %c16_i32_77 : i32 to vector<6x32xi32>
    %140 = arith.cmpi sge, %84, %139 : vector<6x32xi32>
    %c24_i32 = arith.constant 24 : i32
    %141 = vector.broadcast %c24_i32 : i32 to vector<6x32xi32>
    %142 = arith.cmpi slt, %84, %141 : vector<6x32xi32>
    %143 = arith.andi %140, %142 : vector<6x32xi1>
    %cst_78 = arith.constant 0.000000e+00 : f32
    %144 = vector.broadcast %cst_78 : f32 to vector<6x32xf32>
    %145 = arith.select %143, %83, %144 : vector<6x32xi1>, vector<6x32xf32>
    %cst_79 = arith.constant dense<0.000000e+00> : vector<6x6xf32>
    %146 = tpu.matmul %145, %76, %cst_79 {dimension_numbers = #tpu.dot_dimension_numbers<[1], [1], [0], [0], [0, 0, 1, 0], [], []>} : vector<6x32xf32>, vector<6x32xf32>, vector<6x6xf32> -> vector<6x6xf32>
    %147 = arith.addf %146, %64 : vector<6x6xf32>
    %cst_80 = arith.constant dense<0xFF800000> : vector<6xf32>
    %148 = vector.multi_reduction <maximumf>, %147, %cst_80 [1] : vector<6x6xf32> to vector<6xf32>
    %149 = vector.shape_cast %148 : vector<6xf32> to vector<6x1xf32>
    %150 = vector.broadcast %149 : vector<6x1xf32> to vector<6x6xf32>
    %151 = arith.subf %147, %150 : vector<6x6xf32>
    %152 = math.exp %151 : vector<6x6xf32>
    %cst_81 = arith.constant dense<0.000000e+00> : vector<6xf32>
    %153 = vector.multi_reduction <add>, %152, %cst_81 [1] : vector<6x6xf32> to vector<6xf32>
    %154 = vector.shape_cast %153 : vector<6xf32> to vector<6x1xf32>
    %155 = vector.broadcast %154 : vector<6x1xf32> to vector<6x6xf32>
    %156 = arith.divf %152, %155 : vector<6x6xf32>
    %c16_i32_82 = arith.constant 16 : i32
    %157 = vector.broadcast %c16_i32_82 : i32 to vector<6x32xi32>
    %158 = arith.cmpi sge, %85, %157 : vector<6x32xi32>
    %c24_i32_83 = arith.constant 24 : i32
    %159 = vector.broadcast %c24_i32_83 : i32 to vector<6x32xi32>
    %160 = arith.cmpi slt, %85, %159 : vector<6x32xi32>
    %161 = arith.andi %158, %160 : vector<6x32xi1>
    %cst_84 = arith.constant 0.000000e+00 : f32
    %162 = vector.broadcast %cst_84 : f32 to vector<6x32xf32>
    %163 = arith.select %161, %81, %162 : vector<6x32xi1>, vector<6x32xf32>
    %cst_85 = arith.constant dense<0.000000e+00> : vector<6x32xf32>
    %164 = tpu.matmul %156, %163, %cst_85 {dimension_numbers = #tpu.dot_dimension_numbers<[1], [0], [0], [1], [0, 0, 1, 1], [], []>} : vector<6x6xf32>, vector<6x32xf32>, vector<6x32xf32> -> vector<6x32xf32>
    %165 = arith.addf %138, %164 : vector<6x32xf32>
    %c24_i32_86 = arith.constant 24 : i32
    %166 = vector.broadcast %c24_i32_86 : i32 to vector<6x32xi32>
    %167 = arith.cmpi sge, %84, %166 : vector<6x32xi32>
    %c32_i32 = arith.constant 32 : i32
    %168 = vector.broadcast %c32_i32 : i32 to vector<6x32xi32>
    %169 = arith.cmpi slt, %84, %168 : vector<6x32xi32>
    %170 = arith.andi %167, %169 : vector<6x32xi1>
    %cst_87 = arith.constant 0.000000e+00 : f32
    %171 = vector.broadcast %cst_87 : f32 to vector<6x32xf32>
    %172 = arith.select %170, %83, %171 : vector<6x32xi1>, vector<6x32xf32>
    %cst_88 = arith.constant dense<0.000000e+00> : vector<6x6xf32>
    %173 = tpu.matmul %172, %76, %cst_88 {dimension_numbers = #tpu.dot_dimension_numbers<[1], [1], [0], [0], [0, 0, 1, 0], [], []>} : vector<6x32xf32>, vector<6x32xf32>, vector<6x6xf32> -> vector<6x6xf32>
    %174 = arith.addf %173, %64 : vector<6x6xf32>
    %cst_89 = arith.constant dense<0xFF800000> : vector<6xf32>
    %175 = vector.multi_reduction <maximumf>, %174, %cst_89 [1] : vector<6x6xf32> to vector<6xf32>
    %176 = vector.shape_cast %175 : vector<6xf32> to vector<6x1xf32>
    %177 = vector.broadcast %176 : vector<6x1xf32> to vector<6x6xf32>
    %178 = arith.subf %174, %177 : vector<6x6xf32>
    %179 = math.exp %178 : vector<6x6xf32>
    %cst_90 = arith.constant dense<0.000000e+00> : vector<6xf32>
    %180 = vector.multi_reduction <add>, %179, %cst_90 [1] : vector<6x6xf32> to vector<6xf32>
    %181 = vector.shape_cast %180 : vector<6xf32> to vector<6x1xf32>
    %182 = vector.broadcast %181 : vector<6x1xf32> to vector<6x6xf32>
    %183 = arith.divf %179, %182 : vector<6x6xf32>
    %c24_i32_91 = arith.constant 24 : i32
    %184 = vector.broadcast %c24_i32_91 : i32 to vector<6x32xi32>
    %185 = arith.cmpi sge, %85, %184 : vector<6x32xi32>
    %c32_i32_92 = arith.constant 32 : i32
    %186 = vector.broadcast %c32_i32_92 : i32 to vector<6x32xi32>
    %187 = arith.cmpi slt, %85, %186 : vector<6x32xi32>
    %188 = arith.andi %185, %187 : vector<6x32xi1>
    %cst_93 = arith.constant 0.000000e+00 : f32
    %189 = vector.broadcast %cst_93 : f32 to vector<6x32xf32>
    %190 = arith.select %188, %81, %189 : vector<6x32xi1>, vector<6x32xf32>
    %cst_94 = arith.constant dense<0.000000e+00> : vector<6x32xf32>
    %191 = tpu.matmul %183, %190, %cst_94 {dimension_numbers = #tpu.dot_dimension_numbers<[1], [0], [0], [1], [0, 0, 1, 1], [], []>} : vector<6x6xf32>, vector<6x32xf32>, vector<6x32xf32> -> vector<6x32xf32>
    %192 = arith.addf %165, %191 : vector<6x32xf32>
    %c0_95 = arith.constant 0 : index
    %c0_96 = arith.constant 0 : index
    %193 = vector.load %arg72[%c0_95, %c0_96] : memref<32x32xf32, #tpu.memory_space<vmem>>, vector<32x32xf32>
    %cst_97 = arith.constant dense<0.000000e+00> : vector<6x32xf32>
    %194 = tpu.matmul %192, %193, %cst_97 {dimension_numbers = #tpu.dot_dimension_numbers<[1], [0], [0], [1], [0, 0, 1, 1], [], []>} : vector<6x32xf32>, vector<32x32xf32>, vector<6x32xf32> -> vector<6x32xf32>
    %c0_98 = arith.constant 0 : index
    %c0_99 = arith.constant 0 : index
    %195 = vector.load %arg68[%c0_98, %c0_99] : memref<1x32xf32, #tpu.memory_space<vmem>>, vector<1x32xf32>
    %196 = vector.broadcast %195 : vector<1x32xf32> to vector<6x32xf32>
    %197 = arith.addf %194, %196 : vector<6x32xf32>
    %198 = arith.addf %63, %197 : vector<6x32xf32>
    %c0_100 = arith.constant 0 : index
    %c0_101 = arith.constant 0 : index
    %199 = vector.load %arg64[%c0_100, %c0_101] : memref<1x32xf32, #tpu.memory_space<vmem>>, vector<1x32xf32>
    %c0_102 = arith.constant 0 : index
    %c0_103 = arith.constant 0 : index
    %200 = vector.load %arg63[%c0_102, %c0_103] : memref<1x32xf32, #tpu.memory_space<vmem>>, vector<1x32xf32>
    %cst_104 = arith.constant dense<0.000000e+00> : vector<6xf32>
    %201 = vector.multi_reduction <add>, %198, %cst_104 [1] : vector<6x32xf32> to vector<6xf32>
    %202 = vector.shape_cast %201 : vector<6xf32> to vector<6x1xf32>
    %cst_105 = arith.constant 3.200000e+01 : f32
    %203 = vector.broadcast %cst_105 : f32 to vector<6x1xf32>
    %204 = arith.divf %202, %203 : vector<6x1xf32>
    %205 = vector.broadcast %204 : vector<6x1xf32> to vector<6x32xf32>
    %206 = arith.subf %198, %205 : vector<6x32xf32>
    %207 = arith.mulf %206, %206 : vector<6x32xf32>
    %cst_106 = arith.constant dense<0.000000e+00> : vector<6xf32>
    %208 = vector.multi_reduction <add>, %207, %cst_106 [1] : vector<6x32xf32> to vector<6xf32>
    %209 = vector.shape_cast %208 : vector<6xf32> to vector<6x1xf32>
    %cst_107 = arith.constant 3.200000e+01 : f32
    %210 = vector.broadcast %cst_107 : f32 to vector<6x1xf32>
    %211 = arith.divf %209, %210 : vector<6x1xf32>
    %cst_108 = arith.constant 9.99999974E-6 : f32
    %212 = vector.broadcast %cst_108 : f32 to vector<6x1xf32>
    %213 = arith.addf %211, %212 : vector<6x1xf32>
    %214 = math.rsqrt %213 : vector<6x1xf32>
    %215 = vector.broadcast %214 : vector<6x1xf32> to vector<6x32xf32>
    %216 = arith.mulf %206, %215 : vector<6x32xf32>
    %217 = vector.broadcast %199 : vector<1x32xf32> to vector<6x32xf32>
    %218 = arith.mulf %216, %217 : vector<6x32xf32>
    %219 = vector.broadcast %200 : vector<1x32xf32> to vector<6x32xf32>
    %220 = arith.addf %218, %219 : vector<6x32xf32>
    %c0_109 = arith.constant 0 : index
    %c0_110 = arith.constant 0 : index
    %221 = vector.load %arg60[%c0_109, %c0_110] : memref<32x64xf32, #tpu.memory_space<vmem>>, vector<32x64xf32>
    %cst_111 = arith.constant dense<0.000000e+00> : vector<6x64xf32>
    %222 = tpu.matmul %220, %221, %cst_111 {dimension_numbers = #tpu.dot_dimension_numbers<[1], [0], [0], [1], [0, 0, 1, 1], [], []>} : vector<6x32xf32>, vector<32x64xf32>, vector<6x64xf32> -> vector<6x64xf32>
    %c0_112 = arith.constant 0 : index
    %c0_113 = arith.constant 0 : index
    %223 = vector.load %arg59[%c0_112, %c0_113] : memref<1x64xf32, #tpu.memory_space<vmem>>, vector<1x64xf32>
    %224 = vector.broadcast %223 : vector<1x64xf32> to vector<6x64xf32>
    %225 = arith.addf %222, %224 : vector<6x64xf32>
    %cst_114 = arith.constant 0.000000e+00 : f32
    %226 = vector.broadcast %cst_114 : f32 to vector<6x64xf32>
    %227 = arith.maximumf %225, %226 : vector<6x64xf32>
    %c0_115 = arith.constant 0 : index
    %c0_116 = arith.constant 0 : index
    %228 = vector.load %arg62[%c0_115, %c0_116] : memref<64x32xf32, #tpu.memory_space<vmem>>, vector<64x32xf32>
    %cst_117 = arith.constant dense<0.000000e+00> : vector<6x32xf32>
    %229 = tpu.matmul %227, %228, %cst_117 {dimension_numbers = #tpu.dot_dimension_numbers<[1], [0], [0], [1], [0, 0, 1, 1], [], []>} : vector<6x64xf32>, vector<64x32xf32>, vector<6x32xf32> -> vector<6x32xf32>
    %c0_118 = arith.constant 0 : index
    %c0_119 = arith.constant 0 : index
    %230 = vector.load %arg61[%c0_118, %c0_119] : memref<1x32xf32, #tpu.memory_space<vmem>>, vector<1x32xf32>
    %231 = vector.broadcast %230 : vector<1x32xf32> to vector<6x32xf32>
    %232 = arith.addf %229, %231 : vector<6x32xf32>
    %233 = arith.addf %220, %232 : vector<6x32xf32>
    %c0_120 = arith.constant 0 : index
    %c0_121 = arith.constant 0 : index
    %234 = vector.load %arg66[%c0_120, %c0_121] : memref<1x32xf32, #tpu.memory_space<vmem>>, vector<1x32xf32>
    %c0_122 = arith.constant 0 : index
    %c0_123 = arith.constant 0 : index
    %235 = vector.load %arg65[%c0_122, %c0_123] : memref<1x32xf32, #tpu.memory_space<vmem>>, vector<1x32xf32>
    %cst_124 = arith.constant dense<0.000000e+00> : vector<6xf32>
    %236 = vector.multi_reduction <add>, %233, %cst_124 [1] : vector<6x32xf32> to vector<6xf32>
    %237 = vector.shape_cast %236 : vector<6xf32> to vector<6x1xf32>
    %cst_125 = arith.constant 3.200000e+01 : f32
    %238 = vector.broadcast %cst_125 : f32 to vector<6x1xf32>
    %239 = arith.divf %237, %238 : vector<6x1xf32>
    %240 = vector.broadcast %239 : vector<6x1xf32> to vector<6x32xf32>
    %241 = arith.subf %233, %240 : vector<6x32xf32>
    %242 = arith.mulf %241, %241 : vector<6x32xf32>
    %cst_126 = arith.constant dense<0.000000e+00> : vector<6xf32>
    %243 = vector.multi_reduction <add>, %242, %cst_126 [1] : vector<6x32xf32> to vector<6xf32>
    %244 = vector.shape_cast %243 : vector<6xf32> to vector<6x1xf32>
    %cst_127 = arith.constant 3.200000e+01 : f32
    %245 = vector.broadcast %cst_127 : f32 to vector<6x1xf32>
    %246 = arith.divf %244, %245 : vector<6x1xf32>
    %cst_128 = arith.constant 9.99999974E-6 : f32
    %247 = vector.broadcast %cst_128 : f32 to vector<6x1xf32>
    %248 = arith.addf %246, %247 : vector<6x1xf32>
    %249 = math.rsqrt %248 : vector<6x1xf32>
    %250 = vector.broadcast %249 : vector<6x1xf32> to vector<6x32xf32>
    %251 = arith.mulf %241, %250 : vector<6x32xf32>
    %252 = vector.broadcast %234 : vector<1x32xf32> to vector<6x32xf32>
    %253 = arith.mulf %251, %252 : vector<6x32xf32>
    %254 = vector.broadcast %235 : vector<1x32xf32> to vector<6x32xf32>
    %255 = arith.addf %253, %254 : vector<6x32xf32>
    %c0_129 = arith.constant 0 : index
    %c0_130 = arith.constant 0 : index
    %256 = vector.load %arg89[%c0_129, %c0_130] : memref<32x32xf32, #tpu.memory_space<vmem>>, vector<32x32xf32>
    %cst_131 = arith.constant dense<0.000000e+00> : vector<6x32xf32>
    %257 = tpu.matmul %255, %256, %cst_131 {dimension_numbers = #tpu.dot_dimension_numbers<[1], [0], [0], [1], [0, 0, 1, 1], [], []>} : vector<6x32xf32>, vector<32x32xf32>, vector<6x32xf32> -> vector<6x32xf32>
    %c0_132 = arith.constant 0 : index
    %c0_133 = arith.constant 0 : index
    %258 = vector.load %arg85[%c0_132, %c0_133] : memref<1x32xf32, #tpu.memory_space<vmem>>, vector<1x32xf32>
    %259 = vector.broadcast %258 : vector<1x32xf32> to vector<6x32xf32>
    %260 = arith.addf %257, %259 : vector<6x32xf32>
    %c0_134 = arith.constant 0 : index
    %c0_135 = arith.constant 0 : index
    %261 = vector.load %arg87[%c0_134, %c0_135] : memref<32x32xf32, #tpu.memory_space<vmem>>, vector<32x32xf32>
    %cst_136 = arith.constant dense<0.000000e+00> : vector<6x32xf32>
    %262 = tpu.matmul %255, %261, %cst_136 {dimension_numbers = #tpu.dot_dimension_numbers<[1], [0], [0], [1], [0, 0, 1, 1], [], []>} : vector<6x32xf32>, vector<32x32xf32>, vector<6x32xf32> -> vector<6x32xf32>
    %c0_137 = arith.constant 0 : index
    %c0_138 = arith.constant 0 : index
    %263 = vector.load %arg83[%c0_137, %c0_138] : memref<1x32xf32, #tpu.memory_space<vmem>>, vector<1x32xf32>
    %264 = vector.broadcast %263 : vector<1x32xf32> to vector<6x32xf32>
    %265 = arith.addf %262, %264 : vector<6x32xf32>
    %c0_139 = arith.constant 0 : index
    %c0_140 = arith.constant 0 : index
    %266 = vector.load %arg90[%c0_139, %c0_140] : memref<32x32xf32, #tpu.memory_space<vmem>>, vector<32x32xf32>
    %cst_141 = arith.constant dense<0.000000e+00> : vector<6x32xf32>
    %267 = tpu.matmul %255, %266, %cst_141 {dimension_numbers = #tpu.dot_dimension_numbers<[1], [0], [0], [1], [0, 0, 1, 1], [], []>} : vector<6x32xf32>, vector<32x32xf32>, vector<6x32xf32> -> vector<6x32xf32>
    %c0_142 = arith.constant 0 : index
    %c0_143 = arith.constant 0 : index
    %268 = vector.load %arg86[%c0_142, %c0_143] : memref<1x32xf32, #tpu.memory_space<vmem>>, vector<1x32xf32>
    %269 = vector.broadcast %268 : vector<1x32xf32> to vector<6x32xf32>
    %270 = arith.addf %267, %269 : vector<6x32xf32>
    %cst_144 = arith.constant 0.353553385 : f32
    %271 = vector.broadcast %cst_144 : f32 to vector<6x32xf32>
    %272 = arith.mulf %260, %271 : vector<6x32xf32>
    %273 = tpu.iota {dimensions = array<i32: 1>} : vector<6x32xi32>
    %274 = tpu.iota {dimensions = array<i32: 1>} : vector<6x32xi32>
    %c0_i32_145 = arith.constant 0 : i32
    %275 = vector.broadcast %c0_i32_145 : i32 to vector<6x32xi32>
    %276 = arith.cmpi sge, %273, %275 : vector<6x32xi32>
    %c8_i32_146 = arith.constant 8 : i32
    %277 = vector.broadcast %c8_i32_146 : i32 to vector<6x32xi32>
    %278 = arith.cmpi slt, %273, %277 : vector<6x32xi32>
    %279 = arith.andi %276, %278 : vector<6x32xi1>
    %cst_147 = arith.constant 0.000000e+00 : f32
    %280 = vector.broadcast %cst_147 : f32 to vector<6x32xf32>
    %281 = arith.select %279, %272, %280 : vector<6x32xi1>, vector<6x32xf32>
    %cst_148 = arith.constant dense<0.000000e+00> : vector<6x6xf32>
    %282 = tpu.matmul %281, %265, %cst_148 {dimension_numbers = #tpu.dot_dimension_numbers<[1], [1], [0], [0], [0, 0, 1, 0], [], []>} : vector<6x32xf32>, vector<6x32xf32>, vector<6x6xf32> -> vector<6x6xf32>
    %283 = arith.addf %282, %64 : vector<6x6xf32>
    %cst_149 = arith.constant dense<0xFF800000> : vector<6xf32>
    %284 = vector.multi_reduction <maximumf>, %283, %cst_149 [1] : vector<6x6xf32> to vector<6xf32>
    %285 = vector.shape_cast %284 : vector<6xf32> to vector<6x1xf32>
    %286 = vector.broadcast %285 : vector<6x1xf32> to vector<6x6xf32>
    %287 = arith.subf %283, %286 : vector<6x6xf32>
    %288 = math.exp %287 : vector<6x6xf32>
    %cst_150 = arith.constant dense<0.000000e+00> : vector<6xf32>
    %289 = vector.multi_reduction <add>, %288, %cst_150 [1] : vector<6x6xf32> to vector<6xf32>
    %290 = vector.shape_cast %289 : vector<6xf32> to vector<6x1xf32>
    %291 = vector.broadcast %290 : vector<6x1xf32> to vector<6x6xf32>
    %292 = arith.divf %288, %291 : vector<6x6xf32>
    %c0_i32_151 = arith.constant 0 : i32
    %293 = vector.broadcast %c0_i32_151 : i32 to vector<6x32xi32>
    %294 = arith.cmpi sge, %274, %293 : vector<6x32xi32>
    %c8_i32_152 = arith.constant 8 : i32
    %295 = vector.broadcast %c8_i32_152 : i32 to vector<6x32xi32>
    %296 = arith.cmpi slt, %274, %295 : vector<6x32xi32>
    %297 = arith.andi %294, %296 : vector<6x32xi1>
    %cst_153 = arith.constant 0.000000e+00 : f32
    %298 = vector.broadcast %cst_153 : f32 to vector<6x32xf32>
    %299 = arith.select %297, %270, %298 : vector<6x32xi1>, vector<6x32xf32>
    %cst_154 = arith.constant dense<0.000000e+00> : vector<6x32xf32>
    %300 = tpu.matmul %292, %299, %cst_154 {dimension_numbers = #tpu.dot_dimension_numbers<[1], [0], [0], [1], [0, 0, 1, 1], [], []>} : vector<6x6xf32>, vector<6x32xf32>, vector<6x32xf32> -> vector<6x32xf32>
    %c8_i32_155 = arith.constant 8 : i32
    %301 = vector.broadcast %c8_i32_155 : i32 to vector<6x32xi32>
    %302 = arith.cmpi sge, %273, %301 : vector<6x32xi32>
    %c16_i32_156 = arith.constant 16 : i32
    %303 = vector.broadcast %c16_i32_156 : i32 to vector<6x32xi32>
    %304 = arith.cmpi slt, %273, %303 : vector<6x32xi32>
    %305 = arith.andi %302, %304 : vector<6x32xi1>
    %cst_157 = arith.constant 0.000000e+00 : f32
    %306 = vector.broadcast %cst_157 : f32 to vector<6x32xf32>
    %307 = arith.select %305, %272, %306 : vector<6x32xi1>, vector<6x32xf32>
    %cst_158 = arith.constant dense<0.000000e+00> : vector<6x6xf32>
    %308 = tpu.matmul %307, %265, %cst_158 {dimension_numbers = #tpu.dot_dimension_numbers<[1], [1], [0], [0], [0, 0, 1, 0], [], []>} : vector<6x32xf32>, vector<6x32xf32>, vector<6x6xf32> -> vector<6x6xf32>
    %309 = arith.addf %308, %64 : vector<6x6xf32>
    %cst_159 = arith.constant dense<0xFF800000> : vector<6xf32>
    %310 = vector.multi_reduction <maximumf>, %309, %cst_159 [1] : vector<6x6xf32> to vector<6xf32>
    %311 = vector.shape_cast %310 : vector<6xf32> to vector<6x1xf32>
    %312 = vector.broadcast %311 : vector<6x1xf32> to vector<6x6xf32>
    %313 = arith.subf %309, %312 : vector<6x6xf32>
    %314 = math.exp %313 : vector<6x6xf32>
    %cst_160 = arith.constant dense<0.000000e+00> : vector<6xf32>
    %315 = vector.multi_reduction <add>, %314, %cst_160 [1] : vector<6x6xf32> to vector<6xf32>
    %316 = vector.shape_cast %315 : vector<6xf32> to vector<6x1xf32>
    %317 = vector.broadcast %316 : vector<6x1xf32> to vector<6x6xf32>
    %318 = arith.divf %314, %317 : vector<6x6xf32>
    %c8_i32_161 = arith.constant 8 : i32
    %319 = vector.broadcast %c8_i32_161 : i32 to vector<6x32xi32>
    %320 = arith.cmpi sge, %274, %319 : vector<6x32xi32>
    %c16_i32_162 = arith.constant 16 : i32
    %321 = vector.broadcast %c16_i32_162 : i32 to vector<6x32xi32>
    %322 = arith.cmpi slt, %274, %321 : vector<6x32xi32>
    %323 = arith.andi %320, %322 : vector<6x32xi1>
    %cst_163 = arith.constant 0.000000e+00 : f32
    %324 = vector.broadcast %cst_163 : f32 to vector<6x32xf32>
    %325 = arith.select %323, %270, %324 : vector<6x32xi1>, vector<6x32xf32>
    %cst_164 = arith.constant dense<0.000000e+00> : vector<6x32xf32>
    %326 = tpu.matmul %318, %325, %cst_164 {dimension_numbers = #tpu.dot_dimension_numbers<[1], [0], [0], [1], [0, 0, 1, 1], [], []>} : vector<6x6xf32>, vector<6x32xf32>, vector<6x32xf32> -> vector<6x32xf32>
    %327 = arith.addf %300, %326 : vector<6x32xf32>
    %c16_i32_165 = arith.constant 16 : i32
    %328 = vector.broadcast %c16_i32_165 : i32 to vector<6x32xi32>
    %329 = arith.cmpi sge, %273, %328 : vector<6x32xi32>
    %c24_i32_166 = arith.constant 24 : i32
    %330 = vector.broadcast %c24_i32_166 : i32 to vector<6x32xi32>
    %331 = arith.cmpi slt, %273, %330 : vector<6x32xi32>
    %332 = arith.andi %329, %331 : vector<6x32xi1>
    %cst_167 = arith.constant 0.000000e+00 : f32
    %333 = vector.broadcast %cst_167 : f32 to vector<6x32xf32>
    %334 = arith.select %332, %272, %333 : vector<6x32xi1>, vector<6x32xf32>
    %cst_168 = arith.constant dense<0.000000e+00> : vector<6x6xf32>
    %335 = tpu.matmul %334, %265, %cst_168 {dimension_numbers = #tpu.dot_dimension_numbers<[1], [1], [0], [0], [0, 0, 1, 0], [], []>} : vector<6x32xf32>, vector<6x32xf32>, vector<6x6xf32> -> vector<6x6xf32>
    %336 = arith.addf %335, %64 : vector<6x6xf32>
    %cst_169 = arith.constant dense<0xFF800000> : vector<6xf32>
    %337 = vector.multi_reduction <maximumf>, %336, %cst_169 [1] : vector<6x6xf32> to vector<6xf32>
    %338 = vector.shape_cast %337 : vector<6xf32> to vector<6x1xf32>
    %339 = vector.broadcast %338 : vector<6x1xf32> to vector<6x6xf32>
    %340 = arith.subf %336, %339 : vector<6x6xf32>
    %341 = math.exp %340 : vector<6x6xf32>
    %cst_170 = arith.constant dense<0.000000e+00> : vector<6xf32>
    %342 = vector.multi_reduction <add>, %341, %cst_170 [1] : vector<6x6xf32> to vector<6xf32>
    %343 = vector.shape_cast %342 : vector<6xf32> to vector<6x1xf32>
    %344 = vector.broadcast %343 : vector<6x1xf32> to vector<6x6xf32>
    %345 = arith.divf %341, %344 : vector<6x6xf32>
    %c16_i32_171 = arith.constant 16 : i32
    %346 = vector.broadcast %c16_i32_171 : i32 to vector<6x32xi32>
    %347 = arith.cmpi sge, %274, %346 : vector<6x32xi32>
    %c24_i32_172 = arith.constant 24 : i32
    %348 = vector.broadcast %c24_i32_172 : i32 to vector<6x32xi32>
    %349 = arith.cmpi slt, %274, %348 : vector<6x32xi32>
    %350 = arith.andi %347, %349 : vector<6x32xi1>
    %cst_173 = arith.constant 0.000000e+00 : f32
    %351 = vector.broadcast %cst_173 : f32 to vector<6x32xf32>
    %352 = arith.select %350, %270, %351 : vector<6x32xi1>, vector<6x32xf32>
    %cst_174 = arith.constant dense<0.000000e+00> : vector<6x32xf32>
    %353 = tpu.matmul %345, %352, %cst_174 {dimension_numbers = #tpu.dot_dimension_numbers<[1], [0], [0], [1], [0, 0, 1, 1], [], []>} : vector<6x6xf32>, vector<6x32xf32>, vector<6x32xf32> -> vector<6x32xf32>
    %354 = arith.addf %327, %353 : vector<6x32xf32>
    %c24_i32_175 = arith.constant 24 : i32
    %355 = vector.broadcast %c24_i32_175 : i32 to vector<6x32xi32>
    %356 = arith.cmpi sge, %273, %355 : vector<6x32xi32>
    %c32_i32_176 = arith.constant 32 : i32
    %357 = vector.broadcast %c32_i32_176 : i32 to vector<6x32xi32>
    %358 = arith.cmpi slt, %273, %357 : vector<6x32xi32>
    %359 = arith.andi %356, %358 : vector<6x32xi1>
    %cst_177 = arith.constant 0.000000e+00 : f32
    %360 = vector.broadcast %cst_177 : f32 to vector<6x32xf32>
    %361 = arith.select %359, %272, %360 : vector<6x32xi1>, vector<6x32xf32>
    %cst_178 = arith.constant dense<0.000000e+00> : vector<6x6xf32>
    %362 = tpu.matmul %361, %265, %cst_178 {dimension_numbers = #tpu.dot_dimension_numbers<[1], [1], [0], [0], [0, 0, 1, 0], [], []>} : vector<6x32xf32>, vector<6x32xf32>, vector<6x6xf32> -> vector<6x6xf32>
    %363 = arith.addf %362, %64 : vector<6x6xf32>
    %cst_179 = arith.constant dense<0xFF800000> : vector<6xf32>
    %364 = vector.multi_reduction <maximumf>, %363, %cst_179 [1] : vector<6x6xf32> to vector<6xf32>
    %365 = vector.shape_cast %364 : vector<6xf32> to vector<6x1xf32>
    %366 = vector.broadcast %365 : vector<6x1xf32> to vector<6x6xf32>
    %367 = arith.subf %363, %366 : vector<6x6xf32>
    %368 = math.exp %367 : vector<6x6xf32>
    %cst_180 = arith.constant dense<0.000000e+00> : vector<6xf32>
    %369 = vector.multi_reduction <add>, %368, %cst_180 [1] : vector<6x6xf32> to vector<6xf32>
    %370 = vector.shape_cast %369 : vector<6xf32> to vector<6x1xf32>
    %371 = vector.broadcast %370 : vector<6x1xf32> to vector<6x6xf32>
    %372 = arith.divf %368, %371 : vector<6x6xf32>
    %c24_i32_181 = arith.constant 24 : i32
    %373 = vector.broadcast %c24_i32_181 : i32 to vector<6x32xi32>
    %374 = arith.cmpi sge, %274, %373 : vector<6x32xi32>
    %c32_i32_182 = arith.constant 32 : i32
    %375 = vector.broadcast %c32_i32_182 : i32 to vector<6x32xi32>
    %376 = arith.cmpi slt, %274, %375 : vector<6x32xi32>
    %377 = arith.andi %374, %376 : vector<6x32xi1>
    %cst_183 = arith.constant 0.000000e+00 : f32
    %378 = vector.broadcast %cst_183 : f32 to vector<6x32xf32>
    %379 = arith.select %377, %270, %378 : vector<6x32xi1>, vector<6x32xf32>
    %cst_184 = arith.constant dense<0.000000e+00> : vector<6x32xf32>
    %380 = tpu.matmul %372, %379, %cst_184 {dimension_numbers = #tpu.dot_dimension_numbers<[1], [0], [0], [1], [0, 0, 1, 1], [], []>} : vector<6x6xf32>, vector<6x32xf32>, vector<6x32xf32> -> vector<6x32xf32>
    %381 = arith.addf %354, %380 : vector<6x32xf32>
    %c0_185 = arith.constant 0 : index
    %c0_186 = arith.constant 0 : index
    %382 = vector.load %arg88[%c0_185, %c0_186] : memref<32x32xf32, #tpu.memory_space<vmem>>, vector<32x32xf32>
    %cst_187 = arith.constant dense<0.000000e+00> : vector<6x32xf32>
    %383 = tpu.matmul %381, %382, %cst_187 {dimension_numbers = #tpu.dot_dimension_numbers<[1], [0], [0], [1], [0, 0, 1, 1], [], []>} : vector<6x32xf32>, vector<32x32xf32>, vector<6x32xf32> -> vector<6x32xf32>
    %c0_188 = arith.constant 0 : index
    %c0_189 = arith.constant 0 : index
    %384 = vector.load %arg84[%c0_188, %c0_189] : memref<1x32xf32, #tpu.memory_space<vmem>>, vector<1x32xf32>
    %385 = vector.broadcast %384 : vector<1x32xf32> to vector<6x32xf32>
    %386 = arith.addf %383, %385 : vector<6x32xf32>
    %387 = arith.addf %255, %386 : vector<6x32xf32>
    %c0_190 = arith.constant 0 : index
    %c0_191 = arith.constant 0 : index
    %388 = vector.load %arg80[%c0_190, %c0_191] : memref<1x32xf32, #tpu.memory_space<vmem>>, vector<1x32xf32>
    %c0_192 = arith.constant 0 : index
    %c0_193 = arith.constant 0 : index
    %389 = vector.load %arg79[%c0_192, %c0_193] : memref<1x32xf32, #tpu.memory_space<vmem>>, vector<1x32xf32>
    %cst_194 = arith.constant dense<0.000000e+00> : vector<6xf32>
    %390 = vector.multi_reduction <add>, %387, %cst_194 [1] : vector<6x32xf32> to vector<6xf32>
    %391 = vector.shape_cast %390 : vector<6xf32> to vector<6x1xf32>
    %cst_195 = arith.constant 3.200000e+01 : f32
    %392 = vector.broadcast %cst_195 : f32 to vector<6x1xf32>
    %393 = arith.divf %391, %392 : vector<6x1xf32>
    %394 = vector.broadcast %393 : vector<6x1xf32> to vector<6x32xf32>
    %395 = arith.subf %387, %394 : vector<6x32xf32>
    %396 = arith.mulf %395, %395 : vector<6x32xf32>
    %cst_196 = arith.constant dense<0.000000e+00> : vector<6xf32>
    %397 = vector.multi_reduction <add>, %396, %cst_196 [1] : vector<6x32xf32> to vector<6xf32>
    %398 = vector.shape_cast %397 : vector<6xf32> to vector<6x1xf32>
    %cst_197 = arith.constant 3.200000e+01 : f32
    %399 = vector.broadcast %cst_197 : f32 to vector<6x1xf32>
    %400 = arith.divf %398, %399 : vector<6x1xf32>
    %cst_198 = arith.constant 9.99999974E-6 : f32
    %401 = vector.broadcast %cst_198 : f32 to vector<6x1xf32>
    %402 = arith.addf %400, %401 : vector<6x1xf32>
    %403 = math.rsqrt %402 : vector<6x1xf32>
    %404 = vector.broadcast %403 : vector<6x1xf32> to vector<6x32xf32>
    %405 = arith.mulf %395, %404 : vector<6x32xf32>
    %406 = vector.broadcast %388 : vector<1x32xf32> to vector<6x32xf32>
    %407 = arith.mulf %405, %406 : vector<6x32xf32>
    %408 = vector.broadcast %389 : vector<1x32xf32> to vector<6x32xf32>
    %409 = arith.addf %407, %408 : vector<6x32xf32>
    %c0_199 = arith.constant 0 : index
    %c0_200 = arith.constant 0 : index
    %410 = vector.load %arg76[%c0_199, %c0_200] : memref<32x64xf32, #tpu.memory_space<vmem>>, vector<32x64xf32>
    %cst_201 = arith.constant dense<0.000000e+00> : vector<6x64xf32>
    %411 = tpu.matmul %409, %410, %cst_201 {dimension_numbers = #tpu.dot_dimension_numbers<[1], [0], [0], [1], [0, 0, 1, 1], [], []>} : vector<6x32xf32>, vector<32x64xf32>, vector<6x64xf32> -> vector<6x64xf32>
    %c0_202 = arith.constant 0 : index
    %c0_203 = arith.constant 0 : index
    %412 = vector.load %arg75[%c0_202, %c0_203] : memref<1x64xf32, #tpu.memory_space<vmem>>, vector<1x64xf32>
    %413 = vector.broadcast %412 : vector<1x64xf32> to vector<6x64xf32>
    %414 = arith.addf %411, %413 : vector<6x64xf32>
    %cst_204 = arith.constant 0.000000e+00 : f32
    %415 = vector.broadcast %cst_204 : f32 to vector<6x64xf32>
    %416 = arith.maximumf %414, %415 : vector<6x64xf32>
    %c0_205 = arith.constant 0 : index
    %c0_206 = arith.constant 0 : index
    %417 = vector.load %arg78[%c0_205, %c0_206] : memref<64x32xf32, #tpu.memory_space<vmem>>, vector<64x32xf32>
    %cst_207 = arith.constant dense<0.000000e+00> : vector<6x32xf32>
    %418 = tpu.matmul %416, %417, %cst_207 {dimension_numbers = #tpu.dot_dimension_numbers<[1], [0], [0], [1], [0, 0, 1, 1], [], []>} : vector<6x64xf32>, vector<64x32xf32>, vector<6x32xf32> -> vector<6x32xf32>
    %c0_208 = arith.constant 0 : index
    %c0_209 = arith.constant 0 : index
    %419 = vector.load %arg77[%c0_208, %c0_209] : memref<1x32xf32, #tpu.memory_space<vmem>>, vector<1x32xf32>
    %420 = vector.broadcast %419 : vector<1x32xf32> to vector<6x32xf32>
    %421 = arith.addf %418, %420 : vector<6x32xf32>
    %422 = arith.addf %409, %421 : vector<6x32xf32>
    %c0_210 = arith.constant 0 : index
    %c0_211 = arith.constant 0 : index
    %423 = vector.load %arg82[%c0_210, %c0_211] : memref<1x32xf32, #tpu.memory_space<vmem>>, vector<1x32xf32>
    %c0_212 = arith.constant 0 : index
    %c0_213 = arith.constant 0 : index
    %424 = vector.load %arg81[%c0_212, %c0_213] : memref<1x32xf32, #tpu.memory_space<vmem>>, vector<1x32xf32>
    %cst_214 = arith.constant dense<0.000000e+00> : vector<6xf32>
    %425 = vector.multi_reduction <add>, %422, %cst_214 [1] : vector<6x32xf32> to vector<6xf32>
    %426 = vector.shape_cast %425 : vector<6xf32> to vector<6x1xf32>
    %cst_215 = arith.constant 3.200000e+01 : f32
    %427 = vector.broadcast %cst_215 : f32 to vector<6x1xf32>
    %428 = arith.divf %426, %427 : vector<6x1xf32>
    %429 = vector.broadcast %428 : vector<6x1xf32> to vector<6x32xf32>
    %430 = arith.subf %422, %429 : vector<6x32xf32>
    %431 = arith.mulf %430, %430 : vector<6x32xf32>
    %cst_216 = arith.constant dense<0.000000e+00> : vector<6xf32>
    %432 = vector.multi_reduction <add>, %431, %cst_216 [1] : vector<6x32xf32> to vector<6xf32>
    %433 = vector.shape_cast %432 : vector<6xf32> to vector<6x1xf32>
    %cst_217 = arith.constant 3.200000e+01 : f32
    %434 = vector.broadcast %cst_217 : f32 to vector<6x1xf32>
    %435 = arith.divf %433, %434 : vector<6x1xf32>
    %cst_218 = arith.constant 9.99999974E-6 : f32
    %436 = vector.broadcast %cst_218 : f32 to vector<6x1xf32>
    %437 = arith.addf %435, %436 : vector<6x1xf32>
    %438 = math.rsqrt %437 : vector<6x1xf32>
    %439 = vector.broadcast %438 : vector<6x1xf32> to vector<6x32xf32>
    %440 = arith.mulf %430, %439 : vector<6x32xf32>
    %441 = vector.broadcast %423 : vector<1x32xf32> to vector<6x32xf32>
    %442 = arith.mulf %440, %441 : vector<6x32xf32>
    %443 = vector.broadcast %424 : vector<1x32xf32> to vector<6x32xf32>
    %444 = arith.addf %442, %443 : vector<6x32xf32>
    %c0_219 = arith.constant 0 : index
    %c0_220 = arith.constant 0 : index
    %445 = vector.load %arg93[%c0_219, %c0_220] : memref<1x32xf32, #tpu.memory_space<vmem>>, vector<1x32xf32>
    %c0_221 = arith.constant 0 : index
    %c0_222 = arith.constant 0 : index
    %446 = vector.load %arg92[%c0_221, %c0_222] : memref<1x32xf32, #tpu.memory_space<vmem>>, vector<1x32xf32>
    %cst_223 = arith.constant dense<0.000000e+00> : vector<6xf32>
    %447 = vector.multi_reduction <add>, %444, %cst_223 [1] : vector<6x32xf32> to vector<6xf32>
    %448 = vector.shape_cast %447 : vector<6xf32> to vector<6x1xf32>
    %cst_224 = arith.constant 3.200000e+01 : f32
    %449 = vector.broadcast %cst_224 : f32 to vector<6x1xf32>
    %450 = arith.divf %448, %449 : vector<6x1xf32>
    %451 = vector.broadcast %450 : vector<6x1xf32> to vector<6x32xf32>
    %452 = arith.subf %444, %451 : vector<6x32xf32>
    %453 = arith.mulf %452, %452 : vector<6x32xf32>
    %cst_225 = arith.constant dense<0.000000e+00> : vector<6xf32>
    %454 = vector.multi_reduction <add>, %453, %cst_225 [1] : vector<6x32xf32> to vector<6xf32>
    %455 = vector.shape_cast %454 : vector<6xf32> to vector<6x1xf32>
    %cst_226 = arith.constant 3.200000e+01 : f32
    %456 = vector.broadcast %cst_226 : f32 to vector<6x1xf32>
    %457 = arith.divf %455, %456 : vector<6x1xf32>
    %cst_227 = arith.constant 9.99999974E-6 : f32
    %458 = vector.broadcast %cst_227 : f32 to vector<6x1xf32>
    %459 = arith.addf %457, %458 : vector<6x1xf32>
    %460 = math.rsqrt %459 : vector<6x1xf32>
    %461 = vector.broadcast %460 : vector<6x1xf32> to vector<6x32xf32>
    %462 = arith.mulf %452, %461 : vector<6x32xf32>
    %463 = vector.broadcast %445 : vector<1x32xf32> to vector<6x32xf32>
    %464 = arith.mulf %462, %463 : vector<6x32xf32>
    %465 = vector.broadcast %446 : vector<1x32xf32> to vector<6x32xf32>
    %466 = arith.addf %464, %465 : vector<6x32xf32>
    %c0_228 = arith.constant 0 : index
    %c0_229 = arith.constant 0 : index
    %467 = vector.load %arg28[%c0_228, %c0_229] : memref<32x32xf32, #tpu.memory_space<vmem>>, vector<32x32xf32>
    %cst_230 = arith.constant dense<0.000000e+00> : vector<16x32xf32>
    %468 = tpu.matmul %7, %467, %cst_230 {dimension_numbers = #tpu.dot_dimension_numbers<[1], [0], [0], [1], [0, 0, 1, 1], [], []>} : vector<16x32xf32>, vector<32x32xf32>, vector<16x32xf32> -> vector<16x32xf32>
    %c0_231 = arith.constant 0 : index
    %c0_232 = arith.constant 0 : index
    %469 = vector.load %arg24[%c0_231, %c0_232] : memref<1x32xf32, #tpu.memory_space<vmem>>, vector<1x32xf32>
    %470 = vector.broadcast %469 : vector<1x32xf32> to vector<16x32xf32>
    %471 = arith.addf %468, %470 : vector<16x32xf32>
    %c0_233 = arith.constant 0 : index
    %c0_234 = arith.constant 0 : index
    %472 = vector.load %arg26[%c0_233, %c0_234] : memref<32x32xf32, #tpu.memory_space<vmem>>, vector<32x32xf32>
    %cst_235 = arith.constant dense<0.000000e+00> : vector<16x32xf32>
    %473 = tpu.matmul %7, %472, %cst_235 {dimension_numbers = #tpu.dot_dimension_numbers<[1], [0], [0], [1], [0, 0, 1, 1], [], []>} : vector<16x32xf32>, vector<32x32xf32>, vector<16x32xf32> -> vector<16x32xf32>
    %c0_236 = arith.constant 0 : index
    %c0_237 = arith.constant 0 : index
    %474 = vector.load %arg22[%c0_236, %c0_237] : memref<1x32xf32, #tpu.memory_space<vmem>>, vector<1x32xf32>
    %475 = vector.broadcast %474 : vector<1x32xf32> to vector<16x32xf32>
    %476 = arith.addf %473, %475 : vector<16x32xf32>
    %c0_238 = arith.constant 0 : index
    %c0_239 = arith.constant 0 : index
    %477 = vector.load %arg29[%c0_238, %c0_239] : memref<32x32xf32, #tpu.memory_space<vmem>>, vector<32x32xf32>
    %cst_240 = arith.constant dense<0.000000e+00> : vector<16x32xf32>
    %478 = tpu.matmul %7, %477, %cst_240 {dimension_numbers = #tpu.dot_dimension_numbers<[1], [0], [0], [1], [0, 0, 1, 1], [], []>} : vector<16x32xf32>, vector<32x32xf32>, vector<16x32xf32> -> vector<16x32xf32>
    %c0_241 = arith.constant 0 : index
    %c0_242 = arith.constant 0 : index
    %479 = vector.load %arg25[%c0_241, %c0_242] : memref<1x32xf32, #tpu.memory_space<vmem>>, vector<1x32xf32>
    %480 = vector.broadcast %479 : vector<1x32xf32> to vector<16x32xf32>
    %481 = arith.addf %478, %480 : vector<16x32xf32>
    %cst_243 = arith.constant 0.353553385 : f32
    %482 = vector.broadcast %cst_243 : f32 to vector<16x32xf32>
    %483 = arith.mulf %471, %482 : vector<16x32xf32>
    %484 = tpu.iota {dimensions = array<i32: 1>} : vector<16x32xi32>
    %485 = tpu.iota {dimensions = array<i32: 1>} : vector<16x32xi32>
    %c0_i32_244 = arith.constant 0 : i32
    %486 = vector.broadcast %c0_i32_244 : i32 to vector<16x32xi32>
    %487 = arith.cmpi sge, %484, %486 : vector<16x32xi32>
    %c8_i32_245 = arith.constant 8 : i32
    %488 = vector.broadcast %c8_i32_245 : i32 to vector<16x32xi32>
    %489 = arith.cmpi slt, %484, %488 : vector<16x32xi32>
    %490 = arith.andi %487, %489 : vector<16x32xi1>
    %cst_246 = arith.constant 0.000000e+00 : f32
    %491 = vector.broadcast %cst_246 : f32 to vector<16x32xf32>
    %492 = arith.select %490, %483, %491 : vector<16x32xi1>, vector<16x32xf32>
    %cst_247 = arith.constant dense<0.000000e+00> : vector<16x16xf32>
    %493 = tpu.matmul %492, %476, %cst_247 {dimension_numbers = #tpu.dot_dimension_numbers<[1], [1], [0], [0], [0, 0, 1, 0], [], []>} : vector<16x32xf32>, vector<16x32xf32>, vector<16x16xf32> -> vector<16x16xf32>
    %494 = arith.addf %493, %65 : vector<16x16xf32>
    %cst_248 = arith.constant dense<0xFF800000> : vector<16xf32>
    %495 = vector.multi_reduction <maximumf>, %494, %cst_248 [1] : vector<16x16xf32> to vector<16xf32>
    %496 = vector.shape_cast %495 : vector<16xf32> to vector<16x1xf32>
    %497 = vector.broadcast %496 : vector<16x1xf32> to vector<16x16xf32>
    %498 = arith.subf %494, %497 : vector<16x16xf32>
    %499 = math.exp %498 : vector<16x16xf32>
    %cst_249 = arith.constant dense<0.000000e+00> : vector<16xf32>
    %500 = vector.multi_reduction <add>, %499, %cst_249 [1] : vector<16x16xf32> to vector<16xf32>
    %501 = vector.shape_cast %500 : vector<16xf32> to vector<16x1xf32>
    %502 = vector.broadcast %501 : vector<16x1xf32> to vector<16x16xf32>
    %503 = arith.divf %499, %502 : vector<16x16xf32>
    %c0_i32_250 = arith.constant 0 : i32
    %504 = vector.broadcast %c0_i32_250 : i32 to vector<16x32xi32>
    %505 = arith.cmpi sge, %485, %504 : vector<16x32xi32>
    %c8_i32_251 = arith.constant 8 : i32
    %506 = vector.broadcast %c8_i32_251 : i32 to vector<16x32xi32>
    %507 = arith.cmpi slt, %485, %506 : vector<16x32xi32>
    %508 = arith.andi %505, %507 : vector<16x32xi1>
    %cst_252 = arith.constant 0.000000e+00 : f32
    %509 = vector.broadcast %cst_252 : f32 to vector<16x32xf32>
    %510 = arith.select %508, %481, %509 : vector<16x32xi1>, vector<16x32xf32>
    %cst_253 = arith.constant dense<0.000000e+00> : vector<16x32xf32>
    %511 = tpu.matmul %503, %510, %cst_253 {dimension_numbers = #tpu.dot_dimension_numbers<[1], [0], [0], [1], [0, 0, 1, 1], [], []>} : vector<16x16xf32>, vector<16x32xf32>, vector<16x32xf32> -> vector<16x32xf32>
    %c8_i32_254 = arith.constant 8 : i32
    %512 = vector.broadcast %c8_i32_254 : i32 to vector<16x32xi32>
    %513 = arith.cmpi sge, %484, %512 : vector<16x32xi32>
    %c16_i32_255 = arith.constant 16 : i32
    %514 = vector.broadcast %c16_i32_255 : i32 to vector<16x32xi32>
    %515 = arith.cmpi slt, %484, %514 : vector<16x32xi32>
    %516 = arith.andi %513, %515 : vector<16x32xi1>
    %cst_256 = arith.constant 0.000000e+00 : f32
    %517 = vector.broadcast %cst_256 : f32 to vector<16x32xf32>
    %518 = arith.select %516, %483, %517 : vector<16x32xi1>, vector<16x32xf32>
    %cst_257 = arith.constant dense<0.000000e+00> : vector<16x16xf32>
    %519 = tpu.matmul %518, %476, %cst_257 {dimension_numbers = #tpu.dot_dimension_numbers<[1], [1], [0], [0], [0, 0, 1, 0], [], []>} : vector<16x32xf32>, vector<16x32xf32>, vector<16x16xf32> -> vector<16x16xf32>
    %520 = arith.addf %519, %65 : vector<16x16xf32>
    %cst_258 = arith.constant dense<0xFF800000> : vector<16xf32>
    %521 = vector.multi_reduction <maximumf>, %520, %cst_258 [1] : vector<16x16xf32> to vector<16xf32>
    %522 = vector.shape_cast %521 : vector<16xf32> to vector<16x1xf32>
    %523 = vector.broadcast %522 : vector<16x1xf32> to vector<16x16xf32>
    %524 = arith.subf %520, %523 : vector<16x16xf32>
    %525 = math.exp %524 : vector<16x16xf32>
    %cst_259 = arith.constant dense<0.000000e+00> : vector<16xf32>
    %526 = vector.multi_reduction <add>, %525, %cst_259 [1] : vector<16x16xf32> to vector<16xf32>
    %527 = vector.shape_cast %526 : vector<16xf32> to vector<16x1xf32>
    %528 = vector.broadcast %527 : vector<16x1xf32> to vector<16x16xf32>
    %529 = arith.divf %525, %528 : vector<16x16xf32>
    %c8_i32_260 = arith.constant 8 : i32
    %530 = vector.broadcast %c8_i32_260 : i32 to vector<16x32xi32>
    %531 = arith.cmpi sge, %485, %530 : vector<16x32xi32>
    %c16_i32_261 = arith.constant 16 : i32
    %532 = vector.broadcast %c16_i32_261 : i32 to vector<16x32xi32>
    %533 = arith.cmpi slt, %485, %532 : vector<16x32xi32>
    %534 = arith.andi %531, %533 : vector<16x32xi1>
    %cst_262 = arith.constant 0.000000e+00 : f32
    %535 = vector.broadcast %cst_262 : f32 to vector<16x32xf32>
    %536 = arith.select %534, %481, %535 : vector<16x32xi1>, vector<16x32xf32>
    %cst_263 = arith.constant dense<0.000000e+00> : vector<16x32xf32>
    %537 = tpu.matmul %529, %536, %cst_263 {dimension_numbers = #tpu.dot_dimension_numbers<[1], [0], [0], [1], [0, 0, 1, 1], [], []>} : vector<16x16xf32>, vector<16x32xf32>, vector<16x32xf32> -> vector<16x32xf32>
    %538 = arith.addf %511, %537 : vector<16x32xf32>
    %c16_i32_264 = arith.constant 16 : i32
    %539 = vector.broadcast %c16_i32_264 : i32 to vector<16x32xi32>
    %540 = arith.cmpi sge, %484, %539 : vector<16x32xi32>
    %c24_i32_265 = arith.constant 24 : i32
    %541 = vector.broadcast %c24_i32_265 : i32 to vector<16x32xi32>
    %542 = arith.cmpi slt, %484, %541 : vector<16x32xi32>
    %543 = arith.andi %540, %542 : vector<16x32xi1>
    %cst_266 = arith.constant 0.000000e+00 : f32
    %544 = vector.broadcast %cst_266 : f32 to vector<16x32xf32>
    %545 = arith.select %543, %483, %544 : vector<16x32xi1>, vector<16x32xf32>
    %cst_267 = arith.constant dense<0.000000e+00> : vector<16x16xf32>
    %546 = tpu.matmul %545, %476, %cst_267 {dimension_numbers = #tpu.dot_dimension_numbers<[1], [1], [0], [0], [0, 0, 1, 0], [], []>} : vector<16x32xf32>, vector<16x32xf32>, vector<16x16xf32> -> vector<16x16xf32>
    %547 = arith.addf %546, %65 : vector<16x16xf32>
    %cst_268 = arith.constant dense<0xFF800000> : vector<16xf32>
    %548 = vector.multi_reduction <maximumf>, %547, %cst_268 [1] : vector<16x16xf32> to vector<16xf32>
    %549 = vector.shape_cast %548 : vector<16xf32> to vector<16x1xf32>
    %550 = vector.broadcast %549 : vector<16x1xf32> to vector<16x16xf32>
    %551 = arith.subf %547, %550 : vector<16x16xf32>
    %552 = math.exp %551 : vector<16x16xf32>
    %cst_269 = arith.constant dense<0.000000e+00> : vector<16xf32>
    %553 = vector.multi_reduction <add>, %552, %cst_269 [1] : vector<16x16xf32> to vector<16xf32>
    %554 = vector.shape_cast %553 : vector<16xf32> to vector<16x1xf32>
    %555 = vector.broadcast %554 : vector<16x1xf32> to vector<16x16xf32>
    %556 = arith.divf %552, %555 : vector<16x16xf32>
    %c16_i32_270 = arith.constant 16 : i32
    %557 = vector.broadcast %c16_i32_270 : i32 to vector<16x32xi32>
    %558 = arith.cmpi sge, %485, %557 : vector<16x32xi32>
    %c24_i32_271 = arith.constant 24 : i32
    %559 = vector.broadcast %c24_i32_271 : i32 to vector<16x32xi32>
    %560 = arith.cmpi slt, %485, %559 : vector<16x32xi32>
    %561 = arith.andi %558, %560 : vector<16x32xi1>
    %cst_272 = arith.constant 0.000000e+00 : f32
    %562 = vector.broadcast %cst_272 : f32 to vector<16x32xf32>
    %563 = arith.select %561, %481, %562 : vector<16x32xi1>, vector<16x32xf32>
    %cst_273 = arith.constant dense<0.000000e+00> : vector<16x32xf32>
    %564 = tpu.matmul %556, %563, %cst_273 {dimension_numbers = #tpu.dot_dimension_numbers<[1], [0], [0], [1], [0, 0, 1, 1], [], []>} : vector<16x16xf32>, vector<16x32xf32>, vector<16x32xf32> -> vector<16x32xf32>
    %565 = arith.addf %538, %564 : vector<16x32xf32>
    %c24_i32_274 = arith.constant 24 : i32
    %566 = vector.broadcast %c24_i32_274 : i32 to vector<16x32xi32>
    %567 = arith.cmpi sge, %484, %566 : vector<16x32xi32>
    %c32_i32_275 = arith.constant 32 : i32
    %568 = vector.broadcast %c32_i32_275 : i32 to vector<16x32xi32>
    %569 = arith.cmpi slt, %484, %568 : vector<16x32xi32>
    %570 = arith.andi %567, %569 : vector<16x32xi1>
    %cst_276 = arith.constant 0.000000e+00 : f32
    %571 = vector.broadcast %cst_276 : f32 to vector<16x32xf32>
    %572 = arith.select %570, %483, %571 : vector<16x32xi1>, vector<16x32xf32>
    %cst_277 = arith.constant dense<0.000000e+00> : vector<16x16xf32>
    %573 = tpu.matmul %572, %476, %cst_277 {dimension_numbers = #tpu.dot_dimension_numbers<[1], [1], [0], [0], [0, 0, 1, 0], [], []>} : vector<16x32xf32>, vector<16x32xf32>, vector<16x16xf32> -> vector<16x16xf32>
    %574 = arith.addf %573, %65 : vector<16x16xf32>
    %cst_278 = arith.constant dense<0xFF800000> : vector<16xf32>
    %575 = vector.multi_reduction <maximumf>, %574, %cst_278 [1] : vector<16x16xf32> to vector<16xf32>
    %576 = vector.shape_cast %575 : vector<16xf32> to vector<16x1xf32>
    %577 = vector.broadcast %576 : vector<16x1xf32> to vector<16x16xf32>
    %578 = arith.subf %574, %577 : vector<16x16xf32>
    %579 = math.exp %578 : vector<16x16xf32>
    %cst_279 = arith.constant dense<0.000000e+00> : vector<16xf32>
    %580 = vector.multi_reduction <add>, %579, %cst_279 [1] : vector<16x16xf32> to vector<16xf32>
    %581 = vector.shape_cast %580 : vector<16xf32> to vector<16x1xf32>
    %582 = vector.broadcast %581 : vector<16x1xf32> to vector<16x16xf32>
    %583 = arith.divf %579, %582 : vector<16x16xf32>
    %c24_i32_280 = arith.constant 24 : i32
    %584 = vector.broadcast %c24_i32_280 : i32 to vector<16x32xi32>
    %585 = arith.cmpi sge, %485, %584 : vector<16x32xi32>
    %c32_i32_281 = arith.constant 32 : i32
    %586 = vector.broadcast %c32_i32_281 : i32 to vector<16x32xi32>
    %587 = arith.cmpi slt, %485, %586 : vector<16x32xi32>
    %588 = arith.andi %585, %587 : vector<16x32xi1>
    %cst_282 = arith.constant 0.000000e+00 : f32
    %589 = vector.broadcast %cst_282 : f32 to vector<16x32xf32>
    %590 = arith.select %588, %481, %589 : vector<16x32xi1>, vector<16x32xf32>
    %cst_283 = arith.constant dense<0.000000e+00> : vector<16x32xf32>
    %591 = tpu.matmul %583, %590, %cst_283 {dimension_numbers = #tpu.dot_dimension_numbers<[1], [0], [0], [1], [0, 0, 1, 1], [], []>} : vector<16x16xf32>, vector<16x32xf32>, vector<16x32xf32> -> vector<16x32xf32>
    %592 = arith.addf %565, %591 : vector<16x32xf32>
    %c0_284 = arith.constant 0 : index
    %c0_285 = arith.constant 0 : index
    %593 = vector.load %arg27[%c0_284, %c0_285] : memref<32x32xf32, #tpu.memory_space<vmem>>, vector<32x32xf32>
    %cst_286 = arith.constant dense<0.000000e+00> : vector<16x32xf32>
    %594 = tpu.matmul %592, %593, %cst_286 {dimension_numbers = #tpu.dot_dimension_numbers<[1], [0], [0], [1], [0, 0, 1, 1], [], []>} : vector<16x32xf32>, vector<32x32xf32>, vector<16x32xf32> -> vector<16x32xf32>
    %c0_287 = arith.constant 0 : index
    %c0_288 = arith.constant 0 : index
    %595 = vector.load %arg23[%c0_287, %c0_288] : memref<1x32xf32, #tpu.memory_space<vmem>>, vector<1x32xf32>
    %596 = vector.broadcast %595 : vector<1x32xf32> to vector<16x32xf32>
    %597 = arith.addf %594, %596 : vector<16x32xf32>
    %598 = arith.addf %7, %597 : vector<16x32xf32>
    %c0_289 = arith.constant 0 : index
    %c0_290 = arith.constant 0 : index
    %599 = vector.load %arg17[%c0_289, %c0_290] : memref<1x32xf32, #tpu.memory_space<vmem>>, vector<1x32xf32>
    %c0_291 = arith.constant 0 : index
    %c0_292 = arith.constant 0 : index
    %600 = vector.load %arg16[%c0_291, %c0_292] : memref<1x32xf32, #tpu.memory_space<vmem>>, vector<1x32xf32>
    %cst_293 = arith.constant dense<0.000000e+00> : vector<16xf32>
    %601 = vector.multi_reduction <add>, %598, %cst_293 [1] : vector<16x32xf32> to vector<16xf32>
    %602 = vector.shape_cast %601 : vector<16xf32> to vector<16x1xf32>
    %cst_294 = arith.constant 3.200000e+01 : f32
    %603 = vector.broadcast %cst_294 : f32 to vector<16x1xf32>
    %604 = arith.divf %602, %603 : vector<16x1xf32>
    %605 = vector.broadcast %604 : vector<16x1xf32> to vector<16x32xf32>
    %606 = arith.subf %598, %605 : vector<16x32xf32>
    %607 = arith.mulf %606, %606 : vector<16x32xf32>
    %cst_295 = arith.constant dense<0.000000e+00> : vector<16xf32>
    %608 = vector.multi_reduction <add>, %607, %cst_295 [1] : vector<16x32xf32> to vector<16xf32>
    %609 = vector.shape_cast %608 : vector<16xf32> to vector<16x1xf32>
    %cst_296 = arith.constant 3.200000e+01 : f32
    %610 = vector.broadcast %cst_296 : f32 to vector<16x1xf32>
    %611 = arith.divf %609, %610 : vector<16x1xf32>
    %cst_297 = arith.constant 9.99999974E-6 : f32
    %612 = vector.broadcast %cst_297 : f32 to vector<16x1xf32>
    %613 = arith.addf %611, %612 : vector<16x1xf32>
    %614 = math.rsqrt %613 : vector<16x1xf32>
    %615 = vector.broadcast %614 : vector<16x1xf32> to vector<16x32xf32>
    %616 = arith.mulf %606, %615 : vector<16x32xf32>
    %617 = vector.broadcast %599 : vector<1x32xf32> to vector<16x32xf32>
    %618 = arith.mulf %616, %617 : vector<16x32xf32>
    %619 = vector.broadcast %600 : vector<1x32xf32> to vector<16x32xf32>
    %620 = arith.addf %618, %619 : vector<16x32xf32>
    %c0_298 = arith.constant 0 : index
    %c0_299 = arith.constant 0 : index
    %621 = vector.load %arg10[%c0_298, %c0_299] : memref<32x32xf32, #tpu.memory_space<vmem>>, vector<32x32xf32>
    %cst_300 = arith.constant dense<0.000000e+00> : vector<16x32xf32>
    %622 = tpu.matmul %620, %621, %cst_300 {dimension_numbers = #tpu.dot_dimension_numbers<[1], [0], [0], [1], [0, 0, 1, 1], [], []>} : vector<16x32xf32>, vector<32x32xf32>, vector<16x32xf32> -> vector<16x32xf32>
    %c0_301 = arith.constant 0 : index
    %c0_302 = arith.constant 0 : index
    %623 = vector.load %arg6[%c0_301, %c0_302] : memref<1x32xf32, #tpu.memory_space<vmem>>, vector<1x32xf32>
    %624 = vector.broadcast %623 : vector<1x32xf32> to vector<16x32xf32>
    %625 = arith.addf %622, %624 : vector<16x32xf32>
    %c0_303 = arith.constant 0 : index
    %c0_304 = arith.constant 0 : index
    %626 = vector.load %arg8[%c0_303, %c0_304] : memref<32x32xf32, #tpu.memory_space<vmem>>, vector<32x32xf32>
    %cst_305 = arith.constant dense<0.000000e+00> : vector<6x32xf32>
    %627 = tpu.matmul %466, %626, %cst_305 {dimension_numbers = #tpu.dot_dimension_numbers<[1], [0], [0], [1], [0, 0, 1, 1], [], []>} : vector<6x32xf32>, vector<32x32xf32>, vector<6x32xf32> -> vector<6x32xf32>
    %c0_306 = arith.constant 0 : index
    %c0_307 = arith.constant 0 : index
    %628 = vector.load %arg4[%c0_306, %c0_307] : memref<1x32xf32, #tpu.memory_space<vmem>>, vector<1x32xf32>
    %629 = vector.broadcast %628 : vector<1x32xf32> to vector<6x32xf32>
    %630 = arith.addf %627, %629 : vector<6x32xf32>
    %c0_308 = arith.constant 0 : index
    %c0_309 = arith.constant 0 : index
    %631 = vector.load %arg11[%c0_308, %c0_309] : memref<32x32xf32, #tpu.memory_space<vmem>>, vector<32x32xf32>
    %cst_310 = arith.constant dense<0.000000e+00> : vector<6x32xf32>
    %632 = tpu.matmul %466, %631, %cst_310 {dimension_numbers = #tpu.dot_dimension_numbers<[1], [0], [0], [1], [0, 0, 1, 1], [], []>} : vector<6x32xf32>, vector<32x32xf32>, vector<6x32xf32> -> vector<6x32xf32>
    %c0_311 = arith.constant 0 : index
    %c0_312 = arith.constant 0 : index
    %633 = vector.load %arg7[%c0_311, %c0_312] : memref<1x32xf32, #tpu.memory_space<vmem>>, vector<1x32xf32>
    %634 = vector.broadcast %633 : vector<1x32xf32> to vector<6x32xf32>
    %635 = arith.addf %632, %634 : vector<6x32xf32>
    %cst_313 = arith.constant 0.353553385 : f32
    %636 = vector.broadcast %cst_313 : f32 to vector<16x32xf32>
    %637 = arith.mulf %625, %636 : vector<16x32xf32>
    %638 = tpu.iota {dimensions = array<i32: 1>} : vector<16x32xi32>
    %639 = tpu.iota {dimensions = array<i32: 1>} : vector<6x32xi32>
    %c0_i32_314 = arith.constant 0 : i32
    %640 = vector.broadcast %c0_i32_314 : i32 to vector<16x32xi32>
    %641 = arith.cmpi sge, %638, %640 : vector<16x32xi32>
    %c8_i32_315 = arith.constant 8 : i32
    %642 = vector.broadcast %c8_i32_315 : i32 to vector<16x32xi32>
    %643 = arith.cmpi slt, %638, %642 : vector<16x32xi32>
    %644 = arith.andi %641, %643 : vector<16x32xi1>
    %cst_316 = arith.constant 0.000000e+00 : f32
    %645 = vector.broadcast %cst_316 : f32 to vector<16x32xf32>
    %646 = arith.select %644, %637, %645 : vector<16x32xi1>, vector<16x32xf32>
    %cst_317 = arith.constant dense<0.000000e+00> : vector<16x6xf32>
    %647 = tpu.matmul %646, %630, %cst_317 {dimension_numbers = #tpu.dot_dimension_numbers<[1], [1], [0], [0], [0, 0, 1, 0], [], []>} : vector<16x32xf32>, vector<6x32xf32>, vector<16x6xf32> -> vector<16x6xf32>
    %648 = arith.addf %647, %66 : vector<16x6xf32>
    %cst_318 = arith.constant dense<0xFF800000> : vector<16xf32>
    %649 = vector.multi_reduction <maximumf>, %648, %cst_318 [1] : vector<16x6xf32> to vector<16xf32>
    %650 = vector.shape_cast %649 : vector<16xf32> to vector<16x1xf32>
    %651 = vector.broadcast %650 : vector<16x1xf32> to vector<16x6xf32>
    %652 = arith.subf %648, %651 : vector<16x6xf32>
    %653 = math.exp %652 : vector<16x6xf32>
    %cst_319 = arith.constant dense<0.000000e+00> : vector<16xf32>
    %654 = vector.multi_reduction <add>, %653, %cst_319 [1] : vector<16x6xf32> to vector<16xf32>
    %655 = vector.shape_cast %654 : vector<16xf32> to vector<16x1xf32>
    %656 = vector.broadcast %655 : vector<16x1xf32> to vector<16x6xf32>
    %657 = arith.divf %653, %656 : vector<16x6xf32>
    %c0_i32_320 = arith.constant 0 : i32
    %658 = vector.broadcast %c0_i32_320 : i32 to vector<6x32xi32>
    %659 = arith.cmpi sge, %639, %658 : vector<6x32xi32>
    %c8_i32_321 = arith.constant 8 : i32
    %660 = vector.broadcast %c8_i32_321 : i32 to vector<6x32xi32>
    %661 = arith.cmpi slt, %639, %660 : vector<6x32xi32>
    %662 = arith.andi %659, %661 : vector<6x32xi1>
    %cst_322 = arith.constant 0.000000e+00 : f32
    %663 = vector.broadcast %cst_322 : f32 to vector<6x32xf32>
    %664 = arith.select %662, %635, %663 : vector<6x32xi1>, vector<6x32xf32>
    %cst_323 = arith.constant dense<0.000000e+00> : vector<16x32xf32>
    %665 = tpu.matmul %657, %664, %cst_323 {dimension_numbers = #tpu.dot_dimension_numbers<[1], [0], [0], [1], [0, 0, 1, 1], [], []>} : vector<16x6xf32>, vector<6x32xf32>, vector<16x32xf32> -> vector<16x32xf32>
    %c8_i32_324 = arith.constant 8 : i32
    %666 = vector.broadcast %c8_i32_324 : i32 to vector<16x32xi32>
    %667 = arith.cmpi sge, %638, %666 : vector<16x32xi32>
    %c16_i32_325 = arith.constant 16 : i32
    %668 = vector.broadcast %c16_i32_325 : i32 to vector<16x32xi32>
    %669 = arith.cmpi slt, %638, %668 : vector<16x32xi32>
    %670 = arith.andi %667, %669 : vector<16x32xi1>
    %cst_326 = arith.constant 0.000000e+00 : f32
    %671 = vector.broadcast %cst_326 : f32 to vector<16x32xf32>
    %672 = arith.select %670, %637, %671 : vector<16x32xi1>, vector<16x32xf32>
    %cst_327 = arith.constant dense<0.000000e+00> : vector<16x6xf32>
    %673 = tpu.matmul %672, %630, %cst_327 {dimension_numbers = #tpu.dot_dimension_numbers<[1], [1], [0], [0], [0, 0, 1, 0], [], []>} : vector<16x32xf32>, vector<6x32xf32>, vector<16x6xf32> -> vector<16x6xf32>
    %674 = arith.addf %673, %66 : vector<16x6xf32>
    %cst_328 = arith.constant dense<0xFF800000> : vector<16xf32>
    %675 = vector.multi_reduction <maximumf>, %674, %cst_328 [1] : vector<16x6xf32> to vector<16xf32>
    %676 = vector.shape_cast %675 : vector<16xf32> to vector<16x1xf32>
    %677 = vector.broadcast %676 : vector<16x1xf32> to vector<16x6xf32>
    %678 = arith.subf %674, %677 : vector<16x6xf32>
    %679 = math.exp %678 : vector<16x6xf32>
    %cst_329 = arith.constant dense<0.000000e+00> : vector<16xf32>
    %680 = vector.multi_reduction <add>, %679, %cst_329 [1] : vector<16x6xf32> to vector<16xf32>
    %681 = vector.shape_cast %680 : vector<16xf32> to vector<16x1xf32>
    %682 = vector.broadcast %681 : vector<16x1xf32> to vector<16x6xf32>
    %683 = arith.divf %679, %682 : vector<16x6xf32>
    %c8_i32_330 = arith.constant 8 : i32
    %684 = vector.broadcast %c8_i32_330 : i32 to vector<6x32xi32>
    %685 = arith.cmpi sge, %639, %684 : vector<6x32xi32>
    %c16_i32_331 = arith.constant 16 : i32
    %686 = vector.broadcast %c16_i32_331 : i32 to vector<6x32xi32>
    %687 = arith.cmpi slt, %639, %686 : vector<6x32xi32>
    %688 = arith.andi %685, %687 : vector<6x32xi1>
    %cst_332 = arith.constant 0.000000e+00 : f32
    %689 = vector.broadcast %cst_332 : f32 to vector<6x32xf32>
    %690 = arith.select %688, %635, %689 : vector<6x32xi1>, vector<6x32xf32>
    %cst_333 = arith.constant dense<0.000000e+00> : vector<16x32xf32>
    %691 = tpu.matmul %683, %690, %cst_333 {dimension_numbers = #tpu.dot_dimension_numbers<[1], [0], [0], [1], [0, 0, 1, 1], [], []>} : vector<16x6xf32>, vector<6x32xf32>, vector<16x32xf32> -> vector<16x32xf32>
    %692 = arith.addf %665, %691 : vector<16x32xf32>
    %c16_i32_334 = arith.constant 16 : i32
    %693 = vector.broadcast %c16_i32_334 : i32 to vector<16x32xi32>
    %694 = arith.cmpi sge, %638, %693 : vector<16x32xi32>
    %c24_i32_335 = arith.constant 24 : i32
    %695 = vector.broadcast %c24_i32_335 : i32 to vector<16x32xi32>
    %696 = arith.cmpi slt, %638, %695 : vector<16x32xi32>
    %697 = arith.andi %694, %696 : vector<16x32xi1>
    %cst_336 = arith.constant 0.000000e+00 : f32
    %698 = vector.broadcast %cst_336 : f32 to vector<16x32xf32>
    %699 = arith.select %697, %637, %698 : vector<16x32xi1>, vector<16x32xf32>
    %cst_337 = arith.constant dense<0.000000e+00> : vector<16x6xf32>
    %700 = tpu.matmul %699, %630, %cst_337 {dimension_numbers = #tpu.dot_dimension_numbers<[1], [1], [0], [0], [0, 0, 1, 0], [], []>} : vector<16x32xf32>, vector<6x32xf32>, vector<16x6xf32> -> vector<16x6xf32>
    %701 = arith.addf %700, %66 : vector<16x6xf32>
    %cst_338 = arith.constant dense<0xFF800000> : vector<16xf32>
    %702 = vector.multi_reduction <maximumf>, %701, %cst_338 [1] : vector<16x6xf32> to vector<16xf32>
    %703 = vector.shape_cast %702 : vector<16xf32> to vector<16x1xf32>
    %704 = vector.broadcast %703 : vector<16x1xf32> to vector<16x6xf32>
    %705 = arith.subf %701, %704 : vector<16x6xf32>
    %706 = math.exp %705 : vector<16x6xf32>
    %cst_339 = arith.constant dense<0.000000e+00> : vector<16xf32>
    %707 = vector.multi_reduction <add>, %706, %cst_339 [1] : vector<16x6xf32> to vector<16xf32>
    %708 = vector.shape_cast %707 : vector<16xf32> to vector<16x1xf32>
    %709 = vector.broadcast %708 : vector<16x1xf32> to vector<16x6xf32>
    %710 = arith.divf %706, %709 : vector<16x6xf32>
    %c16_i32_340 = arith.constant 16 : i32
    %711 = vector.broadcast %c16_i32_340 : i32 to vector<6x32xi32>
    %712 = arith.cmpi sge, %639, %711 : vector<6x32xi32>
    %c24_i32_341 = arith.constant 24 : i32
    %713 = vector.broadcast %c24_i32_341 : i32 to vector<6x32xi32>
    %714 = arith.cmpi slt, %639, %713 : vector<6x32xi32>
    %715 = arith.andi %712, %714 : vector<6x32xi1>
    %cst_342 = arith.constant 0.000000e+00 : f32
    %716 = vector.broadcast %cst_342 : f32 to vector<6x32xf32>
    %717 = arith.select %715, %635, %716 : vector<6x32xi1>, vector<6x32xf32>
    %cst_343 = arith.constant dense<0.000000e+00> : vector<16x32xf32>
    %718 = tpu.matmul %710, %717, %cst_343 {dimension_numbers = #tpu.dot_dimension_numbers<[1], [0], [0], [1], [0, 0, 1, 1], [], []>} : vector<16x6xf32>, vector<6x32xf32>, vector<16x32xf32> -> vector<16x32xf32>
    %719 = arith.addf %692, %718 : vector<16x32xf32>
    %c24_i32_344 = arith.constant 24 : i32
    %720 = vector.broadcast %c24_i32_344 : i32 to vector<16x32xi32>
    %721 = arith.cmpi sge, %638, %720 : vector<16x32xi32>
    %c32_i32_345 = arith.constant 32 : i32
    %722 = vector.broadcast %c32_i32_345 : i32 to vector<16x32xi32>
    %723 = arith.cmpi slt, %638, %722 : vector<16x32xi32>
    %724 = arith.andi %721, %723 : vector<16x32xi1>
    %cst_346 = arith.constant 0.000000e+00 : f32
    %725 = vector.broadcast %cst_346 : f32 to vector<16x32xf32>
    %726 = arith.select %724, %637, %725 : vector<16x32xi1>, vector<16x32xf32>
    %cst_347 = arith.constant dense<0.000000e+00> : vector<16x6xf32>
    %727 = tpu.matmul %726, %630, %cst_347 {dimension_numbers = #tpu.dot_dimension_numbers<[1], [1], [0], [0], [0, 0, 1, 0], [], []>} : vector<16x32xf32>, vector<6x32xf32>, vector<16x6xf32> -> vector<16x6xf32>
    %728 = arith.addf %727, %66 : vector<16x6xf32>
    %cst_348 = arith.constant dense<0xFF800000> : vector<16xf32>
    %729 = vector.multi_reduction <maximumf>, %728, %cst_348 [1] : vector<16x6xf32> to vector<16xf32>
    %730 = vector.shape_cast %729 : vector<16xf32> to vector<16x1xf32>
    %731 = vector.broadcast %730 : vector<16x1xf32> to vector<16x6xf32>
    %732 = arith.subf %728, %731 : vector<16x6xf32>
    %733 = math.exp %732 : vector<16x6xf32>
    %cst_349 = arith.constant dense<0.000000e+00> : vector<16xf32>
    %734 = vector.multi_reduction <add>, %733, %cst_349 [1] : vector<16x6xf32> to vector<16xf32>
    %735 = vector.shape_cast %734 : vector<16xf32> to vector<16x1xf32>
    %736 = vector.broadcast %735 : vector<16x1xf32> to vector<16x6xf32>
    %737 = arith.divf %733, %736 : vector<16x6xf32>
    %c24_i32_350 = arith.constant 24 : i32
    %738 = vector.broadcast %c24_i32_350 : i32 to vector<6x32xi32>
    %739 = arith.cmpi sge, %639, %738 : vector<6x32xi32>
    %c32_i32_351 = arith.constant 32 : i32
    %740 = vector.broadcast %c32_i32_351 : i32 to vector<6x32xi32>
    %741 = arith.cmpi slt, %639, %740 : vector<6x32xi32>
    %742 = arith.andi %739, %741 : vector<6x32xi1>
    %cst_352 = arith.constant 0.000000e+00 : f32
    %743 = vector.broadcast %cst_352 : f32 to vector<6x32xf32>
    %744 = arith.select %742, %635, %743 : vector<6x32xi1>, vector<6x32xf32>
    %cst_353 = arith.constant dense<0.000000e+00> : vector<16x32xf32>
    %745 = tpu.matmul %737, %744, %cst_353 {dimension_numbers = #tpu.dot_dimension_numbers<[1], [0], [0], [1], [0, 0, 1, 1], [], []>} : vector<16x6xf32>, vector<6x32xf32>, vector<16x32xf32> -> vector<16x32xf32>
    %746 = arith.addf %719, %745 : vector<16x32xf32>
    %c0_354 = arith.constant 0 : index
    %c0_355 = arith.constant 0 : index
    %747 = vector.load %arg9[%c0_354, %c0_355] : memref<32x32xf32, #tpu.memory_space<vmem>>, vector<32x32xf32>
    %cst_356 = arith.constant dense<0.000000e+00> : vector<16x32xf32>
    %748 = tpu.matmul %746, %747, %cst_356 {dimension_numbers = #tpu.dot_dimension_numbers<[1], [0], [0], [1], [0, 0, 1, 1], [], []>} : vector<16x32xf32>, vector<32x32xf32>, vector<16x32xf32> -> vector<16x32xf32>
    %c0_357 = arith.constant 0 : index
    %c0_358 = arith.constant 0 : index
    %749 = vector.load %arg5[%c0_357, %c0_358] : memref<1x32xf32, #tpu.memory_space<vmem>>, vector<1x32xf32>
    %750 = vector.broadcast %749 : vector<1x32xf32> to vector<16x32xf32>
    %751 = arith.addf %748, %750 : vector<16x32xf32>
    %752 = arith.addf %620, %751 : vector<16x32xf32>
    %c0_359 = arith.constant 0 : index
    %c0_360 = arith.constant 0 : index
    %753 = vector.load %arg19[%c0_359, %c0_360] : memref<1x32xf32, #tpu.memory_space<vmem>>, vector<1x32xf32>
    %c0_361 = arith.constant 0 : index
    %c0_362 = arith.constant 0 : index
    %754 = vector.load %arg18[%c0_361, %c0_362] : memref<1x32xf32, #tpu.memory_space<vmem>>, vector<1x32xf32>
    %cst_363 = arith.constant dense<0.000000e+00> : vector<16xf32>
    %755 = vector.multi_reduction <add>, %752, %cst_363 [1] : vector<16x32xf32> to vector<16xf32>
    %756 = vector.shape_cast %755 : vector<16xf32> to vector<16x1xf32>
    %cst_364 = arith.constant 3.200000e+01 : f32
    %757 = vector.broadcast %cst_364 : f32 to vector<16x1xf32>
    %758 = arith.divf %756, %757 : vector<16x1xf32>
    %759 = vector.broadcast %758 : vector<16x1xf32> to vector<16x32xf32>
    %760 = arith.subf %752, %759 : vector<16x32xf32>
    %761 = arith.mulf %760, %760 : vector<16x32xf32>
    %cst_365 = arith.constant dense<0.000000e+00> : vector<16xf32>
    %762 = vector.multi_reduction <add>, %761, %cst_365 [1] : vector<16x32xf32> to vector<16xf32>
    %763 = vector.shape_cast %762 : vector<16xf32> to vector<16x1xf32>
    %cst_366 = arith.constant 3.200000e+01 : f32
    %764 = vector.broadcast %cst_366 : f32 to vector<16x1xf32>
    %765 = arith.divf %763, %764 : vector<16x1xf32>
    %cst_367 = arith.constant 9.99999974E-6 : f32
    %766 = vector.broadcast %cst_367 : f32 to vector<16x1xf32>
    %767 = arith.addf %765, %766 : vector<16x1xf32>
    %768 = math.rsqrt %767 : vector<16x1xf32>
    %769 = vector.broadcast %768 : vector<16x1xf32> to vector<16x32xf32>
    %770 = arith.mulf %760, %769 : vector<16x32xf32>
    %771 = vector.broadcast %753 : vector<1x32xf32> to vector<16x32xf32>
    %772 = arith.mulf %770, %771 : vector<16x32xf32>
    %773 = vector.broadcast %754 : vector<1x32xf32> to vector<16x32xf32>
    %774 = arith.addf %772, %773 : vector<16x32xf32>
    %c0_368 = arith.constant 0 : index
    %c0_369 = arith.constant 0 : index
    %775 = vector.load %arg13[%c0_368, %c0_369] : memref<32x64xf32, #tpu.memory_space<vmem>>, vector<32x64xf32>
    %cst_370 = arith.constant dense<0.000000e+00> : vector<16x64xf32>
    %776 = tpu.matmul %774, %775, %cst_370 {dimension_numbers = #tpu.dot_dimension_numbers<[1], [0], [0], [1], [0, 0, 1, 1], [], []>} : vector<16x32xf32>, vector<32x64xf32>, vector<16x64xf32> -> vector<16x64xf32>
    %c0_371 = arith.constant 0 : index
    %c0_372 = arith.constant 0 : index
    %777 = vector.load %arg12[%c0_371, %c0_372] : memref<1x64xf32, #tpu.memory_space<vmem>>, vector<1x64xf32>
    %778 = vector.broadcast %777 : vector<1x64xf32> to vector<16x64xf32>
    %779 = arith.addf %776, %778 : vector<16x64xf32>
    %cst_373 = arith.constant 0.000000e+00 : f32
    %780 = vector.broadcast %cst_373 : f32 to vector<16x64xf32>
    %781 = arith.maximumf %779, %780 : vector<16x64xf32>
    %c0_374 = arith.constant 0 : index
    %c0_375 = arith.constant 0 : index
    %782 = vector.load %arg15[%c0_374, %c0_375] : memref<64x32xf32, #tpu.memory_space<vmem>>, vector<64x32xf32>
    %cst_376 = arith.constant dense<0.000000e+00> : vector<16x32xf32>
    %783 = tpu.matmul %781, %782, %cst_376 {dimension_numbers = #tpu.dot_dimension_numbers<[1], [0], [0], [1], [0, 0, 1, 1], [], []>} : vector<16x64xf32>, vector<64x32xf32>, vector<16x32xf32> -> vector<16x32xf32>
    %c0_377 = arith.constant 0 : index
    %c0_378 = arith.constant 0 : index
    %784 = vector.load %arg14[%c0_377, %c0_378] : memref<1x32xf32, #tpu.memory_space<vmem>>, vector<1x32xf32>
    %785 = vector.broadcast %784 : vector<1x32xf32> to vector<16x32xf32>
    %786 = arith.addf %783, %785 : vector<16x32xf32>
    %787 = arith.addf %774, %786 : vector<16x32xf32>
    %c0_379 = arith.constant 0 : index
    %c0_380 = arith.constant 0 : index
    %788 = vector.load %arg21[%c0_379, %c0_380] : memref<1x32xf32, #tpu.memory_space<vmem>>, vector<1x32xf32>
    %c0_381 = arith.constant 0 : index
    %c0_382 = arith.constant 0 : index
    %789 = vector.load %arg20[%c0_381, %c0_382] : memref<1x32xf32, #tpu.memory_space<vmem>>, vector<1x32xf32>
    %cst_383 = arith.constant dense<0.000000e+00> : vector<16xf32>
    %790 = vector.multi_reduction <add>, %787, %cst_383 [1] : vector<16x32xf32> to vector<16xf32>
    %791 = vector.shape_cast %790 : vector<16xf32> to vector<16x1xf32>
    %cst_384 = arith.constant 3.200000e+01 : f32
    %792 = vector.broadcast %cst_384 : f32 to vector<16x1xf32>
    %793 = arith.divf %791, %792 : vector<16x1xf32>
    %794 = vector.broadcast %793 : vector<16x1xf32> to vector<16x32xf32>
    %795 = arith.subf %787, %794 : vector<16x32xf32>
    %796 = arith.mulf %795, %795 : vector<16x32xf32>
    %cst_385 = arith.constant dense<0.000000e+00> : vector<16xf32>
    %797 = vector.multi_reduction <add>, %796, %cst_385 [1] : vector<16x32xf32> to vector<16xf32>
    %798 = vector.shape_cast %797 : vector<16xf32> to vector<16x1xf32>
    %cst_386 = arith.constant 3.200000e+01 : f32
    %799 = vector.broadcast %cst_386 : f32 to vector<16x1xf32>
    %800 = arith.divf %798, %799 : vector<16x1xf32>
    %cst_387 = arith.constant 9.99999974E-6 : f32
    %801 = vector.broadcast %cst_387 : f32 to vector<16x1xf32>
    %802 = arith.addf %800, %801 : vector<16x1xf32>
    %803 = math.rsqrt %802 : vector<16x1xf32>
    %804 = vector.broadcast %803 : vector<16x1xf32> to vector<16x32xf32>
    %805 = arith.mulf %795, %804 : vector<16x32xf32>
    %806 = vector.broadcast %788 : vector<1x32xf32> to vector<16x32xf32>
    %807 = arith.mulf %805, %806 : vector<16x32xf32>
    %808 = vector.broadcast %789 : vector<1x32xf32> to vector<16x32xf32>
    %809 = arith.addf %807, %808 : vector<16x32xf32>
    %c0_388 = arith.constant 0 : index
    %c0_389 = arith.constant 0 : index
    %810 = vector.load %arg54[%c0_388, %c0_389] : memref<32x32xf32, #tpu.memory_space<vmem>>, vector<32x32xf32>
    %cst_390 = arith.constant dense<0.000000e+00> : vector<16x32xf32>
    %811 = tpu.matmul %809, %810, %cst_390 {dimension_numbers = #tpu.dot_dimension_numbers<[1], [0], [0], [1], [0, 0, 1, 1], [], []>} : vector<16x32xf32>, vector<32x32xf32>, vector<16x32xf32> -> vector<16x32xf32>
    %c0_391 = arith.constant 0 : index
    %c0_392 = arith.constant 0 : index
    %812 = vector.load %arg50[%c0_391, %c0_392] : memref<1x32xf32, #tpu.memory_space<vmem>>, vector<1x32xf32>
    %813 = vector.broadcast %812 : vector<1x32xf32> to vector<16x32xf32>
    %814 = arith.addf %811, %813 : vector<16x32xf32>
    %c0_393 = arith.constant 0 : index
    %c0_394 = arith.constant 0 : index
    %815 = vector.load %arg52[%c0_393, %c0_394] : memref<32x32xf32, #tpu.memory_space<vmem>>, vector<32x32xf32>
    %cst_395 = arith.constant dense<0.000000e+00> : vector<16x32xf32>
    %816 = tpu.matmul %809, %815, %cst_395 {dimension_numbers = #tpu.dot_dimension_numbers<[1], [0], [0], [1], [0, 0, 1, 1], [], []>} : vector<16x32xf32>, vector<32x32xf32>, vector<16x32xf32> -> vector<16x32xf32>
    %c0_396 = arith.constant 0 : index
    %c0_397 = arith.constant 0 : index
    %817 = vector.load %arg48[%c0_396, %c0_397] : memref<1x32xf32, #tpu.memory_space<vmem>>, vector<1x32xf32>
    %818 = vector.broadcast %817 : vector<1x32xf32> to vector<16x32xf32>
    %819 = arith.addf %816, %818 : vector<16x32xf32>
    %c0_398 = arith.constant 0 : index
    %c0_399 = arith.constant 0 : index
    %820 = vector.load %arg55[%c0_398, %c0_399] : memref<32x32xf32, #tpu.memory_space<vmem>>, vector<32x32xf32>
    %cst_400 = arith.constant dense<0.000000e+00> : vector<16x32xf32>
    %821 = tpu.matmul %809, %820, %cst_400 {dimension_numbers = #tpu.dot_dimension_numbers<[1], [0], [0], [1], [0, 0, 1, 1], [], []>} : vector<16x32xf32>, vector<32x32xf32>, vector<16x32xf32> -> vector<16x32xf32>
    %c0_401 = arith.constant 0 : index
    %c0_402 = arith.constant 0 : index
    %822 = vector.load %arg51[%c0_401, %c0_402] : memref<1x32xf32, #tpu.memory_space<vmem>>, vector<1x32xf32>
    %823 = vector.broadcast %822 : vector<1x32xf32> to vector<16x32xf32>
    %824 = arith.addf %821, %823 : vector<16x32xf32>
    %cst_403 = arith.constant 0.353553385 : f32
    %825 = vector.broadcast %cst_403 : f32 to vector<16x32xf32>
    %826 = arith.mulf %814, %825 : vector<16x32xf32>
    %827 = tpu.iota {dimensions = array<i32: 1>} : vector<16x32xi32>
    %828 = tpu.iota {dimensions = array<i32: 1>} : vector<16x32xi32>
    %c0_i32_404 = arith.constant 0 : i32
    %829 = vector.broadcast %c0_i32_404 : i32 to vector<16x32xi32>
    %830 = arith.cmpi sge, %827, %829 : vector<16x32xi32>
    %c8_i32_405 = arith.constant 8 : i32
    %831 = vector.broadcast %c8_i32_405 : i32 to vector<16x32xi32>
    %832 = arith.cmpi slt, %827, %831 : vector<16x32xi32>
    %833 = arith.andi %830, %832 : vector<16x32xi1>
    %cst_406 = arith.constant 0.000000e+00 : f32
    %834 = vector.broadcast %cst_406 : f32 to vector<16x32xf32>
    %835 = arith.select %833, %826, %834 : vector<16x32xi1>, vector<16x32xf32>
    %cst_407 = arith.constant dense<0.000000e+00> : vector<16x16xf32>
    %836 = tpu.matmul %835, %819, %cst_407 {dimension_numbers = #tpu.dot_dimension_numbers<[1], [1], [0], [0], [0, 0, 1, 0], [], []>} : vector<16x32xf32>, vector<16x32xf32>, vector<16x16xf32> -> vector<16x16xf32>
    %837 = arith.addf %836, %65 : vector<16x16xf32>
    %cst_408 = arith.constant dense<0xFF800000> : vector<16xf32>
    %838 = vector.multi_reduction <maximumf>, %837, %cst_408 [1] : vector<16x16xf32> to vector<16xf32>
    %839 = vector.shape_cast %838 : vector<16xf32> to vector<16x1xf32>
    %840 = vector.broadcast %839 : vector<16x1xf32> to vector<16x16xf32>
    %841 = arith.subf %837, %840 : vector<16x16xf32>
    %842 = math.exp %841 : vector<16x16xf32>
    %cst_409 = arith.constant dense<0.000000e+00> : vector<16xf32>
    %843 = vector.multi_reduction <add>, %842, %cst_409 [1] : vector<16x16xf32> to vector<16xf32>
    %844 = vector.shape_cast %843 : vector<16xf32> to vector<16x1xf32>
    %845 = vector.broadcast %844 : vector<16x1xf32> to vector<16x16xf32>
    %846 = arith.divf %842, %845 : vector<16x16xf32>
    %c0_i32_410 = arith.constant 0 : i32
    %847 = vector.broadcast %c0_i32_410 : i32 to vector<16x32xi32>
    %848 = arith.cmpi sge, %828, %847 : vector<16x32xi32>
    %c8_i32_411 = arith.constant 8 : i32
    %849 = vector.broadcast %c8_i32_411 : i32 to vector<16x32xi32>
    %850 = arith.cmpi slt, %828, %849 : vector<16x32xi32>
    %851 = arith.andi %848, %850 : vector<16x32xi1>
    %cst_412 = arith.constant 0.000000e+00 : f32
    %852 = vector.broadcast %cst_412 : f32 to vector<16x32xf32>
    %853 = arith.select %851, %824, %852 : vector<16x32xi1>, vector<16x32xf32>
    %cst_413 = arith.constant dense<0.000000e+00> : vector<16x32xf32>
    %854 = tpu.matmul %846, %853, %cst_413 {dimension_numbers = #tpu.dot_dimension_numbers<[1], [0], [0], [1], [0, 0, 1, 1], [], []>} : vector<16x16xf32>, vector<16x32xf32>, vector<16x32xf32> -> vector<16x32xf32>
    %c8_i32_414 = arith.constant 8 : i32
    %855 = vector.broadcast %c8_i32_414 : i32 to vector<16x32xi32>
    %856 = arith.cmpi sge, %827, %855 : vector<16x32xi32>
    %c16_i32_415 = arith.constant 16 : i32
    %857 = vector.broadcast %c16_i32_415 : i32 to vector<16x32xi32>
    %858 = arith.cmpi slt, %827, %857 : vector<16x32xi32>
    %859 = arith.andi %856, %858 : vector<16x32xi1>
    %cst_416 = arith.constant 0.000000e+00 : f32
    %860 = vector.broadcast %cst_416 : f32 to vector<16x32xf32>
    %861 = arith.select %859, %826, %860 : vector<16x32xi1>, vector<16x32xf32>
    %cst_417 = arith.constant dense<0.000000e+00> : vector<16x16xf32>
    %862 = tpu.matmul %861, %819, %cst_417 {dimension_numbers = #tpu.dot_dimension_numbers<[1], [1], [0], [0], [0, 0, 1, 0], [], []>} : vector<16x32xf32>, vector<16x32xf32>, vector<16x16xf32> -> vector<16x16xf32>
    %863 = arith.addf %862, %65 : vector<16x16xf32>
    %cst_418 = arith.constant dense<0xFF800000> : vector<16xf32>
    %864 = vector.multi_reduction <maximumf>, %863, %cst_418 [1] : vector<16x16xf32> to vector<16xf32>
    %865 = vector.shape_cast %864 : vector<16xf32> to vector<16x1xf32>
    %866 = vector.broadcast %865 : vector<16x1xf32> to vector<16x16xf32>
    %867 = arith.subf %863, %866 : vector<16x16xf32>
    %868 = math.exp %867 : vector<16x16xf32>
    %cst_419 = arith.constant dense<0.000000e+00> : vector<16xf32>
    %869 = vector.multi_reduction <add>, %868, %cst_419 [1] : vector<16x16xf32> to vector<16xf32>
    %870 = vector.shape_cast %869 : vector<16xf32> to vector<16x1xf32>
    %871 = vector.broadcast %870 : vector<16x1xf32> to vector<16x16xf32>
    %872 = arith.divf %868, %871 : vector<16x16xf32>
    %c8_i32_420 = arith.constant 8 : i32
    %873 = vector.broadcast %c8_i32_420 : i32 to vector<16x32xi32>
    %874 = arith.cmpi sge, %828, %873 : vector<16x32xi32>
    %c16_i32_421 = arith.constant 16 : i32
    %875 = vector.broadcast %c16_i32_421 : i32 to vector<16x32xi32>
    %876 = arith.cmpi slt, %828, %875 : vector<16x32xi32>
    %877 = arith.andi %874, %876 : vector<16x32xi1>
    %cst_422 = arith.constant 0.000000e+00 : f32
    %878 = vector.broadcast %cst_422 : f32 to vector<16x32xf32>
    %879 = arith.select %877, %824, %878 : vector<16x32xi1>, vector<16x32xf32>
    %cst_423 = arith.constant dense<0.000000e+00> : vector<16x32xf32>
    %880 = tpu.matmul %872, %879, %cst_423 {dimension_numbers = #tpu.dot_dimension_numbers<[1], [0], [0], [1], [0, 0, 1, 1], [], []>} : vector<16x16xf32>, vector<16x32xf32>, vector<16x32xf32> -> vector<16x32xf32>
    %881 = arith.addf %854, %880 : vector<16x32xf32>
    %c16_i32_424 = arith.constant 16 : i32
    %882 = vector.broadcast %c16_i32_424 : i32 to vector<16x32xi32>
    %883 = arith.cmpi sge, %827, %882 : vector<16x32xi32>
    %c24_i32_425 = arith.constant 24 : i32
    %884 = vector.broadcast %c24_i32_425 : i32 to vector<16x32xi32>
    %885 = arith.cmpi slt, %827, %884 : vector<16x32xi32>
    %886 = arith.andi %883, %885 : vector<16x32xi1>
    %cst_426 = arith.constant 0.000000e+00 : f32
    %887 = vector.broadcast %cst_426 : f32 to vector<16x32xf32>
    %888 = arith.select %886, %826, %887 : vector<16x32xi1>, vector<16x32xf32>
    %cst_427 = arith.constant dense<0.000000e+00> : vector<16x16xf32>
    %889 = tpu.matmul %888, %819, %cst_427 {dimension_numbers = #tpu.dot_dimension_numbers<[1], [1], [0], [0], [0, 0, 1, 0], [], []>} : vector<16x32xf32>, vector<16x32xf32>, vector<16x16xf32> -> vector<16x16xf32>
    %890 = arith.addf %889, %65 : vector<16x16xf32>
    %cst_428 = arith.constant dense<0xFF800000> : vector<16xf32>
    %891 = vector.multi_reduction <maximumf>, %890, %cst_428 [1] : vector<16x16xf32> to vector<16xf32>
    %892 = vector.shape_cast %891 : vector<16xf32> to vector<16x1xf32>
    %893 = vector.broadcast %892 : vector<16x1xf32> to vector<16x16xf32>
    %894 = arith.subf %890, %893 : vector<16x16xf32>
    %895 = math.exp %894 : vector<16x16xf32>
    %cst_429 = arith.constant dense<0.000000e+00> : vector<16xf32>
    %896 = vector.multi_reduction <add>, %895, %cst_429 [1] : vector<16x16xf32> to vector<16xf32>
    %897 = vector.shape_cast %896 : vector<16xf32> to vector<16x1xf32>
    %898 = vector.broadcast %897 : vector<16x1xf32> to vector<16x16xf32>
    %899 = arith.divf %895, %898 : vector<16x16xf32>
    %c16_i32_430 = arith.constant 16 : i32
    %900 = vector.broadcast %c16_i32_430 : i32 to vector<16x32xi32>
    %901 = arith.cmpi sge, %828, %900 : vector<16x32xi32>
    %c24_i32_431 = arith.constant 24 : i32
    %902 = vector.broadcast %c24_i32_431 : i32 to vector<16x32xi32>
    %903 = arith.cmpi slt, %828, %902 : vector<16x32xi32>
    %904 = arith.andi %901, %903 : vector<16x32xi1>
    %cst_432 = arith.constant 0.000000e+00 : f32
    %905 = vector.broadcast %cst_432 : f32 to vector<16x32xf32>
    %906 = arith.select %904, %824, %905 : vector<16x32xi1>, vector<16x32xf32>
    %cst_433 = arith.constant dense<0.000000e+00> : vector<16x32xf32>
    %907 = tpu.matmul %899, %906, %cst_433 {dimension_numbers = #tpu.dot_dimension_numbers<[1], [0], [0], [1], [0, 0, 1, 1], [], []>} : vector<16x16xf32>, vector<16x32xf32>, vector<16x32xf32> -> vector<16x32xf32>
    %908 = arith.addf %881, %907 : vector<16x32xf32>
    %c24_i32_434 = arith.constant 24 : i32
    %909 = vector.broadcast %c24_i32_434 : i32 to vector<16x32xi32>
    %910 = arith.cmpi sge, %827, %909 : vector<16x32xi32>
    %c32_i32_435 = arith.constant 32 : i32
    %911 = vector.broadcast %c32_i32_435 : i32 to vector<16x32xi32>
    %912 = arith.cmpi slt, %827, %911 : vector<16x32xi32>
    %913 = arith.andi %910, %912 : vector<16x32xi1>
    %cst_436 = arith.constant 0.000000e+00 : f32
    %914 = vector.broadcast %cst_436 : f32 to vector<16x32xf32>
    %915 = arith.select %913, %826, %914 : vector<16x32xi1>, vector<16x32xf32>
    %cst_437 = arith.constant dense<0.000000e+00> : vector<16x16xf32>
    %916 = tpu.matmul %915, %819, %cst_437 {dimension_numbers = #tpu.dot_dimension_numbers<[1], [1], [0], [0], [0, 0, 1, 0], [], []>} : vector<16x32xf32>, vector<16x32xf32>, vector<16x16xf32> -> vector<16x16xf32>
    %917 = arith.addf %916, %65 : vector<16x16xf32>
    %cst_438 = arith.constant dense<0xFF800000> : vector<16xf32>
    %918 = vector.multi_reduction <maximumf>, %917, %cst_438 [1] : vector<16x16xf32> to vector<16xf32>
    %919 = vector.shape_cast %918 : vector<16xf32> to vector<16x1xf32>
    %920 = vector.broadcast %919 : vector<16x1xf32> to vector<16x16xf32>
    %921 = arith.subf %917, %920 : vector<16x16xf32>
    %922 = math.exp %921 : vector<16x16xf32>
    %cst_439 = arith.constant dense<0.000000e+00> : vector<16xf32>
    %923 = vector.multi_reduction <add>, %922, %cst_439 [1] : vector<16x16xf32> to vector<16xf32>
    %924 = vector.shape_cast %923 : vector<16xf32> to vector<16x1xf32>
    %925 = vector.broadcast %924 : vector<16x1xf32> to vector<16x16xf32>
    %926 = arith.divf %922, %925 : vector<16x16xf32>
    %c24_i32_440 = arith.constant 24 : i32
    %927 = vector.broadcast %c24_i32_440 : i32 to vector<16x32xi32>
    %928 = arith.cmpi sge, %828, %927 : vector<16x32xi32>
    %c32_i32_441 = arith.constant 32 : i32
    %929 = vector.broadcast %c32_i32_441 : i32 to vector<16x32xi32>
    %930 = arith.cmpi slt, %828, %929 : vector<16x32xi32>
    %931 = arith.andi %928, %930 : vector<16x32xi1>
    %cst_442 = arith.constant 0.000000e+00 : f32
    %932 = vector.broadcast %cst_442 : f32 to vector<16x32xf32>
    %933 = arith.select %931, %824, %932 : vector<16x32xi1>, vector<16x32xf32>
    %cst_443 = arith.constant dense<0.000000e+00> : vector<16x32xf32>
    %934 = tpu.matmul %926, %933, %cst_443 {dimension_numbers = #tpu.dot_dimension_numbers<[1], [0], [0], [1], [0, 0, 1, 1], [], []>} : vector<16x16xf32>, vector<16x32xf32>, vector<16x32xf32> -> vector<16x32xf32>
    %935 = arith.addf %908, %934 : vector<16x32xf32>
    %c0_444 = arith.constant 0 : index
    %c0_445 = arith.constant 0 : index
    %936 = vector.load %arg53[%c0_444, %c0_445] : memref<32x32xf32, #tpu.memory_space<vmem>>, vector<32x32xf32>
    %cst_446 = arith.constant dense<0.000000e+00> : vector<16x32xf32>
    %937 = tpu.matmul %935, %936, %cst_446 {dimension_numbers = #tpu.dot_dimension_numbers<[1], [0], [0], [1], [0, 0, 1, 1], [], []>} : vector<16x32xf32>, vector<32x32xf32>, vector<16x32xf32> -> vector<16x32xf32>
    %c0_447 = arith.constant 0 : index
    %c0_448 = arith.constant 0 : index
    %938 = vector.load %arg49[%c0_447, %c0_448] : memref<1x32xf32, #tpu.memory_space<vmem>>, vector<1x32xf32>
    %939 = vector.broadcast %938 : vector<1x32xf32> to vector<16x32xf32>
    %940 = arith.addf %937, %939 : vector<16x32xf32>
    %941 = arith.addf %809, %940 : vector<16x32xf32>
    %c0_449 = arith.constant 0 : index
    %c0_450 = arith.constant 0 : index
    %942 = vector.load %arg43[%c0_449, %c0_450] : memref<1x32xf32, #tpu.memory_space<vmem>>, vector<1x32xf32>
    %c0_451 = arith.constant 0 : index
    %c0_452 = arith.constant 0 : index
    %943 = vector.load %arg42[%c0_451, %c0_452] : memref<1x32xf32, #tpu.memory_space<vmem>>, vector<1x32xf32>
    %cst_453 = arith.constant dense<0.000000e+00> : vector<16xf32>
    %944 = vector.multi_reduction <add>, %941, %cst_453 [1] : vector<16x32xf32> to vector<16xf32>
    %945 = vector.shape_cast %944 : vector<16xf32> to vector<16x1xf32>
    %cst_454 = arith.constant 3.200000e+01 : f32
    %946 = vector.broadcast %cst_454 : f32 to vector<16x1xf32>
    %947 = arith.divf %945, %946 : vector<16x1xf32>
    %948 = vector.broadcast %947 : vector<16x1xf32> to vector<16x32xf32>
    %949 = arith.subf %941, %948 : vector<16x32xf32>
    %950 = arith.mulf %949, %949 : vector<16x32xf32>
    %cst_455 = arith.constant dense<0.000000e+00> : vector<16xf32>
    %951 = vector.multi_reduction <add>, %950, %cst_455 [1] : vector<16x32xf32> to vector<16xf32>
    %952 = vector.shape_cast %951 : vector<16xf32> to vector<16x1xf32>
    %cst_456 = arith.constant 3.200000e+01 : f32
    %953 = vector.broadcast %cst_456 : f32 to vector<16x1xf32>
    %954 = arith.divf %952, %953 : vector<16x1xf32>
    %cst_457 = arith.constant 9.99999974E-6 : f32
    %955 = vector.broadcast %cst_457 : f32 to vector<16x1xf32>
    %956 = arith.addf %954, %955 : vector<16x1xf32>
    %957 = math.rsqrt %956 : vector<16x1xf32>
    %958 = vector.broadcast %957 : vector<16x1xf32> to vector<16x32xf32>
    %959 = arith.mulf %949, %958 : vector<16x32xf32>
    %960 = vector.broadcast %942 : vector<1x32xf32> to vector<16x32xf32>
    %961 = arith.mulf %959, %960 : vector<16x32xf32>
    %962 = vector.broadcast %943 : vector<1x32xf32> to vector<16x32xf32>
    %963 = arith.addf %961, %962 : vector<16x32xf32>
    %c0_458 = arith.constant 0 : index
    %c0_459 = arith.constant 0 : index
    %964 = vector.load %arg36[%c0_458, %c0_459] : memref<32x32xf32, #tpu.memory_space<vmem>>, vector<32x32xf32>
    %cst_460 = arith.constant dense<0.000000e+00> : vector<16x32xf32>
    %965 = tpu.matmul %963, %964, %cst_460 {dimension_numbers = #tpu.dot_dimension_numbers<[1], [0], [0], [1], [0, 0, 1, 1], [], []>} : vector<16x32xf32>, vector<32x32xf32>, vector<16x32xf32> -> vector<16x32xf32>
    %c0_461 = arith.constant 0 : index
    %c0_462 = arith.constant 0 : index
    %966 = vector.load %arg32[%c0_461, %c0_462] : memref<1x32xf32, #tpu.memory_space<vmem>>, vector<1x32xf32>
    %967 = vector.broadcast %966 : vector<1x32xf32> to vector<16x32xf32>
    %968 = arith.addf %965, %967 : vector<16x32xf32>
    %c0_463 = arith.constant 0 : index
    %c0_464 = arith.constant 0 : index
    %969 = vector.load %arg34[%c0_463, %c0_464] : memref<32x32xf32, #tpu.memory_space<vmem>>, vector<32x32xf32>
    %cst_465 = arith.constant dense<0.000000e+00> : vector<6x32xf32>
    %970 = tpu.matmul %466, %969, %cst_465 {dimension_numbers = #tpu.dot_dimension_numbers<[1], [0], [0], [1], [0, 0, 1, 1], [], []>} : vector<6x32xf32>, vector<32x32xf32>, vector<6x32xf32> -> vector<6x32xf32>
    %c0_466 = arith.constant 0 : index
    %c0_467 = arith.constant 0 : index
    %971 = vector.load %arg30[%c0_466, %c0_467] : memref<1x32xf32, #tpu.memory_space<vmem>>, vector<1x32xf32>
    %972 = vector.broadcast %971 : vector<1x32xf32> to vector<6x32xf32>
    %973 = arith.addf %970, %972 : vector<6x32xf32>
    %c0_468 = arith.constant 0 : index
    %c0_469 = arith.constant 0 : index
    %974 = vector.load %arg37[%c0_468, %c0_469] : memref<32x32xf32, #tpu.memory_space<vmem>>, vector<32x32xf32>
    %cst_470 = arith.constant dense<0.000000e+00> : vector<6x32xf32>
    %975 = tpu.matmul %466, %974, %cst_470 {dimension_numbers = #tpu.dot_dimension_numbers<[1], [0], [0], [1], [0, 0, 1, 1], [], []>} : vector<6x32xf32>, vector<32x32xf32>, vector<6x32xf32> -> vector<6x32xf32>
    %c0_471 = arith.constant 0 : index
    %c0_472 = arith.constant 0 : index
    %976 = vector.load %arg33[%c0_471, %c0_472] : memref<1x32xf32, #tpu.memory_space<vmem>>, vector<1x32xf32>
    %977 = vector.broadcast %976 : vector<1x32xf32> to vector<6x32xf32>
    %978 = arith.addf %975, %977 : vector<6x32xf32>
    %cst_473 = arith.constant 0.353553385 : f32
    %979 = vector.broadcast %cst_473 : f32 to vector<16x32xf32>
    %980 = arith.mulf %968, %979 : vector<16x32xf32>
    %981 = tpu.iota {dimensions = array<i32: 1>} : vector<16x32xi32>
    %982 = tpu.iota {dimensions = array<i32: 1>} : vector<6x32xi32>
    %c0_i32_474 = arith.constant 0 : i32
    %983 = vector.broadcast %c0_i32_474 : i32 to vector<16x32xi32>
    %984 = arith.cmpi sge, %981, %983 : vector<16x32xi32>
    %c8_i32_475 = arith.constant 8 : i32
    %985 = vector.broadcast %c8_i32_475 : i32 to vector<16x32xi32>
    %986 = arith.cmpi slt, %981, %985 : vector<16x32xi32>
    %987 = arith.andi %984, %986 : vector<16x32xi1>
    %cst_476 = arith.constant 0.000000e+00 : f32
    %988 = vector.broadcast %cst_476 : f32 to vector<16x32xf32>
    %989 = arith.select %987, %980, %988 : vector<16x32xi1>, vector<16x32xf32>
    %cst_477 = arith.constant dense<0.000000e+00> : vector<16x6xf32>
    %990 = tpu.matmul %989, %973, %cst_477 {dimension_numbers = #tpu.dot_dimension_numbers<[1], [1], [0], [0], [0, 0, 1, 0], [], []>} : vector<16x32xf32>, vector<6x32xf32>, vector<16x6xf32> -> vector<16x6xf32>
    %991 = arith.addf %990, %66 : vector<16x6xf32>
    %cst_478 = arith.constant dense<0xFF800000> : vector<16xf32>
    %992 = vector.multi_reduction <maximumf>, %991, %cst_478 [1] : vector<16x6xf32> to vector<16xf32>
    %993 = vector.shape_cast %992 : vector<16xf32> to vector<16x1xf32>
    %994 = vector.broadcast %993 : vector<16x1xf32> to vector<16x6xf32>
    %995 = arith.subf %991, %994 : vector<16x6xf32>
    %996 = math.exp %995 : vector<16x6xf32>
    %cst_479 = arith.constant dense<0.000000e+00> : vector<16xf32>
    %997 = vector.multi_reduction <add>, %996, %cst_479 [1] : vector<16x6xf32> to vector<16xf32>
    %998 = vector.shape_cast %997 : vector<16xf32> to vector<16x1xf32>
    %999 = vector.broadcast %998 : vector<16x1xf32> to vector<16x6xf32>
    %1000 = arith.divf %996, %999 : vector<16x6xf32>
    %c0_i32_480 = arith.constant 0 : i32
    %1001 = vector.broadcast %c0_i32_480 : i32 to vector<6x32xi32>
    %1002 = arith.cmpi sge, %982, %1001 : vector<6x32xi32>
    %c8_i32_481 = arith.constant 8 : i32
    %1003 = vector.broadcast %c8_i32_481 : i32 to vector<6x32xi32>
    %1004 = arith.cmpi slt, %982, %1003 : vector<6x32xi32>
    %1005 = arith.andi %1002, %1004 : vector<6x32xi1>
    %cst_482 = arith.constant 0.000000e+00 : f32
    %1006 = vector.broadcast %cst_482 : f32 to vector<6x32xf32>
    %1007 = arith.select %1005, %978, %1006 : vector<6x32xi1>, vector<6x32xf32>
    %cst_483 = arith.constant dense<0.000000e+00> : vector<16x32xf32>
    %1008 = tpu.matmul %1000, %1007, %cst_483 {dimension_numbers = #tpu.dot_dimension_numbers<[1], [0], [0], [1], [0, 0, 1, 1], [], []>} : vector<16x6xf32>, vector<6x32xf32>, vector<16x32xf32> -> vector<16x32xf32>
    %c8_i32_484 = arith.constant 8 : i32
    %1009 = vector.broadcast %c8_i32_484 : i32 to vector<16x32xi32>
    %1010 = arith.cmpi sge, %981, %1009 : vector<16x32xi32>
    %c16_i32_485 = arith.constant 16 : i32
    %1011 = vector.broadcast %c16_i32_485 : i32 to vector<16x32xi32>
    %1012 = arith.cmpi slt, %981, %1011 : vector<16x32xi32>
    %1013 = arith.andi %1010, %1012 : vector<16x32xi1>
    %cst_486 = arith.constant 0.000000e+00 : f32
    %1014 = vector.broadcast %cst_486 : f32 to vector<16x32xf32>
    %1015 = arith.select %1013, %980, %1014 : vector<16x32xi1>, vector<16x32xf32>
    %cst_487 = arith.constant dense<0.000000e+00> : vector<16x6xf32>
    %1016 = tpu.matmul %1015, %973, %cst_487 {dimension_numbers = #tpu.dot_dimension_numbers<[1], [1], [0], [0], [0, 0, 1, 0], [], []>} : vector<16x32xf32>, vector<6x32xf32>, vector<16x6xf32> -> vector<16x6xf32>
    %1017 = arith.addf %1016, %66 : vector<16x6xf32>
    %cst_488 = arith.constant dense<0xFF800000> : vector<16xf32>
    %1018 = vector.multi_reduction <maximumf>, %1017, %cst_488 [1] : vector<16x6xf32> to vector<16xf32>
    %1019 = vector.shape_cast %1018 : vector<16xf32> to vector<16x1xf32>
    %1020 = vector.broadcast %1019 : vector<16x1xf32> to vector<16x6xf32>
    %1021 = arith.subf %1017, %1020 : vector<16x6xf32>
    %1022 = math.exp %1021 : vector<16x6xf32>
    %cst_489 = arith.constant dense<0.000000e+00> : vector<16xf32>
    %1023 = vector.multi_reduction <add>, %1022, %cst_489 [1] : vector<16x6xf32> to vector<16xf32>
    %1024 = vector.shape_cast %1023 : vector<16xf32> to vector<16x1xf32>
    %1025 = vector.broadcast %1024 : vector<16x1xf32> to vector<16x6xf32>
    %1026 = arith.divf %1022, %1025 : vector<16x6xf32>
    %c8_i32_490 = arith.constant 8 : i32
    %1027 = vector.broadcast %c8_i32_490 : i32 to vector<6x32xi32>
    %1028 = arith.cmpi sge, %982, %1027 : vector<6x32xi32>
    %c16_i32_491 = arith.constant 16 : i32
    %1029 = vector.broadcast %c16_i32_491 : i32 to vector<6x32xi32>
    %1030 = arith.cmpi slt, %982, %1029 : vector<6x32xi32>
    %1031 = arith.andi %1028, %1030 : vector<6x32xi1>
    %cst_492 = arith.constant 0.000000e+00 : f32
    %1032 = vector.broadcast %cst_492 : f32 to vector<6x32xf32>
    %1033 = arith.select %1031, %978, %1032 : vector<6x32xi1>, vector<6x32xf32>
    %cst_493 = arith.constant dense<0.000000e+00> : vector<16x32xf32>
    %1034 = tpu.matmul %1026, %1033, %cst_493 {dimension_numbers = #tpu.dot_dimension_numbers<[1], [0], [0], [1], [0, 0, 1, 1], [], []>} : vector<16x6xf32>, vector<6x32xf32>, vector<16x32xf32> -> vector<16x32xf32>
    %1035 = arith.addf %1008, %1034 : vector<16x32xf32>
    %c16_i32_494 = arith.constant 16 : i32
    %1036 = vector.broadcast %c16_i32_494 : i32 to vector<16x32xi32>
    %1037 = arith.cmpi sge, %981, %1036 : vector<16x32xi32>
    %c24_i32_495 = arith.constant 24 : i32
    %1038 = vector.broadcast %c24_i32_495 : i32 to vector<16x32xi32>
    %1039 = arith.cmpi slt, %981, %1038 : vector<16x32xi32>
    %1040 = arith.andi %1037, %1039 : vector<16x32xi1>
    %cst_496 = arith.constant 0.000000e+00 : f32
    %1041 = vector.broadcast %cst_496 : f32 to vector<16x32xf32>
    %1042 = arith.select %1040, %980, %1041 : vector<16x32xi1>, vector<16x32xf32>
    %cst_497 = arith.constant dense<0.000000e+00> : vector<16x6xf32>
    %1043 = tpu.matmul %1042, %973, %cst_497 {dimension_numbers = #tpu.dot_dimension_numbers<[1], [1], [0], [0], [0, 0, 1, 0], [], []>} : vector<16x32xf32>, vector<6x32xf32>, vector<16x6xf32> -> vector<16x6xf32>
    %1044 = arith.addf %1043, %66 : vector<16x6xf32>
    %cst_498 = arith.constant dense<0xFF800000> : vector<16xf32>
    %1045 = vector.multi_reduction <maximumf>, %1044, %cst_498 [1] : vector<16x6xf32> to vector<16xf32>
    %1046 = vector.shape_cast %1045 : vector<16xf32> to vector<16x1xf32>
    %1047 = vector.broadcast %1046 : vector<16x1xf32> to vector<16x6xf32>
    %1048 = arith.subf %1044, %1047 : vector<16x6xf32>
    %1049 = math.exp %1048 : vector<16x6xf32>
    %cst_499 = arith.constant dense<0.000000e+00> : vector<16xf32>
    %1050 = vector.multi_reduction <add>, %1049, %cst_499 [1] : vector<16x6xf32> to vector<16xf32>
    %1051 = vector.shape_cast %1050 : vector<16xf32> to vector<16x1xf32>
    %1052 = vector.broadcast %1051 : vector<16x1xf32> to vector<16x6xf32>
    %1053 = arith.divf %1049, %1052 : vector<16x6xf32>
    %c16_i32_500 = arith.constant 16 : i32
    %1054 = vector.broadcast %c16_i32_500 : i32 to vector<6x32xi32>
    %1055 = arith.cmpi sge, %982, %1054 : vector<6x32xi32>
    %c24_i32_501 = arith.constant 24 : i32
    %1056 = vector.broadcast %c24_i32_501 : i32 to vector<6x32xi32>
    %1057 = arith.cmpi slt, %982, %1056 : vector<6x32xi32>
    %1058 = arith.andi %1055, %1057 : vector<6x32xi1>
    %cst_502 = arith.constant 0.000000e+00 : f32
    %1059 = vector.broadcast %cst_502 : f32 to vector<6x32xf32>
    %1060 = arith.select %1058, %978, %1059 : vector<6x32xi1>, vector<6x32xf32>
    %cst_503 = arith.constant dense<0.000000e+00> : vector<16x32xf32>
    %1061 = tpu.matmul %1053, %1060, %cst_503 {dimension_numbers = #tpu.dot_dimension_numbers<[1], [0], [0], [1], [0, 0, 1, 1], [], []>} : vector<16x6xf32>, vector<6x32xf32>, vector<16x32xf32> -> vector<16x32xf32>
    %1062 = arith.addf %1035, %1061 : vector<16x32xf32>
    %c24_i32_504 = arith.constant 24 : i32
    %1063 = vector.broadcast %c24_i32_504 : i32 to vector<16x32xi32>
    %1064 = arith.cmpi sge, %981, %1063 : vector<16x32xi32>
    %c32_i32_505 = arith.constant 32 : i32
    %1065 = vector.broadcast %c32_i32_505 : i32 to vector<16x32xi32>
    %1066 = arith.cmpi slt, %981, %1065 : vector<16x32xi32>
    %1067 = arith.andi %1064, %1066 : vector<16x32xi1>
    %cst_506 = arith.constant 0.000000e+00 : f32
    %1068 = vector.broadcast %cst_506 : f32 to vector<16x32xf32>
    %1069 = arith.select %1067, %980, %1068 : vector<16x32xi1>, vector<16x32xf32>
    %cst_507 = arith.constant dense<0.000000e+00> : vector<16x6xf32>
    %1070 = tpu.matmul %1069, %973, %cst_507 {dimension_numbers = #tpu.dot_dimension_numbers<[1], [1], [0], [0], [0, 0, 1, 0], [], []>} : vector<16x32xf32>, vector<6x32xf32>, vector<16x6xf32> -> vector<16x6xf32>
    %1071 = arith.addf %1070, %66 : vector<16x6xf32>
    %cst_508 = arith.constant dense<0xFF800000> : vector<16xf32>
    %1072 = vector.multi_reduction <maximumf>, %1071, %cst_508 [1] : vector<16x6xf32> to vector<16xf32>
    %1073 = vector.shape_cast %1072 : vector<16xf32> to vector<16x1xf32>
    %1074 = vector.broadcast %1073 : vector<16x1xf32> to vector<16x6xf32>
    %1075 = arith.subf %1071, %1074 : vector<16x6xf32>
    %1076 = math.exp %1075 : vector<16x6xf32>
    %cst_509 = arith.constant dense<0.000000e+00> : vector<16xf32>
    %1077 = vector.multi_reduction <add>, %1076, %cst_509 [1] : vector<16x6xf32> to vector<16xf32>
    %1078 = vector.shape_cast %1077 : vector<16xf32> to vector<16x1xf32>
    %1079 = vector.broadcast %1078 : vector<16x1xf32> to vector<16x6xf32>
    %1080 = arith.divf %1076, %1079 : vector<16x6xf32>
    %c24_i32_510 = arith.constant 24 : i32
    %1081 = vector.broadcast %c24_i32_510 : i32 to vector<6x32xi32>
    %1082 = arith.cmpi sge, %982, %1081 : vector<6x32xi32>
    %c32_i32_511 = arith.constant 32 : i32
    %1083 = vector.broadcast %c32_i32_511 : i32 to vector<6x32xi32>
    %1084 = arith.cmpi slt, %982, %1083 : vector<6x32xi32>
    %1085 = arith.andi %1082, %1084 : vector<6x32xi1>
    %cst_512 = arith.constant 0.000000e+00 : f32
    %1086 = vector.broadcast %cst_512 : f32 to vector<6x32xf32>
    %1087 = arith.select %1085, %978, %1086 : vector<6x32xi1>, vector<6x32xf32>
    %cst_513 = arith.constant dense<0.000000e+00> : vector<16x32xf32>
    %1088 = tpu.matmul %1080, %1087, %cst_513 {dimension_numbers = #tpu.dot_dimension_numbers<[1], [0], [0], [1], [0, 0, 1, 1], [], []>} : vector<16x6xf32>, vector<6x32xf32>, vector<16x32xf32> -> vector<16x32xf32>
    %1089 = arith.addf %1062, %1088 : vector<16x32xf32>
    %c0_514 = arith.constant 0 : index
    %c0_515 = arith.constant 0 : index
    %1090 = vector.load %arg35[%c0_514, %c0_515] : memref<32x32xf32, #tpu.memory_space<vmem>>, vector<32x32xf32>
    %cst_516 = arith.constant dense<0.000000e+00> : vector<16x32xf32>
    %1091 = tpu.matmul %1089, %1090, %cst_516 {dimension_numbers = #tpu.dot_dimension_numbers<[1], [0], [0], [1], [0, 0, 1, 1], [], []>} : vector<16x32xf32>, vector<32x32xf32>, vector<16x32xf32> -> vector<16x32xf32>
    %c0_517 = arith.constant 0 : index
    %c0_518 = arith.constant 0 : index
    %1092 = vector.load %arg31[%c0_517, %c0_518] : memref<1x32xf32, #tpu.memory_space<vmem>>, vector<1x32xf32>
    %1093 = vector.broadcast %1092 : vector<1x32xf32> to vector<16x32xf32>
    %1094 = arith.addf %1091, %1093 : vector<16x32xf32>
    %1095 = arith.addf %963, %1094 : vector<16x32xf32>
    %c0_519 = arith.constant 0 : index
    %c0_520 = arith.constant 0 : index
    %1096 = vector.load %arg45[%c0_519, %c0_520] : memref<1x32xf32, #tpu.memory_space<vmem>>, vector<1x32xf32>
    %c0_521 = arith.constant 0 : index
    %c0_522 = arith.constant 0 : index
    %1097 = vector.load %arg44[%c0_521, %c0_522] : memref<1x32xf32, #tpu.memory_space<vmem>>, vector<1x32xf32>
    %cst_523 = arith.constant dense<0.000000e+00> : vector<16xf32>
    %1098 = vector.multi_reduction <add>, %1095, %cst_523 [1] : vector<16x32xf32> to vector<16xf32>
    %1099 = vector.shape_cast %1098 : vector<16xf32> to vector<16x1xf32>
    %cst_524 = arith.constant 3.200000e+01 : f32
    %1100 = vector.broadcast %cst_524 : f32 to vector<16x1xf32>
    %1101 = arith.divf %1099, %1100 : vector<16x1xf32>
    %1102 = vector.broadcast %1101 : vector<16x1xf32> to vector<16x32xf32>
    %1103 = arith.subf %1095, %1102 : vector<16x32xf32>
    %1104 = arith.mulf %1103, %1103 : vector<16x32xf32>
    %cst_525 = arith.constant dense<0.000000e+00> : vector<16xf32>
    %1105 = vector.multi_reduction <add>, %1104, %cst_525 [1] : vector<16x32xf32> to vector<16xf32>
    %1106 = vector.shape_cast %1105 : vector<16xf32> to vector<16x1xf32>
    %cst_526 = arith.constant 3.200000e+01 : f32
    %1107 = vector.broadcast %cst_526 : f32 to vector<16x1xf32>
    %1108 = arith.divf %1106, %1107 : vector<16x1xf32>
    %cst_527 = arith.constant 9.99999974E-6 : f32
    %1109 = vector.broadcast %cst_527 : f32 to vector<16x1xf32>
    %1110 = arith.addf %1108, %1109 : vector<16x1xf32>
    %1111 = math.rsqrt %1110 : vector<16x1xf32>
    %1112 = vector.broadcast %1111 : vector<16x1xf32> to vector<16x32xf32>
    %1113 = arith.mulf %1103, %1112 : vector<16x32xf32>
    %1114 = vector.broadcast %1096 : vector<1x32xf32> to vector<16x32xf32>
    %1115 = arith.mulf %1113, %1114 : vector<16x32xf32>
    %1116 = vector.broadcast %1097 : vector<1x32xf32> to vector<16x32xf32>
    %1117 = arith.addf %1115, %1116 : vector<16x32xf32>
    %c0_528 = arith.constant 0 : index
    %c0_529 = arith.constant 0 : index
    %1118 = vector.load %arg39[%c0_528, %c0_529] : memref<32x64xf32, #tpu.memory_space<vmem>>, vector<32x64xf32>
    %cst_530 = arith.constant dense<0.000000e+00> : vector<16x64xf32>
    %1119 = tpu.matmul %1117, %1118, %cst_530 {dimension_numbers = #tpu.dot_dimension_numbers<[1], [0], [0], [1], [0, 0, 1, 1], [], []>} : vector<16x32xf32>, vector<32x64xf32>, vector<16x64xf32> -> vector<16x64xf32>
    %c0_531 = arith.constant 0 : index
    %c0_532 = arith.constant 0 : index
    %1120 = vector.load %arg38[%c0_531, %c0_532] : memref<1x64xf32, #tpu.memory_space<vmem>>, vector<1x64xf32>
    %1121 = vector.broadcast %1120 : vector<1x64xf32> to vector<16x64xf32>
    %1122 = arith.addf %1119, %1121 : vector<16x64xf32>
    %cst_533 = arith.constant 0.000000e+00 : f32
    %1123 = vector.broadcast %cst_533 : f32 to vector<16x64xf32>
    %1124 = arith.maximumf %1122, %1123 : vector<16x64xf32>
    %c0_534 = arith.constant 0 : index
    %c0_535 = arith.constant 0 : index
    %1125 = vector.load %arg41[%c0_534, %c0_535] : memref<64x32xf32, #tpu.memory_space<vmem>>, vector<64x32xf32>
    %cst_536 = arith.constant dense<0.000000e+00> : vector<16x32xf32>
    %1126 = tpu.matmul %1124, %1125, %cst_536 {dimension_numbers = #tpu.dot_dimension_numbers<[1], [0], [0], [1], [0, 0, 1, 1], [], []>} : vector<16x64xf32>, vector<64x32xf32>, vector<16x32xf32> -> vector<16x32xf32>
    %c0_537 = arith.constant 0 : index
    %c0_538 = arith.constant 0 : index
    %1127 = vector.load %arg40[%c0_537, %c0_538] : memref<1x32xf32, #tpu.memory_space<vmem>>, vector<1x32xf32>
    %1128 = vector.broadcast %1127 : vector<1x32xf32> to vector<16x32xf32>
    %1129 = arith.addf %1126, %1128 : vector<16x32xf32>
    %1130 = arith.addf %1117, %1129 : vector<16x32xf32>
    %c0_539 = arith.constant 0 : index
    %c0_540 = arith.constant 0 : index
    %1131 = vector.load %arg47[%c0_539, %c0_540] : memref<1x32xf32, #tpu.memory_space<vmem>>, vector<1x32xf32>
    %c0_541 = arith.constant 0 : index
    %c0_542 = arith.constant 0 : index
    %1132 = vector.load %arg46[%c0_541, %c0_542] : memref<1x32xf32, #tpu.memory_space<vmem>>, vector<1x32xf32>
    %cst_543 = arith.constant dense<0.000000e+00> : vector<16xf32>
    %1133 = vector.multi_reduction <add>, %1130, %cst_543 [1] : vector<16x32xf32> to vector<16xf32>
    %1134 = vector.shape_cast %1133 : vector<16xf32> to vector<16x1xf32>
    %cst_544 = arith.constant 3.200000e+01 : f32
    %1135 = vector.broadcast %cst_544 : f32 to vector<16x1xf32>
    %1136 = arith.divf %1134, %1135 : vector<16x1xf32>
    %1137 = vector.broadcast %1136 : vector<16x1xf32> to vector<16x32xf32>
    %1138 = arith.subf %1130, %1137 : vector<16x32xf32>
    %1139 = arith.mulf %1138, %1138 : vector<16x32xf32>
    %cst_545 = arith.constant dense<0.000000e+00> : vector<16xf32>
    %1140 = vector.multi_reduction <add>, %1139, %cst_545 [1] : vector<16x32xf32> to vector<16xf32>
    %1141 = vector.shape_cast %1140 : vector<16xf32> to vector<16x1xf32>
    %cst_546 = arith.constant 3.200000e+01 : f32
    %1142 = vector.broadcast %cst_546 : f32 to vector<16x1xf32>
    %1143 = arith.divf %1141, %1142 : vector<16x1xf32>
    %cst_547 = arith.constant 9.99999974E-6 : f32
    %1144 = vector.broadcast %cst_547 : f32 to vector<16x1xf32>
    %1145 = arith.addf %1143, %1144 : vector<16x1xf32>
    %1146 = math.rsqrt %1145 : vector<16x1xf32>
    %1147 = vector.broadcast %1146 : vector<16x1xf32> to vector<16x32xf32>
    %1148 = arith.mulf %1138, %1147 : vector<16x32xf32>
    %1149 = vector.broadcast %1131 : vector<1x32xf32> to vector<16x32xf32>
    %1150 = arith.mulf %1148, %1149 : vector<16x32xf32>
    %1151 = vector.broadcast %1132 : vector<1x32xf32> to vector<16x32xf32>
    %1152 = arith.addf %1150, %1151 : vector<16x32xf32>
    %c0_548 = arith.constant 0 : index
    %c0_549 = arith.constant 0 : index
    %1153 = vector.load %arg58[%c0_548, %c0_549] : memref<1x32xf32, #tpu.memory_space<vmem>>, vector<1x32xf32>
    %c0_550 = arith.constant 0 : index
    %c0_551 = arith.constant 0 : index
    %1154 = vector.load %arg57[%c0_550, %c0_551] : memref<1x32xf32, #tpu.memory_space<vmem>>, vector<1x32xf32>
    %cst_552 = arith.constant dense<0.000000e+00> : vector<16xf32>
    %1155 = vector.multi_reduction <add>, %1152, %cst_552 [1] : vector<16x32xf32> to vector<16xf32>
    %1156 = vector.shape_cast %1155 : vector<16xf32> to vector<16x1xf32>
    %cst_553 = arith.constant 3.200000e+01 : f32
    %1157 = vector.broadcast %cst_553 : f32 to vector<16x1xf32>
    %1158 = arith.divf %1156, %1157 : vector<16x1xf32>
    %1159 = vector.broadcast %1158 : vector<16x1xf32> to vector<16x32xf32>
    %1160 = arith.subf %1152, %1159 : vector<16x32xf32>
    %1161 = arith.mulf %1160, %1160 : vector<16x32xf32>
    %cst_554 = arith.constant dense<0.000000e+00> : vector<16xf32>
    %1162 = vector.multi_reduction <add>, %1161, %cst_554 [1] : vector<16x32xf32> to vector<16xf32>
    %1163 = vector.shape_cast %1162 : vector<16xf32> to vector<16x1xf32>
    %cst_555 = arith.constant 3.200000e+01 : f32
    %1164 = vector.broadcast %cst_555 : f32 to vector<16x1xf32>
    %1165 = arith.divf %1163, %1164 : vector<16x1xf32>
    %cst_556 = arith.constant 9.99999974E-6 : f32
    %1166 = vector.broadcast %cst_556 : f32 to vector<16x1xf32>
    %1167 = arith.addf %1165, %1166 : vector<16x1xf32>
    %1168 = math.rsqrt %1167 : vector<16x1xf32>
    %1169 = vector.broadcast %1168 : vector<16x1xf32> to vector<16x32xf32>
    %1170 = arith.mulf %1160, %1169 : vector<16x32xf32>
    %1171 = vector.broadcast %1153 : vector<1x32xf32> to vector<16x32xf32>
    %1172 = arith.mulf %1170, %1171 : vector<16x32xf32>
    %1173 = vector.broadcast %1154 : vector<1x32xf32> to vector<16x32xf32>
    %1174 = arith.addf %1172, %1173 : vector<16x32xf32>
    %c0_557 = arith.constant 0 : index
    %c0_558 = arith.constant 0 : index
    %1175 = vector.load %arg100[%c0_557, %c0_558] : memref<32x4xf32, #tpu.memory_space<vmem>>, vector<32x4xf32>
    %cst_559 = arith.constant dense<0.000000e+00> : vector<16x4xf32>
    %1176 = tpu.matmul %1174, %1175, %cst_559 {dimension_numbers = #tpu.dot_dimension_numbers<[1], [0], [0], [1], [0, 0, 1, 1], [], []>} : vector<16x32xf32>, vector<32x4xf32>, vector<16x4xf32> -> vector<16x4xf32>
    %c0_560 = arith.constant 0 : index
    %c0_561 = arith.constant 0 : index
    %1177 = vector.load %arg99[%c0_560, %c0_561] : memref<1x4xf32, #tpu.memory_space<vmem>>, vector<1x4xf32>
    %1178 = vector.broadcast %1177 : vector<1x4xf32> to vector<16x4xf32>
    %1179 = arith.addf %1176, %1178 : vector<16x4xf32>
    %c0_562 = arith.constant 0 : index
    %c0_563 = arith.constant 0 : index
    %1180 = vector.load %arg103[%c0_562, %c0_563] : memref<16x4xf32, #tpu.memory_space<vmem>>, vector<16x4xf32>
    tpu.vector_store %arg103[%c0_562, %c0_563], %1179 {strides = array<i32>} : memref<16x4xf32, #tpu.memory_space<vmem>>, vector<16x4xf32>,
    return
  }
}

</mosaic_0001>

<bundles_post_ra>
// kernel: gesam_transformer_forward.1
= control target key start
LH: loop header
LB: loop body
LE: loop exit
PB: predicated region body
PF: predicated region fallthrough
CT: control target
= control target key end

     0   :  { %s12706_s6 = smov 1   ;;  %s12707_s10 = smov 2   ;;  %s14665_s0 = inlined_call_operand.smem [shape: u32[104], index: -1, kind: input, shape index: {}] }
   0x1   :  { %s12897_s5 = sld [smem:[%s14665_s0]]   ;;  %s12708_s14 = smov 3  }
   0x2   :  { %s12902_s9 = sld [smem:[%s14665_s0 + %s12706_s6]]   ;;  %s12709_s18 = smov 4  }
   0x3   :  { %s12907_s13 = sld [smem:[%s14665_s0 + %s12707_s10]]   ;;  %s12710_s22 = smov 5  }
   0x4   :  { %s12912_s17 = sld [smem:[%s14665_s0 + %s12708_s14]]   ;;  %s12711_s26 = smov 6  }
   0x5   :  { %s12917_s21 = sld [smem:[%s14665_s0 + %s12709_s18]]   ;;  %s12712_s30 = smov 7  }
   0x6   :  { %s12922_s25 = sld [smem:[%s14665_s0 + %s12710_s22]]   ;;  %s12713_s4 = smov 8  }
   0x7   :  { %14688 = sst [smem:[#allocation156_spill]] %s12897_s5  ;;  %s12714_s10 = smov 9  }
   0x8   :  { %14689 = sst [smem:[#allocation157_spill]] %s12902_s9  ;;  %s12715_s15 = smov 10  }
   0x9   :  { %14690 = sst [smem:[#allocation158_spill]] %s12907_s13  ;;  %s12716_s20 = smov 11  }
   0xa   :  { %14691 = sst [smem:[#allocation159_spill]] %s12912_s17  ;;  %s12718_s1 = smov 13  }
   0xb   :  { %14692 = sst [smem:[#allocation160_spill]] %s12917_s21  ;;  %s12719_s7 = smov 14  }
   0xc   :  { %14693 = sst [smem:[#allocation161_spill]] %s12922_s25  ;;  %s12721_s22 = smov 16  }
   0xd   :  { %s12927_s29 = sld [smem:[%s14665_s0 + %s12711_s26]]   ;;  %s12717_s26 = smov 12  }
   0xe   :  { %s12932_s3 = sld [smem:[%s14665_s0 + %s12712_s30]]   ;;  %s12722_s28 = smov 17  }
   0xf   :  { %s12937_s8 = sld [smem:[%s14665_s0 + %s12713_s4]]  }
  0x10   :  { %s12942_s14 = sld [smem:[%s14665_s0 + %s12714_s10]]  }
  0x11   :  { %s12947_s19 = sld [smem:[%s14665_s0 + %s12715_s15]]   ;;  %s12720_s15 = smov 15  }
  0x12   :  { %s12952_s24 = sld [smem:[%s14665_s0 + %s12716_s20]]  }
  0x13   :  { %14694 = sst [smem:[#allocation162_spill]] %s12927_s29 }
  0x14   :  { %s12957_s30 = sld [smem:[%s14665_s0 + %s12717_s26]]  }
  0x15   :  { %14695 = sst [smem:[#allocation163_spill]] %s12937_s8 }
  0x16   :  { %14696 = sst [smem:[#allocation164_spill]] %s12942_s14 }
  0x17   :  { %14697 = sst [smem:[#allocation165_spill]] %s12947_s19 }
  0x18   :  { %14698 = sst [smem:[#allocation166_spill]] %s12952_s24 }
  0x19   :  { %s12962_s6 = sld [smem:[%s14665_s0 + %s12718_s1]]  }
  0x1a   :  { %14699 = sst [smem:[#allocation167_spill]] %s12957_s30 }
  0x1b   :  { %s12967_s12 = sld [smem:[%s14665_s0 + %s12719_s7]]   ;;  %s12723_s7 = smov 18  }
  0x1c   :  { %s12972_s20 = sld [smem:[%s14665_s0 + %s12720_s15]]   ;;  %s12724_s15 = smov 19  }
  0x1d   :  { %s12977_s27 = sld [smem:[%s14665_s0 + %s12721_s22]]   ;;  %s12725_s22 = smov 20  }
  0x1e   :  { %s12982_s4 = sld [smem:[%s14665_s0 + %s12722_s28]]   ;;  %s12726_s28 = smov 21  }
  0x1f   :  { %14700 = sst [smem:[#allocation168_spill]] %s12962_s6 }
  0x20   :  { %s12987_s6 = sld [smem:[%s14665_s0 + %s12723_s7]]   ;;  %s12727_s7 = smov 22  }
  0x21   :  { %s12997_s25 = sld [smem:[%s14665_s0 + %s12725_s22]]   ;;  %s12729_s22 = smov 24  }
  0x22   :  { %14701 = sst [smem:[#allocation169_spill]] %s12972_s20 }
  0x23   :  { %14702 = sst [smem:[#allocation170_spill]] %s12977_s27 }
  0x24   :  { %s12992_s20 = sld [smem:[%s14665_s0 + %s12724_s15]]   ;;  %s12728_s15 = smov 23  }
  0x25   :  { %s13002_s14 = sld [smem:[%s14665_s0 + %s12726_s28]]   ;;  %s12730_s28 = smov 25  }
  0x26   :  { %14703 = sst [smem:[#allocation171_spill]] %s12987_s6 }
  0x27   :  { %14704 = sst [smem:[#allocation172_spill]] %s12997_s25 }
  0x28   :  { %s13007_s17 = sld [smem:[%s14665_s0 + %s12727_s7]]   ;;  %s12731_s7 = smov 26  }
  0x29   :  { %s13012_s21 = sld [smem:[%s14665_s0 + %s12728_s15]]   ;;  %s12732_s15 = smov 27  }
  0x2a   :  { %s13017_s24 = sld [smem:[%s14665_s0 + %s12729_s22]]   ;;  %s12733_s22 = smov 28  }
  0x2b   :  { %s13022_s8 = sld [smem:[%s14665_s0 + %s12730_s28]]   ;;  %s12734_s28 = smov 29  }
  0x2c   :  { %s13027_s19 = sld [smem:[%s14665_s0 + %s12731_s7]]   ;;  %s12735_s7 = smov 30  }
  0x2d   :  { %s13032_s5 = sld [smem:[%s14665_s0 + %s12732_s15]]   ;;  %s12736_s15 = smov 31  }
  0x2e   :  { %14705 = sst [smem:[#allocation173_spill]] %s13007_s17 }
  0x2f   :  { %s13037_s13 = sld [smem:[%s14665_s0 + %s12733_s22]]   ;;  %s12737_s22 = smov 32  }
  0x30   :  { %14706 = sst [smem:[#allocation174_spill]] %s13017_s24 }
  0x31   :  { %s13042_s24 = sld [smem:[%s14665_s0 + %s12734_s28]]   ;;  %s12738_s28 = smov 33  }
  0x32   :  { %14707 = sst [smem:[#allocation175_spill]] %s13027_s19 }
  0x33   :  { %14708 = sst [smem:[#allocation176_spill]] %s13032_s5 }
  0x34   :  { %s13047_s19 = sld [smem:[%s14665_s0 + %s12735_s7]]   ;;  %s12739_s7 = smov 34  }
  0x35   :  { %14709 = sst [smem:[#allocation177_spill]] %s13037_s13 }
  0x36   :  { %s13052_s5 = sld [smem:[%s14665_s0 + %s12736_s15]]   ;;  %s12740_s15 = smov 35  }
  0x37   :  { %14710 = sst [smem:[#allocation178_spill]] %s13042_s24 }
  0x38   :  { %s13057_s13 = sld [smem:[%s14665_s0 + %s12737_s22]]   ;;  %s12741_s22 = smov 36  }
  0x39   :  { %s13062_s24 = sld [smem:[%s14665_s0 + %s12738_s28]]   ;;  %s12742_s28 = smov 37  }
  0x3a   :  { %14711 = sst [smem:[#allocation179_spill]] %s13047_s19 }
  0x3b   :  { %s13067_s19 = sld [smem:[%s14665_s0 + %s12739_s7]]   ;;  %s12743_s7 = smov 38  }
  0x3c   :  { %s13072_s17 = sld [smem:[%s14665_s0 + %s12740_s15]]   ;;  %s12744_s15 = smov 39  }
  0x3d   :  { %s13082_s25 = sld [smem:[%s14665_s0 + %s12742_s28]]   ;;  %s12746_s28 = smov 41  }
  0x3e   :  { %14712 = sst [smem:[#allocation180_spill]] %s13057_s13 }
  0x3f   :  { %s13077_s13 = sld [smem:[%s14665_s0 + %s12741_s22]]   ;;  %s12745_s22 = smov 40  }
  0x41   :  { %14713 = sst [smem:[#allocation181_spill]] %s13067_s19 }
  0x42   :  { %14714 = sst [smem:[#allocation182_spill]] %s13072_s17 }
  0x43   :  { %14716 = sst [smem:[#allocation184_spill]] %s13082_s25 }
  0x44   :  { %s13087_s19 = sld [smem:[%s14665_s0 + %s12743_s7]]   ;;  %s12747_s7 = smov 42  }
  0x45   :  { %14715 = sst [smem:[#allocation183_spill]] %s13077_s13 }
  0x46   :  { %s13092_s17 = sld [smem:[%s14665_s0 + %s12744_s15]]   ;;  %s12748_s15 = smov 43  }
  0x47   :  { %s13097_s13 = sld [smem:[%s14665_s0 + %s12745_s22]]   ;;  %s12749_s22 = smov 44  }
  0x48   :  { %s13102_s25 = sld [smem:[%s14665_s0 + %s12746_s28]]   ;;  %s12750_s28 = smov 45  }
  0x49   :  { %s13107_s6 = sld [smem:[%s14665_s0 + %s12747_s7]]   ;;  %s12751_s7 = smov 46  }
  0x4a   :  { %s13117_s27 = sld [smem:[%s14665_s0 + %s12749_s22]]   ;;  %s12753_s22 = smov 48  }
  0x4c   :  { %14717 = sst [smem:[#allocation185_spill]] %s13092_s17 }
  0x4d   :  { %s13112_s17 = sld [smem:[%s14665_s0 + %s12748_s15]]   ;;  %s12752_s15 = smov 47  }
  0x4e   :  { %14718 = sst [smem:[#allocation186_spill]] %s13102_s25 }
  0x4f   :  { %14719 = sst [smem:[#allocation187_spill]] %s13107_s6 }
  0x50   :  { %14720 = sst [smem:[#allocation188_spill]] %s13117_s27 }
  0x51   :  { %s13122_s25 = sld [smem:[%s14665_s0 + %s12750_s28]]   ;;  %s12754_s28 = smov 49  }
  0x52   :  { %s13127_s6 = sld [smem:[%s14665_s0 + %s12751_s7]]   ;;  %s12755_s7 = smov 50  }
  0x53   :  { %s13132_s30 = sld [smem:[%s14665_s0 + %s12752_s15]]   ;;  %s12756_s15 = smov 51  }
  0x54   :  { %s13137_s27 = sld [smem:[%s14665_s0 + %s12753_s22]]   ;;  %s12757_s22 = smov 52  }
  0x55   :  { %s13142_s29 = sld [smem:[%s14665_s0 + %s12754_s28]]   ;;  %s12758_s28 = smov 53  }
  0x56   :  { %s13152_s9 = sld [smem:[%s14665_s0 + %s12756_s15]]   ;;  %s12760_s15 = smov 55  }
  0x58   :  { %14721 = sst [smem:[#allocation189_spill]] %s13127_s6 }
  0x59   :  { %s13147_s6 = sld [smem:[%s14665_s0 + %s12755_s7]]   ;;  %s12759_s7 = smov 54  }
  0x5a   :  { %14722 = sst [smem:[#allocation190_spill]] %s13137_s27 }
  0x5b   :  { %14723 = sst [smem:[#allocation191_spill]] %s13142_s29 }
  0x5c   :  { %14725 = sst [smem:[#allocation193_spill]] %s13152_s9 }
  0x5d   :  { %s13157_s27 = sld [smem:[%s14665_s0 + %s12757_s22]]   ;;  %s12761_s22 = smov 56  }
  0x5e   :  { %s13162_s29 = sld [smem:[%s14665_s0 + %s12758_s28]]   ;;  %s12762_s28 = smov 57  }
  0x5f   :  { %14724 = sst [smem:[#allocation192_spill]] %s13147_s6 }
  0x60   :  { %s13167_s6 = sld [smem:[%s14665_s0 + %s12759_s7]]   ;;  %s12763_s7 = smov 58  }
  0x61   :  { %s13172_s9 = sld [smem:[%s14665_s0 + %s12760_s15]]   ;;  %s12764_s15 = smov 59  }
  0x63   :  { %14726 = sst [smem:[#allocation194_spill]] %s13157_s27 }
  0x64   :  { %14727 = sst [smem:[#allocation195_spill]] %s13162_s29 }
  0x65   :  { %s13177_s27 = sld [smem:[%s14665_s0 + %s12761_s22]]   ;;  %s12765_s22 = smov 60  }
  0x66   :  { %14728 = sst [smem:[#allocation196_spill]] %s13167_s6 }
  0x67   :  { %14729 = sst [smem:[#allocation197_spill]] %s13172_s9 }
  0x68   :  { %s13182_s29 = sld [smem:[%s14665_s0 + %s12762_s28]]   ;;  %s12766_s28 = smov 61  }
  0x69   :  { %s13187_s6 = sld [smem:[%s14665_s0 + %s12763_s7]]   ;;  %s12767_s7 = smov 62  }
  0x6a   :  { %s13192_s9 = sld [smem:[%s14665_s0 + %s12764_s15]]   ;;  %s12768_s15 = smov 63  }
  0x6b   :  { %14730 = sst [smem:[#allocation198_spill]] %s13177_s27 }
  0x6c   :  { %s13197_s27 = sld [smem:[%s14665_s0 + %s12765_s22]]   ;;  %s12769_s22 = smov 64  }
  0x6e   :  { %14731 = sst [smem:[#allocation199_spill]] %s13182_s29 }
  0x6f   :  { %14732 = sst [smem:[#allocation200_spill]] %s13187_s6 }
  0x70   :  { %14733 = sst [smem:[#allocation201_spill]] %s13192_s9 }
  0x71   :  { %s13202_s29 = sld [smem:[%s14665_s0 + %s12766_s28]]   ;;  %s12770_s28 = smov 65  }
  0x72   :  { %14734 = sst [smem:[#allocation202_spill]] %s13197_s27 }
  0x73   :  { %s13207_s6 = sld [smem:[%s14665_s0 + %s12767_s7]]   ;;  %s12771_s7 = smov 66  }
  0x74   :  { %s13212_s9 = sld [smem:[%s14665_s0 + %s12768_s15]]   ;;  %s12772_s15 = smov 67  }
  0x75   :  { %s13217_s27 = sld [smem:[%s14665_s0 + %s12769_s22]]   ;;  %s12773_s22 = smov 68  }
  0x77   :  { %14735 = sst [smem:[#allocation203_spill]] %s13202_s29 }
  0x78   :  { %s13222_s29 = sld [smem:[%s14665_s0 + %s12770_s28]]   ;;  %s12774_s28 = smov 69  }
  0x79   :  { %14736 = sst [smem:[#allocation204_spill]] %s13207_s6 }
  0x7a   :  { %14737 = sst [smem:[#allocation205_spill]] %s13212_s9 }
  0x7b   :  { %14738 = sst [smem:[#allocation206_spill]] %s13217_s27 }
  0x7c   :  { %s13227_s6 = sld [smem:[%s14665_s0 + %s12771_s7]]   ;;  %s12775_s7 = smov 70  }
  0x7d   :  { %s13232_s9 = sld [smem:[%s14665_s0 + %s12772_s15]]   ;;  %s12776_s15 = smov 71  }
  0x7e   :  { %14739 = sst [smem:[#allocation207_spill]] %s13222_s29 }
  0x7f   :  { %s13237_s27 = sld [smem:[%s14665_s0 + %s12773_s22]]   ;;  %s12777_s22 = smov 72  }
  0x80   :  { %s13242_s29 = sld [smem:[%s14665_s0 + %s12774_s28]]   ;;  %s12778_s28 = smov 73  }
  0x82   :  { %14740 = sst [smem:[#allocation208_spill]] %s13227_s6 }
  0x83   :  { %14741 = sst [smem:[#allocation209_spill]] %s13232_s9 }
  0x84   :  { %s13247_s6 = sld [smem:[%s14665_s0 + %s12775_s7]]   ;;  %s12779_s7 = smov 74  }
  0x85   :  { %14742 = sst [smem:[#allocation210_spill]] %s13237_s27 }
  0x86   :  { %14743 = sst [smem:[#allocation211_spill]] %s13242_s29 }
  0x87   :  { %s13252_s9 = sld [smem:[%s14665_s0 + %s12776_s15]]   ;;  %s12780_s15 = smov 75  }
  0x88   :  { %s13257_s27 = sld [smem:[%s14665_s0 + %s12777_s22]]   ;;  %s12781_s22 = smov 76  }
  0x89   :  { %s13262_s29 = sld [smem:[%s14665_s0 + %s12778_s28]]   ;;  %s12782_s28 = smov 77  }
  0x8a   :  { %14744 = sst [smem:[#allocation212_spill]] %s13247_s6 }
  0x8b   :  { %s13267_s6 = sld [smem:[%s14665_s0 + %s12779_s7]]   ;;  %s12783_s7 = smov 78  }
  0x8d   :  { %14745 = sst [smem:[#allocation213_spill]] %s13252_s9 }
  0x8e   :  { %14746 = sst [smem:[#allocation214_spill]] %s13257_s27 }
  0x8f   :  { %14747 = sst [smem:[#allocation215_spill]] %s13262_s29 }
  0x90   :  { %s13272_s9 = sld [smem:[%s14665_s0 + %s12780_s15]]   ;;  %s12784_s15 = smov 79  }
  0x91   :  { %14748 = sst [smem:[#allocation216_spill]] %s13267_s6 }
  0x92   :  { %s13277_s27 = sld [smem:[%s14665_s0 + %s12781_s22]]   ;;  %s12785_s22 = smov 80  }
  0x93   :  { %s13282_s29 = sld [smem:[%s14665_s0 + %s12782_s28]]   ;;  %s12786_s28 = smov 81  }
  0x94   :  { %s13287_s6 = sld [smem:[%s14665_s0 + %s12783_s7]]   ;;  %s12787_s7 = smov 82  }
  0x96   :  { %14749 = sst [smem:[#allocation217_spill]] %s13272_s9 }
  0x97   :  { %s13292_s9 = sld [smem:[%s14665_s0 + %s12784_s15]]   ;;  %s12788_s15 = smov 83  }
  0x98   :  { %14750 = sst [smem:[#allocation218_spill]] %s13277_s27 }
  0x99   :  { %14751 = sst [smem:[#allocation219_spill]] %s13282_s29 }
  0x9a   :  { %14752 = sst [smem:[#allocation220_spill]] %s13287_s6 }
  0x9b   :  { %s13297_s27 = sld [smem:[%s14665_s0 + %s12785_s22]]   ;;  %s12789_s22 = smov 84  }
  0x9c   :  { %s13302_s29 = sld [smem:[%s14665_s0 + %s12786_s28]]   ;;  %s12790_s28 = smov 85  }
  0x9d   :  { %14753 = sst [smem:[#allocation221_spill]] %s13292_s9 }
  0x9e   :  { %s13307_s6 = sld [smem:[%s14665_s0 + %s12787_s7]]   ;;  %s12791_s7 = smov 86  }
  0x9f   :  { %s13312_s9 = sld [smem:[%s14665_s0 + %s12788_s15]]   ;;  %s12792_s15 = smov 87  }
  0xa1   :  { %14754 = sst [smem:[#allocation222_spill]] %s13297_s27 }
  0xa2   :  { %14755 = sst [smem:[#allocation223_spill]] %s13302_s29 }
  0xa3   :  { %s13317_s27 = sld [smem:[%s14665_s0 + %s12789_s22]]   ;;  %s12793_s22 = smov 88  }
  0xa4   :  { %14756 = sst [smem:[#allocation224_spill]] %s13307_s6 }
  0xa5   :  { %14757 = sst [smem:[#allocation225_spill]] %s13312_s9 }
  0xa6   :  { %s13322_s29 = sld [smem:[%s14665_s0 + %s12790_s28]]   ;;  %s12794_s28 = smov 89  }
  0xa7   :  { %s13327_s6 = sld [smem:[%s14665_s0 + %s12791_s7]]   ;;  %s12795_s7 = smov 90  }
  0xa8   :  { %s13332_s9 = sld [smem:[%s14665_s0 + %s12792_s15]]   ;;  %s12796_s15 = smov 91  }
  0xa9   :  { %14758 = sst [smem:[#allocation226_spill]] %s13317_s27 }
  0xaa   :  { %s13337_s27 = sld [smem:[%s14665_s0 + %s12793_s22]]   ;;  %s12797_s22 = smov 92  }
  0xac   :  { %14759 = sst [smem:[#allocation227_spill]] %s13322_s29 }
  0xad   :  { %14760 = sst [smem:[#allocation228_spill]] %s13327_s6 }
  0xae   :  { %14761 = sst [smem:[#allocation229_spill]] %s13332_s9 }
  0xaf   :  { %s13342_s29 = sld [smem:[%s14665_s0 + %s12794_s28]]   ;;  %s12798_s28 = smov 93  }
  0xb0   :  { %14762 = sst [smem:[#allocation230_spill]] %s13337_s27 }
  0xb1   :  { %s13347_s6 = sld [smem:[%s14665_s0 + %s12795_s7]]   ;;  %s12799_s7 = smov 94  }
  0xb2   :  { %s13352_s9 = sld [smem:[%s14665_s0 + %s12796_s15]]   ;;  %s12800_s15 = smov 95  }
  0xb3   :  { %s13357_s27 = sld [smem:[%s14665_s0 + %s12797_s22]]   ;;  %s12801_s22 = smov 96  }
  0xb5   :  { %14763 = sst [smem:[#allocation231_spill]] %s13342_s29 }
  0xb6   :  { %s13362_s29 = sld [smem:[%s14665_s0 + %s12798_s28]]   ;;  %s12802_s28 = smov 97  }
  0xb7   :  { %14764 = sst [smem:[#allocation232_spill]] %s13347_s6 }
  0xb8   :  { %14765 = sst [smem:[#allocation233_spill]] %s13352_s9 }
  0xb9   :  { %14766 = sst [smem:[#allocation234_spill]] %s13357_s27 }
  0xba   :  { %s13367_s6 = sld [smem:[%s14665_s0 + %s12799_s7]]   ;;  %s12803_s7 = smov 98  }
  0xbb   :  { %s13372_s9 = sld [smem:[%s14665_s0 + %s12800_s15]]   ;;  %s12804_s15 = smov 99  }
  0xbc   :  { %14767 = sst [smem:[#allocation235_spill]] %s13362_s29 }
  0xbd   :  { %s13377_s27 = sld [smem:[%s14665_s0 + %s12801_s22]]   ;;  %s12805_s22 = smov 100  }
  0xbe   :  { %s13382_s29 = sld [smem:[%s14665_s0 + %s12802_s28]]   ;;  %s12806_s28 = smov 101  }
  0xc0   :  { %14768 = sst [smem:[#allocation236_spill]] %s13367_s6 }
  0xc1   :  { %14769 = sst [smem:[#allocation237_spill]] %s13372_s9 }
  0xc2   :  { %s13387_s6 = sld [smem:[%s14665_s0 + %s12803_s7]]   ;;  %s12807_s7 = smov 102  }
  0xc3   :  { %14770 = sst [smem:[#allocation238_spill]] %s13377_s27 }
  0xc4   :  { %14771 = sst [smem:[#allocation239_spill]] %s13382_s29 }
  0xc5   :  { %s13392_s9 = sld [smem:[%s14665_s0 + %s12804_s15]]   ;;  %s12808_s15 = smov 103  }
  0xc6   :  { %s13397_s27 = sld [smem:[%s14665_s0 + %s12805_s22]]  }
  0xc7   :  { %s13402_s29 = sld [smem:[%s14665_s0 + %s12806_s28]]  }
  0xc8   :  { %14772 = sst [smem:[#allocation240_spill]] %s13387_s6 }
  0xc9   :  { %s13407_s6 = sld [smem:[%s14665_s0 + %s12807_s7]]  }
  0xcb   :  { %14773 = sst [smem:[#allocation241_spill]] %s13392_s9 }
  0xcc   :  { %s13412_s9 = sld [smem:[%s14665_s0 + %s12808_s15]]  }
  0xcd   :  { %212 = vsyncpa [#allocation5], 0 }
  0xce   :  { %213 = vsyncpa [#allocation4], 0 }
  0xcf   :  { %214 = vsyncpa [#allocation8], 0 }
  0xd0   :  { %215 = vsyncpa [#allocation11], 0 }
  0xd1   :  { %216 = vsyncpa [#allocation14], 0 }
  0xd2   :  { %217 = vsyncpa [#allocation17], 0 }
  0xd3   :  { %218 = vsyncpa [#allocation20], 0 }
  0xd4   :  { %219 = vsyncpa [#allocation23], 0 }
  0xd5   :  { %220 = vsyncpa [#allocation26], 0 }
  0xd6   :  { %221 = vsyncpa [#allocation29], 0 }
  0xd7   :  { %222 = vsyncpa [#allocation32], 0 }
  0xd8   :  { %223 = vsyncpa [#allocation35], 0 }
  0xd9   :  { %224 = vsyncpa [#allocation38], 0 }
  0xda   :  { %225 = vsyncpa [#allocation41], 0 }
  0xdb   :  { %226 = vsyncpa [#allocation44], 0 }
  0xdc   :  { %227 = vsyncpa [#allocation47], 0 }
  0xdd   :  { %228 = vsyncpa [#allocation50], 0 }
  0xde   :  { %229 = vsyncpa [#allocation53], 0 }
  0xdf   :  { %230 = vsyncpa [#allocation56], 0 }
  0xe0   :  { %231 = vsyncpa [#allocation59], 0 }
  0xe1   :  { %232 = vsyncpa [#allocation62], 0 }
  0xe2   :  { %233 = vsyncpa [#allocation65], 0 }
  0xe3   :  { %234 = vsyncpa [#allocation68], 0 }
  0xe4   :  { %235 = vsyncpa [#allocation71], 0 }
  0xe5   :  { %236 = vsyncpa [#allocation74], 0 }
  0xe6   :  { %237 = vsyncpa [#allocation77], 0 }
  0xe7   :  { %238 = vsyncpa [#allocation80], 0 }
  0xe8   :  { %239 = vsyncpa [#allocation83], 0 }
  0xe9   :  { %240 = vsyncpa [#allocation86], 0 }
  0xea   :  { %241 = vsyncpa [#allocation89], 0 }
  0xeb   :  { %242 = vsyncpa [#allocation92], 0 }
  0xec   :  { %243 = vsyncpa [#allocation95], 0 }
  0xed   :  { %244 = vsyncpa [#allocation98], 0 }
  0xee   :  { %245 = vsyncpa [#allocation101], 0 }
  0xef   :  { %246 = vsyncpa [#allocation104], 0 }
  0xf0   :  { %247 = vsyncpa [#allocation107], 0 }
  0xf1   :  { %248 = vsyncpa [#allocation110], 0 }
  0xf2   :  { %249 = vsyncpa [#allocation113], 0 }
  0xf3   :  { %250 = vsyncpa [#allocation116], 0  ;;  %s12809_s0 = smov [#allocation7]   ;;  %s12810_s23 = smov [#allocation10]  }
  0xf4   :  { %s287_s22 = sshll.u32 %s12809_s0, 4  ;;  %s317_s26 = sshll.u32 %s12810_s23, 4  ;;  %s288_s22 = int_to_ptr.vmem [resolvable:$true] %s287_s22  ;;  %s318_s26 = int_to_ptr.vmem [resolvable:$true] %s317_s26 }
  0xf5   :  { %s11144_s28 = scalar_lea.vmem %s288_s22, 16  ;;  %s11148_s1 = scalar_lea.vmem %s288_s22, 32 }
  0xf6   :  { %p11145_p0 = scmp.ne.s32.totalorder %s288_s22, %s11144_s28  ;;  %p11149_p1 = scmp.lt.s32.totalorder %s288_s22, %s288_s22 }
  0xf7   :  { %p11150_p2 = scmp.lt.s32.totalorder %s11148_s1, %s11144_s28 }
  0xf9   :  { %p11151_p3 = por %p11150_p2, %p11149_p1 }
  0xfb   :  { %p11152_p4 = pnand %p11151_p3, %p11145_p0 }
  0xfd   :  { %11155 = shalt.err (!%p11152_p4)
}
  0xfe   :  { %290 = dma.hbm_to_vmem [thread:$0]  %s12932_s3, 16, %s288_s22, [#allocation8]  }
  0xff   :  { %s11164_s2 = scalar_lea.vmem %s318_s26, 16  ;;  %s11168_s7 = scalar_lea.vmem %s318_s26, 32 }
 0x100   :  { %p11165_p5 = scmp.ne.s32.totalorder %s318_s26, %s11164_s2  ;;  %p11169_p6 = scmp.lt.s32.totalorder %s318_s26, %s318_s26 }
 0x101   :  { %p11170_p7 = scmp.lt.s32.totalorder %s11168_s7, %s11164_s2 }
 0x103   :  { %p11171_p8 = por %p11170_p7, %p11169_p6 }
 0x105   :  { %p11172_p9 = pnand %p11171_p8, %p11165_p5 }
 0x107   :  { %11175 = shalt.err (!%p11172_p9)
}
 0x108   :  { %320 = dma.hbm_to_vmem [thread:$0]  %s12967_s12, 16, %s318_s26, [#allocation11]  }
 0x109   :  { %s12811_s10 = smov [#allocation13]   ;;  %s12812_s15 = smov [#allocation16]  }
 0x10a   :  { %s339_s11 = sshll.u32 %s12811_s10, 4  ;;  %s359_s16 = sshll.u32 %s12812_s15, 4  ;;  %s340_s11 = int_to_ptr.vmem [resolvable:$true] %s339_s11  ;;  %s360_s16 = int_to_ptr.vmem [resolvable:$true] %s359_s16 }
 0x10b   :  { %s11184_s18 = scalar_lea.vmem %s340_s11, 16  ;;  %s11188_s0 = scalar_lea.vmem %s340_s11, 32 }
 0x10c   :  { %p11185_p10 = scmp.ne.s32.totalorder %s340_s11, %s11184_s18  ;;  %p11189_p11 = scmp.lt.s32.totalorder %s340_s11, %s340_s11 }
 0x10d   :  { %p11190_p12 = scmp.lt.s32.totalorder %s11188_s0, %s11184_s18 }
 0x10f   :  { %p11191_p13 = por %p11190_p12, %p11189_p11 }
 0x111   :  { %p11192_p0 = pnand %p11191_p13, %p11185_p10 }
 0x113   :  { %11195 = shalt.err (!%p11192_p0)
}
 0x114   :  { %342 = dma.hbm_to_vmem [thread:$0]  %s12982_s4, 16, %s340_s11, [#allocation14]  }
 0x115   :  { %s11204_s3 = scalar_lea.vmem %s360_s16, 16  ;;  %s11208_s22 = scalar_lea.vmem %s360_s16, 32 }
 0x116   :  { %p11205_p1 = scmp.ne.s32.totalorder %s360_s16, %s11204_s3  ;;  %p11209_p2 = scmp.lt.s32.totalorder %s360_s16, %s360_s16 }
 0x117   :  { %p11210_p3 = scmp.lt.s32.totalorder %s11208_s22, %s11204_s3 }
 0x119   :  { %p11211_p4 = por %p11210_p3, %p11209_p2 }
 0x11b   :  { %p11212_p5 = pnand %p11211_p4, %p11205_p1 }
 0x11d   :  { %11215 = shalt.err (!%p11212_p5)
}
 0x11e   :  { %362 = dma.hbm_to_vmem [thread:$0]  %s12992_s20, 16, %s360_s16, [#allocation17]  }
 0x11f   :  { %s12813_s12 = smov [#allocation19]   ;;  %s12814_s26 = smov [#allocation22]  }
 0x120   :  { %s379_s23 = sshll.u32 %s12813_s12, 4  ;;  %s399_s28 = sshll.u32 %s12814_s26, 4  ;;  %s380_s23 = int_to_ptr.vmem [resolvable:$true] %s379_s23  ;;  %s400_s28 = int_to_ptr.vmem [resolvable:$true] %s399_s28 }
 0x121   :  { %s11224_s1 = scalar_lea.vmem %s380_s23, 16  ;;  %s11228_s2 = scalar_lea.vmem %s380_s23, 32 }
 0x122   :  { %p11225_p6 = scmp.ne.s32.totalorder %s380_s23, %s11224_s1  ;;  %p11229_p7 = scmp.lt.s32.totalorder %s380_s23, %s380_s23 }
 0x123   :  { %p11230_p8 = scmp.lt.s32.totalorder %s11228_s2, %s11224_s1 }
 0x125   :  { %p11231_p9 = por %p11230_p8, %p11229_p7 }
 0x127   :  { %p11232_p10 = pnand %p11231_p9, %p11225_p6 }
 0x129   :  { %11235 = shalt.err (!%p11232_p10)
}
 0x12a   :  { %382 = dma.hbm_to_vmem [thread:$0]  %s13002_s14, 16, %s380_s23, [#allocation20]  }
 0x12b   :  { %s11244_s4 = scalar_lea.vmem %s400_s28, 16  ;;  %s11248_s7 = scalar_lea.vmem %s400_s28, 32 }
 0x12c   :  { %p11245_p11 = scmp.ne.s32.totalorder %s400_s28, %s11244_s4  ;;  %p11249_p12 = scmp.lt.s32.totalorder %s400_s28, %s400_s28 }
 0x12d   :  { %p11250_p13 = scmp.lt.s32.totalorder %s11248_s7, %s11244_s4 }
 0x12f   :  { %p11251_p0 = por %p11250_p13, %p11249_p12 }
 0x131   :  { %p11252_p1 = pnand %p11251_p0, %p11245_p11 }
 0x133   :  { %11255 = shalt.err (!%p11252_p1)
}
 0x134   :  { %402 = dma.hbm_to_vmem [thread:$0]  %s13012_s21, 16, %s400_s28, [#allocation23]  }
 0x135   :  { %s12815_s20 = smov [#allocation25]   ;;  %s12816_s11 = smov [#allocation28]  }
 0x136   :  { %s419_s10 = sshll.u32 %s12815_s20, 4  ;;  %s447_s15 = sshll.u32 %s12816_s11, 4  ;;  %s420_s10 = int_to_ptr.vmem [resolvable:$true] %s419_s10  ;;  %s448_s15 = int_to_ptr.vmem [resolvable:$true] %s447_s15 }
 0x137   :  { %s11264_s16 = scalar_lea.vmem %s420_s10, 16  ;;  %s11268_s18 = scalar_lea.vmem %s420_s10, 32 }
 0x138   :  { %p11265_p2 = scmp.ne.s32.totalorder %s420_s10, %s11264_s16  ;;  %p11269_p3 = scmp.lt.s32.totalorder %s420_s10, %s420_s10 }
 0x139   :  { %p11270_p4 = scmp.lt.s32.totalorder %s11268_s18, %s11264_s16 }
 0x13b   :  { %p11271_p5 = por %p11270_p4, %p11269_p3 }
 0x13d   :  { %p11272_p6 = pnand %p11271_p5, %p11265_p2 }
 0x13f   :  { %11275 = shalt.err (!%p11272_p6)
}
 0x140   :  { %422 = dma.hbm_to_vmem [thread:$0]  %s13022_s8, 16, %s420_s10, [#allocation26]  }
 0x141   :  { %s11284_s14 = scalar_lea.vmem %s448_s15, 16  ;;  %s11288_s0 = scalar_lea.vmem %s448_s15, 32 }
 0x142   :  { %p11285_p7 = scmp.ne.s32.totalorder %s448_s15, %s11284_s14  ;;  %p11289_p8 = scmp.lt.s32.totalorder %s448_s15, %s448_s15 }
 0x143   :  { %p11290_p9 = scmp.lt.s32.totalorder %s11288_s0, %s11284_s14 }
 0x145   :  { %p11291_p10 = por %p11290_p9, %p11289_p8 }
 0x147   :  { %p11292_p11 = pnand %p11291_p10, %p11285_p7 }
 0x149   :  { %11295 = shalt.err (!%p11292_p11)
}
 0x14a   :  { %450 = dma.hbm_to_vmem [thread:$0]  %s13052_s5, 16, %s448_s15, [#allocation29]  }
 0x14b   :  { %s12817_s21 = smov [#allocation31]   ;;  %s12818_s22 = smov [#allocation34]  }
 0x14c   :  { %s467_s3 = sshll.u32 %s12817_s21, 4  ;;  %s495_s12 = sshll.u32 %s12818_s22, 4  ;;  %s468_s3 = int_to_ptr.vmem [resolvable:$true] %s467_s3  ;;  %s496_s12 = int_to_ptr.vmem [resolvable:$true] %s495_s12 }
 0x14d   :  { %s11304_s23 = scalar_lea.vmem %s468_s3, 16  ;;  %s11308_s26 = scalar_lea.vmem %s468_s3, 32 }
 0x14e   :  { %p11305_p12 = scmp.ne.s32.totalorder %s468_s3, %s11304_s23  ;;  %p11309_p13 = scmp.lt.s32.totalorder %s468_s3, %s468_s3 }
 0x14f   :  { %p11310_p0 = scmp.lt.s32.totalorder %s11308_s26, %s11304_s23 }
 0x151   :  { %p11311_p1 = por %p11310_p0, %p11309_p13 }
 0x153   :  { %p11312_p2 = pnand %p11311_p1, %p11305_p12 }
 0x155   :  { %11315 = shalt.err (!%p11312_p2)
}
 0x156   :  { %470 = dma.hbm_to_vmem [thread:$0]  %s13062_s24, 16, %s468_s3, [#allocation32]  }
 0x157   :  { %s11324_s8 = scalar_lea.vmem %s496_s12, 16  ;;  %s11328_s28 = scalar_lea.vmem %s496_s12, 32 }
 0x158   :  { %p11325_p3 = scmp.ne.s32.totalorder %s496_s12, %s11324_s8  ;;  %p11329_p4 = scmp.lt.s32.totalorder %s496_s12, %s496_s12 }
 0x159   :  { %p11330_p5 = scmp.lt.s32.totalorder %s11328_s28, %s11324_s8 }
 0x15b   :  { %p11331_p6 = por %p11330_p5, %p11329_p4 }
 0x15d   :  { %p11332_p7 = pnand %p11331_p6, %p11325_p3 }
 0x15f   :  { %11335 = shalt.err (!%p11332_p7)
}
 0x160   :  { %498 = dma.hbm_to_vmem [thread:$0]  %s13087_s19, 16, %s496_s12, [#allocation35]  }
 0x161   :  { %s12819_s5 = smov [#allocation37]   ;;  %s12820_s2 = smov [#allocation40]  }
 0x162   :  { %s517_s1 = sshll.u32 %s12819_s5, 4  ;;  %s539_s4 = sshll.u32 %s12820_s2, 4  ;;  %s518_s1 = int_to_ptr.vmem [resolvable:$true] %s517_s1  ;;  %s540_s4 = int_to_ptr.vmem [resolvable:$true] %s539_s4 }
 0x163   :  { %s11344_s7 = scalar_lea.vmem %s518_s1, 16  ;;  %s11348_s20 = scalar_lea.vmem %s518_s1, 32 }
 0x164   :  { %p11345_p8 = scmp.ne.s32.totalorder %s518_s1, %s11344_s7  ;;  %p11349_p9 = scmp.lt.s32.totalorder %s518_s1, %s518_s1 }
 0x165   :  { %p11350_p10 = scmp.lt.s32.totalorder %s11348_s20, %s11344_s7 }
 0x167   :  { %p11351_p11 = por %p11350_p10, %p11349_p9 }
 0x169   :  { %p11352_p12 = pnand %p11351_p11, %p11345_p8 }
 0x16b   :  { %11355 = shalt.err (!%p11352_p12)
}
 0x16c   :  { %520 = dma.hbm_to_vmem [thread:$0]  %s13097_s13, 16, %s518_s1, [#allocation38]  }
 0x16d   :  { %s11364_s24 = scalar_lea.vmem %s540_s4, 16  ;;  %s11368_s10 = scalar_lea.vmem %s540_s4, 32 }
 0x16e   :  { %p11365_p13 = scmp.ne.s32.totalorder %s540_s4, %s11364_s24  ;;  %p11369_p0 = scmp.lt.s32.totalorder %s540_s4, %s540_s4 }
 0x16f   :  { %p11370_p1 = scmp.lt.s32.totalorder %s11368_s10, %s11364_s24 }
 0x171   :  { %p11371_p2 = por %p11370_p1, %p11369_p0 }
 0x173   :  { %p11372_p3 = pnand %p11371_p2, %p11365_p13 }
 0x175   :  { %11375 = shalt.err (!%p11372_p3)
}
 0x176   :  { %542 = dma.hbm_to_vmem [thread:$0]  %s13112_s17, 16, %s540_s4, [#allocation41]  }
 0x177   :  { %s12821_s19 = smov [#allocation43]   ;;  %s12822_s15 = smov [#allocation46]  }
 0x178   :  { %s559_s11 = sshll.u32 %s12821_s19, 4  ;;  %s579_s16 = sshll.u32 %s12822_s15, 4  ;;  %s560_s11 = int_to_ptr.vmem [resolvable:$true] %s559_s11  ;;  %s580_s16 = int_to_ptr.vmem [resolvable:$true] %s579_s16 }
 0x179   :  { %s11384_s18 = scalar_lea.vmem %s560_s11, 16  ;;  %s11388_s14 = scalar_lea.vmem %s560_s11, 32 }
 0x17a   :  { %p11385_p4 = scmp.ne.s32.totalorder %s560_s11, %s11384_s18  ;;  %p11389_p5 = scmp.lt.s32.totalorder %s560_s11, %s560_s11 }
 0x17b   :  { %p11390_p6 = scmp.lt.s32.totalorder %s11388_s14, %s11384_s18 }
 0x17d   :  { %p11391_p7 = por %p11390_p6, %p11389_p5 }
 0x17f   :  { %p11392_p8 = pnand %p11391_p7, %p11385_p4 }
 0x181   :  { %11395 = shalt.err (!%p11392_p8)
}
 0x182   :  { %562 = dma.hbm_to_vmem [thread:$0]  %s13122_s25, 16, %s560_s11, [#allocation44]  }
 0x183   :  { %s11404_s13 = scalar_lea.vmem %s580_s16, 16  ;;  %s11408_s0 = scalar_lea.vmem %s580_s16, 32 }
 0x184   :  { %p11405_p9 = scmp.ne.s32.totalorder %s580_s16, %s11404_s13  ;;  %p11409_p10 = scmp.lt.s32.totalorder %s580_s16, %s580_s16 }
 0x185   :  { %p11410_p11 = scmp.lt.s32.totalorder %s11408_s0, %s11404_s13 }
 0x187   :  { %p11411_p12 = por %p11410_p11, %p11409_p10 }
 0x189   :  { %p11412_p13 = pnand %p11411_p12, %p11405_p9 }
 0x18b   :  { %11415 = shalt.err (!%p11412_p13)
}
 0x18c   :  { %582 = dma.hbm_to_vmem [thread:$0]  %s13132_s30, 16, %s580_s16, [#allocation47]  }
 0x18d   :  { %s12823_s17 = smov [#allocation49]   ;;  %s12824_s3 = smov [#allocation52]  }
 0x18e   :  { %s599_s21 = sshll.u32 %s12823_s17, 4  ;;  %s619_s22 = sshll.u32 %s12824_s3, 4  ;;  %s600_s21 = int_to_ptr.vmem [resolvable:$true] %s599_s21  ;;  %s620_s22 = int_to_ptr.vmem [resolvable:$true] %s619_s22 }
 0x18f   :  { %s11424_s12 = scalar_lea.vmem %s600_s21, 16  ;;  %s11428_s23 = scalar_lea.vmem %s600_s21, 32 }
 0x190   :  { %p11425_p0 = scmp.ne.s32.totalorder %s600_s21, %s11424_s12  ;;  %p11429_p1 = scmp.lt.s32.totalorder %s600_s21, %s600_s21 }
 0x191   :  { %p11430_p2 = scmp.lt.s32.totalorder %s11428_s23, %s11424_s12 }
 0x193   :  { %p11431_p3 = por %p11430_p2, %p11429_p1 }
 0x195   :  { %p11432_p4 = pnand %p11431_p3, %p11425_p0 }
 0x197   :  { %11435 = shalt.err (!%p11432_p4)
}
 0x198   :  { %s14774_s25 = sld [smem:[#allocation191_spill]]  ;;  %s11444_s26 = scalar_lea.vmem %s620_s22, 16 }
 0x199   :  { %p11445_p5 = scmp.ne.s32.totalorder %s620_s22, %s11444_s26  ;;  %s11448_s8 = scalar_lea.vmem %s620_s22, 32 }
 0x19a   :  { %p11449_p6 = scmp.lt.s32.totalorder %s620_s22, %s620_s22  ;;  %p11450_p7 = scmp.lt.s32.totalorder %s11448_s8, %s11444_s26 }
 0x19c   :  { %p11451_p8 = por %p11450_p7, %p11449_p6 }
 0x19e   :  { %602 = dma.hbm_to_vmem [thread:$0]  %s14774_s25, 16, %s600_s21, [#allocation50]  }
 0x19f   :  { %p11452_p9 = pnand %p11451_p8, %p11445_p5 }
 0x1a1   :  { %11455 = shalt.err (!%p11452_p9)
}
 0x1a2   :  { %s14775_s30 = sld [smem:[#allocation193_spill]]  ;;  %s12825_s28 = smov [#allocation55]  }
 0x1a3   :  { %s642_s5 = sshll.u32 %s12825_s28, 4  ;;  %s12826_s1 = smov [#allocation58]   ;;  %s643_s5 = int_to_ptr.vmem [resolvable:$true] %s642_s5 }
 0x1a4   :  { %s669_s2 = sshll.u32 %s12826_s1, 4  ;;  %s11464_s4 = scalar_lea.vmem %s643_s5, 512  ;;  %s670_s2 = int_to_ptr.vmem [resolvable:$true] %s669_s2 }
 0x1a5   :  { %p11465_p10 = scmp.ne.s32.totalorder %s643_s5, %s11464_s4  ;;  %p11469_p11 = scmp.lt.s32.totalorder %s643_s5, %s643_s5 }
 0x1a6   :  { %p11470_p12 = scmp.lt.s32.totalorder %s11464_s4, %s11464_s4 }
 0x1a8   :  { %622 = dma.hbm_to_vmem [thread:$0]  %s14775_s30, 16, %s620_s22, [#allocation53]  }
 0x1a9   :  { %p11471_p13 = por %p11470_p12, %p11469_p11 }
 0x1ab   :  { %p11472_p0 = pnand %p11471_p13, %p11465_p10 }
 0x1ad   :  { %11475 = shalt.err (!%p11472_p0)
}
 0x1ae   :  { %s12827_s7 = smov 128   ;;  %s14776_s20 = sld [smem:[#allocation196_spill]] }
 0x1af   :  { %s12828_s24 = smov 8   ;;  %s11484_s10 = scalar_lea.vmem %s670_s2, 16 }
 0x1b0   :  { %p11485_p1 = scmp.ne.s32.totalorder %s670_s2, %s11484_s10  ;;  %s11488_s19 = scalar_lea.vmem %s670_s2, 32 }
 0x1b1   :  { %p11489_p2 = scmp.lt.s32.totalorder %s670_s2, %s670_s2  ;;  %p11490_p3 = scmp.lt.s32.totalorder %s11488_s19, %s11484_s10 }
 0x1b3   :  { %p11491_p4 = por %p11490_p3, %p11489_p2 }
 0x1b4   :  { %648 = dma.hbm_to_vmem [thread:$0]  %s14776_s20, 512, %s643_s5, [#allocation56], %s12827_s7, %s12827_s7, %s12828_s24  }
 0x1b5   :  { %p11492_p5 = pnand %p11491_p4, %p11485_p1 }
 0x1b7   :  { %11495 = shalt.err (!%p11492_p5)
}
 0x1b8   :  { %s14777_s11 = sld [smem:[#allocation199_spill]]  ;;  %s12829_s15 = smov [#allocation61]  }
 0x1b9   :  { %s689_s16 = sshll.u32 %s12829_s15, 4  ;;  %s12830_s18 = smov [#allocation64]   ;;  %s690_s16 = int_to_ptr.vmem [resolvable:$true] %s689_s16 }
 0x1ba   :  { %s711_s14 = sshll.u32 %s12830_s18, 4  ;;  %s11504_s13 = scalar_lea.vmem %s690_s16, 16  ;;  %s712_s14 = int_to_ptr.vmem [resolvable:$true] %s711_s14 }
 0x1bb   :  { %p11505_p6 = scmp.ne.s32.totalorder %s690_s16, %s11504_s13  ;;  %s11508_s0 = scalar_lea.vmem %s690_s16, 32 }
 0x1bc   :  { %p11509_p7 = scmp.lt.s32.totalorder %s690_s16, %s690_s16  ;;  %p11510_p8 = scmp.lt.s32.totalorder %s11508_s0, %s11504_s13 }
 0x1be   :  { %672 = dma.hbm_to_vmem [thread:$0]  %s14777_s11, 16, %s670_s2, [#allocation59]  }
 0x1bf   :  { %p11511_p9 = por %p11510_p8, %p11509_p7 }
 0x1c1   :  { %p11512_p10 = pnand %p11511_p9, %p11505_p6 }
 0x1c3   :  { %11515 = shalt.err (!%p11512_p10)
}
 0x1c4   :  { %s14778_s17 = sld [smem:[#allocation201_spill]]  ;;  %s11524_s21 = scalar_lea.vmem %s712_s14, 16 }
 0x1c5   :  { %p11525_p11 = scmp.ne.s32.totalorder %s712_s14, %s11524_s21  ;;  %s11528_s3 = scalar_lea.vmem %s712_s14, 32 }
 0x1c6   :  { %p11529_p12 = scmp.lt.s32.totalorder %s712_s14, %s712_s14  ;;  %p11530_p13 = scmp.lt.s32.totalorder %s11528_s3, %s11524_s21 }
 0x1c8   :  { %p11531_p0 = por %p11530_p13, %p11529_p12 }
 0x1ca   :  { %692 = dma.hbm_to_vmem [thread:$0]  %s14778_s17, 16, %s690_s16, [#allocation62]  }
 0x1cb   :  { %p11532_p1 = pnand %p11531_p0, %p11525_p11 }
 0x1cd   :  { %11535 = shalt.err (!%p11532_p1)
}
 0x1ce   :  { %s14779_s22 = sld [smem:[#allocation203_spill]]  ;;  %s12831_s12 = smov [#allocation67]  }
 0x1cf   :  { %s733_s23 = sshll.u32 %s12831_s12, 4  ;;  %s12832_s25 = smov [#allocation70]   ;;  %s734_s23 = int_to_ptr.vmem [resolvable:$true] %s733_s23 }
 0x1d0   :  { %s753_s26 = sshll.u32 %s12832_s25, 4  ;;  %s11544_s8 = scalar_lea.vmem %s734_s23, 16  ;;  %s754_s26 = int_to_ptr.vmem [resolvable:$true] %s753_s26 }
 0x1d1   :  { %p11545_p2 = scmp.ne.s32.totalorder %s734_s23, %s11544_s8  ;;  %s11548_s30 = scalar_lea.vmem %s734_s23, 32 }
 0x1d2   :  { %p11549_p3 = scmp.lt.s32.totalorder %s734_s23, %s734_s23  ;;  %p11550_p4 = scmp.lt.s32.totalorder %s11548_s30, %s11544_s8 }
 0x1d4   :  { %714 = dma.hbm_to_vmem [thread:$0]  %s14779_s22, 16, %s712_s14, [#allocation65]  }
 0x1d5   :  { %p11551_p5 = por %p11550_p4, %p11549_p3 }
 0x1d7   :  { %p11552_p6 = pnand %p11551_p5, %p11545_p2 }
 0x1d9   :  { %11555 = shalt.err (!%p11552_p6)
}
 0x1da   :  { %s14780_s28 = sld [smem:[#allocation206_spill]]  ;;  %s11564_s5 = scalar_lea.vmem %s754_s26, 16 }
 0x1db   :  { %p11565_p7 = scmp.ne.s32.totalorder %s754_s26, %s11564_s5  ;;  %s11568_s1 = scalar_lea.vmem %s754_s26, 32 }
 0x1dc   :  { %p11569_p8 = scmp.lt.s32.totalorder %s754_s26, %s754_s26  ;;  %p11570_p9 = scmp.lt.s32.totalorder %s11568_s1, %s11564_s5 }
 0x1de   :  { %p11571_p10 = por %p11570_p9, %p11569_p8 }
 0x1e0   :  { %736 = dma.hbm_to_vmem [thread:$0]  %s14780_s28, 16, %s734_s23, [#allocation68]  }
 0x1e1   :  { %p11572_p11 = pnand %p11571_p10, %p11565_p7 }
 0x1e3   :  { %11575 = shalt.err (!%p11572_p11)
}
 0x1e4   :  { %s14781_s2 = sld [smem:[#allocation208_spill]]  ;;  %s12833_s4 = smov [#allocation73]  }
 0x1e5   :  { %s773_s20 = sshll.u32 %s12833_s4, 4  ;;  %s12834_s10 = smov [#allocation76]   ;;  %s774_s20 = int_to_ptr.vmem [resolvable:$true] %s773_s20 }
 0x1e6   :  { %s793_s19 = sshll.u32 %s12834_s10, 4  ;;  %s11584_s11 = scalar_lea.vmem %s774_s20, 16  ;;  %s794_s19 = int_to_ptr.vmem [resolvable:$true] %s793_s19 }
 0x1e7   :  { %p11585_p12 = scmp.ne.s32.totalorder %s774_s20, %s11584_s11  ;;  %s11588_s15 = scalar_lea.vmem %s774_s20, 32 }
 0x1e8   :  { %p11589_p13 = scmp.lt.s32.totalorder %s774_s20, %s774_s20  ;;  %p11590_p0 = scmp.lt.s32.totalorder %s11588_s15, %s11584_s11 }
 0x1ea   :  { %756 = dma.hbm_to_vmem [thread:$0]  %s14781_s2, 16, %s754_s26, [#allocation71]  }
 0x1eb   :  { %p11591_p1 = por %p11590_p0, %p11589_p13 }
 0x1ed   :  { %p11592_p2 = pnand %p11591_p1, %p11585_p12 }
 0x1ef   :  { %11595 = shalt.err (!%p11592_p2)
}
 0x1f0   :  { %s14782_s16 = sld [smem:[#allocation210_spill]]  ;;  %s11604_s18 = scalar_lea.vmem %s794_s19, 16 }
 0x1f1   :  { %p11605_p3 = scmp.ne.s32.totalorder %s794_s19, %s11604_s18  ;;  %s11608_s14 = scalar_lea.vmem %s794_s19, 32 }
 0x1f2   :  { %p11609_p4 = scmp.lt.s32.totalorder %s794_s19, %s794_s19  ;;  %p11610_p5 = scmp.lt.s32.totalorder %s11608_s14, %s11604_s18 }
 0x1f4   :  { %p11611_p6 = por %p11610_p5, %p11609_p4 }
 0x1f6   :  { %776 = dma.hbm_to_vmem [thread:$0]  %s14782_s16, 16, %s774_s20, [#allocation74]  }
 0x1f7   :  { %p11612_p7 = pnand %p11611_p6, %p11605_p3 }
 0x1f9   :  { %11615 = shalt.err (!%p11612_p7)
}
 0x1fa   :  { %s14783_s13 = sld [smem:[#allocation212_spill]]  ;;  %s12835_s0 = smov [#allocation79]  }
 0x1fb   :  { %s816_s17 = sshll.u32 %s12835_s0, 4  ;;  %s12836_s21 = smov [#allocation82]   ;;  %s817_s17 = int_to_ptr.vmem [resolvable:$true] %s816_s17 }
 0x1fc   :  { %s841_s3 = sshll.u32 %s12836_s21, 4  ;;  %s11624_s22 = scalar_lea.vmem %s817_s17, 512  ;;  %s842_s3 = int_to_ptr.vmem [resolvable:$true] %s841_s3 }
 0x1fd   :  { %p11625_p8 = scmp.ne.s32.totalorder %s817_s17, %s11624_s22  ;;  %p11629_p9 = scmp.lt.s32.totalorder %s817_s17, %s817_s17 }
 0x1fe   :  { %p11630_p10 = scmp.lt.s32.totalorder %s11624_s22, %s11624_s22 }
 0x200   :  { %796 = dma.hbm_to_vmem [thread:$0]  %s14783_s13, 16, %s794_s19, [#allocation77]  }
 0x201   :  { %p11631_p11 = por %p11630_p10, %p11629_p9 }
 0x203   :  { %p11632_p12 = pnand %p11631_p11, %p11625_p8 }
 0x205   :  { %11635 = shalt.err (!%p11632_p12)
}
 0x206   :  { %s14784_s12 = sld [smem:[#allocation215_spill]]  ;;  %s11644_s23 = scalar_lea.vmem %s842_s3, 16 }
 0x207   :  { %p11645_p13 = scmp.ne.s32.totalorder %s842_s3, %s11644_s23  ;;  %s11648_s25 = scalar_lea.vmem %s842_s3, 32 }
 0x208   :  { %p11649_p0 = scmp.lt.s32.totalorder %s842_s3, %s842_s3  ;;  %p11650_p1 = scmp.lt.s32.totalorder %s11648_s25, %s11644_s23 }
 0x20a   :  { %p11651_p2 = por %p11650_p1, %p11649_p0 }
 0x20c   :  { %822 = dma.hbm_to_vmem [thread:$0]  %s14784_s12, 512, %s817_s17, [#allocation80], %s12827_s7, %s12827_s7, %s12828_s24  }
 0x20d   :  { %p11652_p3 = pnand %p11651_p2, %p11645_p13 }
 0x20f   :  { %11655 = shalt.err (!%p11652_p3)
}
 0x210   :  { %s14785_s26 = sld [smem:[#allocation217_spill]]  ;;  %s12837_s8 = smov [#allocation85]  }
 0x211   :  { %s863_s30 = sshll.u32 %s12837_s8, 4  ;;  %s12838_s28 = smov [#allocation88]   ;;  %s864_s30 = int_to_ptr.vmem [resolvable:$true] %s863_s30 }
 0x212   :  { %s885_s5 = sshll.u32 %s12838_s28, 4  ;;  %s11664_s1 = scalar_lea.vmem %s864_s30, 16  ;;  %s886_s5 = int_to_ptr.vmem [resolvable:$true] %s885_s5 }
 0x213   :  { %p11665_p4 = scmp.ne.s32.totalorder %s864_s30, %s11664_s1  ;;  %s11668_s2 = scalar_lea.vmem %s864_s30, 32 }
 0x214   :  { %p11669_p5 = scmp.lt.s32.totalorder %s864_s30, %s864_s30  ;;  %p11670_p6 = scmp.lt.s32.totalorder %s11668_s2, %s11664_s1 }
 0x216   :  { %844 = dma.hbm_to_vmem [thread:$0]  %s14785_s26, 16, %s842_s3, [#allocation83]  }
 0x217   :  { %p11671_p7 = por %p11670_p6, %p11669_p5 }
 0x219   :  { %p11672_p8 = pnand %p11671_p7, %p11665_p4 }
 0x21b   :  { %11675 = shalt.err (!%p11672_p8)
}
 0x21c   :  { %s14786_s4 = sld [smem:[#allocation219_spill]]  ;;  %s11684_s20 = scalar_lea.vmem %s886_s5, 16 }
 0x21d   :  { %p11685_p9 = scmp.ne.s32.totalorder %s886_s5, %s11684_s20  ;;  %s11688_s10 = scalar_lea.vmem %s886_s5, 32 }
 0x21e   :  { %p11689_p10 = scmp.lt.s32.totalorder %s886_s5, %s886_s5  ;;  %p11690_p11 = scmp.lt.s32.totalorder %s11688_s10, %s11684_s20 }
 0x220   :  { %p11691_p12 = por %p11690_p11, %p11689_p10 }
 0x222   :  { %866 = dma.hbm_to_vmem [thread:$0]  %s14786_s4, 16, %s864_s30, [#allocation86]  }
 0x223   :  { %p11692_p13 = pnand %p11691_p12, %p11685_p9 }
 0x225   :  { %11695 = shalt.err (!%p11692_p13)
}
 0x226   :  { %s14787_s19 = sld [smem:[#allocation222_spill]]  ;;  %s12839_s11 = smov [#allocation91]  }
 0x227   :  { %s905_s15 = sshll.u32 %s12839_s11, 4  ;;  %s12840_s16 = smov [#allocation94]   ;;  %s906_s15 = int_to_ptr.vmem [resolvable:$true] %s905_s15 }
 0x228   :  { %s925_s18 = sshll.u32 %s12840_s16, 4  ;;  %s11704_s14 = scalar_lea.vmem %s906_s15, 16  ;;  %s926_s18 = int_to_ptr.vmem [resolvable:$true] %s925_s18 }
 0x229   :  { %p11705_p0 = scmp.ne.s32.totalorder %s906_s15, %s11704_s14  ;;  %s11708_s13 = scalar_lea.vmem %s906_s15, 32 }
 0x22a   :  { %p11709_p1 = scmp.lt.s32.totalorder %s906_s15, %s906_s15  ;;  %p11710_p2 = scmp.lt.s32.totalorder %s11708_s13, %s11704_s14 }
 0x22c   :  { %888 = dma.hbm_to_vmem [thread:$0]  %s14787_s19, 16, %s886_s5, [#allocation89]  }
 0x22d   :  { %p11711_p3 = por %p11710_p2, %p11709_p1 }
 0x22f   :  { %p11712_p4 = pnand %p11711_p3, %p11705_p0 }
 0x231   :  { %11715 = shalt.err (!%p11712_p4)
}
 0x232   :  { %s14788_s0 = sld [smem:[#allocation224_spill]]  ;;  %s11724_s17 = scalar_lea.vmem %s926_s18, 16 }
 0x233   :  { %p11725_p5 = scmp.ne.s32.totalorder %s926_s18, %s11724_s17  ;;  %s11728_s21 = scalar_lea.vmem %s926_s18, 32 }
 0x234   :  { %p11729_p6 = scmp.lt.s32.totalorder %s926_s18, %s926_s18  ;;  %p11730_p7 = scmp.lt.s32.totalorder %s11728_s21, %s11724_s17 }
 0x236   :  { %p11731_p8 = por %p11730_p7, %p11729_p6 }
 0x238   :  { %908 = dma.hbm_to_vmem [thread:$0]  %s14788_s0, 16, %s906_s15, [#allocation92]  }
 0x239   :  { %p11732_p9 = pnand %p11731_p8, %p11725_p5 }
 0x23b   :  { %11735 = shalt.err (!%p11732_p9)
}
 0x23c   :  { %s14789_s3 = sld [smem:[#allocation226_spill]]  ;;  %s12841_s22 = smov [#allocation97]  }
 0x23d   :  { %s945_s12 = sshll.u32 %s12841_s22, 4  ;;  %s12842_s23 = smov [#allocation100]   ;;  %s946_s12 = int_to_ptr.vmem [resolvable:$true] %s945_s12 }
 0x23e   :  { %s968_s25 = sshll.u32 %s12842_s23, 4  ;;  %s11744_s26 = scalar_lea.vmem %s946_s12, 16  ;;  %s969_s25 = int_to_ptr.vmem [resolvable:$true] %s968_s25 }
 0x23f   :  { %p11745_p10 = scmp.ne.s32.totalorder %s946_s12, %s11744_s26  ;;  %s11748_s8 = scalar_lea.vmem %s946_s12, 32 }
 0x240   :  { %p11749_p11 = scmp.lt.s32.totalorder %s946_s12, %s946_s12  ;;  %p11750_p12 = scmp.lt.s32.totalorder %s11748_s8, %s11744_s26 }
 0x242   :  { %928 = dma.hbm_to_vmem [thread:$0]  %s14789_s3, 16, %s926_s18, [#allocation95]  }
 0x243   :  { %p11751_p13 = por %p11750_p12, %p11749_p11 }
 0x245   :  { %p11752_p0 = pnand %p11751_p13, %p11745_p10 }
 0x247   :  { %11755 = shalt.err (!%p11752_p0)
}
 0x248   :  { %s14790_s30 = sld [smem:[#allocation228_spill]]  ;;  %s11764_s28 = scalar_lea.vmem %s969_s25, 512 }
 0x249   :  { %p11765_p1 = scmp.ne.s32.totalorder %s969_s25, %s11764_s28  ;;  %p11769_p2 = scmp.lt.s32.totalorder %s969_s25, %s969_s25 }
 0x24a   :  { %p11770_p3 = scmp.lt.s32.totalorder %s11764_s28, %s11764_s28 }
 0x24c   :  { %p11771_p4 = por %p11770_p3, %p11769_p2 }
 0x24e   :  { %948 = dma.hbm_to_vmem [thread:$0]  %s14790_s30, 16, %s946_s12, [#allocation98]  }
 0x24f   :  { %p11772_p5 = pnand %p11771_p4, %p11765_p1 }
 0x251   :  { %11775 = shalt.err (!%p11772_p5)
}
 0x252   :  { %s14791_s5 = sld [smem:[#allocation231_spill]]  ;;  %s12843_s1 = smov [#allocation103]  }
 0x253   :  { %s993_s2 = sshll.u32 %s12843_s1, 4  ;;  %s12844_s4 = smov [#allocation106]   ;;  %s994_s2 = int_to_ptr.vmem [resolvable:$true] %s993_s2 }
 0x254   :  { %s1013_s20 = sshll.u32 %s12844_s4, 4  ;;  %s11784_s10 = scalar_lea.vmem %s994_s2, 128  ;;  %s1014_s20 = int_to_ptr.vmem [resolvable:$true] %s1013_s20 }
 0x255   :  { %p11785_p6 = scmp.ne.s32.totalorder %s994_s2, %s11784_s10  ;;  %p11789_p7 = scmp.lt.s32.totalorder %s994_s2, %s994_s2 }
 0x256   :  { %p11790_p8 = scmp.lt.s32.totalorder %s11784_s10, %s11784_s10 }
 0x258   :  { %974 = dma.hbm_to_vmem [thread:$0]  %s14791_s5, 512, %s969_s25, [#allocation101], %s12827_s7, %s12827_s7, %s12828_s24  }
 0x259   :  { %p11791_p9 = por %p11790_p8, %p11789_p7 }
 0x25b   :  { %p11792_p10 = pnand %p11791_p9, %p11785_p6 }
 0x25d   :  { %11795 = shalt.err (!%p11792_p10)
}
 0x25e   :  { %s14792_s19 = sld [smem:[#allocation233_spill]]  ;;  %s11804_s11 = scalar_lea.vmem %s1014_s20, 16 }
 0x25f   :  { %p11805_p11 = scmp.ne.s32.totalorder %s1014_s20, %s11804_s11  ;;  %s11808_s15 = scalar_lea.vmem %s1014_s20, 32 }
 0x260   :  { %p11809_p12 = scmp.lt.s32.totalorder %s1014_s20, %s1014_s20  ;;  %p11810_p13 = scmp.lt.s32.totalorder %s11808_s15, %s11804_s11 }
 0x262   :  { %p11811_p0 = por %p11810_p13, %p11809_p12 }
 0x264   :  { %996 = dma.hbm_to_vmem [thread:$0]  %s14792_s19, 128, %s994_s2, [#allocation104]  }
 0x265   :  { %p11812_p1 = pnand %p11811_p0, %p11805_p11 }
 0x267   :  { %11815 = shalt.err (!%p11812_p1)
}
 0x268   :  { %s14793_s16 = sld [smem:[#allocation235_spill]]  ;;  %s12845_s18 = smov [#allocation109]  }
 0x269   :  { %s1033_s14 = sshll.u32 %s12845_s18, 4  ;;  %s12846_s13 = smov [#allocation112]   ;;  %s1034_s14 = int_to_ptr.vmem [resolvable:$true] %s1033_s14 }
 0x26a   :  { %s1053_s0 = sshll.u32 %s12846_s13, 4  ;;  %s11824_s17 = scalar_lea.vmem %s1034_s14, 64  ;;  %s1054_s0 = int_to_ptr.vmem [resolvable:$true] %s1053_s0 }
 0x26b   :  { %p11825_p2 = scmp.ne.s32.totalorder %s1034_s14, %s11824_s17  ;;  %p11829_p3 = scmp.lt.s32.totalorder %s1034_s14, %s1034_s14 }
 0x26c   :  { %p11830_p4 = scmp.lt.s32.totalorder %s11824_s17, %s11824_s17 }
 0x26e   :  { %1016 = dma.hbm_to_vmem [thread:$0]  %s14793_s16, 16, %s1014_s20, [#allocation107]  }
 0x26f   :  { %p11831_p5 = por %p11830_p4, %p11829_p3 }
 0x271   :  { %p11832_p6 = pnand %p11831_p5, %p11825_p2 }
 0x273   :  { %11835 = shalt.err (!%p11832_p6)
}
 0x274   :  { %s14794_s21 = sld [smem:[#allocation237_spill]]  ;;  %s11844_s3 = scalar_lea.vmem %s1054_s0, 16 }
 0x275   :  { %p11845_p7 = scmp.ne.s32.totalorder %s1054_s0, %s11844_s3  ;;  %s11848_s22 = scalar_lea.vmem %s1054_s0, 32 }
 0x276   :  { %p11849_p8 = scmp.lt.s32.totalorder %s1054_s0, %s1054_s0  ;;  %p11850_p9 = scmp.lt.s32.totalorder %s11848_s22, %s11844_s3 }
 0x278   :  { %p11851_p10 = por %p11850_p9, %p11849_p8 }
 0x27a   :  { %1036 = dma.hbm_to_vmem [thread:$0]  %s14794_s21, 64, %s1034_s14, [#allocation110]  }
 0x27b   :  { %p11852_p11 = pnand %p11851_p10, %p11845_p7 }
 0x27d   :  { %11855 = shalt.err (!%p11852_p11)
}
 0x27e   :  { %s14795_s12 = sld [smem:[#allocation239_spill]] }
 0x27f   :  { %s14796_s23 = sld [smem:[#allocation157_spill]] }
 0x284   :  { %1056 = dma.hbm_to_vmem [thread:$0]  %s14795_s12, 16, %s1054_s0, [#allocation113]  }
 0x285   :  { %s259_s25 = sshll.u32 %s14796_s23, 4  ;;  %s260_s25 = int_to_ptr.vmem [resolvable:$true] %s259_s25 }
 0x286   :  { %s11856_s26 = scalar_lea.vmem %s260_s25, 32  ;;  %p11861_p13 = scmp.lt.s32.totalorder %s260_s25, %s260_s25 }
 0x287   :  { %p11857_p12 = scmp.ne.s32.totalorder %s260_s25, %s11856_s26  ;;  %p11862_p0 = scmp.lt.s32.totalorder %s11856_s26, %s11856_s26 }
 0x289   :  { %p11863_p1 = por %p11862_p0, %p11861_p13 }
 0x28b   :  { %p11864_p2 = pnand %p11863_p1, %p11857_p12 }
 0x28d   :  { %11867 = shalt.err (!%p11864_p2)
}
 0x28e   :  { %s12847_s8 = smov [#allocation3]   ;;  %s12848_s30 = smov [#allocation6]  }
 0x28f   :  { %262 = dma.vmem_to_smem %s260_s25, 32, %s12847_s8, [#allocation5]  }
 0x290   :  { %s277_s28 = sshll.u32 %s12848_s30, 4  ;;  %s12849_s5 = smov [#allocation9]   ;;  %s278_s28 = int_to_ptr.vmem [resolvable:$true] %s277_s28 }
 0x291   :  { %s305_s1 = sshll.u32 %s12849_s5, 4  ;;  %s11876_s2 = scalar_lea.vmem %s278_s28, 16  ;;  %s306_s1 = int_to_ptr.vmem [resolvable:$true] %s305_s1 }
 0x292   :  { %p11877_p3 = scmp.ne.s32.totalorder %s278_s28, %s11876_s2  ;;  %s11880_s4 = scalar_lea.vmem %s278_s28, 32 }
 0x293   :  { %p11881_p4 = scmp.lt.s32.totalorder %s278_s28, %s278_s28  ;;  %p11882_p5 = scmp.lt.s32.totalorder %s11880_s4, %s11876_s2 }
 0x295   :  { %p11883_p6 = por %p11882_p5, %p11881_p4 }
 0x297   :  { %p11884_p7 = pnand %p11883_p6, %p11877_p3 }
 0x299   :  { %11887 = shalt.err (!%p11884_p7)
}
 0x29a   :  { %s14797_s20 = sld [smem:[#allocation162_spill]]  ;;  %s11896_s10 = scalar_lea.vmem %s306_s1, 16 }
 0x29b   :  { %p11897_p8 = scmp.ne.s32.totalorder %s306_s1, %s11896_s10  ;;  %s11900_s19 = scalar_lea.vmem %s306_s1, 32 }
 0x29c   :  { %p11901_p9 = scmp.lt.s32.totalorder %s306_s1, %s306_s1  ;;  %p11902_p10 = scmp.lt.s32.totalorder %s11900_s19, %s11896_s10 }
 0x29e   :  { %p11903_p11 = por %p11902_p10, %p11901_p9 }
 0x2a0   :  { %280 = dma.hbm_to_vmem [thread:$0]  %s14797_s20, 16, %s278_s28, [#allocation4]  }
 0x2a1   :  { %p11904_p12 = pnand %p11903_p11, %p11897_p8 }
 0x2a3   :  { %11907 = shalt.err (!%p11904_p12)
}
 0x2a4   :  { %s14798_s11 = sld [smem:[#allocation167_spill]]  ;;  %s12850_s15 = smov [#allocation12]  }
 0x2a5   :  { %s329_s16 = sshll.u32 %s12850_s15, 4  ;;  %s12851_s18 = smov [#allocation15]   ;;  %s330_s16 = int_to_ptr.vmem [resolvable:$true] %s329_s16 }
 0x2a6   :  { %s349_s14 = sshll.u32 %s12851_s18, 4  ;;  %s11916_s13 = scalar_lea.vmem %s330_s16, 16  ;;  %s350_s14 = int_to_ptr.vmem [resolvable:$true] %s349_s14 }
 0x2a7   :  { %p11917_p13 = scmp.ne.s32.totalorder %s330_s16, %s11916_s13  ;;  %s11920_s0 = scalar_lea.vmem %s330_s16, 32 }
 0x2a8   :  { %p11921_p0 = scmp.lt.s32.totalorder %s330_s16, %s330_s16  ;;  %p11922_p1 = scmp.lt.s32.totalorder %s11920_s0, %s11916_s13 }
 0x2aa   :  { %308 = dma.hbm_to_vmem [thread:$0]  %s14798_s11, 16, %s306_s1, [#allocation8]  }
 0x2ab   :  { %p11923_p2 = por %p11922_p1, %p11921_p0 }
 0x2ad   :  { %p11924_p3 = pnand %p11923_p2, %p11917_p13 }
 0x2af   :  { %11927 = shalt.err (!%p11924_p3)
}
 0x2b0   :  { %s14799_s17 = sld [smem:[#allocation170_spill]]  ;;  %s11936_s21 = scalar_lea.vmem %s350_s14, 16 }
 0x2b1   :  { %p11937_p4 = scmp.ne.s32.totalorder %s350_s14, %s11936_s21  ;;  %s11940_s3 = scalar_lea.vmem %s350_s14, 32 }
 0x2b2   :  { %p11941_p5 = scmp.lt.s32.totalorder %s350_s14, %s350_s14  ;;  %p11942_p6 = scmp.lt.s32.totalorder %s11940_s3, %s11936_s21 }
 0x2b4   :  { %p11943_p7 = por %p11942_p6, %p11941_p5 }
 0x2b6   :  { %332 = dma.hbm_to_vmem [thread:$0]  %s14799_s17, 16, %s330_s16, [#allocation11]  }
 0x2b7   :  { %p11944_p8 = pnand %p11943_p7, %p11937_p4 }
 0x2b9   :  { %11947 = shalt.err (!%p11944_p8)
}
 0x2ba   :  { %s14800_s22 = sld [smem:[#allocation171_spill]]  ;;  %s12852_s12 = smov [#allocation18]  }
 0x2bb   :  { %s369_s23 = sshll.u32 %s12852_s12, 4  ;;  %s12853_s25 = smov [#allocation21]   ;;  %s370_s23 = int_to_ptr.vmem [resolvable:$true] %s369_s23 }
 0x2bc   :  { %s389_s26 = sshll.u32 %s12853_s25, 4  ;;  %s11956_s8 = scalar_lea.vmem %s370_s23, 16  ;;  %s390_s26 = int_to_ptr.vmem [resolvable:$true] %s389_s26 }
 0x2bd   :  { %p11957_p9 = scmp.ne.s32.totalorder %s370_s23, %s11956_s8  ;;  %s11960_s30 = scalar_lea.vmem %s370_s23, 32 }
 0x2be   :  { %p11961_p10 = scmp.lt.s32.totalorder %s370_s23, %s370_s23  ;;  %p11962_p11 = scmp.lt.s32.totalorder %s11960_s30, %s11956_s8 }
 0x2c0   :  { %352 = dma.hbm_to_vmem [thread:$0]  %s14800_s22, 16, %s350_s14, [#allocation14]  }
 0x2c1   :  { %p11963_p12 = por %p11962_p11, %p11961_p10 }
 0x2c3   :  { %p11964_p13 = pnand %p11963_p12, %p11957_p9 }
 0x2c5   :  { %11967 = shalt.err (!%p11964_p13)
}
 0x2c6   :  { %s14801_s28 = sld [smem:[#allocation172_spill]]  ;;  %s11976_s5 = scalar_lea.vmem %s390_s26, 16 }
 0x2c7   :  { %p11977_p0 = scmp.ne.s32.totalorder %s390_s26, %s11976_s5  ;;  %s11980_s1 = scalar_lea.vmem %s390_s26, 32 }
 0x2c8   :  { %p11981_p1 = scmp.lt.s32.totalorder %s390_s26, %s390_s26  ;;  %p11982_p2 = scmp.lt.s32.totalorder %s11980_s1, %s11976_s5 }
 0x2ca   :  { %p11983_p3 = por %p11982_p2, %p11981_p1 }
 0x2cc   :  { %372 = dma.hbm_to_vmem [thread:$0]  %s14801_s28, 16, %s370_s23, [#allocation17]  }
 0x2cd   :  { %p11984_p4 = pnand %p11983_p3, %p11977_p0 }
 0x2cf   :  { %11987 = shalt.err (!%p11984_p4)
}
 0x2d0   :  { %s14802_s2 = sld [smem:[#allocation173_spill]]  ;;  %s12854_s4 = smov [#allocation24]  }
 0x2d1   :  { %s409_s20 = sshll.u32 %s12854_s4, 4  ;;  %s12855_s10 = smov [#allocation27]   ;;  %s410_s20 = int_to_ptr.vmem [resolvable:$true] %s409_s20 }
 0x2d2   :  { %s437_s19 = sshll.u32 %s12855_s10, 4  ;;  %s11996_s11 = scalar_lea.vmem %s410_s20, 16  ;;  %s438_s19 = int_to_ptr.vmem [resolvable:$true] %s437_s19 }
 0x2d3   :  { %p11997_p5 = scmp.ne.s32.totalorder %s410_s20, %s11996_s11  ;;  %s12000_s15 = scalar_lea.vmem %s410_s20, 32 }
 0x2d4   :  { %p12001_p6 = scmp.lt.s32.totalorder %s410_s20, %s410_s20  ;;  %p12002_p7 = scmp.lt.s32.totalorder %s12000_s15, %s11996_s11 }
 0x2d6   :  { %392 = dma.hbm_to_vmem [thread:$0]  %s14802_s2, 16, %s390_s26, [#allocation20]  }
 0x2d7   :  { %p12003_p8 = por %p12002_p7, %p12001_p6 }
 0x2d9   :  { %p12004_p9 = pnand %p12003_p8, %p11997_p5 }
 0x2db   :  { %12007 = shalt.err (!%p12004_p9)
}
 0x2dc   :  { %s14803_s16 = sld [smem:[#allocation174_spill]]  ;;  %s12016_s18 = scalar_lea.vmem %s438_s19, 16 }
 0x2dd   :  { %p12017_p10 = scmp.ne.s32.totalorder %s438_s19, %s12016_s18  ;;  %s12020_s14 = scalar_lea.vmem %s438_s19, 32 }
 0x2de   :  { %p12021_p11 = scmp.lt.s32.totalorder %s438_s19, %s438_s19  ;;  %p12022_p12 = scmp.lt.s32.totalorder %s12020_s14, %s12016_s18 }
 0x2e0   :  { %p12023_p13 = por %p12022_p12, %p12021_p11 }
 0x2e2   :  { %412 = dma.hbm_to_vmem [thread:$0]  %s14803_s16, 16, %s410_s20, [#allocation23]  }
 0x2e3   :  { %p12024_p0 = pnand %p12023_p13, %p12017_p10 }
 0x2e5   :  { %12027 = shalt.err (!%p12024_p0)
}
 0x2e6   :  { %s14804_s13 = sld [smem:[#allocation179_spill]]  ;;  %s12856_s0 = smov [#allocation30]  }
 0x2e7   :  { %s457_s17 = sshll.u32 %s12856_s0, 4  ;;  %s12857_s21 = smov [#allocation33]   ;;  %s458_s17 = int_to_ptr.vmem [resolvable:$true] %s457_s17 }
 0x2e8   :  { %s482_s3 = sshll.u32 %s12857_s21, 4  ;;  %s12036_s22 = scalar_lea.vmem %s458_s17, 16  ;;  %s483_s3 = int_to_ptr.vmem [resolvable:$true] %s482_s3 }
 0x2e9   :  { %p12037_p1 = scmp.ne.s32.totalorder %s458_s17, %s12036_s22  ;;  %s12040_s12 = scalar_lea.vmem %s458_s17, 32 }
 0x2ea   :  { %p12041_p2 = scmp.lt.s32.totalorder %s458_s17, %s458_s17  ;;  %p12042_p3 = scmp.lt.s32.totalorder %s12040_s12, %s12036_s22 }
 0x2ec   :  { %440 = dma.hbm_to_vmem [thread:$0]  %s14804_s13, 16, %s438_s19, [#allocation26]  }
 0x2ed   :  { %p12043_p4 = por %p12042_p3, %p12041_p2 }
 0x2ef   :  { %p12044_p5 = pnand %p12043_p4, %p12037_p1 }
 0x2f1   :  { %12047 = shalt.err (!%p12044_p5)
}
 0x2f2   :  { %s14805_s23 = sld [smem:[#allocation180_spill]]  ;;  %s12056_s25 = scalar_lea.vmem %s483_s3, 512 }
 0x2f3   :  { %p12057_p6 = scmp.ne.s32.totalorder %s483_s3, %s12056_s25  ;;  %p12061_p7 = scmp.lt.s32.totalorder %s483_s3, %s483_s3 }
 0x2f4   :  { %p12062_p8 = scmp.lt.s32.totalorder %s12056_s25, %s12056_s25 }
 0x2f6   :  { %p12063_p9 = por %p12062_p8, %p12061_p7 }
 0x2f8   :  { %460 = dma.hbm_to_vmem [thread:$0]  %s14805_s23, 16, %s458_s17, [#allocation29]  }
 0x2f9   :  { %p12064_p10 = pnand %p12063_p9, %p12057_p6 }
 0x2fb   :  { %12067 = shalt.err (!%p12064_p10)
}
 0x2fc   :  { %s14806_s26 = sld [smem:[#allocation184_spill]]  ;;  %s12858_s8 = smov [#allocation36]  }
 0x2fd   :  { %s504_s30 = sshll.u32 %s12858_s8, 4  ;;  %s12859_s28 = smov [#allocation39]   ;;  %s505_s30 = int_to_ptr.vmem [resolvable:$true] %s504_s30 }
 0x2fe   :  { %s529_s5 = sshll.u32 %s12859_s28, 4  ;;  %s12076_s1 = scalar_lea.vmem %s505_s30, 512  ;;  %s530_s5 = int_to_ptr.vmem [resolvable:$true] %s529_s5 }
 0x2ff   :  { %p12077_p11 = scmp.ne.s32.totalorder %s505_s30, %s12076_s1  ;;  %p12081_p12 = scmp.lt.s32.totalorder %s505_s30, %s505_s30 }
 0x300   :  { %p12082_p13 = scmp.lt.s32.totalorder %s12076_s1, %s12076_s1 }
 0x302   :  { %488 = dma.hbm_to_vmem [thread:$0]  %s14806_s26, 512, %s483_s3, [#allocation32], %s12827_s7, %s12827_s7, %s12828_s24  }
 0x303   :  { %p12083_p0 = por %p12082_p13, %p12081_p12 }
 0x305   :  { %p12084_p1 = pnand %p12083_p0, %p12077_p11 }
 0x307   :  { %12087 = shalt.err (!%p12084_p1)
}
 0x308   :  { %s14807_s2 = sld [smem:[#allocation185_spill]]  ;;  %s12096_s4 = scalar_lea.vmem %s530_s5, 16 }
 0x309   :  { %p12097_p2 = scmp.ne.s32.totalorder %s530_s5, %s12096_s4  ;;  %s12100_s20 = scalar_lea.vmem %s530_s5, 32 }
 0x30a   :  { %p12101_p3 = scmp.lt.s32.totalorder %s530_s5, %s530_s5  ;;  %p12102_p4 = scmp.lt.s32.totalorder %s12100_s20, %s12096_s4 }
 0x30c   :  { %p12103_p5 = por %p12102_p4, %p12101_p3 }
 0x30e   :  { %510 = dma.hbm_to_vmem [thread:$0]  %s14807_s2, 512, %s505_s30, [#allocation35], %s12827_s7, %s12827_s7, %s12828_s24  }
 0x30f   :  { %p12104_p6 = pnand %p12103_p5, %p12097_p2 }
 0x311   :  { %12107 = shalt.err (!%p12104_p6)
}
 0x312   :  { %s14808_s10 = sld [smem:[#allocation187_spill]]  ;;  %s12860_s19 = smov [#allocation42]  }
 0x313   :  { %s549_s11 = sshll.u32 %s12860_s19, 4  ;;  %s12861_s15 = smov [#allocation45]   ;;  %s550_s11 = int_to_ptr.vmem [resolvable:$true] %s549_s11 }
 0x314   :  { %s569_s16 = sshll.u32 %s12861_s15, 4  ;;  %s12116_s18 = scalar_lea.vmem %s550_s11, 16  ;;  %s570_s16 = int_to_ptr.vmem [resolvable:$true] %s569_s16 }
 0x315   :  { %p12117_p7 = scmp.ne.s32.totalorder %s550_s11, %s12116_s18  ;;  %s12120_s14 = scalar_lea.vmem %s550_s11, 32 }
 0x316   :  { %p12121_p8 = scmp.lt.s32.totalorder %s550_s11, %s550_s11  ;;  %p12122_p9 = scmp.lt.s32.totalorder %s12120_s14, %s12116_s18 }
 0x318   :  { %532 = dma.hbm_to_vmem [thread:$0]  %s14808_s10, 16, %s530_s5, [#allocation38]  }
 0x319   :  { %p12123_p10 = por %p12122_p9, %p12121_p8 }
 0x31b   :  { %p12124_p11 = pnand %p12123_p10, %p12117_p7 }
 0x31d   :  { %12127 = shalt.err (!%p12124_p11)
}
 0x31e   :  { %s14809_s13 = sld [smem:[#allocation188_spill]]  ;;  %s12136_s0 = scalar_lea.vmem %s570_s16, 16 }
 0x31f   :  { %p12137_p12 = scmp.ne.s32.totalorder %s570_s16, %s12136_s0  ;;  %s12140_s17 = scalar_lea.vmem %s570_s16, 32 }
 0x320   :  { %p12141_p13 = scmp.lt.s32.totalorder %s570_s16, %s570_s16  ;;  %p12142_p0 = scmp.lt.s32.totalorder %s12140_s17, %s12136_s0 }
 0x322   :  { %p12143_p1 = por %p12142_p0, %p12141_p13 }
 0x324   :  { %552 = dma.hbm_to_vmem [thread:$0]  %s14809_s13, 16, %s550_s11, [#allocation41]  }
 0x325   :  { %p12144_p2 = pnand %p12143_p1, %p12137_p12 }
 0x327   :  { %12147 = shalt.err (!%p12144_p2)
}
 0x328   :  { %s14810_s21 = sld [smem:[#allocation189_spill]]  ;;  %s12862_s3 = smov [#allocation48]  }
 0x329   :  { %s589_s22 = sshll.u32 %s12862_s3, 4  ;;  %s12863_s12 = smov [#allocation51]   ;;  %s590_s22 = int_to_ptr.vmem [resolvable:$true] %s589_s22 }
 0x32a   :  { %s609_s23 = sshll.u32 %s12863_s12, 4  ;;  %s12156_s25 = scalar_lea.vmem %s590_s22, 16  ;;  %s610_s23 = int_to_ptr.vmem [resolvable:$true] %s609_s23 }
 0x32b   :  { %p12157_p3 = scmp.ne.s32.totalorder %s590_s22, %s12156_s25  ;;  %s12160_s26 = scalar_lea.vmem %s590_s22, 32 }
 0x32c   :  { %p12161_p4 = scmp.lt.s32.totalorder %s590_s22, %s590_s22  ;;  %p12162_p5 = scmp.lt.s32.totalorder %s12160_s26, %s12156_s25 }
 0x32e   :  { %572 = dma.hbm_to_vmem [thread:$0]  %s14810_s21, 16, %s570_s16, [#allocation44]  }
 0x32f   :  { %p12163_p6 = por %p12162_p5, %p12161_p4 }
 0x331   :  { %p12164_p7 = pnand %p12163_p6, %p12157_p3 }
 0x333   :  { %12167 = shalt.err (!%p12164_p7)
}
 0x334   :  { %s14811_s8 = sld [smem:[#allocation190_spill]]  ;;  %s12176_s30 = scalar_lea.vmem %s610_s23, 16 }
 0x335   :  { %p12177_p8 = scmp.ne.s32.totalorder %s610_s23, %s12176_s30  ;;  %s12180_s28 = scalar_lea.vmem %s610_s23, 32 }
 0x336   :  { %p12181_p9 = scmp.lt.s32.totalorder %s610_s23, %s610_s23  ;;  %p12182_p10 = scmp.lt.s32.totalorder %s12180_s28, %s12176_s30 }
 0x338   :  { %p12183_p11 = por %p12182_p10, %p12181_p9 }
 0x33a   :  { %592 = dma.hbm_to_vmem [thread:$0]  %s14811_s8, 16, %s590_s22, [#allocation47]  }
 0x33b   :  { %p12184_p12 = pnand %p12183_p11, %p12177_p8 }
 0x33d   :  { %12187 = shalt.err (!%p12184_p12)
}
 0x33e   :  { %s14812_s5 = sld [smem:[#allocation192_spill]]  ;;  %s12864_s1 = smov [#allocation54]  }
 0x33f   :  { %s630_s2 = sshll.u32 %s12864_s1, 4  ;;  %s12865_s4 = smov [#allocation57]   ;;  %s631_s2 = int_to_ptr.vmem [resolvable:$true] %s630_s2 }
 0x340   :  { %s654_s20 = sshll.u32 %s12865_s4, 4  ;;  %s12196_s10 = scalar_lea.vmem %s631_s2, 512  ;;  %s655_s20 = int_to_ptr.vmem [resolvable:$true] %s654_s20 }
 0x341   :  { %p12197_p13 = scmp.ne.s32.totalorder %s631_s2, %s12196_s10  ;;  %p12201_p0 = scmp.lt.s32.totalorder %s631_s2, %s631_s2 }
 0x342   :  { %p12202_p1 = scmp.lt.s32.totalorder %s12196_s10, %s12196_s10 }
 0x344   :  { %612 = dma.hbm_to_vmem [thread:$0]  %s14812_s5, 16, %s610_s23, [#allocation50]  }
 0x345   :  { %p12203_p2 = por %p12202_p1, %p12201_p0 }
 0x347   :  { %p12204_p3 = pnand %p12203_p2, %p12197_p13 }
 0x349   :  { %12207 = shalt.err (!%p12204_p3)
}
 0x34a   :  { %s14813_s19 = sld [smem:[#allocation195_spill]]  ;;  %s12216_s11 = scalar_lea.vmem %s655_s20, 512 }
 0x34b   :  { %p12217_p4 = scmp.ne.s32.totalorder %s655_s20, %s12216_s11  ;;  %p12221_p5 = scmp.lt.s32.totalorder %s655_s20, %s655_s20 }
 0x34c   :  { %p12222_p6 = scmp.lt.s32.totalorder %s12216_s11, %s12216_s11 }
 0x34e   :  { %p12223_p7 = por %p12222_p6, %p12221_p5 }
 0x350   :  { %636 = dma.hbm_to_vmem [thread:$0]  %s14813_s19, 512, %s631_s2, [#allocation53], %s12827_s7, %s12827_s7, %s12828_s24  }
 0x351   :  { %p12224_p8 = pnand %p12223_p7, %p12217_p4 }
 0x353   :  { %12227 = shalt.err (!%p12224_p8)
}
 0x354   :  { %s14814_s15 = sld [smem:[#allocation197_spill]]  ;;  %s12866_s16 = smov [#allocation60]  }
 0x355   :  { %s679_s18 = sshll.u32 %s12866_s16, 4  ;;  %s12867_s14 = smov [#allocation63]   ;;  %s680_s18 = int_to_ptr.vmem [resolvable:$true] %s679_s18 }
 0x356   :  { %s698_s13 = sshll.u32 %s12867_s14, 4  ;;  %s12236_s0 = scalar_lea.vmem %s680_s18, 16  ;;  %s699_s13 = int_to_ptr.vmem [resolvable:$true] %s698_s13 }
 0x357   :  { %p12237_p9 = scmp.ne.s32.totalorder %s680_s18, %s12236_s0  ;;  %s12240_s17 = scalar_lea.vmem %s680_s18, 32 }
 0x358   :  { %p12241_p10 = scmp.lt.s32.totalorder %s680_s18, %s680_s18  ;;  %p12242_p11 = scmp.lt.s32.totalorder %s12240_s17, %s12236_s0 }
 0x35a   :  { %660 = dma.hbm_to_vmem [thread:$0]  %s14814_s15, 512, %s655_s20, [#allocation56], %s12827_s7, %s12827_s7, %s12828_s24  }
 0x35b   :  { %p12243_p12 = por %p12242_p11, %p12241_p10 }
 0x35d   :  { %p12244_p13 = pnand %p12243_p12, %p12237_p9 }
 0x35f   :  { %12247 = shalt.err (!%p12244_p13)
}
 0x360   :  { %s14815_s21 = sld [smem:[#allocation200_spill]]  ;;  %s12256_s3 = scalar_lea.vmem %s699_s13, 512 }
 0x361   :  { %p12257_p0 = scmp.ne.s32.totalorder %s699_s13, %s12256_s3  ;;  %p12261_p1 = scmp.lt.s32.totalorder %s699_s13, %s699_s13 }
 0x362   :  { %p12262_p2 = scmp.lt.s32.totalorder %s12256_s3, %s12256_s3 }
 0x364   :  { %p12263_p3 = por %p12262_p2, %p12261_p1 }
 0x366   :  { %682 = dma.hbm_to_vmem [thread:$0]  %s14815_s21, 16, %s680_s18, [#allocation59]  }
 0x367   :  { %p12264_p4 = pnand %p12263_p3, %p12257_p0 }
 0x369   :  { %12267 = shalt.err (!%p12264_p4)
}
 0x36a   :  { %s14816_s22 = sld [smem:[#allocation202_spill]]  ;;  %s12868_s12 = smov [#allocation66]  }
 0x36b   :  { %s723_s23 = sshll.u32 %s12868_s12, 4  ;;  %s12869_s25 = smov [#allocation69]   ;;  %s724_s23 = int_to_ptr.vmem [resolvable:$true] %s723_s23 }
 0x36c   :  { %s743_s26 = sshll.u32 %s12869_s25, 4  ;;  %s12276_s8 = scalar_lea.vmem %s724_s23, 16  ;;  %s744_s26 = int_to_ptr.vmem [resolvable:$true] %s743_s26 }
 0x36d   :  { %p12277_p5 = scmp.ne.s32.totalorder %s724_s23, %s12276_s8  ;;  %s12280_s30 = scalar_lea.vmem %s724_s23, 32 }
 0x36e   :  { %p12281_p6 = scmp.lt.s32.totalorder %s724_s23, %s724_s23  ;;  %p12282_p7 = scmp.lt.s32.totalorder %s12280_s30, %s12276_s8 }
 0x370   :  { %704 = dma.hbm_to_vmem [thread:$0]  %s14816_s22, 512, %s699_s13, [#allocation62], %s12827_s7, %s12827_s7, %s12828_s24  }
 0x371   :  { %p12283_p8 = por %p12282_p7, %p12281_p6 }
 0x373   :  { %p12284_p9 = pnand %p12283_p8, %p12277_p5 }
 0x375   :  { %12287 = shalt.err (!%p12284_p9)
}
 0x376   :  { %s14817_s28 = sld [smem:[#allocation205_spill]]  ;;  %s12296_s5 = scalar_lea.vmem %s744_s26, 16 }
 0x377   :  { %p12297_p10 = scmp.ne.s32.totalorder %s744_s26, %s12296_s5  ;;  %s12300_s1 = scalar_lea.vmem %s744_s26, 32 }
 0x378   :  { %p12301_p11 = scmp.lt.s32.totalorder %s744_s26, %s744_s26  ;;  %p12302_p12 = scmp.lt.s32.totalorder %s12300_s1, %s12296_s5 }
 0x37a   :  { %p12303_p13 = por %p12302_p12, %p12301_p11 }
 0x37c   :  { %726 = dma.hbm_to_vmem [thread:$0]  %s14817_s28, 16, %s724_s23, [#allocation65]  }
 0x37d   :  { %p12304_p0 = pnand %p12303_p13, %p12297_p10 }
 0x37f   :  { %12307 = shalt.err (!%p12304_p0)
}
 0x380   :  { %s14818_s2 = sld [smem:[#allocation207_spill]]  ;;  %s12870_s4 = smov [#allocation72]  }
 0x381   :  { %s763_s20 = sshll.u32 %s12870_s4, 4  ;;  %s12871_s10 = smov [#allocation75]   ;;  %s764_s20 = int_to_ptr.vmem [resolvable:$true] %s763_s20 }
 0x382   :  { %s783_s19 = sshll.u32 %s12871_s10, 4  ;;  %s12316_s11 = scalar_lea.vmem %s764_s20, 16  ;;  %s784_s19 = int_to_ptr.vmem [resolvable:$true] %s783_s19 }
 0x383   :  { %p12317_p1 = scmp.ne.s32.totalorder %s764_s20, %s12316_s11  ;;  %s12320_s15 = scalar_lea.vmem %s764_s20, 32 }
 0x384   :  { %p12321_p2 = scmp.lt.s32.totalorder %s764_s20, %s764_s20  ;;  %p12322_p3 = scmp.lt.s32.totalorder %s12320_s15, %s12316_s11 }
 0x386   :  { %746 = dma.hbm_to_vmem [thread:$0]  %s14818_s2, 16, %s744_s26, [#allocation68]  }
 0x387   :  { %p12323_p4 = por %p12322_p3, %p12321_p2 }
 0x389   :  { %p12324_p5 = pnand %p12323_p4, %p12317_p1 }
 0x38b   :  { %12327 = shalt.err (!%p12324_p5)
}
 0x38c   :  { %s14819_s16 = sld [smem:[#allocation209_spill]]  ;;  %s12336_s18 = scalar_lea.vmem %s784_s19, 16 }
 0x38d   :  { %p12337_p6 = scmp.ne.s32.totalorder %s784_s19, %s12336_s18  ;;  %s12340_s14 = scalar_lea.vmem %s784_s19, 32 }
 0x38e   :  { %p12341_p7 = scmp.lt.s32.totalorder %s784_s19, %s784_s19  ;;  %p12342_p8 = scmp.lt.s32.totalorder %s12340_s14, %s12336_s18 }
 0x390   :  { %p12343_p9 = por %p12342_p8, %p12341_p7 }
 0x392   :  { %766 = dma.hbm_to_vmem [thread:$0]  %s14819_s16, 16, %s764_s20, [#allocation71]  }
 0x393   :  { %p12344_p10 = pnand %p12343_p9, %p12337_p6 }
 0x395   :  { %12347 = shalt.err (!%p12344_p10)
}
 0x396   :  { %s14820_s13 = sld [smem:[#allocation211_spill]]  ;;  %s12872_s0 = smov [#allocation78]  }
 0x397   :  { %s804_s17 = sshll.u32 %s12872_s0, 4  ;;  %s12873_s21 = smov [#allocation81]   ;;  %s805_s17 = int_to_ptr.vmem [resolvable:$true] %s804_s17 }
 0x398   :  { %s828_s3 = sshll.u32 %s12873_s21, 4  ;;  %s12356_s22 = scalar_lea.vmem %s805_s17, 512  ;;  %s829_s3 = int_to_ptr.vmem [resolvable:$true] %s828_s3 }
 0x399   :  { %p12357_p11 = scmp.ne.s32.totalorder %s805_s17, %s12356_s22  ;;  %p12361_p12 = scmp.lt.s32.totalorder %s805_s17, %s805_s17 }
 0x39a   :  { %p12362_p13 = scmp.lt.s32.totalorder %s12356_s22, %s12356_s22 }
 0x39c   :  { %786 = dma.hbm_to_vmem [thread:$0]  %s14820_s13, 16, %s784_s19, [#allocation74]  }
 0x39d   :  { %p12363_p0 = por %p12362_p13, %p12361_p12 }
 0x39f   :  { %p12364_p1 = pnand %p12363_p0, %p12357_p11 }
 0x3a1   :  { %12367 = shalt.err (!%p12364_p1)
}
 0x3a2   :  { %s14821_s12 = sld [smem:[#allocation214_spill]]  ;;  %s12376_s23 = scalar_lea.vmem %s829_s3, 512 }
 0x3a3   :  { %p12377_p2 = scmp.ne.s32.totalorder %s829_s3, %s12376_s23  ;;  %p12381_p3 = scmp.lt.s32.totalorder %s829_s3, %s829_s3 }
 0x3a4   :  { %p12382_p4 = scmp.lt.s32.totalorder %s12376_s23, %s12376_s23 }
 0x3a6   :  { %p12383_p5 = por %p12382_p4, %p12381_p3 }
 0x3a8   :  { %810 = dma.hbm_to_vmem [thread:$0]  %s14821_s12, 512, %s805_s17, [#allocation77], %s12827_s7, %s12827_s7, %s12828_s24  }
 0x3a9   :  { %p12384_p6 = pnand %p12383_p5, %p12377_p2 }
 0x3ab   :  { %12387 = shalt.err (!%p12384_p6)
}
 0x3ac   :  { %s14822_s25 = sld [smem:[#allocation216_spill]]  ;;  %s12874_s26 = smov [#allocation84]  }
 0x3ad   :  { %s850_s8 = sshll.u32 %s12874_s26, 4  ;;  %s12875_s30 = smov [#allocation87]   ;;  %s851_s8 = int_to_ptr.vmem [resolvable:$true] %s850_s8 }
 0x3ae   :  { %s875_s28 = sshll.u32 %s12875_s30, 4  ;;  %s12396_s5 = scalar_lea.vmem %s851_s8, 512  ;;  %s876_s28 = int_to_ptr.vmem [resolvable:$true] %s875_s28 }
 0x3af   :  { %p12397_p7 = scmp.ne.s32.totalorder %s851_s8, %s12396_s5  ;;  %p12401_p8 = scmp.lt.s32.totalorder %s851_s8, %s851_s8 }
 0x3b0   :  { %p12402_p9 = scmp.lt.s32.totalorder %s12396_s5, %s12396_s5 }
 0x3b2   :  { %834 = dma.hbm_to_vmem [thread:$0]  %s14822_s25, 512, %s829_s3, [#allocation80], %s12827_s7, %s12827_s7, %s12828_s24  }
 0x3b3   :  { %p12403_p10 = por %p12402_p9, %p12401_p8 }
 0x3b5   :  { %p12404_p11 = pnand %p12403_p10, %p12397_p7 }
 0x3b7   :  { %12407 = shalt.err (!%p12404_p11)
}
 0x3b8   :  { %s14823_s1 = sld [smem:[#allocation218_spill]]  ;;  %s12416_s2 = scalar_lea.vmem %s876_s28, 16 }
 0x3b9   :  { %p12417_p12 = scmp.ne.s32.totalorder %s876_s28, %s12416_s2  ;;  %s12420_s4 = scalar_lea.vmem %s876_s28, 32 }
 0x3ba   :  { %p12421_p13 = scmp.lt.s32.totalorder %s876_s28, %s876_s28  ;;  %p12422_p0 = scmp.lt.s32.totalorder %s12420_s4, %s12416_s2 }
 0x3bc   :  { %p12423_p1 = por %p12422_p0, %p12421_p13 }
 0x3be   :  { %856 = dma.hbm_to_vmem [thread:$0]  %s14823_s1, 512, %s851_s8, [#allocation83], %s12827_s7, %s12827_s7, %s12828_s24  }
 0x3bf   :  { %p12424_p2 = pnand %p12423_p1, %p12417_p12 }
 0x3c1   :  { %12427 = shalt.err (!%p12424_p2)
}
 0x3c2   :  { %s14824_s20 = sld [smem:[#allocation221_spill]]  ;;  %s12876_s10 = smov [#allocation90]  }
 0x3c3   :  { %s895_s19 = sshll.u32 %s12876_s10, 4  ;;  %s12877_s11 = smov [#allocation93]   ;;  %s896_s19 = int_to_ptr.vmem [resolvable:$true] %s895_s19 }
 0x3c4   :  { %s915_s15 = sshll.u32 %s12877_s11, 4  ;;  %s12436_s16 = scalar_lea.vmem %s896_s19, 16  ;;  %s916_s15 = int_to_ptr.vmem [resolvable:$true] %s915_s15 }
 0x3c5   :  { %p12437_p3 = scmp.ne.s32.totalorder %s896_s19, %s12436_s16  ;;  %s12440_s18 = scalar_lea.vmem %s896_s19, 32 }
 0x3c6   :  { %p12441_p4 = scmp.lt.s32.totalorder %s896_s19, %s896_s19  ;;  %p12442_p5 = scmp.lt.s32.totalorder %s12440_s18, %s12436_s16 }
 0x3c8   :  { %878 = dma.hbm_to_vmem [thread:$0]  %s14824_s20, 16, %s876_s28, [#allocation86]  }
 0x3c9   :  { %p12443_p6 = por %p12442_p5, %p12441_p4 }
 0x3cb   :  { %p12444_p7 = pnand %p12443_p6, %p12437_p3 }
 0x3cd   :  { %12447 = shalt.err (!%p12444_p7)
}
 0x3ce   :  { %s14825_s14 = sld [smem:[#allocation223_spill]]  ;;  %s12456_s13 = scalar_lea.vmem %s916_s15, 16 }
 0x3cf   :  { %p12457_p8 = scmp.ne.s32.totalorder %s916_s15, %s12456_s13  ;;  %s12460_s0 = scalar_lea.vmem %s916_s15, 32 }
 0x3d0   :  { %p12461_p9 = scmp.lt.s32.totalorder %s916_s15, %s916_s15  ;;  %p12462_p10 = scmp.lt.s32.totalorder %s12460_s0, %s12456_s13 }
 0x3d2   :  { %p12463_p11 = por %p12462_p10, %p12461_p9 }
 0x3d4   :  { %898 = dma.hbm_to_vmem [thread:$0]  %s14825_s14, 16, %s896_s19, [#allocation89]  }
 0x3d5   :  { %p12464_p12 = pnand %p12463_p11, %p12457_p8 }
 0x3d7   :  { %12467 = shalt.err (!%p12464_p12)
}
 0x3d8   :  { %s14826_s17 = sld [smem:[#allocation225_spill]]  ;;  %s12878_s21 = smov [#allocation96]  }
 0x3d9   :  { %s935_s3 = sshll.u32 %s12878_s21, 4  ;;  %s12879_s22 = smov [#allocation99]   ;;  %s936_s3 = int_to_ptr.vmem [resolvable:$true] %s935_s3 }
 0x3da   :  { %s956_s12 = sshll.u32 %s12879_s22, 4  ;;  %s12476_s23 = scalar_lea.vmem %s936_s3, 16  ;;  %s957_s12 = int_to_ptr.vmem [resolvable:$true] %s956_s12 }
 0x3db   :  { %p12477_p13 = scmp.ne.s32.totalorder %s936_s3, %s12476_s23  ;;  %s12480_s25 = scalar_lea.vmem %s936_s3, 32 }
 0x3dc   :  { %p12481_p0 = scmp.lt.s32.totalorder %s936_s3, %s936_s3  ;;  %p12482_p1 = scmp.lt.s32.totalorder %s12480_s25, %s12476_s23 }
 0x3de   :  { %918 = dma.hbm_to_vmem [thread:$0]  %s14826_s17, 16, %s916_s15, [#allocation92]  }
 0x3df   :  { %p12483_p2 = por %p12482_p1, %p12481_p0 }
 0x3e1   :  { %p12484_p3 = pnand %p12483_p2, %p12477_p13 }
 0x3e3   :  { %12487 = shalt.err (!%p12484_p3)
}
 0x3e4   :  { %s14827_s26 = sld [smem:[#allocation227_spill]]  ;;  %s12496_s8 = scalar_lea.vmem %s957_s12, 512 }
 0x3e5   :  { %p12497_p4 = scmp.ne.s32.totalorder %s957_s12, %s12496_s8  ;;  %p12501_p5 = scmp.lt.s32.totalorder %s957_s12, %s957_s12 }
 0x3e6   :  { %p12502_p6 = scmp.lt.s32.totalorder %s12496_s8, %s12496_s8 }
 0x3e8   :  { %p12503_p7 = por %p12502_p6, %p12501_p5 }
 0x3ea   :  { %938 = dma.hbm_to_vmem [thread:$0]  %s14827_s26, 16, %s936_s3, [#allocation95]  }
 0x3eb   :  { %p12504_p8 = pnand %p12503_p7, %p12497_p4 }
 0x3ed   :  { %12507 = shalt.err (!%p12504_p8)
}
 0x3ee   :  { %s14828_s30 = sld [smem:[#allocation230_spill]]  ;;  %s12880_s28 = smov [#allocation102]  }
 0x3ef   :  { %s980_s5 = sshll.u32 %s12880_s28, 4  ;;  %s12881_s1 = smov [#allocation105]   ;;  %s981_s5 = int_to_ptr.vmem [resolvable:$true] %s980_s5 }
 0x3f0   :  { %s1003_s2 = sshll.u32 %s12881_s1, 4  ;;  %s12516_s4 = scalar_lea.vmem %s981_s5, 512  ;;  %s1004_s2 = int_to_ptr.vmem [resolvable:$true] %s1003_s2 }
 0x3f1   :  { %p12517_p9 = scmp.ne.s32.totalorder %s981_s5, %s12516_s4  ;;  %p12521_p10 = scmp.lt.s32.totalorder %s981_s5, %s981_s5 }
 0x3f2   :  { %p12522_p11 = scmp.lt.s32.totalorder %s12516_s4, %s12516_s4 }
 0x3f4   :  { %962 = dma.hbm_to_vmem [thread:$0]  %s14828_s30, 512, %s957_s12, [#allocation98], %s12827_s7, %s12827_s7, %s12828_s24  }
 0x3f5   :  { %p12523_p12 = por %p12522_p11, %p12521_p10 }
 0x3f7   :  { %p12524_p13 = pnand %p12523_p12, %p12517_p9 }
 0x3f9   :  { %12527 = shalt.err (!%p12524_p13)
}
 0x3fa   :  { %s14829_s20 = sld [smem:[#allocation232_spill]]  ;;  %s12536_s10 = scalar_lea.vmem %s1004_s2, 16 }
 0x3fb   :  { %p12537_p0 = scmp.ne.s32.totalorder %s1004_s2, %s12536_s10  ;;  %s12540_s19 = scalar_lea.vmem %s1004_s2, 32 }
 0x3fc   :  { %p12541_p1 = scmp.lt.s32.totalorder %s1004_s2, %s1004_s2  ;;  %p12542_p2 = scmp.lt.s32.totalorder %s12540_s19, %s12536_s10 }
 0x3fe   :  { %p12543_p3 = por %p12542_p2, %p12541_p1 }
 0x400   :  { %986 = dma.hbm_to_vmem [thread:$0]  %s14829_s20, 512, %s981_s5, [#allocation101], %s12827_s7, %s12827_s7, %s12828_s24  }
 0x401   :  { %p12544_p4 = pnand %p12543_p3, %p12537_p0 }
 0x403   :  { %12547 = shalt.err (!%p12544_p4)
}
 0x404   :  { %s14830_s11 = sld [smem:[#allocation234_spill]]  ;;  %s12882_s15 = smov [#allocation108]  }
 0x405   :  { %s1023_s16 = sshll.u32 %s12882_s15, 4  ;;  %s12883_s18 = smov [#allocation111]   ;;  %s1024_s16 = int_to_ptr.vmem [resolvable:$true] %s1023_s16 }
 0x406   :  { %s1043_s14 = sshll.u32 %s12883_s18, 4  ;;  %s12556_s13 = scalar_lea.vmem %s1024_s16, 16  ;;  %s1044_s14 = int_to_ptr.vmem [resolvable:$true] %s1043_s14 }
 0x407   :  { %p12557_p5 = scmp.ne.s32.totalorder %s1024_s16, %s12556_s13  ;;  %s12560_s0 = scalar_lea.vmem %s1024_s16, 32 }
 0x408   :  { %p12561_p6 = scmp.lt.s32.totalorder %s1024_s16, %s1024_s16  ;;  %p12562_p7 = scmp.lt.s32.totalorder %s12560_s0, %s12556_s13 }
 0x40a   :  { %1006 = dma.hbm_to_vmem [thread:$0]  %s14830_s11, 16, %s1004_s2, [#allocation104]  }
 0x40b   :  { %p12563_p8 = por %p12562_p7, %p12561_p6 }
 0x40d   :  { %p12564_p9 = pnand %p12563_p8, %p12557_p5 }
 0x40f   :  { %12567 = shalt.err (!%p12564_p9)
}
 0x410   :  { %s14831_s7 = sld [smem:[#allocation236_spill]]  ;;  %s12576_s24 = scalar_lea.vmem %s1044_s14, 16 }
 0x411   :  { %p12577_p10 = scmp.ne.s32.totalorder %s1044_s14, %s12576_s24  ;;  %s12580_s17 = scalar_lea.vmem %s1044_s14, 32 }
 0x412   :  { %p12581_p11 = scmp.lt.s32.totalorder %s1044_s14, %s1044_s14  ;;  %p12582_p12 = scmp.lt.s32.totalorder %s12580_s17, %s12576_s24 }
 0x414   :  { %p12583_p13 = por %p12582_p12, %p12581_p11 }
 0x416   :  { %1026 = dma.hbm_to_vmem [thread:$0]  %s14831_s7, 16, %s1024_s16, [#allocation107]  }
 0x417   :  { %p12584_p0 = pnand %p12583_p13, %p12577_p10 }
 0x419   :  { %12587 = shalt.err (!%p12584_p0)
}
 0x41a   :  { %s14832_s21 = sld [smem:[#allocation238_spill]]  ;;  %s12884_s3 = smov [#allocation114]  }
 0x41b   :  { %s1063_s22 = sshll.u32 %s12884_s3, 4  ;;  %s12885_s12 = smov [#allocation115]   ;;  %s1064_s22 = int_to_ptr.vmem [resolvable:$true] %s1063_s22 }
 0x41c   :  { %s1079_s23 = sshll.u32 %s12885_s12, 4  ;;  %s12596_s25 = scalar_lea.vmem %s1064_s22, 128  ;;  %s1080_s23 = int_to_ptr.vmem [resolvable:$true] %s1079_s23 }
 0x41d   :  { %p12597_p1 = scmp.ne.s32.totalorder %s1064_s22, %s12596_s25  ;;  %p12601_p2 = scmp.lt.s32.totalorder %s1064_s22, %s1064_s22 }
 0x41e   :  { %p12602_p3 = scmp.lt.s32.totalorder %s12596_s25, %s12596_s25 }
 0x420   :  { %1046 = dma.hbm_to_vmem [thread:$0]  %s14832_s21, 16, %s1044_s14, [#allocation110]  }
 0x421   :  { %p12603_p4 = por %p12602_p3, %p12601_p2 }
 0x423   :  { %p12604_p5 = pnand %p12603_p4, %p12597_p1 }
 0x425   :  { %12607 = shalt.err (!%p12604_p5)
}
 0x426   :  { %s14833_s26 = sld [smem:[#allocation240_spill]]  ;;  %s12616_s8 = scalar_lea.vmem %s1080_s23, 64 }
 0x427   :  { %p12617_p6 = scmp.ne.s32.totalorder %s1080_s23, %s12616_s8  ;;  %p12621_p7 = scmp.lt.s32.totalorder %s1080_s23, %s1080_s23 }
 0x428   :  { %p12622_p8 = scmp.lt.s32.totalorder %s12616_s8, %s12616_s8 }
 0x42a   :  { %p12623_p9 = por %p12622_p8, %p12621_p7 }
 0x42c   :  { %1066 = dma.hbm_to_vmem [thread:$0]  %s14833_s26, 128, %s1064_s22, [#allocation113]  }
 0x42d   :  { %p12624_p10 = pnand %p12623_p9, %p12617_p6 }
 0x42f   :  { %12627 = shalt.err (!%p12624_p10)
}
 0x430   :  { %1082 = dma.hbm_to_vmem [thread:$0]  %s13407_s6, 64, %s1080_s23, [#allocation116]  }
 0x431   :  { %12628 = dma.done.wait [#allocation5], 32  }
 0x432   :  { %12629 = vsyncadd [#allocation5], 4294967264 }
 0x433   :  { %12630 = dma.done.wait [#allocation4], 16  }
 0x434   :  { %12631 = vsyncadd [#allocation4], 4294967280 }
 0x435   :  { %12632 = dma.done.wait [#allocation8], 32  }
 0x436   :  { %12633 = vsyncadd [#allocation8], 4294967264 }
 0x437   :  { %12634 = dma.done.wait [#allocation11], 32  }
 0x438   :  { %12635 = vsyncadd [#allocation11], 4294967264 }
 0x439   :  { %12636 = dma.done.wait [#allocation14], 32  }
 0x43a   :  { %12637 = vsyncadd [#allocation14], 4294967264 }
 0x43b   :  { %12638 = dma.done.wait [#allocation17], 32  }
 0x43c   :  { %12639 = vsyncadd [#allocation17], 4294967264 }
 0x43d   :  { %12640 = dma.done.wait [#allocation20], 32  }
 0x43e   :  { %12641 = vsyncadd [#allocation20], 4294967264 }
 0x43f   :  { %12642 = dma.done.wait [#allocation23], 32  }
 0x440   :  { %12643 = vsyncadd [#allocation23], 4294967264 }
 0x441   :  { %12644 = dma.done.wait [#allocation26], 32  }
 0x442   :  { %12645 = vsyncadd [#allocation26], 4294967264 }
 0x443   :  { %12646 = dma.done.wait [#allocation29], 32  }
 0x444   :  { %12647 = vsyncadd [#allocation29], 4294967264 }
 0x445   :  { %12648 = dma.done.wait [#allocation32], 528  }
 0x446   :  { %12649 = vsyncadd [#allocation32], 4294966768 }
 0x447   :  { %12650 = dma.done.wait [#allocation35], 528  }
 0x448   :  { %12651 = vsyncadd [#allocation35], 4294966768 }
 0x449   :  { %12652 = dma.done.wait [#allocation38], 32  }
 0x44a   :  { %12653 = vsyncadd [#allocation38], 4294967264 }
 0x44b   :  { %12654 = dma.done.wait [#allocation41], 32  }
 0x44c   :  { %12655 = vsyncadd [#allocation41], 4294967264 }
 0x44d   :  { %12656 = dma.done.wait [#allocation44], 32  }
 0x44e   :  { %12657 = vsyncadd [#allocation44], 4294967264 }
 0x44f   :  { %12658 = dma.done.wait [#allocation47], 32  }
 0x450   :  { %12659 = vsyncadd [#allocation47], 4294967264 }
 0x451   :  { %12660 = dma.done.wait [#allocation50], 32  }
 0x452   :  { %12661 = vsyncadd [#allocation50], 4294967264 }
 0x453   :  { %12662 = dma.done.wait [#allocation53], 528  }
 0x454   :  { %12663 = vsyncadd [#allocation53], 4294966768 }
 0x455   :  { %12664 = dma.done.wait [#allocation56], 1024  }
 0x456   :  { %12665 = vsyncadd [#allocation56], 4294966272 }
 0x457   :  { %12666 = dma.done.wait [#allocation59], 32  }
 0x458   :  { %12667 = vsyncadd [#allocation59], 4294967264 }
 0x459   :  { %12668 = dma.done.wait [#allocation62], 528  }
 0x45a   :  { %12669 = vsyncadd [#allocation62], 4294966768 }
 0x45b   :  { %12670 = dma.done.wait [#allocation65], 32  }
 0x45c   :  { %12671 = vsyncadd [#allocation65], 4294967264 }
 0x45d   :  { %12672 = dma.done.wait [#allocation68], 32  }
 0x45e   :  { %12673 = vsyncadd [#allocation68], 4294967264 }
 0x45f   :  { %12674 = dma.done.wait [#allocation71], 32  }
 0x460   :  { %12675 = vsyncadd [#allocation71], 4294967264 }
 0x461   :  { %12676 = dma.done.wait [#allocation74], 32  }
 0x462   :  { %12677 = vsyncadd [#allocation74], 4294967264 }
 0x463   :  { %12678 = dma.done.wait [#allocation77], 528  }
 0x464   :  { %12679 = vsyncadd [#allocation77], 4294966768 }
 0x465   :  { %12680 = dma.done.wait [#allocation80], 1024  }
 0x466   :  { %12681 = vsyncadd [#allocation80], 4294966272 }
 0x467   :  { %12682 = dma.done.wait [#allocation83], 528  }
 0x468   :  { %12683 = vsyncadd [#allocation83], 4294966768 }
 0x469   :  { %12684 = dma.done.wait [#allocation86], 32  }
 0x46a   :  { %12685 = vsyncadd [#allocation86], 4294967264 }
 0x46b   :  { %12686 = dma.done.wait [#allocation89], 32  }
 0x46c   :  { %12687 = vsyncadd [#allocation89], 4294967264 }
 0x46d   :  { %12688 = dma.done.wait [#allocation92], 32  }
 0x46e   :  { %12689 = vsyncadd [#allocation92], 4294967264 }
 0x46f   :  { %12690 = dma.done.wait [#allocation95], 32  }
 0x470   :  { %12691 = vsyncadd [#allocation95], 4294967264 }
 0x471   :  { %12692 = dma.done.wait [#allocation98], 528  }
 0x472   :  { %12693 = vsyncadd [#allocation98], 4294966768 }
 0x473   :  { %12694 = dma.done.wait [#allocation101], 1024  }
 0x474   :  { %12695 = vsyncadd [#allocation101], 4294966272 }
 0x475   :  { %12696 = dma.done.wait [#allocation104], 144  }
 0x476   :  { %12697 = vsyncadd [#allocation104], 4294967152 }
 0x477   :  { %12698 = dma.done.wait [#allocation107], 32  }
 0x478   :  { %12699 = vsyncadd [#allocation107], 4294967264 }
 0x479   :  { %12700 = dma.done.wait [#allocation110], 80  }
 0x47a   :  { %12701 = vsyncadd [#allocation110], 4294967216 }
 0x47b   :  { %12702 = dma.done.wait [#allocation113], 144  }
 0x47c   :  { %12703 = vsyncadd [#allocation113], 4294967152 }
 0x47d   :  { %12704 = dma.done.wait [#allocation116], 64  }
 0x47e   :  { %12705 = vsyncadd [#allocation116], 4294967232 }
 0x47f   :  { %1308 = sfence }
 0x480   :  { %s14834_s6 = sld [smem:[#allocation158_spill]]  ;;  %vm1410_vm0 = vcmask 58368   ;;  %v1414_v2 = vlaneseq  ;;  %v1436_v13 = vld [vmem:[#allocation114] sm:$0xff]  ;;  %v12886_v14 = vmov 0.0   ;;  %vm12887_vm3 = vmmov 0   ;;  %v1574_v48 = vld [vmem:[#allocation79 + $0x18] sm:$0xff] }
 0x481   :  { %10079 = vmatprep.subr.mxu1 %v12886_v14  ;;  %10081 = vmatprep.mubr.msk.f32.mxu1 %vm12887_vm3, %v12886_v14  ;;  %v1311_v15 = vld [vmem:[#allocation109] sm:$0xf]  ;;  %vm1326_vm4 = vcmask 1043456   ;;  %vm1437_vm5 = vcmask 64512   ;;  %v12888_v22 = vmov 1966171168  }
 0x482   :  { %v13529_v3 = vand.u32 127, %v1414_v2  ;;  %10080 = vmatpush3.msra.mxu1 %v1436_v13  ;;  %10074 = vmatprep.subr.msk.mxu0 %vm1326_vm4, %v1311_v15  ;;  %v1527_v23 = vunpack.c.l.s4 %v12888_v22  ;;  %s1514_s30 = sld [smem:[#allocation3]]  ;;  %v1530_v25 = vshrl.u32 %v1414_v2, 7  ;;  %v13541_v27 = vld [vmem:[#allocation115] sm:$0x7]  ;;  %vm1519_vm7 = vcmask 253952  }
 0x483   :  { %10095 = vmatprep.subr.mxu1 %v12886_v14  ;;  %10075 = vmatpush3.msk.msra.mxu0 %vm1326_vm4, %v1311_v15  ;;  %s9473_s28 = sld [smem:[#allocation3 + $0x1]]  ;;  %v1511_v29 = vld [vmem:[#allocation112] sm:$0x1]  ;;  %v1512_v34 = vld [vmem:[#allocation111] sm:$0x1]  ;;  %vm1319_vm8 = vcmask 31744  }
 0x484   :  { %10084 = vmatprep.subr.mxu0 %v12886_v14  ;;  %v1528_v24 = vunpack.c.0.s8 %v1527_v23  ;;  %s9474_s5 = sld [smem:[#allocation3 + $0x80]]  ;;  %v1573_v52 = vld [vmem:[#allocation79 + $0x10] sm:$0xff]  ;;  %v1572_v55 = vld [vmem:[#allocation79 + $0x8] sm:$0xff]  ;;  %v1571_v57 = vld [vmem:[#allocation79] sm:$0xff]  ;;  %v1544_v59 = vrot.slane %v13541_v27, 2  ;;  %v1560_v60 = vrot.slane %v13541_v27, 1 }
 0x485   :  { %s9475_s1 = sld [smem:[#allocation3 + $0x81]]  ;;  %vm1563_vm9 = vcmask 254977   ;;  %vm1582_vm10 = vcmask 261120   ;;  %vm2155_vm11 = vcmp.ge.s32.totalorder %v13529_v3, 16  ;;  %vm2156_vm12 = vcmp.lt.s32.totalorder %v13529_v3, 24 }
 0x486   :  { %v1409_v0 = vld [vmem:[%s14834_s6] sm:$0x3]  ;;  %v1531_v26 = vsub.s32 %v1528_v24, %v1530_v25  ;;  %s14835_s2 = sld [smem:[#allocation156_spill]]  ;;  %vm1820_vm13 = vcmp.lt.s32.totalorder %v13529_v3, 8  ;;  %vm1912_vm14 = vcmp.ge.s32.totalorder %v13529_v3, 8  ;;  %vm1913_vm15 = vcmp.lt.s32.totalorder %v13529_v3, 16 }
 0x487   :  { %v1411_v1 = vsel %vm1410_vm0, %v1409_v0, -inf  ;;  %s14836_s4 = sld [smem:[#allocation213_spill]]  ;;  %vm13608_vm4 = vmand %vm1912_vm14, %vm1913_vm15  ;;  %v9480_v24 = vld [vmem:[#allocation76] ss:$0 sm:$0xff]  ;;  %vm4408_vm14 = vcmask 130048  }
 0x488   :  { %1412 = vmax.xlane.f32.xlu0 %v1411_v1  ;;  %v1532_v28 = vrot.slane %v13541_v27, %v1531_v26  ;;  %v1515_v30 = vstv %s1514_s30  ;;  %v1740_v1 = vld [vmem:[#allocation81 + $0x18] sm:$0xff]  ;;  %s14843_s20 = sld [smem:[#allocation204_spill]] }
 0x489   :  { %v1516_v31 = vmul.f32 %v1515_v30, %v1511_v29  ;;  %v1522_v32 = vstv %s9473_s28  ;;  %s14844_s10 = sld [smem:[#allocation229_spill]] }
 0x48a   :  { %v1533_v33 = vcombine.high %v1532_v28, %v1532_v28  ;;  %v1523_v35 = vmul.f32 %v1522_v32, %v1511_v29  ;;  %v1549_v36 = vstv %s9474_s5  ;;  %s14845_s19 = sld [smem:[#allocation177_spill]] }
 0x48b   :  { %v1517_v37 = vadd.f32 %v1516_v31, %v1512_v34  ;;  %v1550_v39 = vmul.f32 %v1549_v36, %v1511_v29  ;;  %v1555_v41 = vstv %s9475_s1  ;;  %v13647_v31 = vld [vmem:[#allocation103] sm:$0x3f]  ;;  %s14846_s11 = sld [smem:[#allocation220_spill]] }
 0x48c   :  { %v1540_v38 = vrot.slane %v1533_v33, %v1531_v26  ;;  %v1524_v40 = vadd.f32 %v1523_v35, %v1512_v34  ;;  %v1309_v42 = vld [vmem:[%s14835_s2] sm:$0xff]  ;;  %v1556_v45 = vmul.f32 %v1555_v41, %v1511_v29  ;;  %v1310_v46 = vld [vmem:[%s14835_s2 + $0x8] sm:$0xff]  ;;  %s14847_s15 = sld [smem:[#allocation175_spill]] }
 0x48d   :  { %v1518_v43 = vadd.f32 %v1517_v37, %v13541_v27  ;;  %v1551_v44 = vadd.f32 %v1550_v39, %v1512_v34  ;;  %10076 = vmatprep.mubr.msk.f32.mxu0 %vm1319_vm8, %v1309_v42  ;;  %v1659_v51 = vld [vmem:[%s14836_s4 + $0x18] sm:$0xff]  ;;  %v1658_v53 = vld [vmem:[%s14836_s4 + $0x10] sm:$0xff]  ;;  %v1657_v56 = vld [vmem:[%s14836_s4 + $0x8] sm:$0xff]  ;;  %s14848_s16 = sld [smem:[#allocation178_spill]] }
 0x48e   :  { %v1542_v47 = vadd.f32 %v1540_v38, %v1524_v40  ;;  %v1557_v50 = vadd.f32 %v1556_v45, %v1512_v34  ;;  %10077 = vmatmul.mubr.msk.f32.vlgmr.msra.gmra.mxu0 %vm1319_vm8, %v1310_v46  ;;  %v1656_v58 = vld [vmem:[%s14836_s4] sm:$0xff]  ;;  %s14850_s18 = sld [smem:[#allocation176_spill]] }
 0x48f   :  { %1520 = vst.msk [vmem:[#allocation2] sm:$0x1] %vm1519_vm7, %v1518_v43  ;;  %v1552_v49 = vadd.f32 %v1551_v44, %v13541_v27  ;;  %10085 = vmatpush3.msra.mxu0 %v1574_v48  ;;  %10092 = vmatprep.mubr.msk.f32.mxu0 %vm12887_vm3, %v12886_v14  ;;  %s14851_s14 = sld [smem:[#allocation165_spill]] }
 0x490   :  { %1543 = vst.msk [vmem:[#allocation2 + $0x1] sm:$0x1] %vm1519_vm7, %v1542_v47  ;;  %v1558_v54 = vadd.f32 %v1557_v50, %v1540_v38  ;;  %10086 = vmatprep.subr.mxu0 %v12886_v14  ;;  %s14852_s13 = sld [smem:[#allocation163_spill]] }
 0x491   :  { %1553 = vst.msk [vmem:[#allocation2 + $0x3] sm:$0x1] %vm1519_vm7, %v1552_v49  ;;  %10087 = vmatpush3.msra.mxu0 %v1573_v52  ;;  %s14853_s0 = sld [smem:[#allocation166_spill]] }
 0x492   :  { %1559 = vst.msk [vmem:[#allocation2 + $0x4] sm:$0x1] %vm1519_vm7, %v1558_v54  ;;  %10088 = vmatprep.subr.mxu0 %v12886_v14  ;;  %s14854_s7 = sld [smem:[#allocation160_spill]] }
 0x493   :  { %10089 = vmatpush3.msra.mxu0 %v1572_v55  ;;  %s14855_s24 = sld [smem:[#allocation159_spill]] }
 0x494   :  { %10090 = vmatprep.subr.mxu0 %v12886_v14  ;;  %s14856_s17 = sld [smem:[#allocation164_spill]] }
 0x495   :  { %10091 = vmatpush3.msra.mxu0 %v1571_v57  ;;  %s14857_s21 = sld [smem:[#allocation161_spill]] }
 0x496   :  { %10106 = vmatprep.subr.mxu0 %v12886_v14  ;;  %s14858_s3 = sld [smem:[#allocation168_spill]] }
 0x497   :  { %s14859_s22 = sld [smem:[#allocation169_spill]] }
 0x498   :  { %s14860_s12 = sld [smem:[#allocation194_spill]] }
 0x499   :  { %s14861_s23 = sld [smem:[#allocation181_spill]] }
 0x49a   :  { %s14862_s25 = sld [smem:[#allocation183_spill]] }
 0x49b   :  { %s14863_s26 = sld [smem:[#allocation182_spill]] }
 0x49c   :  { %s14864_s8 = sld [smem:[#allocation186_spill]] }
 0x49d   :  { %s14865_s6 = sld [smem:[#allocation241_spill]] }
 0x511   :  { %v1413_v4 = vpop.xlane.xlu0 %1412 }
 0x512   :  { %vm1416_vm1 = vcmp.ge.f32.partialorder %v1409_v0, %v1413_v4  ;;  %v1739_v4 = vld [vmem:[#allocation81 + $0x10] sm:$0xff] }
 0x513   :  { %v1417_v5 = vsel %vm1416_vm1, %v13529_v3, 8  ;;  %vm2321_vm1 = vcmp.ge.s32.totalorder %v13529_v3, 24 }
 0x514   :  { %v1418_v6 = vsel %vm1410_vm0, %v1417_v5, 2147483647  ;;  %v1738_v5 = vld [vmem:[#allocation81 + $0x8] sm:$0xff]  ;;  %vm13598_vm0 = vmand %vm2155_vm11, %vm2156_vm12  ;;  %vm2574_vm11 = vcmask 259072   ;;  %vm2703_vm12 = vcmask 523264  }
 0x515   :  { %v1420_v7 = vshra.s32 %v1418_v6, 16  ;;  %v1419_v9 = vand.u32 65535, %v1418_v6  ;;  %v1737_v6 = vld [vmem:[#allocation81] sm:$0xff] }
 0x517   :  { %v1422_v8 = vcvt.s32.f32 %v1420_v7  ;;  %v1421_v11 = vcvt.s32.f32 %v1419_v9  ;;  %v9476_v9 = vld [vmem:[#allocation75] ss:$0 sm:$0xff] }
 0x519   :  { %1423 = vmin.xlane.f32.xlu0 %v1422_v8 }
 0x54e   :  { %v13589_v7 = vpop.f32.mrf.mxu0 }
 0x5a2   :  { %v1424_v10 = vpop.xlane.xlu0 %1423 }
 0x5a3   :  { %vm1425_vm2 = vcmp.eq.f32.partialorder %v1422_v8, %v1424_v10  ;;  %v1430_v16 = vcvt.f32.s32 %v1424_v10  ;;  %v13591_v8 = vpop.f32.mrf.mxu0  ;;  %v9478_v10 = vld [vmem:[#allocation72] ss:$0 sm:$0xff] }
 0x5a4   :  { %v1426_v12 = vsel %vm1425_vm2, %v1421_v11, inf  ;;  %vm2322_vm2 = vcmp.lt.s32.totalorder %v13529_v3, 32 }
 0x5a5   :  { %1427 = vmin.xlane.f32.xlu1 %v1426_v12  ;;  %v1431_v18 = vshll.u32 %v1430_v16, 16 }
 0x62e   :  { %v1428_v17 = vpop.xlane.xlu1 %1427 }
 0x62f   :  { %v1429_v19 = vcvt.f32.s32 %v1428_v17 }
 0x631   :  { %v1432_v20 = vadd.s32 %v1431_v18, %v1429_v19 }
 0x633   :  { %vm1433_vm6 = vcmp.eq.s32.totalorder %v13529_v3, %v1432_v20  ;;  %v14550_v20 = vld [vmem:[%s14855_s24 + $0x8] sm:$0xff] }
 0x634   :  { %v9471_v21 = vsel %vm1433_vm6, 1.0, %v12886_v14  ;;  %vm2005_vm6 = vcmask 1045504  }
 0x635   :  { %10082 = vmatmul.mubr.msk.f32.vlgmr.msra.gmra.mxu1 %vm1437_vm5, %v9471_v21  ;;  %vm13616_vm5 = vmand %vm2321_vm1, %vm2322_vm2 }
 0x636   :  { %10103 = vmatprep.mubr.msk.f32.mxu1 %vm12887_vm3, %v12886_v14  ;;  %10096 = vmatpush3.msra.mxu1 %v1659_v51 }
 0x637   :  { %10097 = vmatprep.subr.mxu1 %v12886_v14 }
 0x638   :  { %10098 = vmatpush3.msra.mxu1 %v1658_v53 }
 0x639   :  { %10099 = vmatprep.subr.mxu1 %v12886_v14 }
 0x63a   :  { %10100 = vmatpush3.msra.mxu1 %v1657_v56 }
 0x63b   :  { %10101 = vmatprep.subr.mxu1 %v12886_v14 }
 0x63c   :  { %10102 = vmatpush3.msra.mxu1 %v1656_v58 }
 0x63d   :  { %10117 = vmatprep.subr.mxu1 %v12886_v14 }
 0x6f5   :  { %v1507_v61 = vpop.f32.mrf.mxu1 }
 0x6f6   :  { %v1546_v62 = vadd.f32 %v1544_v59, %v1507_v61  ;;  %v1562_v63 = vadd.f32 %v1560_v60, %v1507_v61 }
 0x6f7   :  { %v10083_v0 = vpop.f32.mrf.mxu1 }
 0x6f8   :  { %1547 = vst.msk [vmem:[#allocation2 + $0x2] sm:$0x1] %vm1519_vm7, %v1546_v62  ;;  %vm1899_vm7 = vcmask 46080  }
 0x6f9   :  { %1564 = vst.msk [vmem:[#allocation2 + $0x4] sm:$0x2] %vm1563_vm9, %v1562_v63  ;;  %vm2001_vm9 = vcmask 48128  }
 0x700   :  { %v13571_v2 = vld [vmem:[#allocation2] sm:$0x3f] }
 0x701   :  { %10093 = vmatmul.mubr.msk.f32.vlgmr.msra.gmra.mxu0 %vm1582_vm10, %v13571_v2  ;;  %10104 = vmatmul.mubr.msk.f32.vlgmr.msra.gmra.mxu1 %vm1582_vm10, %v13571_v2 }
 0x702   :  { %10107 = vmatpush3.msra.mxu0 %v1740_v1  ;;  %10114 = vmatprep.mubr.msk.f32.mxu0 %vm12887_vm3, %v12886_v14 }
 0x703   :  { %10108 = vmatprep.subr.mxu0 %v12886_v14  ;;  %10119 = vmatprep.mubr.msk.f32.mxu1 %vm12887_vm3, %v12886_v14 }
 0x704   :  { %10109 = vmatpush3.msra.mxu0 %v1739_v4 }
 0x705   :  { %10110 = vmatprep.subr.mxu0 %v12886_v14 }
 0x706   :  { %10111 = vmatpush3.msra.mxu0 %v1738_v5 }
 0x707   :  { %10112 = vmatprep.subr.mxu0 %v12886_v14 }
 0x708   :  { %10113 = vmatpush3.msra.mxu0 %v1737_v6 }
 0x709   :  { %10115 = vmatmul.mubr.msk.f32.vlgmr.msra.gmra.mxu0 %vm1582_vm10, %v13571_v2  ;;  %10137 = vmatprep.subr.mxu0 %v12886_v14 }
 0x70a   :  { %10139 = vmatprep.mubr.msk.f32.mxu0 %vm12887_vm3, %v12886_v14 }
 0x7c1   :  { %v1652_v11 = vpop.f32.mrf.mxu0  ;;  %v1733_v12 = vpop.f32.mrf.mxu1 }
 0x7c2   :  { %v1653_v13 = vadd.f32 %v9476_v9, %v1652_v11  ;;  %v1734_v15 = vadd.f32 %v9478_v10, %v1733_v12 }
 0x7c3   :  { %v10094_v17 = vpop.f32.mrf.mxu0  ;;  %v10105_v18 = vpop.f32.mrf.mxu1 }
 0x7c4   :  { %v1818_v19 = vmul.f32 0.35355338, %v1653_v13  ;;  %10118 = vmatpush3.xpose.msk.msra.mxu1 %vm1582_vm10, %v1734_v15  ;;  %10138 = vmatpush3.xpose.msk.msra.mxu0 %vm1582_vm10, %v1734_v15 }
 0x7c5   :  { %10122 = vmatprep.subr.mxu1 %v12886_v14  ;;  %10147 = vmatprep.subr.mxu0 %v12886_v14 }
 0x7c6   :  { %v1822_v21 = vsel %vm1820_vm13, %v1818_v19, 0.0  ;;  %v2158_v22 = vsel %vm13598_vm0, %v1818_v19, 0.0  ;;  %v1915_v27 = vsel %vm13608_vm4, %v1818_v19, 0.0  ;;  %v2324_v28 = vsel %vm13616_vm5, %v1818_v19, 0.0 }
 0x7c7   :  { %10120 = vmatmul.mubr.msk.f32.vlgmr.msra.gmra.mxu1 %vm1582_vm10, %v1822_v21  ;;  %10140 = vmatmul.mubr.msk.f32.vlgmr.msra.gmra.mxu0 %vm1582_vm10, %v2158_v22 }
 0x7c8   :  { %10123 = vmatpush3.xpose.msk.msra.mxu1 %vm1582_vm10, %v1734_v15  ;;  %10148 = vmatpush3.xpose.msk.msra.mxu0 %vm1582_vm10, %v1734_v15 }
 0x7c9   :  { %v1814_v25 = vpop.f32.mrf.mxu0  ;;  %10124 = vmatprep.mubr.msk.f32.mxu1 %vm12887_vm3, %v12886_v14  ;;  %10149 = vmatprep.mubr.msk.f32.mxu0 %vm12887_vm3, %v12886_v14 }
 0x7ca   :  { %v13628_v26 = vadd.f32 %v9480_v24, %v1814_v25  ;;  %10127 = vmatprep.subr.mxu1 %v12886_v14  ;;  %10157 = vmatprep.subr.mxu0 %v12886_v14 }
 0x7cb   :  { %v10116_v29 = vpop.f32.mrf.mxu0  ;;  %10125 = vmatmul.mubr.msk.f32.vlgmr.msra.gmra.mxu1 %vm1582_vm10, %v1915_v27  ;;  %10150 = vmatmul.mubr.msk.f32.vlgmr.msra.gmra.mxu0 %vm1582_vm10, %v2324_v28  ;;  %v2490_v28 = vld [vmem:[#allocation78 + $0x18] sm:$0xff] }
 0x7cc   :  { %v2000_v30 = vsel %vm13608_vm4, %v13628_v26, 0.0  ;;  %10129 = vmatprep.mubr.msk.f32.mxu1 %vm12887_vm3, %v12886_v14  ;;  %10165 = vmatprep.mubr.msk.f32.mxu0 %vm12887_vm3, %v12886_v14  ;;  %v1911_v17 = vsel %vm1820_vm13, %v13628_v26, 0.0  ;;  %v2243_v21 = vsel %vm13598_vm0, %v13628_v26, 0.0  ;;  %v2409_v25 = vsel %vm13616_vm5, %v13628_v26, 0.0  ;;  %v2489_v29 = vld [vmem:[#allocation78 + $0x10] sm:$0xff]  ;;  %v2488_v26 = vld [vmem:[#allocation78 + $0x8] sm:$0xff] }
 0x7cd   :  { %10128 = vmatpush3.msk.msra.mxu1 %vm2005_vm6, %v2000_v30  ;;  %10158 = vmatpush3.msra.mxu0 %v2490_v28  ;;  %v2487_v30 = vld [vmem:[#allocation78] sm:$0xff] }
 0x7ce   :  { %10132 = vmatprep.subr.mxu1 %v12886_v14  ;;  %10159 = vmatprep.subr.mxu0 %v12886_v14 }
 0x7cf   :  { %10160 = vmatpush3.msra.mxu0 %v2489_v29 }
 0x7d0   :  { %10161 = vmatprep.subr.mxu0 %v12886_v14 }
 0x7d1   :  { %10162 = vmatpush3.msra.mxu0 %v2488_v26 }
 0x7d2   :  { %10163 = vmatprep.subr.mxu0 %v12886_v14 }
 0x7d3   :  { %10164 = vmatpush3.msra.mxu0 %v2487_v30 }
 0x7d4   :  { %10179 = vmatprep.subr.mxu0 %v12886_v14 }
 0x887   :  { %v1895_v32 = vpop.f32.mrf.mxu1  ;;  %v2228_v33 = vpop.f32.mrf.mxu0 }
 0x888   :  { %v1896_v34 = vadd.f32 %v1895_v32, %v13647_v31  ;;  %v2229_v44 = vadd.f32 %v2228_v33, %v13647_v31 }
 0x889   :  { %v10121_v35 = vpop.f32.mrf.mxu1  ;;  %v10141_v36 = vpop.f32.mrf.mxu0 }
 0x88a   :  { %v1900_v37 = vsel %vm1899_vm7, %v1896_v34, -inf  ;;  %v2232_v47 = vsel %vm1899_vm7, %v2229_v44, -inf }
 0x88b   :  { %1901 = vmax.xlane.f32.xlu0 %v1900_v37  ;;  %v1985_v38 = vpop.f32.mrf.mxu1  ;;  %v2394_v39 = vpop.f32.mrf.mxu0 }
 0x88c   :  { %v1986_v40 = vadd.f32 %v1985_v38, %v13647_v31  ;;  %v2395_v41 = vadd.f32 %v2394_v39, %v13647_v31 }
 0x88d   :  { %v10126_v42 = vpop.f32.mrf.mxu1  ;;  %v10151_v43 = vpop.f32.mrf.mxu0 }
 0x88e   :  { %v1989_v45 = vsel %vm1899_vm7, %v1986_v40, -inf  ;;  %v2398_v46 = vsel %vm1899_vm7, %v2395_v41, -inf  ;;  %v9498_v43 = vld [vmem:[#allocation73] ss:$0 sm:$0xff] }
 0x88f   :  { %1990 = vmax.xlane.f32.xlu1 %v1989_v45  ;;  %2399 = vmax.xlane.f32.xlu0 %v2398_v46 }
 0x893   :  { %2233 = vmax.xlane.f32.xlu1 %v2232_v47 }
 0x914   :  { %v1902_v48 = vpop.xlane.xlu0 %1901 }
 0x915   :  { %v1903_v49 = vsub.f32 %v1896_v34, %v1902_v48 }
 0x917   :  { %v1904_v50 = vmul.f32 1.442695, %v1903_v49 }
 0x918   :  { %v1991_v51 = vpop.xlane.xlu1 %1990  ;;  %v2400_v52 = vpop.xlane.xlu0 %2399 }
 0x919   :  { %10934 = vpow2.f32 %v1904_v50  ;;  %v1992_v53 = vsub.f32 %v1986_v40, %v1991_v51  ;;  %v2401_v54 = vsub.f32 %v2395_v41, %v2400_v52 }
 0x91b   :  { %v1993_v55 = vmul.f32 1.442695, %v1992_v53  ;;  %v2402_v56 = vmul.f32 1.442695, %v2401_v54  ;;  %v2606_v54 = vld [vmem:[#allocation63 + $0x18] sm:$0xff] }
 0x91c   :  { %v2234_v57 = vpop.xlane.xlu1 %2233 }
 0x91d   :  { %10936 = vpow2.f32 %v1993_v55  ;;  %v2235_v58 = vsub.f32 %v2229_v44, %v2234_v57  ;;  %v2605_v55 = vld [vmem:[#allocation63 + $0x10] sm:$0xff] }
 0x91e   :  { %10938 = vpow2.f32 %v2402_v56  ;;  %v2603_v56 = vld [vmem:[#allocation63] sm:$0xff]  ;;  %v2695_v57 = vld [vmem:[%s14843_s20 + $0x38] sm:$0xff] }
 0x91f   :  { %v2236_v59 = vmul.f32 1.442695, %v2235_v58  ;;  %v2694_v58 = vld [vmem:[%s14843_s20 + $0x30] sm:$0xff] }
 0x921   :  { %10940 = vpow2.f32 %v2236_v59  ;;  %v2693_v59 = vld [vmem:[%s14843_s20 + $0x28] sm:$0xff] }
 0x926   :  { %v10935_v60 = vpop.eup %10934 }
 0x927   :  { %v1906_v61 = vsel %vm1899_vm7, %v10935_v60, 0.0 }
 0x928   :  { %1907 = vadd.xlane.f32.xlu0 %v1906_v61  ;;  %v2691_v61 = vld [vmem:[%s14843_s20 + $0x18] sm:$0xff] }
 0x92a   :  { %v10937_v62 = vpop.eup %10936 }
 0x92b   :  { %v10939_v63 = vpop.eup %10938  ;;  %v1995_v0 = vsel %vm1899_vm7, %v10937_v62, 0.0 }
 0x92c   :  { %1996 = vadd.xlane.f32.xlu1 %v1995_v0  ;;  %v2404_v1 = vsel %vm1899_vm7, %v10939_v63, 0.0 }
 0x92d   :  { %2405 = vadd.xlane.f32.xlu0 %v2404_v1 }
 0x92e   :  { %v10941_v4 = vpop.eup %10940 }
 0x92f   :  { %v2238_v5 = vsel %vm1899_vm7, %v10941_v4, 0.0 }
 0x930   :  { %2239 = vadd.xlane.f32.xlu1 %v2238_v5 }
 0x9b1   :  { %v1908_v6 = vpop.xlane.xlu0 %1907 }
 0x9b5   :  { %v1997_v9 = vpop.xlane.xlu1 %1996 }
 0x9b6   :  { %10942 = vrcp.f32 %v1997_v9  ;;  %v2406_v11 = vpop.xlane.xlu0 %2405 }
 0x9b7   :  { %10944 = vrcp.f32 %v1908_v6  ;;  %v9501_v6 = vld [vmem:[#allocation66] ss:$0 sm:$0xff] }
 0x9b9   :  { %v2240_v10 = vpop.xlane.xlu1 %2239 }
 0x9ba   :  { %10946 = vrcp.f32 %v2240_v10 }
 0x9bb   :  { %10948 = vrcp.f32 %v2406_v11  ;;  %v2690_v11 = vld [vmem:[%s14843_s20 + $0x10] sm:$0xff] }
 0x9c3   :  { %v10943_v12 = vpop.eup %10942 }
 0x9c4   :  { %v1999_v13 = vmul.f32 %v10943_v12, %v10937_v62  ;;  %v10945_v15 = vpop.eup %10944  ;;  %v2689_v12 = vld [vmem:[%s14843_s20 + $0x8] sm:$0xff] }
 0x9c5   :  { %v1910_v18 = vmul.f32 %v10945_v15, %v10935_v60  ;;  %v2692_v60 = vld [vmem:[%s14843_s20 + $0x20] sm:$0xff]  ;;  %v9502_v15 = vld [vmem:[#allocation61] ss:$0 sm:$0xff] }
 0x9c6   :  { %10130 = vmatmul.mubr.msk.f32.vlgmr.msra.gmra.mxu1 %vm2001_vm9, %v1999_v13  ;;  %v2688_v13 = vld [vmem:[%s14843_s20] sm:$0xff] }
 0x9c7   :  { %10133 = vmatpush3.msk.msra.mxu1 %vm2005_vm6, %v1911_v17  ;;  %10134 = vmatprep.mubr.msk.f32.mxu1 %vm12887_vm3, %v12886_v14  ;;  %v10947_v19 = vpop.eup %10946 }
 0x9c8   :  { %10142 = vmatprep.subr.mxu1 %v12886_v14  ;;  %v2242_v22 = vmul.f32 %v10947_v19, %v10941_v4  ;;  %v10949_v24 = vpop.eup %10948  ;;  %v9500_v4 = vld [vmem:[#allocation67] ss:$0 sm:$0xff] }
 0x9c9   :  { %v2408_v27 = vmul.f32 %v10949_v24, %v10939_v63 }
 0x9ca   :  { %10135 = vmatmul.mubr.msk.f32.vlgmr.msra.gmra.mxu1 %vm2001_vm9, %v1910_v18 }
 0x9cb   :  { %10143 = vmatpush3.msk.msra.mxu1 %vm2005_vm6, %v2243_v21  ;;  %10144 = vmatprep.mubr.msk.f32.mxu1 %vm12887_vm3, %v12886_v14 }
 0x9cc   :  { %10152 = vmatprep.subr.mxu1 %v12886_v14 }
 0x9ce   :  { %10145 = vmatmul.mubr.msk.f32.vlgmr.msra.gmra.mxu1 %vm2001_vm9, %v2242_v22  ;;  %v9504_v22 = vld [vmem:[#allocation64] ss:$0 sm:$0xff] }
 0x9cf   :  { %10153 = vmatpush3.msk.msra.mxu1 %vm2005_vm6, %v2409_v25  ;;  %10154 = vmatprep.mubr.msk.f32.mxu1 %vm12887_vm3, %v12886_v14 }
 0x9d0   :  { %10168 = vmatprep.subr.mxu1 %v12886_v14 }
 0x9d2   :  { %10155 = vmatmul.mubr.msk.f32.vlgmr.msra.gmra.mxu1 %vm2001_vm9, %v2408_v27 }
 0x9d3   :  { %10176 = vmatprep.mubr.msk.f32.mxu1 %vm12887_vm3, %v12886_v14  ;;  %10169 = vmatpush3.msra.mxu1 %v2606_v54  ;;  %v2892_v54 = vld [vmem:[%s14844_s10 + $0x8] sm:$0xff] }
 0x9d4   :  { %10170 = vmatprep.subr.mxu1 %v12886_v14 }
 0x9d5   :  { %10171 = vmatpush3.msra.mxu1 %v2605_v55  ;;  %v2891_v55 = vld [vmem:[%s14844_s10] sm:$0xff] }
 0x9d6   :  { %10172 = vmatprep.subr.mxu1 %v12886_v14 }
 0xa86   :  { %v2075_v32 = vpop.f32.mrf.mxu1 }
 0xa88   :  { %v10131_v33 = vpop.f32.mrf.mxu1 }
 0xa8a   :  { %v2151_v34 = vpop.f32.mrf.mxu1 }
 0xa8b   :  { %v2152_v37 = vadd.f32 %v2151_v34, %v2075_v32 }
 0xa8c   :  { %v10136_v35 = vpop.f32.mrf.mxu1 }
 0xa8d   :  { %v2810_v35 = vld [vmem:[#allocation100 + $0x18] sm:$0xff] }
 0xa8e   :  { %v2316_v36 = vpop.f32.mrf.mxu1 }
 0xa8f   :  { %v2320_v39 = vadd.f32 %v2316_v36, %v2152_v37  ;;  %v2975_v36 = vld [vmem:[#allocation102 + $0x18] sm:$0xff]  ;;  %v2809_v37 = vld [vmem:[#allocation100 + $0x10] sm:$0xff] }
 0xa90   :  { %v10146_v38 = vpop.f32.mrf.mxu1 }
 0xa91   :  { %v2974_v38 = vld [vmem:[#allocation102 + $0x10] sm:$0xff] }
 0xa92   :  { %v2482_v40 = vpop.f32.mrf.mxu1 }
 0xa93   :  { %v2486_v41 = vadd.f32 %v2482_v40, %v2320_v39  ;;  %v2808_v39 = vld [vmem:[#allocation100 + $0x8] sm:$0xff] }
 0xa94   :  { %v10156_v42 = vpop.f32.mrf.mxu1  ;;  %v2973_v40 = vld [vmem:[#allocation102 + $0x8] sm:$0xff] }
 0xa95   :  { %10166 = vmatmul.mubr.msk.f32.vlgmr.msra.gmra.mxu0 %vm1582_vm10, %v2486_v41  ;;  %v2807_v41 = vld [vmem:[#allocation100] sm:$0xff] }
 0xa96   :  { %10195 = vmatprep.mubr.msk.f32.mxu0 %vm12887_vm3, %v12886_v14  ;;  %10180 = vmatpush3.msra.mxu0 %v2695_v57  ;;  %v2972_v42 = vld [vmem:[#allocation102] sm:$0xff] }
 0xa97   :  { %10181 = vmatprep.subr.mxu0 %v12886_v14 }
 0xa98   :  { %10182 = vmatpush3.msra.mxu0 %v2694_v58 }
 0xa99   :  { %10183 = vmatprep.subr.mxu0 %v12886_v14 }
 0xa9a   :  { %10184 = vmatpush3.msra.mxu0 %v2693_v59  ;;  %v9508_v59 = vld [vmem:[#allocation96] ss:$0 sm:$0xff] }
 0xa9b   :  { %10185 = vmatprep.subr.mxu0 %v12886_v14 }
 0xa9c   :  { %10186 = vmatpush3.msra.mxu0 %v2692_v60 }
 0xa9d   :  { %10187 = vmatprep.subr.mxu0 %v12886_v14 }
 0xa9e   :  { %10188 = vmatpush3.msra.mxu0 %v2691_v61 }
 0xa9f   :  { %10189 = vmatprep.subr.mxu0 %v12886_v14 }
 0xaa0   :  { %10190 = vmatpush3.msra.mxu0 %v2690_v11 }
 0xaa1   :  { %10191 = vmatprep.subr.mxu0 %v12886_v14 }
 0xaa2   :  { %10192 = vmatpush3.msra.mxu0 %v2689_v12 }
 0xaa3   :  { %10193 = vmatprep.subr.mxu0 %v12886_v14 }
 0xaa4   :  { %10194 = vmatpush3.msra.mxu0 %v2688_v13 }
 0xaa5   :  { %10220 = vmatprep.subr.mxu0 %v12886_v14 }
 0xb55   :  { %v2567_v44 = vpop.f32.mrf.mxu0 }
 0xb56   :  { %v2568_v45 = vadd.f32 %v9498_v43, %v2567_v44 }
 0xb57   :  { %v10167_v46 = vpop.f32.mrf.mxu0 }
 0xb58   :  { %v2571_v47 = vadd.f32 %v2568_v45, %v13571_v2  ;;  %v2604_v2 = vld [vmem:[#allocation63 + $0x8] sm:$0xff] }
 0xb59   :  { %10173 = vmatpush3.msra.mxu1 %v2604_v2  ;;  %v9512_v2 = vld [vmem:[#allocation97] ss:$0 sm:$0xff] }
 0xb5a   :  { %v2575_v48 = vsel %vm2574_vm11, %v2571_v47, 0.0  ;;  %10174 = vmatprep.subr.mxu1 %v12886_v14 }
 0xb5b   :  { %2576 = vadd.xlane.f32.xlu1 %v2575_v48  ;;  %10175 = vmatpush3.msra.mxu1 %v2603_v56 }
 0xb5c   :  { %10198 = vmatprep.subr.mxu1 %v12886_v14 }
 0xbe4   :  { %v2577_v49 = vpop.xlane.xlu1 %2576 }
 0xbe5   :  { %v2579_v50 = vmul.f32 0.03125, %v2577_v49  ;;  %v9507_v49 = vld [vmem:[#allocation69] ss:$0 sm:$0xff] }
 0xbe7   :  { %v2580_v51 = vsub.f32 %v2571_v47, %v2579_v50  ;;  %v9506_v47 = vld [vmem:[#allocation70] ss:$0 sm:$0xff] }
 0xbe9   :  { %v2581_v52 = vmul.f32 %v2580_v51, %v2580_v51 }
 0xbeb   :  { %v2582_v53 = vsel %vm2574_vm11, %v2581_v52, 0.0  ;;  %v2894_v52 = vld [vmem:[%s14844_s10 + $0x18] sm:$0xff] }
 0xbec   :  { %2583 = vadd.xlane.f32.xlu0 %v2582_v53  ;;  %v2893_v53 = vld [vmem:[%s14844_s10 + $0x10] sm:$0xff] }
 0xc75   :  { %v2584_v62 = vpop.xlane.xlu0 %2583 }
 0xc76   :  { %v2585_v63 = vmul.f32 0.03125, %v2584_v62 }
 0xc78   :  { %v2586_v0 = vadd.f32 1e-05, %v2585_v63 }
 0xc7a   :  { %10950 = vrsqrt.f32 %v2586_v0  ;;  %v9510_v0 = vld [vmem:[#allocation93] ss:$0 sm:$0xff] }
 0xc87   :  { %v10951_v1 = vpop.eup %10950 }
 0xc88   :  { %v2588_v5 = vmul.f32 %v10951_v1, %v2580_v51 }
 0xc8a   :  { %v2595_v9 = vmul.f32 %v9500_v4, %v2588_v5 }
 0xc8c   :  { %v2602_v10 = vadd.f32 %v9501_v6, %v2595_v9 }
 0xc8e   :  { %10177 = vmatmul.mubr.msk.f32.vlgmr.msra.gmra.mxu1 %vm1582_vm10, %v2602_v10 }
 0xc8f   :  { %10206 = vmatprep.mubr.msk.f32.mxu1 %vm12887_vm3, %v12886_v14  ;;  %10199 = vmatpush3.msra.mxu1 %v2810_v35 }
 0xc90   :  { %10200 = vmatprep.subr.mxu1 %v12886_v14 }
 0xc91   :  { %10201 = vmatpush3.msra.mxu1 %v2809_v37 }
 0xc92   :  { %10202 = vmatprep.subr.mxu1 %v12886_v14 }
 0xc93   :  { %10203 = vmatpush3.msra.mxu1 %v2808_v39 }
 0xc94   :  { %10204 = vmatprep.subr.mxu1 %v12886_v14 }
 0xc95   :  { %10205 = vmatpush3.msra.mxu1 %v2807_v41 }
 0xc96   :  { %10209 = vmatprep.subr.mxu1 %v12886_v14 }
 0xd4e   :  { %v2683_v17 = vpop.f32.mrf.mxu1 }
 0xd4f   :  { %v2684_v18 = vadd.f32 %v9502_v15, %v2683_v17 }
 0xd50   :  { %v10178_v19 = vpop.f32.mrf.mxu1 }
 0xd51   :  { %v2687_v21 = vmax.f32 %v2684_v18, 0.0 }
 0xd53   :  { %10196 = vmatmul.mubr.msk.f32.vlgmr.msra.gmra.mxu0 %vm2703_vm12, %v2687_v21 }
 0xd54   :  { %10228 = vmatprep.mubr.msk.f32.mxu0 %vm12887_vm3, %v12886_v14  ;;  %10221 = vmatpush3.msra.mxu0 %v2975_v36 }
 0xd55   :  { %10222 = vmatprep.subr.mxu0 %v12886_v14 }
 0xd56   :  { %10223 = vmatpush3.msra.mxu0 %v2974_v38 }
 0xd57   :  { %10224 = vmatprep.subr.mxu0 %v12886_v14 }
 0xd58   :  { %10225 = vmatpush3.msra.mxu0 %v2973_v40 }
 0xd59   :  { %10226 = vmatprep.subr.mxu0 %v12886_v14 }
 0xd5a   :  { %10227 = vmatpush3.msra.mxu0 %v2972_v42 }
 0xd5b   :  { %10241 = vmatprep.subr.mxu0 %v12886_v14 }
 0xe13   :  { %v2773_v24 = vpop.f32.mrf.mxu0 }
 0xe14   :  { %v2774_v25 = vadd.f32 %v9504_v22, %v2773_v24 }
 0xe15   :  { %v10197_v27 = vpop.f32.mrf.mxu0 }
 0xe16   :  { %v2777_v28 = vadd.f32 %v2774_v25, %v2602_v10 }
 0xe18   :  { %v2780_v29 = vsel %vm2574_vm11, %v2777_v28, 0.0 }
 0xe19   :  { %2781 = vadd.xlane.f32.xlu1 %v2780_v29 }
 0xea2   :  { %v2782_v26 = vpop.xlane.xlu1 %2781 }
 0xea3   :  { %v2783_v30 = vmul.f32 0.03125, %v2782_v26 }
 0xea5   :  { %v2784_v32 = vsub.f32 %v2777_v28, %v2783_v30 }
 0xea7   :  { %v2785_v33 = vmul.f32 %v2784_v32, %v2784_v32 }
 0xea9   :  { %v2786_v34 = vsel %vm2574_vm11, %v2785_v33, 0.0 }
 0xeaa   :  { %2787 = vadd.xlane.f32.xlu0 %v2786_v34 }
 0xf33   :  { %v2788_v43 = vpop.xlane.xlu0 %2787 }
 0xf34   :  { %v2789_v44 = vmul.f32 0.03125, %v2788_v43 }
 0xf36   :  { %v2790_v45 = vadd.f32 1e-05, %v2789_v44 }
 0xf38   :  { %10952 = vrsqrt.f32 %v2790_v45 }
 0xf45   :  { %v10953_v46 = vpop.eup %10952 }
 0xf46   :  { %v2792_v48 = vmul.f32 %v10953_v46, %v2784_v32 }
 0xf48   :  { %v2799_v50 = vmul.f32 %v9506_v47, %v2792_v48 }
 0xf4a   :  { %v13734_v51 = vadd.f32 %v9507_v49, %v2799_v50 }
 0xf4c   :  { %10207 = vmatmul.mubr.msk.f32.vlgmr.msra.gmra.mxu1 %vm1582_vm10, %v13734_v51  ;;  %10229 = vmatmul.mubr.msk.f32.vlgmr.msra.gmra.mxu0 %vm1582_vm10, %v13734_v51 }
 0xf4d   :  { %10210 = vmatpush3.msra.mxu1 %v2894_v52  ;;  %10217 = vmatprep.mubr.msk.f32.mxu1 %vm12887_vm3, %v12886_v14 }
 0xf4e   :  { %10211 = vmatprep.subr.mxu1 %v12886_v14  ;;  %10243 = vmatprep.mubr.msk.f32.mxu0 %vm12887_vm3, %v12886_v14 }
 0xf4f   :  { %10212 = vmatpush3.msra.mxu1 %v2893_v53 }
 0xf50   :  { %10213 = vmatprep.subr.mxu1 %v12886_v14 }
 0xf51   :  { %10214 = vmatpush3.msra.mxu1 %v2892_v54 }
 0xf52   :  { %10215 = vmatprep.subr.mxu1 %v12886_v14 }
 0xf53   :  { %10216 = vmatpush3.msra.mxu1 %v2891_v55 }
 0xf54   :  { %10218 = vmatmul.mubr.msk.f32.vlgmr.msra.gmra.mxu1 %vm1582_vm10, %v13734_v51  ;;  %10231 = vmatprep.subr.mxu1 %v12886_v14 }
 0xf55   :  { %10233 = vmatprep.mubr.msk.f32.mxu1 %vm12887_vm3, %v12886_v14 }
0x100c   :  { %v2887_v56 = vpop.f32.mrf.mxu1  ;;  %v3049_v57 = vpop.f32.mrf.mxu0 }
0x100d   :  { %v13756_v58 = vadd.f32 %v9512_v2, %v3049_v57  ;;  %v2888_v63 = vadd.f32 %v9508_v59, %v2887_v56 }
0x100e   :  { %v10208_v60 = vpop.f32.mrf.mxu1  ;;  %v10230_v61 = vpop.f32.mrf.mxu0 }
0x100f   :  { %v3228_v62 = vsel %vm13608_vm4, %v13756_v58, 0.0  ;;  %v3053_v4 = vmul.f32 0.35355338, %v2888_v63  ;;  %v3142_v11 = vsel %vm1820_vm13, %v13756_v58, 0.0 }
0x1010   :  { %10242 = vmatpush3.msk.msra.mxu0 %vm2005_vm6, %v3228_v62  ;;  %v3466_v62 = vsel %vm13598_vm0, %v13756_v58, 0.0 }
0x1011   :  { %10251 = vmatprep.subr.mxu0 %v12886_v14  ;;  %v3054_v9 = vsel %vm1820_vm13, %v3053_v4, 0.0  ;;  %v3143_v10 = vsel %vm13608_vm4, %v3053_v4, 0.0  ;;  %v3381_v33 = vsel %vm13598_vm0, %v3053_v4, 0.0  ;;  %v3544_v34 = vsel %vm13616_vm5, %v3053_v4, 0.0 }
0x1014   :  { %v2968_v1 = vpop.f32.mrf.mxu1 }
0x1015   :  { %v2969_v5 = vadd.f32 %v9510_v0, %v2968_v1 }
0x1016   :  { %v10219_v6 = vpop.f32.mrf.mxu1 }
0x1017   :  { %10232 = vmatpush3.xpose.msk.msra.mxu1 %vm1582_vm10, %v2969_v5  ;;  %v3629_v6 = vsel %vm13616_vm5, %v13756_v58, 0.0  ;;  %v3708_v58 = vld [vmem:[#allocation99 + $0x8] sm:$0xff] }
0x1018   :  { %10236 = vmatprep.subr.mxu1 %v12886_v14 }
0x101a   :  { %10234 = vmatmul.mubr.msk.f32.vlgmr.msra.gmra.mxu1 %vm1582_vm10, %v3054_v9 }
0x101b   :  { %10237 = vmatpush3.xpose.msk.msra.mxu1 %vm1582_vm10, %v2969_v5  ;;  %10238 = vmatprep.mubr.msk.f32.mxu1 %vm12887_vm3, %v12886_v14 }
0x101c   :  { %10246 = vmatprep.subr.mxu1 %v12886_v14 }
0x101e   :  { %10239 = vmatmul.mubr.msk.f32.vlgmr.msra.gmra.mxu1 %vm1582_vm10, %v3143_v10 }
0x101f   :  { %10247 = vmatpush3.msk.msra.mxu1 %vm2005_vm6, %v3142_v11  ;;  %10248 = vmatprep.mubr.msk.f32.mxu1 %vm12887_vm3, %v12886_v14 }
0x1020   :  { %10256 = vmatprep.subr.mxu1 %v12886_v14 }
0x10da   :  { %v3127_v12 = vpop.f32.mrf.mxu1 }
0x10db   :  { %v3128_v19 = vadd.f32 %v3127_v12, %v13647_v31 }
0x10dc   :  { %v10235_v13 = vpop.f32.mrf.mxu1 }
0x10dd   :  { %v3131_v22 = vsel %vm1899_vm7, %v3128_v19, -inf  ;;  %v3710_v13 = vld [vmem:[#allocation99 + $0x18] sm:$0xff] }
0x10de   :  { %v3213_v15 = vpop.f32.mrf.mxu1 }
0x10df   :  { %v3214_v17 = vadd.f32 %v3213_v15, %v13647_v31  ;;  %v3709_v15 = vld [vmem:[#allocation99 + $0x10] sm:$0xff] }
0x10e0   :  { %v10240_v18 = vpop.f32.mrf.mxu1 }
0x10e1   :  { %v3217_v21 = vsel %vm1899_vm7, %v3214_v17, -inf }
0x10e2   :  { %3218 = vmax.xlane.f32.xlu1 %v3217_v21 }
0x10e6   :  { %3132 = vmax.xlane.f32.xlu1 %v3131_v22 }
0x116b   :  { %v3219_v24 = vpop.xlane.xlu1 %3218 }
0x116c   :  { %v3220_v25 = vsub.f32 %v3214_v17, %v3219_v24  ;;  %v3707_v17 = vld [vmem:[#allocation99] sm:$0xff] }
0x116e   :  { %v3221_v27 = vmul.f32 1.442695, %v3220_v25 }
0x116f   :  { %v3133_v35 = vpop.xlane.xlu1 %3132 }
0x1170   :  { %10954 = vpow2.f32 %v3221_v27  ;;  %v3134_v36 = vsub.f32 %v3128_v19, %v3133_v35 }
0x1172   :  { %v3135_v37 = vmul.f32 1.442695, %v3134_v36 }
0x117d   :  { %v10955_v28 = vpop.eup %10954 }
0x117e   :  { %v3223_v29 = vsel %vm1899_vm7, %v10955_v28, 0.0 }
0x117f   :  { %3224 = vadd.xlane.f32.xlu0 %v3223_v29 }
0x1208   :  { %v3225_v26 = vpop.xlane.xlu0 %3224 }
0x1209   :  { %10956 = vrcp.f32 %v3225_v26 }
0x120a   :  { %10958 = vpow2.f32 %v3135_v37 }
0x1216   :  { %v10957_v30 = vpop.eup %10956 }
0x1217   :  { %v3227_v32 = vmul.f32 %v10957_v30, %v10955_v28  ;;  %v10959_v44 = vpop.eup %10958  ;;  %v9530_v28 = vld [vmem:[#allocation94] ss:$0 sm:$0xff] }
0x1218   :  { %v3137_v48 = vsel %vm1899_vm7, %v10959_v44, 0.0 }
0x1219   :  { %10244 = vmatmul.mubr.msk.f32.vlgmr.msra.gmra.mxu0 %vm2001_vm9, %v3227_v32 }
0x121a   :  { %10252 = vmatpush3.xpose.msk.msra.mxu0 %vm1582_vm10, %v2969_v5  ;;  %10253 = vmatprep.mubr.msk.f32.mxu0 %vm12887_vm3, %v12886_v14 }
0x121b   :  { %10261 = vmatprep.subr.mxu0 %v12886_v14 }
0x121d   :  { %10254 = vmatmul.mubr.msk.f32.vlgmr.msra.gmra.mxu0 %vm1582_vm10, %v3381_v33 }
0x121e   :  { %10262 = vmatpush3.xpose.msk.msra.mxu0 %vm1582_vm10, %v2969_v5  ;;  %10263 = vmatprep.mubr.msk.f32.mxu0 %vm12887_vm3, %v12886_v14 }
0x121f   :  { %10271 = vmatprep.subr.mxu0 %v12886_v14 }
0x1221   :  { %10264 = vmatmul.mubr.msk.f32.vlgmr.msra.gmra.mxu0 %vm1582_vm10, %v3544_v34 }
0x1222   :  { %10279 = vmatprep.mubr.msk.f32.mxu0 %vm12887_vm3, %v12886_v14  ;;  %10272 = vmatpush3.msra.mxu0 %v3710_v13  ;;  %v9534_v13 = vld [vmem:[#allocation82] ss:$0 sm:$0xff] }
0x1223   :  { %10273 = vmatprep.subr.mxu0 %v12886_v14 }
0x1224   :  { %10274 = vmatpush3.msra.mxu0 %v3709_v15 }
0x1225   :  { %10275 = vmatprep.subr.mxu0 %v12886_v14 }
0x1226   :  { %10276 = vmatpush3.msra.mxu0 %v3708_v58 }
0x1227   :  { %10277 = vmatprep.subr.mxu0 %v12886_v14 }
0x1228   :  { %10278 = vmatpush3.msra.mxu0 %v3707_v17 }
0x1229   :  { %10293 = vmatprep.subr.mxu0 %v12886_v14 }
0x12d9   :  { %v13804_v38 = vpop.f32.mrf.mxu0 }
0x12db   :  { %v10245_v39 = vpop.f32.mrf.mxu0 }
0x12dc   :  { %v3824_v39 = vld [vmem:[#allocation84 + $0x18] sm:$0xff] }
0x12dd   :  { %v3451_v40 = vpop.f32.mrf.mxu0 }
0x12de   :  { %v3452_v41 = vadd.f32 %v3451_v40, %v13647_v31  ;;  %v3823_v40 = vld [vmem:[#allocation84 + $0x10] sm:$0xff] }
0x12df   :  { %v10255_v42 = vpop.f32.mrf.mxu0 }
0x12e0   :  { %v3455_v43 = vsel %vm1899_vm7, %v3452_v41, -inf  ;;  %v4056_v42 = vld [vmem:[%s14845_s19 + $0x18] sm:$0xff] }
0x12e1   :  { %3456 = vmax.xlane.f32.xlu0 %v3455_v43  ;;  %v3614_v45 = vpop.f32.mrf.mxu0  ;;  %v3913_v43 = vld [vmem:[%s14846_s11 + $0x38] sm:$0xff] }
0x12e2   :  { %v3615_v46 = vadd.f32 %v3614_v45, %v13647_v31  ;;  %v3911_v45 = vld [vmem:[%s14846_s11 + $0x28] sm:$0xff] }
0x12e3   :  { %v10265_v47 = vpop.f32.mrf.mxu0 }
0x12e4   :  { %v3618_v49 = vsel %vm1899_vm7, %v3615_v46, -inf  ;;  %v3909_v47 = vld [vmem:[%s14846_s11 + $0x18] sm:$0xff] }
0x12e5   :  { %3138 = vadd.xlane.f32.xlu0 %v3137_v48  ;;  %3619 = vmax.xlane.f32.xlu1 %v3618_v49  ;;  %v3908_v48 = vld [vmem:[%s14846_s11 + $0x10] sm:$0xff] }
0x136a   :  { %v3457_v50 = vpop.xlane.xlu0 %3456 }
0x136b   :  { %v3458_v52 = vsub.f32 %v3452_v41, %v3457_v50  ;;  %v3821_v41 = vld [vmem:[#allocation84] sm:$0xff] }
0x136d   :  { %v3459_v53 = vmul.f32 1.442695, %v3458_v52 }
0x136e   :  { %v3139_v54 = vpop.xlane.xlu0 %3138  ;;  %v3620_v55 = vpop.xlane.xlu1 %3619 }
0x136f   :  { %10960 = vpow2.f32 %v3459_v53  ;;  %v3621_v2 = vsub.f32 %v3615_v46, %v3620_v55  ;;  %v3910_v46 = vld [vmem:[%s14846_s11 + $0x20] sm:$0xff]  ;;  %v9467_v53 = vld [vmem:[#allocation108] ss:$0 sm:$0xff] }
0x1370   :  { %10962 = vrcp.f32 %v3139_v54  ;;  %v9532_v55 = vld [vmem:[#allocation88] ss:$0 sm:$0xff] }
0x1371   :  { %v3622_v56 = vmul.f32 1.442695, %v3621_v2 }
0x1373   :  { %10964 = vpow2.f32 %v3622_v56  ;;  %v1397_v56 = vadd.f32 %v9467_v53, %v13591_v8  ;;  %v1402_v8 = vadd.f32 %v13589_v7, %v9467_v53  ;;  %v4146_v7 = vld [vmem:[%s14847_s15 + $0x8] sm:$0xff] }
0x137c   :  { %v10961_v57 = vpop.eup %10960 }
0x137d   :  { %v10963_v59 = vpop.eup %10962  ;;  %v3461_v31 = vsel %vm1899_vm7, %v10961_v57, 0.0 }
0x137e   :  { %3462 = vadd.xlane.f32.xlu1 %v3461_v31  ;;  %v3141_v60 = vmul.f32 %v10963_v59, %v10959_v44  ;;  %v3912_v44 = vld [vmem:[%s14846_s11 + $0x30] sm:$0xff]  ;;  %v1405_v59 = vld [vmem:[%s13402_s29] sm:$0xff] }
0x1380   :  { %v10965_v61 = vpop.eup %10964  ;;  %10249 = vmatmul.mubr.msk.f32.vlgmr.msra.gmra.mxu1 %vm2001_vm9, %v3141_v60 }
0x1381   :  { %10257 = vmatpush3.msk.msra.mxu1 %vm2005_vm6, %v3466_v62  ;;  %v3624_v63 = vsel %vm1899_vm7, %v10965_v61, 0.0  ;;  %10258 = vmatprep.mubr.msk.f32.mxu1 %vm12887_vm3, %v12886_v14  ;;  %v4055_v62 = vld [vmem:[%s14845_s19 + $0x10] sm:$0xff] }
0x1382   :  { %3625 = vadd.xlane.f32.xlu0 %v3624_v63  ;;  %10266 = vmatprep.subr.mxu1 %v12886_v14  ;;  %v4054_v63 = vld [vmem:[%s14845_s19 + $0x8] sm:$0xff] }
0x1407   :  { %v3463_v0 = vpop.xlane.xlu1 %3462 }
0x1408   :  { %10966 = vrcp.f32 %v3463_v0  ;;  %v1406_v0 = vld [vmem:[%s13402_s29 + $0x8] sm:$0xff]  ;;  %s14849_s29 = sld [smem:[#allocation198_spill]] }
0x140b   :  { %v3626_v1 = vpop.xlane.xlu0 %3625 }
0x140c   :  { %10968 = vrcp.f32 %v3626_v1  ;;  %v4053_v1 = vld [vmem:[%s14845_s19] sm:$0xff] }
0x140e   :  { %v13991_v53 = vld [vmem:[%s14849_s29] sm:$0xff] }
0x1415   :  { %v10967_v4 = vpop.eup %10966 }
0x1416   :  { %v3465_v5 = vmul.f32 %v10967_v4, %v10961_v57  ;;  %v9533_v57 = vld [vmem:[#allocation87] ss:$0 sm:$0xff]  ;;  %v4148_v4 = vld [vmem:[%s14847_s15 + $0x18] sm:$0xff] }
0x1418   :  { %10259 = vmatmul.mubr.msk.f32.vlgmr.msra.gmra.mxu1 %vm2001_vm9, %v3465_v5  ;;  %v13875_v5 = vadd.f32 %v1406_v0, %v1402_v8 }
0x1419   :  { %v10969_v9 = vpop.eup %10968  ;;  %10267 = vmatpush3.msk.msra.mxu1 %vm2005_vm6, %v3629_v6  ;;  %10268 = vmatprep.mubr.msk.f32.mxu1 %vm12887_vm3, %v12886_v14  ;;  %v4147_v6 = vld [vmem:[%s14847_s15 + $0x10] sm:$0xff] }
0x141a   :  { %v3628_v10 = vmul.f32 %v10969_v9, %v10965_v61  ;;  %10282 = vmatprep.subr.mxu1 %v12886_v14  ;;  %v13863_v61 = vadd.f32 %v1405_v59, %v1397_v56  ;;  %v4145_v9 = vld [vmem:[%s14847_s15] sm:$0xff] }
0x141c   :  { %10269 = vmatmul.mubr.msk.f32.vlgmr.msra.gmra.mxu1 %vm2001_vm9, %v3628_v10  ;;  %v3907_v10 = vld [vmem:[%s14846_s11 + $0x8] sm:$0xff] }
0x141d   :  { %10290 = vmatprep.mubr.msk.f32.mxu1 %vm12887_vm3, %v12886_v14  ;;  %10283 = vmatpush3.msra.mxu1 %v3824_v39 }
0x141e   :  { %10284 = vmatprep.subr.mxu1 %v12886_v14 }
0x141f   :  { %10285 = vmatpush3.msra.mxu1 %v3823_v40 }
0x1420   :  { %10286 = vmatprep.subr.mxu1 %v12886_v14 }
0x1440   :  { %v3377_v11 = vpop.f32.mrf.mxu1 }
0x1441   :  { %v3378_v19 = vadd.f32 %v3377_v11, %v13804_v38  ;;  %v3906_v11 = vld [vmem:[%s14846_s11] sm:$0xff] }
0x1442   :  { %v10250_v12 = vpop.f32.mrf.mxu1 }
0x1443   :  { %v4234_v12 = vld [vmem:[%s14848_s16 + $0x18] sm:$0xff] }
0x14d8   :  { %v3539_v18 = vpop.f32.mrf.mxu1 }
0x14d9   :  { %v3543_v22 = vadd.f32 %v3539_v18, %v3378_v19  ;;  %v4233_v19 = vld [vmem:[%s14848_s16 + $0x10] sm:$0xff] }
0x14da   :  { %v10260_v21 = vpop.f32.mrf.mxu1 }
0x14db   :  { %v4232_v21 = vld [vmem:[%s14848_s16 + $0x8] sm:$0xff] }
0x14dc   :  { %v3702_v24 = vpop.f32.mrf.mxu1 }
0x14dd   :  { %v3706_v25 = vadd.f32 %v3702_v24, %v3543_v22  ;;  %v4231_v24 = vld [vmem:[%s14848_s16] sm:$0xff] }
0x14de   :  { %v10270_v27 = vpop.f32.mrf.mxu1 }
0x14df   :  { %10280 = vmatmul.mubr.msk.f32.vlgmr.msra.gmra.mxu0 %vm1582_vm10, %v3706_v25  ;;  %v9542_v25 = vld [vmem:[#allocation24] ss:$0 sm:$0xff] }
0x14e0   :  { %10309 = vmatprep.mubr.msk.f32.mxu0 %vm12887_vm3, %v12886_v14  ;;  %10294 = vmatpush3.msra.mxu0 %v3913_v43 }
0x14e1   :  { %10295 = vmatprep.subr.mxu0 %v12886_v14 }
0x14e2   :  { %10296 = vmatpush3.msra.mxu0 %v3912_v44  ;;  %v9548_v44 = vld [vmem:[#allocation25] ss:$0 sm:$0xff] }
0x14e3   :  { %10297 = vmatprep.subr.mxu0 %v12886_v14 }
0x14e4   :  { %10298 = vmatpush3.msra.mxu0 %v3911_v45 }
0x14e5   :  { %10299 = vmatprep.subr.mxu0 %v12886_v14 }
0x14e6   :  { %10300 = vmatpush3.msra.mxu0 %v3910_v46 }
0x14e7   :  { %10301 = vmatprep.subr.mxu0 %v12886_v14 }
0x14e8   :  { %10302 = vmatpush3.msra.mxu0 %v3909_v47 }
0x14e9   :  { %10303 = vmatprep.subr.mxu0 %v12886_v14 }
0x14ea   :  { %10304 = vmatpush3.msra.mxu0 %v3908_v48 }
0x14eb   :  { %10305 = vmatprep.subr.mxu0 %v12886_v14 }
0x14ec   :  { %10306 = vmatpush3.msra.mxu0 %v3907_v10 }
0x14ed   :  { %10307 = vmatprep.subr.mxu0 %v12886_v14 }
0x14ee   :  { %10308 = vmatpush3.msra.mxu0 %v3906_v11 }
0x14ef   :  { %10334 = vmatprep.subr.mxu0 %v4234_v12 }
0x159f   :  { %v3787_v29 = vpop.f32.mrf.mxu0 }
0x15a0   :  { %v3788_v26 = vadd.f32 %v9530_v28, %v3787_v29 }
0x15a1   :  { %v10281_v30 = vpop.f32.mrf.mxu0 }
0x15a2   :  { %v3791_v32 = vadd.f32 %v3788_v26, %v13734_v51  ;;  %v3822_v51 = vld [vmem:[#allocation84 + $0x8] sm:$0xff]  ;;  %v9545_v26 = vld [vmem:[#allocation21] ss:$0 sm:$0xff] }
0x15a3   :  { %10287 = vmatpush3.msra.mxu1 %v3822_v51 }
0x15a4   :  { %v3794_v33 = vsel %vm2574_vm11, %v3791_v32, 0.0  ;;  %10288 = vmatprep.subr.mxu1 %v12886_v14 }
0x15a5   :  { %3795 = vadd.xlane.f32.xlu1 %v3794_v33  ;;  %10289 = vmatpush3.msra.mxu1 %v3821_v41 }
0x15a6   :  { %10312 = vmatprep.subr.mxu1 %v4056_v42 }
0x162e   :  { %v3796_v34 = vpop.xlane.xlu1 %3795 }
0x162f   :  { %v3797_v35 = vmul.f32 0.03125, %v3796_v34 }
0x1631   :  { %v3798_v36 = vsub.f32 %v3791_v32, %v3797_v35 }
0x1633   :  { %v3799_v37 = vmul.f32 %v3798_v36, %v3798_v36 }
0x1635   :  { %v3800_v38 = vsel %vm2574_vm11, %v3799_v37, 0.0 }
0x1636   :  { %3801 = vadd.xlane.f32.xlu0 %v3800_v38 }
0x16bf   :  { %v3802_v49 = vpop.xlane.xlu0 %3801 }
0x16c0   :  { %v3803_v50 = vmul.f32 0.03125, %v3802_v49  ;;  %v13988_v49 = vld [vmem:[%s14849_s29 + $0x8] sm:$0xff] }
0x16c2   :  { %v3804_v52 = vadd.f32 1e-05, %v3803_v50 }
0x16c4   :  { %10970 = vrsqrt.f32 %v3804_v52 }
0x16d1   :  { %v10971_v54 = vpop.eup %10970 }
0x16d2   :  { %v3806_v2 = vmul.f32 %v10971_v54, %v3798_v36 }
0x16d4   :  { %v3813_v31 = vmul.f32 %v9532_v55, %v3806_v2 }
0x16d6   :  { %v13861_v60 = vadd.f32 %v9533_v57, %v3813_v31 }
0x16d8   :  { %10291 = vmatmul.mubr.msk.f32.vlgmr.msra.gmra.mxu1 %vm1582_vm10, %v13861_v60 }
0x16d9   :  { %10313 = vmatpush3.msra.mxu1 %v4056_v42  ;;  %10320 = vmatprep.mubr.msk.f32.mxu1 %vm1582_vm10, %v13863_v61 }
0x16da   :  { %10314 = vmatprep.subr.mxu1 %v4055_v62 }
0x16db   :  { %10315 = vmatpush3.msra.mxu1 %v4055_v62 }
0x16dc   :  { %10316 = vmatprep.subr.mxu1 %v4054_v63 }
0x16dd   :  { %10317 = vmatpush3.msra.mxu1 %v4054_v63 }
0x16de   :  { %10318 = vmatprep.subr.mxu1 %v4053_v1 }
0x16df   :  { %10319 = vmatpush3.msra.mxu1 %v4053_v1 }
0x16e0   :  { %10321 = vmatmul.mubr.msk.f32.vlgmr.msra.gmra.mxu1 %vm1582_vm10, %v13875_v5  ;;  %10323 = vmatprep.subr.mxu1 %v4148_v4 }
0x16e1   :  { %10324 = vmatpush3.msra.mxu1 %v4148_v4  ;;  %10331 = vmatprep.mubr.msk.f32.mxu1 %vm1582_vm10, %v13863_v61 }
0x16e2   :  { %10325 = vmatprep.subr.mxu1 %v4147_v6 }
0x16e3   :  { %10326 = vmatpush3.msra.mxu1 %v4147_v6 }
0x16e4   :  { %10327 = vmatprep.subr.mxu1 %v4146_v7 }
0x16e5   :  { %10328 = vmatpush3.msra.mxu1 %v4146_v7 }
0x16e6   :  { %10329 = vmatprep.subr.mxu1 %v4145_v9 }
0x16e7   :  { %10330 = vmatpush3.msra.mxu1 %v4145_v9 }
0x16e8   :  { %10332 = vmatmul.mubr.msk.f32.vlgmr.msra.gmra.mxu1 %vm1582_vm10, %v13875_v5 }
0x1798   :  { %v3901_v15 = vpop.f32.mrf.mxu1 }
0x1799   :  { %v3902_v58 = vadd.f32 %v9534_v13, %v3901_v15 }
0x179a   :  { %v10292_v17 = vpop.f32.mrf.mxu1 }
0x179b   :  { %v3905_v18 = vmax.f32 %v3902_v58, 0.0 }
0x179d   :  { %10310 = vmatmul.mubr.msk.f32.vlgmr.msra.gmra.mxu0 %vm2703_vm12, %v3905_v18 }
0x179e   :  { %10335 = vmatpush3.msra.mxu0 %v4234_v12  ;;  %10342 = vmatprep.mubr.msk.f32.mxu0 %vm1582_vm10, %v13863_v61 }
0x179f   :  { %10336 = vmatprep.subr.mxu0 %v4233_v19 }
0x17a0   :  { %v10322_v22 = vpop.f32.mrf.mxu1  ;;  %10337 = vmatpush3.msra.mxu0 %v4233_v19 }
0x17a1   :  { %10338 = vmatprep.subr.mxu0 %v4232_v21  ;;  %v4142_v35 = vadd.f32 %v10322_v22, %v9542_v25 }
0x17a2   :  { %v4136_v27 = vpop.f32.mrf.mxu1  ;;  %10339 = vmatpush3.msra.mxu0 %v4232_v21 }
0x17a3   :  { %v4137_v28 = vadd.f32 %v9542_v25, %v4136_v27  ;;  %10340 = vmatprep.subr.mxu0 %v4231_v24  ;;  %v13924_v38 = vmul.f32 0.35355338, %v4142_v35 }
0x17a4   :  { %10341 = vmatpush3.msra.mxu0 %v4231_v24 }
0x17a5   :  { %v13896_v29 = vmul.f32 0.35355338, %v4137_v28  ;;  %10343 = vmatmul.mubr.msk.f32.vlgmr.msra.gmra.mxu0 %vm1582_vm10, %v13875_v5  ;;  %v4320_v39 = vsel %vm1820_vm13, %v13924_v38, 0.0  ;;  %v4434_v40 = vsel %vm13608_vm4, %v13924_v38, 0.0  ;;  %v4703_v41 = vsel %vm13598_vm0, %v13924_v38, 0.0 }
0x17a7   :  { %v4319_v30 = vsel %vm1820_vm13, %v13896_v29, 0.0  ;;  %v4433_v32 = vsel %vm13608_vm4, %v13896_v29, 0.0  ;;  %v4702_v51 = vsel %vm13598_vm0, %v13896_v29, 0.0 }
0x17a8   :  { %v10333_v33 = vpop.f32.mrf.mxu1  ;;  %10349 = vmatprep.mubr.msk.f32.mxu1 %vm1582_vm10, %v4319_v30  ;;  %10356 = vmatprep.mubr.msk.f32.mxu0 %vm1582_vm10, %v4433_v32 }
0x17a9   :  { %v13908_v34 = vadd.f32 %v10333_v33, %v9545_v26 }
0x17aa   :  { %v4222_v36 = vpop.f32.mrf.mxu1 }
0x17ab   :  { %v13910_v37 = vadd.f32 %v9545_v26, %v4222_v36  ;;  %10345 = vmatprep.subr.msk.mxu1 %vm1582_vm10, %v13908_v34  ;;  %10352 = vmatprep.subr.msk.mxu0 %vm1582_vm10, %v13908_v34 }
0x17ac   :  { %10346 = vmatpush3.xpose.msk.msra.mxu1 %vm1582_vm10, %v13908_v34  ;;  %10353 = vmatpush3.xpose.msk.msra.mxu0 %vm1582_vm10, %v13908_v34 }
0x17ad   :  { %10347 = vmatprep.subr.msk.mxu1 %vm1582_vm10, %v13910_v37  ;;  %10354 = vmatprep.subr.msk.mxu0 %vm1582_vm10, %v13910_v37 }
0x17b0   :  { %10348 = vmatpush3.xpose.msk.msra.mxu1 %vm1582_vm10, %v13910_v37  ;;  %10355 = vmatpush3.xpose.msk.msra.mxu0 %vm1582_vm10, %v13910_v37 }
0x17b1   :  { %10373 = vmatprep.subr.msk.mxu0 %vm1582_vm10, %v13908_v34 }
0x17b3   :  { %10350 = vmatmul.mubr.msk.f32.vlgmr.msra.gmra.mxu1 %vm1582_vm10, %v4320_v39  ;;  %10357 = vmatmul.mubr.msk.f32.vlgmr.msra.gmra.mxu0 %vm1582_vm10, %v4434_v40 }
0x17b4   :  { %10374 = vmatpush3.xpose.msk.msra.mxu0 %vm1582_vm10, %v13908_v34  ;;  %10377 = vmatprep.mubr.msk.f32.mxu0 %vm1582_vm10, %v4702_v51 }
0x17b5   :  { %10375 = vmatprep.subr.msk.mxu0 %vm1582_vm10, %v13910_v37 }
0x17b8   :  { %10376 = vmatpush3.xpose.msk.msra.mxu0 %vm1582_vm10, %v13910_v37 }
0x17bb   :  { %10378 = vmatmul.mubr.msk.f32.vlgmr.msra.gmra.mxu0 %vm1582_vm10, %v4703_v41 }
0x185d   :  { %v13954_v42 = vpop.f32.mrf.mxu0 }
0x185f   :  { %v10311_v43 = vpop.f32.mrf.mxu0 }
0x1865   :  { %v10344_v45 = vpop.f32.mrf.mxu0 }
0x1866   :  { %v13956_v46 = vadd.f32 %v10344_v45, %v9548_v44 }
0x1867   :  { %v4308_v47 = vpop.f32.mrf.mxu0 }
0x1868   :  { %v13958_v48 = vadd.f32 %v9548_v44, %v4308_v47  ;;  %10359 = vmatprep.subr.msk.mxu1 %vm13608_vm4, %v13956_v46  ;;  %10394 = vmatprep.subr.msk.mxu0 %vm13616_vm5, %v13956_v46 }
0x1869   :  { %10360 = vmatpush3.msk.msra.mxu1 %vm13608_vm4, %v13956_v46  ;;  %10395 = vmatpush3.msk.msra.mxu0 %vm13616_vm5, %v13956_v46 }
0x186a   :  { %10361 = vmatprep.subr.msk.mxu1 %vm13608_vm4, %v13958_v48  ;;  %10396 = vmatprep.subr.msk.mxu0 %vm13616_vm5, %v13958_v48 }
0x186b   :  { %10362 = vmatpush3.msk.msra.mxu1 %vm13608_vm4, %v13958_v48  ;;  %10397 = vmatpush3.msk.msra.mxu0 %vm13616_vm5, %v13958_v48 }
0x186c   :  { %10366 = vmatprep.subr.msk.mxu1 %vm1820_vm13, %v13956_v46 }
0x1873   :  { %v10351_v50 = vpop.f32.mrf.mxu1  ;;  %v10358_v52 = vpop.f32.mrf.mxu0 }
0x1874   :  { %v4513_v54 = vadd.f32 %v10358_v52, %v13988_v49  ;;  %v4405_v56 = vadd.f32 %v10351_v50, %v13988_v49 }
0x1875   :  { %v4399_v55 = vpop.f32.mrf.mxu1  ;;  %v4507_v2 = vpop.f32.mrf.mxu0 }
0x1876   :  { %v4508_v57 = vadd.f32 %v4507_v2, %v13991_v53  ;;  %v4519_v59 = vsel %vm4408_vm14, %v4513_v54, -inf  ;;  %v4400_v31 = vadd.f32 %v4399_v55, %v13991_v53  ;;  %v4412_v63 = vsel %vm4408_vm14, %v4405_v56, -inf }
0x1877   :  { %4520 = vmax.xlane.f32.xlu0 %v4519_v59 }
0x1878   :  { %v4516_v62 = vsel %vm4408_vm14, %v4508_v57, -inf  ;;  %v4409_v1 = vsel %vm4408_vm14, %v4400_v31, -inf }
0x1879   :  { %4517 = vmax.xlane.f32.xlu1 %v4516_v62 }
0x187b   :  { %v10379_v8 = vpop.f32.mrf.mxu0  ;;  %4413 = vmax.xlane.f32.xlu0 %v4412_v63 }
0x187c   :  { %v4782_v0 = vadd.f32 %v10379_v8, %v13988_v49 }
0x187d   :  { %v4776_v4 = vpop.f32.mrf.mxu0  ;;  %4410 = vmax.xlane.f32.xlu1 %v4409_v1 }
0x187e   :  { %v4777_v6 = vadd.f32 %v4776_v4, %v13991_v53  ;;  %v4788_v7 = vsel %vm4408_vm14, %v4782_v0, -inf }
0x187f   :  { %4789 = vmax.xlane.f32.xlu0 %v4788_v7 }
0x1880   :  { %v4785_v9 = vsel %vm4408_vm14, %v4777_v6, -inf }
0x1881   :  { %4786 = vmax.xlane.f32.xlu1 %v4785_v9 }
0x1900   :  { %v4521_v10 = vpop.xlane.xlu0 %4520 }
0x1901   :  { %v4523_v11 = vsub.f32 %v4513_v54, %v4521_v10 }
0x1902   :  { %v4518_v12 = vpop.xlane.xlu1 %4517 }
0x1903   :  { %v4526_v13 = vmul.f32 1.442695, %v4523_v11  ;;  %v4522_v15 = vsub.f32 %v4508_v57, %v4518_v12 }
0x1904   :  { %v4414_v58 = vpop.xlane.xlu0 %4413 }
0x1905   :  { %10972 = vpow2.f32 %v4526_v13  ;;  %v4524_v17 = vmul.f32 1.442695, %v4522_v15  ;;  %v4416_v18 = vsub.f32 %v4405_v56, %v4414_v58 }
0x1906   :  { %v4411_v19 = vpop.xlane.xlu1 %4410 }
0x1907   :  { %10974 = vpow2.f32 %v4524_v17  ;;  %v4419_v21 = vmul.f32 1.442695, %v4416_v18  ;;  %v4415_v22 = vsub.f32 %v4400_v31, %v4411_v19 }
0x1908   :  { %v4790_v24 = vpop.xlane.xlu0 %4789 }
0x1909   :  { %10976 = vpow2.f32 %v4419_v21  ;;  %v4417_v25 = vmul.f32 1.442695, %v4415_v22  ;;  %v4792_v27 = vsub.f32 %v4782_v0, %v4790_v24 }
0x190a   :  { %v4787_v28 = vpop.xlane.xlu1 %4786 }
0x190b   :  { %10978 = vpow2.f32 %v4417_v25  ;;  %v4795_v26 = vmul.f32 1.442695, %v4792_v27  ;;  %v4791_v30 = vsub.f32 %v4777_v6, %v4787_v28 }
0x190d   :  { %10980 = vpow2.f32 %v4795_v26  ;;  %v4793_v32 = vmul.f32 1.442695, %v4791_v30 }
0x190f   :  { %10982 = vpow2.f32 %v4793_v32 }
0x1912   :  { %v10973_v33 = vpop.eup %10972 }
0x1913   :  { %v4531_v35 = vsel %vm4408_vm14, %v10973_v33, 0.0 }
0x1914   :  { %v10975_v36 = vpop.eup %10974  ;;  %4532 = vadd.xlane.f32.xlu0 %v4531_v35  ;;  %v9536_v35 = vld [vmem:[#allocation85] ss:$0 sm:$0xff] }
0x1915   :  { %v4528_v39 = vsel %vm4408_vm14, %v10975_v36, 0.0 }
0x1916   :  { %v10977_v40 = vpop.eup %10976  ;;  %4529 = vadd.xlane.f32.xlu1 %v4528_v39 }
0x1917   :  { %v4424_v51 = vsel %vm4408_vm14, %v10977_v40, 0.0 }
0x1918   :  { %v10979_v41 = vpop.eup %10978  ;;  %4425 = vadd.xlane.f32.xlu0 %v4424_v51 }
0x1919   :  { %v4421_v43 = vsel %vm4408_vm14, %v10979_v41, 0.0 }
0x191a   :  { %v10981_v44 = vpop.eup %10980  ;;  %4422 = vadd.xlane.f32.xlu1 %v4421_v43 }
0x191b   :  { %v4800_v45 = vsel %vm4408_vm14, %v10981_v44, 0.0 }
0x191c   :  { %v10983_v47 = vpop.eup %10982  ;;  %4801 = vadd.xlane.f32.xlu0 %v4800_v45 }
0x191d   :  { %v4797_v50 = vsel %vm4408_vm14, %v10983_v47, 0.0 }
0x191e   :  { %4798 = vadd.xlane.f32.xlu1 %v4797_v50 }
0x199d   :  { %v4533_v52 = vpop.xlane.xlu0 %4532 }
0x199e   :  { %10984 = vrcp.f32 %v4533_v52 }
0x199f   :  { %v4530_v54 = vpop.xlane.xlu1 %4529 }
0x19a0   :  { %10986 = vrcp.f32 %v4530_v54 }
0x19a1   :  { %v4426_v55 = vpop.xlane.xlu0 %4425 }
0x19a2   :  { %10988 = vrcp.f32 %v4426_v55 }
0x19a3   :  { %v4423_v2 = vpop.xlane.xlu1 %4422 }
0x19a4   :  { %10990 = vrcp.f32 %v4423_v2 }
0x19a5   :  { %v4802_v56 = vpop.xlane.xlu0 %4801 }
0x19a6   :  { %10992 = vrcp.f32 %v4802_v56  ;;  %v5085_v56 = vld [vmem:[%s14850_s18 + $0x18] sm:$0xff] }
0x19a7   :  { %v4799_v57 = vpop.xlane.xlu1 %4798  ;;  %10401 = vmatprep.subr.mxu0 %v5085_v56 }
0x19a8   :  { %10994 = vrcp.f32 %v4799_v57  ;;  %v5084_v57 = vld [vmem:[%s14850_s18 + $0x10] sm:$0xff] }
0x19ab   :  { %v10985_v59 = vpop.eup %10984 }
0x19ac   :  { %v4537_v63 = vmul.f32 %v10985_v59, %v10973_v33  ;;  %v5083_v59 = vld [vmem:[%s14850_s18 + $0x8] sm:$0xff] }
0x19ad   :  { %v10987_v31 = vpop.eup %10986 }
0x19ae   :  { %v4535_v62 = vmul.f32 %v10987_v31, %v10975_v36  ;;  %v5082_v31 = vld [vmem:[%s14850_s18] sm:$0xff] }
0x19af   :  { %v10989_v8 = vpop.eup %10988 }
0x19b0   :  { %10363 = vmatprep.mubr.msk.f32.mxu1 %vm4408_vm14, %v4535_v62  ;;  %v4430_v4 = vmul.f32 %v10989_v8, %v10977_v40 }
0x19b1   :  { %v10991_v0 = vpop.eup %10990  ;;  %10364 = vmatmul.mubr.msk.f32.vlgmr.msra.gmra.mxu1 %vm4408_vm14, %v4537_v63 }
0x19b2   :  { %10367 = vmatpush3.msk.msra.mxu1 %vm1820_vm13, %v13956_v46  ;;  %v4428_v1 = vmul.f32 %v10991_v0, %v10979_v41 }
0x19b3   :  { %10368 = vmatprep.subr.msk.mxu1 %vm1820_vm13, %v13958_v48  ;;  %v10993_v6 = vpop.eup %10992 }
0x19b4   :  { %10369 = vmatpush3.msk.msra.mxu1 %vm1820_vm13, %v13958_v48  ;;  %10370 = vmatprep.mubr.msk.f32.mxu1 %vm4408_vm14, %v4428_v1  ;;  %v4806_v10 = vmul.f32 %v10993_v6, %v10981_v44 }
0x19b5   :  { %v10995_v7 = vpop.eup %10994  ;;  %10380 = vmatprep.subr.msk.mxu1 %vm13598_vm0, %v13956_v46  ;;  %10371 = vmatmul.mubr.msk.f32.vlgmr.msra.gmra.mxu1 %vm4408_vm14, %v4430_v4 }
0x19b6   :  { %10381 = vmatpush3.msk.msra.mxu1 %vm13598_vm0, %v13956_v46  ;;  %v4804_v9 = vmul.f32 %v10995_v7, %v10983_v47  ;;  %v4892_v46 = vsel %vm13616_vm5, %v13896_v29, 0.0 }
0x19b7   :  { %10382 = vmatprep.subr.msk.mxu1 %vm13598_vm0, %v13958_v48 }
0x19b8   :  { %10383 = vmatpush3.msk.msra.mxu1 %vm13598_vm0, %v13958_v48  ;;  %10384 = vmatprep.mubr.msk.f32.mxu1 %vm4408_vm14, %v4804_v9  ;;  %v4893_v48 = vsel %vm13616_vm5, %v13924_v38, 0.0  ;;  %v9583_v9 = vld [vmem:[#allocation22] ss:$0 sm:$0xff] }
0x19b9   :  { %10387 = vmatprep.subr.msk.mxu1 %vm1582_vm10, %v13908_v34  ;;  %10385 = vmatmul.mubr.msk.f32.vlgmr.msra.gmra.mxu1 %vm4408_vm14, %v4806_v10 }
0x19ba   :  { %10388 = vmatpush3.xpose.msk.msra.mxu1 %vm1582_vm10, %v13908_v34  ;;  %10391 = vmatprep.mubr.msk.f32.mxu1 %vm1582_vm10, %v4892_v46 }
0x19bb   :  { %10389 = vmatprep.subr.msk.mxu1 %vm1582_vm10, %v13910_v37 }
0x19be   :  { %10390 = vmatpush3.xpose.msk.msra.mxu1 %vm1582_vm10, %v13910_v37 }
0x19c1   :  { %10392 = vmatmul.mubr.msk.f32.vlgmr.msra.gmra.mxu1 %vm1582_vm10, %v4893_v48  ;;  %v9538_v48 = vld [vmem:[#allocation91] ss:$0 sm:$0xff] }
0x1a71   :  { %v10365_v11 = vpop.f32.mrf.mxu1 }
0x1a73   :  { %v4612_v12 = vpop.f32.mrf.mxu1 }
0x1a75   :  { %v10372_v29 = vpop.f32.mrf.mxu1 }
0x1a76   :  { %v4699_v13 = vadd.f32 %v10372_v29, %v10365_v11 }
0x1a77   :  { %v4693_v15 = vpop.f32.mrf.mxu1 }
0x1a78   :  { %v4694_v34 = vadd.f32 %v4693_v15, %v4612_v12 }
0x1a79   :  { %v10386_v58 = vpop.f32.mrf.mxu1 }
0x1a7a   :  { %v4891_v17 = vadd.f32 %v10386_v58, %v4699_v13 }
0x1a7b   :  { %v4881_v18 = vpop.f32.mrf.mxu1 }
0x1a7c   :  { %v4890_v19 = vadd.f32 %v4881_v18, %v4694_v34  ;;  %v9539_v34 = vld [vmem:[#allocation90] ss:$0 sm:$0xff] }
0x1a81   :  { %v10393_v21 = vpop.f32.mrf.mxu1 }
0x1a82   :  { %v4972_v22 = vadd.f32 %v10393_v21, %v13988_v49  ;;  %v3991_v49 = vadd.f32 %v9536_v35, %v13954_v42 }
0x1a83   :  { %v4966_v37 = vpop.f32.mrf.mxu1 }
0x1a84   :  { %v4967_v24 = vadd.f32 %v4966_v37, %v13991_v53  ;;  %v4978_v38 = vsel %vm4408_vm14, %v4972_v22, -inf  ;;  %v3994_v51 = vadd.f32 %v3991_v49, %v13861_v60 }
0x1a85   :  { %4979 = vmax.xlane.f32.xlu0 %v4978_v38 }
0x1a86   :  { %v4975_v25 = vsel %vm4408_vm14, %v4967_v24, -inf  ;;  %v3997_v41 = vsel %vm2574_vm11, %v3994_v51, 0.0 }
0x1a87   :  { %4976 = vmax.xlane.f32.xlu1 %v4975_v25 }
0x1b0e   :  { %v4980_v27 = vpop.xlane.xlu0 %4979 }
0x1b0f   :  { %v4982_v28 = vsub.f32 %v4972_v22, %v4980_v27 }
0x1b10   :  { %v4977_v26 = vpop.xlane.xlu1 %4976 }
0x1b11   :  { %v4985_v30 = vmul.f32 1.442695, %v4982_v28  ;;  %v4981_v32 = vsub.f32 %v4967_v24, %v4977_v26 }
0x1b13   :  { %10996 = vpow2.f32 %v4985_v30  ;;  %v4983_v33 = vmul.f32 1.442695, %v4981_v32 }
0x1b15   :  { %10998 = vpow2.f32 %v4983_v33 }
0x1b20   :  { %v10997_v36 = vpop.eup %10996 }
0x1b21   :  { %v4990_v53 = vsel %vm4408_vm14, %v10997_v36, 0.0 }
0x1b22   :  { %v10999_v39 = vpop.eup %10998  ;;  %4991 = vadd.xlane.f32.xlu0 %v4990_v53  ;;  %v5222_v53 = vld [vmem:[%s14851_s14 + $0x10] sm:$0xff] }
0x1b23   :  { %v4987_v40 = vsel %vm4408_vm14, %v10999_v39, 0.0 }
0x1b24   :  { %4988 = vadd.xlane.f32.xlu1 %v4987_v40  ;;  %v5315_v40 = vld [vmem:[%s14852_s13 + $0x18] sm:$0xff] }
0x1b28   :  { %3998 = vadd.xlane.f32.xlu1 %v3997_v41  ;;  %v5314_v41 = vld [vmem:[%s14852_s13 + $0x10] sm:$0xff] }
0x1bab   :  { %v4992_v43 = vpop.xlane.xlu0 %4991 }
0x1bac   :  { %11000 = vrcp.f32 %v4992_v43  ;;  %v5313_v43 = vld [vmem:[%s14852_s13 + $0x8] sm:$0xff] }
0x1bad   :  { %v4989_v44 = vpop.xlane.xlu1 %4988 }
0x1bae   :  { %11002 = vrcp.f32 %v4989_v44  ;;  %v5312_v44 = vld [vmem:[%s14852_s13] sm:$0xff] }
0x1bb1   :  { %v3999_v42 = vpop.xlane.xlu1 %3998 }
0x1bb2   :  { %v4000_v45 = vmul.f32 0.03125, %v3999_v42 }
0x1bb4   :  { %v4001_v47 = vsub.f32 %v3994_v51, %v4000_v45  ;;  %v5220_v51 = vld [vmem:[%s14851_s14] sm:$0xff] }
0x1bb6   :  { %v4002_v50 = vmul.f32 %v4001_v47, %v4001_v47 }
0x1bb8   :  { %v4003_v52 = vsel %vm2574_vm11, %v4002_v50, 0.0 }
0x1bb9   :  { %4004 = vadd.xlane.f32.xlu0 %v4003_v52  ;;  %v11001_v60 = vpop.eup %11000 }
0x1bba   :  { %v4996_v2 = vmul.f32 %v11001_v60, %v10997_v36  ;;  %v5223_v36 = vld [vmem:[%s14851_s14 + $0x18] sm:$0xff] }
0x1bbb   :  { %v11003_v54 = vpop.eup %11002  ;;  %10412 = vmatprep.subr.mxu1 %v5223_v36 }
0x1bbc   :  { %v4994_v55 = vmul.f32 %v11003_v54, %v10999_v39  ;;  %10413 = vmatpush3.msra.mxu1 %v5223_v36  ;;  %v5221_v39 = vld [vmem:[%s14851_s14 + $0x8] sm:$0xff] }
0x1bbd   :  { %10414 = vmatprep.subr.mxu1 %v5222_v53  ;;  %v14171_v36 = vld [vmem:[%s14855_s24 + $0x8] sm:$0xff] }
0x1bbe   :  { %10398 = vmatprep.mubr.msk.f32.mxu0 %vm4408_vm14, %v4994_v55  ;;  %10415 = vmatpush3.msra.mxu1 %v5222_v53 }
0x1bbf   :  { %10399 = vmatmul.mubr.msk.f32.vlgmr.msra.gmra.mxu0 %vm4408_vm14, %v4996_v2  ;;  %10416 = vmatprep.subr.mxu1 %v5221_v39 }
0x1bc0   :  { %10402 = vmatpush3.msra.mxu0 %v5085_v56  ;;  %10417 = vmatpush3.msra.mxu1 %v5221_v39  ;;  %v14174_v39 = vld [vmem:[%s14855_s24] sm:$0xff] }
0x1bc1   :  { %10403 = vmatprep.subr.mxu0 %v5084_v57  ;;  %10418 = vmatprep.subr.mxu1 %v5220_v51 }
0x1bc2   :  { %10404 = vmatpush3.msra.mxu0 %v5084_v57  ;;  %10419 = vmatpush3.msra.mxu1 %v5220_v51  ;;  %v9586_v57 = vld [vmem:[#allocation13] ss:$0 sm:$0xff] }
0x1bc3   :  { %10405 = vmatprep.subr.mxu0 %v5083_v59  ;;  %10434 = vmatprep.subr.mxu1 %v12886_v14 }
0x1bc4   :  { %10406 = vmatpush3.msra.mxu0 %v5083_v59 }
0x1bc5   :  { %10407 = vmatprep.subr.mxu0 %v5082_v31 }
0x1bc6   :  { %10408 = vmatpush3.msra.mxu0 %v5082_v31 }
0x1bc7   :  { %10423 = vmatprep.subr.mxu0 %v12886_v14 }
0x1c42   :  { %v4005_v1 = vpop.xlane.xlu0 %4004 }
0x1c43   :  { %v4006_v4 = vmul.f32 0.03125, %v4005_v1 }
0x1c45   :  { %v4007_v6 = vadd.f32 1e-05, %v4006_v4  ;;  %v9540_v4 = vld [vmem:[#allocation106] ss:$0 sm:$0xff] }
0x1c47   :  { %11004 = vrsqrt.f32 %v4007_v6 }
0x1c54   :  { %v11005_v7 = vpop.eup %11004 }
0x1c55   :  { %v4009_v10 = vmul.f32 %v11005_v7, %v4001_v47 }
0x1c57   :  { %v4016_v15 = vmul.f32 %v9538_v48, %v4009_v10  ;;  %v5399_v10 = vld [vmem:[%s14853_s0 + $0x18] sm:$0xff] }
0x1c7f   :  { %v10400_v62 = vpop.f32.mrf.mxu0 }
0x1c80   :  { %v5081_v0 = vadd.f32 %v10400_v62, %v4891_v17 }
0x1c81   :  { %v5071_v63 = vpop.f32.mrf.mxu0 }
0x1c82   :  { %v5080_v8 = vadd.f32 %v5071_v63, %v4890_v19  ;;  %v4023_v19 = vadd.f32 %v9539_v34, %v4016_v15  ;;  %v9588_v15 = vld [vmem:[#allocation6] ss:$0 sm:$0xff] }
0x1c84   :  { %10409 = vmatprep.mubr.msk.f32.mxu0 %vm1582_vm10, %v5080_v8  ;;  %v4026_v21 = vsel %vm2574_vm11, %v4023_v19, 0.0  ;;  %v9587_v8 = vld [vmem:[#allocation12] ss:$0 sm:$0xff] }
0x1c85   :  { %10410 = vmatmul.mubr.msk.f32.vlgmr.msra.gmra.mxu0 %vm1582_vm10, %v5081_v0 }
0x1c86   :  { %10431 = vmatprep.mubr.msk.f32.mxu0 %vm12887_vm3, %v12886_v14  ;;  %10424 = vmatpush3.msra.mxu0 %v5315_v40 }
0x1c87   :  { %10425 = vmatprep.subr.mxu0 %v12886_v14 }
0x1c88   :  { %10426 = vmatpush3.msra.mxu0 %v5314_v41 }
0x1c89   :  { %10427 = vmatprep.subr.mxu0 %v12886_v14 }
0x1c8a   :  { %10428 = vmatpush3.msra.mxu0 %v5313_v43 }
0x1c8b   :  { %10429 = vmatprep.subr.mxu0 %v12886_v14 }
0x1c8c   :  { %10430 = vmatpush3.msra.mxu0 %v5312_v44 }
0x1d45   :  { %v10411_v46 = vpop.f32.mrf.mxu0 }
0x1d46   :  { %v5171_v11 = vadd.f32 %v10411_v46, %v9583_v9  ;;  %v9541_v46 = vld [vmem:[#allocation105] ss:$0 sm:$0xff] }
0x1d47   :  { %v5165_v12 = vpop.f32.mrf.mxu0 }
0x1d48   :  { %v5166_v29 = vadd.f32 %v9583_v9, %v5165_v12  ;;  %v5175_v13 = vadd.f32 %v5171_v11, %v13875_v5  ;;  %v5398_v11 = vld [vmem:[%s14853_s0 + $0x10] sm:$0xff] }
0x1d4a   :  { %v5181_v58 = vsel %vm1582_vm10, %v5175_v13, 0.0  ;;  %v5174_v17 = vadd.f32 %v5166_v29, %v13863_v61  ;;  %v5397_v29 = vld [vmem:[%s14853_s0 + $0x8] sm:$0xff] }
0x1d4b   :  { %5182 = vadd.xlane.f32.xlu0 %v5181_v58 }
0x1d4c   :  { %v5178_v18 = vsel %vm1582_vm10, %v5174_v17, 0.0 }
0x1d4d   :  { %5179 = vadd.xlane.f32.xlu1 %v5178_v18 }
0x1d51   :  { %4027 = vadd.xlane.f32.xlu1 %v4026_v21 }
0x1dd4   :  { %v5183_v22 = vpop.xlane.xlu0 %5182 }
0x1dd5   :  { %v5185_v37 = vmul.f32 0.03125, %v5183_v22 }
0x1dd6   :  { %v5180_v24 = vpop.xlane.xlu1 %5179 }
0x1dd7   :  { %v5187_v38 = vsub.f32 %v5175_v13, %v5185_v37  ;;  %v5184_v5 = vmul.f32 0.03125, %v5180_v24  ;;  %v5396_v13 = vld [vmem:[%s14853_s0] sm:$0xff] }
0x1dd9   :  { %v5186_v25 = vsub.f32 %v5174_v17, %v5184_v5  ;;  %v5189_v27 = vmul.f32 %v5187_v38, %v5187_v38  ;;  %v9591_v17 = vld [vmem:[%s14854_s7] ss:$0 sm:$0xff]  ;;  %v9593_v5 = vld [vmem:[#allocation7] ss:$0 sm:$0xff] }
0x1dda   :  { %v4028_v28 = vpop.xlane.xlu1 %4027 }
0x1ddb   :  { %v4029_v26 = vmul.f32 0.03125, %v4028_v28  ;;  %v5193_v61 = vsel %vm1582_vm10, %v5189_v27, 0.0  ;;  %v5188_v30 = vmul.f32 %v5186_v25, %v5186_v25 }
0x1ddc   :  { %5194 = vadd.xlane.f32.xlu1 %v5193_v61 }
0x1ddd   :  { %v4030_v32 = vsub.f32 %v4023_v19, %v4029_v26  ;;  %v5190_v33 = vsel %vm1582_vm10, %v5188_v30, 0.0 }
0x1dde   :  { %5191 = vadd.xlane.f32.xlu0 %v5190_v33 }
0x1ddf   :  { %v4031_v35 = vmul.f32 %v4030_v32, %v4030_v32 }
0x1de1   :  { %v4032_v49 = vsel %vm2574_vm11, %v4031_v35, 0.0 }
0x1de2   :  { %4033 = vadd.xlane.f32.xlu0 %v4032_v49 }
0x1e65   :  { %v5195_v42 = vpop.xlane.xlu1 %5194 }
0x1e66   :  { %v5197_v45 = vmul.f32 0.03125, %v5195_v42 }
0x1e67   :  { %v5192_v47 = vpop.xlane.xlu0 %5191 }
0x1e68   :  { %v5199_v50 = vadd.f32 1e-05, %v5197_v45  ;;  %v5196_v52 = vmul.f32 0.03125, %v5192_v47 }
0x1e6a   :  { %11006 = vrsqrt.f32 %v5199_v50  ;;  %v5198_v60 = vadd.f32 1e-05, %v5196_v52 }
0x1e6b   :  { %v4034_v54 = vpop.xlane.xlu0 %4033 }
0x1e6c   :  { %11008 = vrsqrt.f32 %v5198_v60  ;;  %v4035_v55 = vmul.f32 0.03125, %v4034_v54 }
0x1e6e   :  { %v4036_v2 = vadd.f32 1e-05, %v4035_v55 }
0x1e70   :  { %11010 = vrsqrt.f32 %v4036_v2 }
0x1e77   :  { %v11007_v56 = vpop.eup %11006 }
0x1e78   :  { %v5203_v59 = vmul.f32 %v11007_v56, %v5187_v38 }
0x1e79   :  { %v11009_v31 = vpop.eup %11008 }
0x1e7a   :  { %v5202_v62 = vmul.f32 %v11009_v31, %v5186_v25  ;;  %v5211_v63 = vmul.f32 %v9586_v57, %v5203_v59 }
0x1e7c   :  { %v5210_v0 = vmul.f32 %v9586_v57, %v5202_v62  ;;  %v14097_v9 = vadd.f32 %v9587_v8, %v5211_v63 }
0x1e7d   :  { %v11011_v1 = vpop.eup %11010 }
0x1e7e   :  { %v4038_v6 = vmul.f32 %v11011_v1, %v4030_v32  ;;  %v14095_v7 = vadd.f32 %v9587_v8, %v5210_v0 }
0x1e80   :  { %10420 = vmatprep.mubr.msk.f32.mxu1 %vm1582_vm10, %v14095_v7  ;;  %v4045_v48 = vmul.f32 %v9540_v4, %v4038_v6 }
0x1e81   :  { %10421 = vmatmul.mubr.msk.f32.vlgmr.msra.gmra.mxu1 %vm1582_vm10, %v14097_v9 }
0x1e82   :  { %10435 = vmatpush3.msra.mxu1 %v5399_v10  ;;  %v14105_v12 = vadd.f32 %v9541_v46, %v4045_v48  ;;  %10442 = vmatprep.mubr.msk.f32.mxu1 %vm12887_vm3, %v12886_v14 }
0x1e83   :  { %10436 = vmatprep.subr.mxu1 %v12886_v14 }
0x1e84   :  { %10437 = vmatpush3.msra.mxu1 %v5398_v11  ;;  %10432 = vmatmul.mubr.msk.f32.vlgmr.msra.gmra.mxu0 %vm1582_vm10, %v14105_v12 }
0x1e85   :  { %10438 = vmatprep.subr.mxu1 %v12886_v14 }
0x1e86   :  { %10439 = vmatpush3.msra.mxu1 %v5397_v29 }
0x1e87   :  { %10440 = vmatprep.subr.mxu1 %v12886_v14 }
0x1e88   :  { %10441 = vmatpush3.msra.mxu1 %v5396_v13 }
0x1e89   :  { %10443 = vmatmul.mubr.msk.f32.vlgmr.msra.gmra.mxu1 %vm1582_vm10, %v14105_v12 }
0x1f41   :  { %v10422_v34 = vpop.f32.mrf.mxu1 }
0x1f42   :  { %v5309_v58 = vadd.f32 %v10422_v34, %v9588_v15 }
0x1f43   :  { %v5303_v18 = vpop.f32.mrf.mxu1 }
0x1f44   :  { %v5304_v19 = vadd.f32 %v9588_v15, %v5303_v18  ;;  %v5392_v21 = vpop.f32.mrf.mxu0  ;;  %v14121_v37 = vmul.f32 0.35355338, %v5309_v58 }
0x1f45   :  { %v14119_v22 = vadd.f32 %v9591_v17, %v5392_v21 }
0x1f46   :  { %v14123_v24 = vmul.f32 0.35355338, %v5304_v19  ;;  %v10433_v38 = vpop.f32.mrf.mxu0  ;;  %v5480_v61 = vsel %vm1820_vm13, %v14121_v37, 0.0  ;;  %v5589_v30 = vsel %vm13608_vm4, %v14121_v37, 0.0  ;;  %v5863_v11 = vsel %vm13598_vm0, %v14121_v37, 0.0 }
0x1f47   :  { %10445 = vmatprep.subr.msk.mxu0 %vm1582_vm10, %v14119_v22  ;;  %10450 = vmatprep.subr.msk.mxu1 %vm1582_vm10, %v14119_v22  ;;  %v6055_v13 = vsel %vm13616_vm5, %v14121_v37, 0.0 }
0x1f48   :  { %10446 = vmatpush3.xpose.msk.msra.mxu0 %vm1582_vm10, %v14119_v22  ;;  %10451 = vmatpush3.xpose.msk.msra.mxu1 %vm1582_vm10, %v14119_v22  ;;  %v5479_v25 = vsel %vm1820_vm13, %v14123_v24, 0.0  ;;  %v5588_v27 = vsel %vm13608_vm4, %v14123_v24, 0.0  ;;  %v5862_v48 = vsel %vm13598_vm0, %v14123_v24, 0.0  ;;  %v6054_v29 = vsel %vm13616_vm5, %v14123_v24, 0.0 }
0x1f49   :  { %v5473_v28 = vpop.f32.mrf.mxu1  ;;  %10447 = vmatprep.mubr.msk.f32.mxu0 %vm1582_vm10, %v5479_v25  ;;  %10452 = vmatprep.mubr.msk.f32.mxu1 %vm1582_vm10, %v5588_v27 }
0x1f4a   :  { %v14141_v26 = vadd.f32 %v9593_v5, %v5473_v28 }
0x1f4b   :  { %v10444_v32 = vpop.f32.mrf.mxu1  ;;  %10448 = vmatmul.mubr.msk.f32.vlgmr.msra.gmra.mxu0 %vm1582_vm10, %v5480_v61  ;;  %10453 = vmatmul.mubr.msk.f32.vlgmr.msra.gmra.mxu1 %vm1582_vm10, %v5589_v30 }
0x1f4c   :  { %v5693_v33 = vsel %vm13608_vm4, %v14141_v26, 0.0  ;;  %v5587_v35 = vsel %vm1820_vm13, %v14141_v26, 0.0  ;;  %v14164_v49 = vsel %vm13598_vm0, %v14141_v26, 0.0 }
0x1f4d   :  { %10455 = vmatprep.subr.msk.mxu0 %vm2005_vm6, %v5693_v33  ;;  %10460 = vmatprep.subr.msk.mxu1 %vm2005_vm6, %v5587_v35 }
0x1f4e   :  { %10456 = vmatpush3.msk.msra.mxu0 %vm2005_vm6, %v5693_v33  ;;  %10461 = vmatpush3.msk.msra.mxu1 %vm2005_vm6, %v5587_v35 }
0x1f4f   :  { %10465 = vmatprep.subr.msk.mxu0 %vm1582_vm10, %v14119_v22  ;;  %10470 = vmatprep.subr.msk.mxu1 %vm2005_vm6, %v14164_v49 }
0x200b   :  { %v10454_v53 = vpop.f32.mrf.mxu1  ;;  %v10449_v54 = vpop.f32.mrf.mxu0 }
0x200c   :  { %v5668_v40 = vadd.f32 %v10454_v53, %v14171_v36  ;;  %v5562_v56 = vadd.f32 %v10449_v54, %v14171_v36 }
0x200d   :  { %v5662_v51 = vpop.f32.mrf.mxu1  ;;  %v5556_v2 = vpop.f32.mrf.mxu0 }
0x200e   :  { %v5663_v41 = vadd.f32 %v5662_v51, %v14174_v39  ;;  %v5674_v43 = vsel %vm2001_vm9, %v5668_v40, -inf  ;;  %v5557_v31 = vadd.f32 %v5556_v2, %v14174_v39  ;;  %v5568_v63 = vsel %vm2001_vm9, %v5562_v56, -inf }
0x200f   :  { %5675 = vmax.xlane.f32.xlu0 %v5674_v43 }
0x2010   :  { %v5671_v44 = vsel %vm2001_vm9, %v5663_v41, -inf  ;;  %v5565_v8 = vsel %vm2001_vm9, %v5557_v31, -inf }
0x2011   :  { %5672 = vmax.xlane.f32.xlu1 %v5671_v44 }
0x2098   :  { %v5676_v42 = vpop.xlane.xlu0 %5675 }
0x2099   :  { %v5678_v45 = vsub.f32 %v5668_v40, %v5676_v42 }
0x209a   :  { %v5673_v47 = vpop.xlane.xlu1 %5672 }
0x209b   :  { %v5681_v50 = vmul.f32 1.442695, %v5678_v45  ;;  %v5677_v52 = vsub.f32 %v5663_v41, %v5673_v47 }
0x209d   :  { %11012 = vpow2.f32 %v5681_v50  ;;  %v5679_v60 = vmul.f32 1.442695, %v5677_v52 }
0x209f   :  { %11014 = vpow2.f32 %v5679_v60 }
0x20aa   :  { %v11013_v55 = vpop.eup %11012 }
0x20ab   :  { %v5686_v57 = vsel %vm2001_vm9, %v11013_v55, 0.0 }
0x20ac   :  { %v11015_v59 = vpop.eup %11014  ;;  %5687 = vadd.xlane.f32.xlu0 %v5686_v57 }
0x20ad   :  { %v5683_v62 = vsel %vm2001_vm9, %v11015_v59, 0.0 }
0x20ae   :  { %5684 = vadd.xlane.f32.xlu1 %v5683_v62 }
0x20b0   :  { %5569 = vmax.xlane.f32.xlu0 %v5568_v63 }
0x20b2   :  { %5566 = vmax.xlane.f32.xlu1 %v5565_v8 }
0x2135   :  { %v5688_v0 = vpop.xlane.xlu0 %5687 }
0x2136   :  { %11016 = vrcp.f32 %v5688_v0 }
0x2137   :  { %v5685_v1 = vpop.xlane.xlu1 %5684 }
0x2138   :  { %11018 = vrcp.f32 %v5685_v1 }
0x2139   :  { %v5570_v15 = vpop.xlane.xlu0 %5569 }
0x213a   :  { %v5572_v58 = vsub.f32 %v5562_v56, %v5570_v15 }
0x213b   :  { %v5567_v34 = vpop.xlane.xlu1 %5566 }
0x213c   :  { %v5571_v17 = vsub.f32 %v5557_v31, %v5567_v34  ;;  %v5575_v18 = vmul.f32 1.442695, %v5572_v58 }
0x213e   :  { %v5573_v19 = vmul.f32 1.442695, %v5571_v17  ;;  %11020 = vpow2.f32 %v5575_v18 }
0x2140   :  { %11022 = vpow2.f32 %v5573_v19 }
0x2143   :  { %v11017_v4 = vpop.eup %11016 }
0x2144   :  { %v5692_v46 = vmul.f32 %v11017_v4, %v11013_v55 }
0x2145   :  { %v11019_v6 = vpop.eup %11018 }
0x2146   :  { %v5690_v10 = vmul.f32 %v11019_v6, %v11015_v59 }
0x2148   :  { %10457 = vmatprep.mubr.msk.f32.mxu0 %vm2001_vm9, %v5690_v10 }
0x2149   :  { %10458 = vmatmul.mubr.msk.f32.vlgmr.msra.gmra.mxu0 %vm2001_vm9, %v5692_v46 }
0x214a   :  { %10466 = vmatpush3.xpose.msk.msra.mxu0 %vm1582_vm10, %v14119_v22  ;;  %10467 = vmatprep.mubr.msk.f32.mxu0 %vm1582_vm10, %v5862_v48  ;;  %v6159_v48 = vsel %vm13616_vm5, %v14141_v26, 0.0 }
0x214b   :  { %10475 = vmatprep.subr.msk.mxu0 %vm1582_vm10, %v14119_v22  ;;  %v11021_v35 = vpop.eup %11020 }
0x214c   :  { %v5580_v51 = vsel %vm2001_vm9, %v11021_v35, 0.0 }
0x214d   :  { %10468 = vmatmul.mubr.msk.f32.vlgmr.msra.gmra.mxu0 %vm1582_vm10, %v5863_v11  ;;  %v11023_v40 = vpop.eup %11022 }
0x214e   :  { %10476 = vmatpush3.xpose.msk.msra.mxu0 %vm1582_vm10, %v14119_v22  ;;  %10477 = vmatprep.mubr.msk.f32.mxu0 %vm1582_vm10, %v6054_v29  ;;  %v5577_v41 = vsel %vm2001_vm9, %v11023_v40, 0.0 }
0x2151   :  { %10478 = vmatmul.mubr.msk.f32.vlgmr.msra.gmra.mxu0 %vm1582_vm10, %v6055_v13 }
0x2209   :  { %v14210_v21 = vpop.f32.mrf.mxu0 }
0x220b   :  { %v14212_v24 = vpop.f32.mrf.mxu0 }
0x220d   :  { %v10469_v22 = vpop.f32.mrf.mxu0 }
0x220e   :  { %v5942_v38 = vadd.f32 %v10469_v22, %v14171_v36 }
0x220f   :  { %v5936_v5 = vpop.f32.mrf.mxu0 }
0x2210   :  { %v5937_v37 = vadd.f32 %v5936_v5, %v14174_v39  ;;  %v5948_v25 = vsel %vm2001_vm9, %v5942_v38, -inf  ;;  %v6248_v5 = vld [vmem:[%s14856_s17 + $0x10] sm:$0xff] }
0x2211   :  { %5949 = vmax.xlane.f32.xlu0 %v5948_v25  ;;  %v10479_v27 = vpop.f32.mrf.mxu0  ;;  %v6246_v25 = vld [vmem:[%s14856_s17] sm:$0xff] }
0x2212   :  { %v6134_v28 = vadd.f32 %v10479_v27, %v14171_v36  ;;  %v5945_v61 = vsel %vm2001_vm9, %v5937_v37, -inf }
0x2213   :  { %v6128_v30 = vpop.f32.mrf.mxu0  ;;  %5946 = vmax.xlane.f32.xlu1 %v5945_v61 }
0x2214   :  { %v6129_v32 = vadd.f32 %v6128_v30, %v14174_v39  ;;  %v6140_v33 = vsel %vm2001_vm9, %v6134_v28, -inf }
0x2215   :  { %6141 = vmax.xlane.f32.xlu0 %v6140_v33 }
0x2216   :  { %v6137_v53 = vsel %vm2001_vm9, %v6129_v32, -inf }
0x2217   :  { %6138 = vmax.xlane.f32.xlu1 %v6137_v53 }
0x2219   :  { %5581 = vadd.xlane.f32.xlu0 %v5580_v51 }
0x221b   :  { %5578 = vadd.xlane.f32.xlu1 %v5577_v41 }
0x229a   :  { %v5950_v36 = vpop.xlane.xlu0 %5949 }
0x229b   :  { %v5952_v43 = vsub.f32 %v5942_v38, %v5950_v36  ;;  %v6249_v38 = vld [vmem:[%s14856_s17 + $0x18] sm:$0xff] }
0x229c   :  { %v5947_v44 = vpop.xlane.xlu1 %5946  ;;  %10485 = vmatprep.subr.mxu0 %v6249_v38 }
0x229d   :  { %v5955_v42 = vmul.f32 1.442695, %v5952_v43  ;;  %v5951_v45 = vsub.f32 %v5937_v37, %v5947_v44  ;;  %10486 = vmatpush3.msra.mxu0 %v6249_v38  ;;  %v6247_v37 = vld [vmem:[%s14856_s17 + $0x8] sm:$0xff]  ;;  %v9619_v43 = vld [vmem:[%s14857_s21] ss:$0 sm:$0xff] }
0x229e   :  { %v6142_v39 = vpop.xlane.xlu0 %6141  ;;  %10487 = vmatprep.subr.mxu0 %v6248_v5 }
0x229f   :  { %11024 = vpow2.f32 %v5955_v42  ;;  %v5953_v47 = vmul.f32 1.442695, %v5951_v45  ;;  %v6144_v50 = vsub.f32 %v6134_v28, %v6142_v39  ;;  %10488 = vmatpush3.msra.mxu0 %v6248_v5  ;;  %v6481_v5 = vld [vmem:[%s14859_s22 + $0x18] sm:$0xff] }
0x22a0   :  { %v6139_v52 = vpop.xlane.xlu1 %6138  ;;  %10489 = vmatprep.subr.mxu0 %v6247_v37 }
0x22a1   :  { %11026 = vpow2.f32 %v5953_v47  ;;  %v6147_v60 = vmul.f32 1.442695, %v6144_v50  ;;  %v6143_v54 = vsub.f32 %v6129_v32, %v6139_v52  ;;  %10490 = vmatpush3.msra.mxu0 %v6247_v37  ;;  %v6480_v37 = vld [vmem:[%s14859_s22 + $0x10] sm:$0xff] }
0x22a2   :  { %v5582_v55 = vpop.xlane.xlu0 %5581  ;;  %10491 = vmatprep.subr.mxu0 %v6246_v25 }
0x22a3   :  { %11028 = vpow2.f32 %v6147_v60  ;;  %v6145_v2 = vmul.f32 1.442695, %v6143_v54  ;;  %10492 = vmatpush3.msra.mxu0 %v6246_v25  ;;  %v6479_v25 = vld [vmem:[%s14859_s22 + $0x8] sm:$0xff] }
0x22a4   :  { %11030 = vrcp.f32 %v5582_v55  ;;  %v5579_v56 = vpop.xlane.xlu1 %5578 }
0x22a5   :  { %11032 = vpow2.f32 %v6145_v2 }
0x22a6   :  { %11034 = vrcp.f32 %v5579_v56 }
0x22ac   :  { %v11025_v57 = vpop.eup %11024 }
0x22ad   :  { %v5960_v59 = vsel %vm2001_vm9, %v11025_v57, 0.0 }
0x22ae   :  { %v11027_v31 = vpop.eup %11026  ;;  %5961 = vadd.xlane.f32.xlu0 %v5960_v59 }
0x22af   :  { %v5957_v62 = vsel %vm2001_vm9, %v11027_v31, 0.0 }
0x22b0   :  { %v11029_v63 = vpop.eup %11028  ;;  %5958 = vadd.xlane.f32.xlu1 %v5957_v62  ;;  %v6386_v62 = vld [vmem:[%s14858_s3 + $0x10] sm:$0xff] }
0x22b1   :  { %v11031_v8 = vpop.eup %11030  ;;  %v6152_v0 = vsel %vm2001_vm9, %v11029_v63, 0.0 }
0x22b2   :  { %v11033_v1 = vpop.eup %11032  ;;  %6153 = vadd.xlane.f32.xlu0 %v6152_v0  ;;  %v5586_v46 = vmul.f32 %v11031_v8, %v11021_v35  ;;  %v6384_v8 = vld [vmem:[%s14858_s3] sm:$0xff]  ;;  %v6485_v0 = vld [vmem:[%s14859_s22 + $0x38] sm:$0xff] }
0x22b3   :  { %v11035_v4 = vpop.eup %11034  ;;  %v6149_v6 = vsel %vm2001_vm9, %v11033_v1, 0.0  ;;  %10507 = vmatprep.subr.mxu0 %v6485_v0 }
0x22b4   :  { %6150 = vadd.xlane.f32.xlu1 %v6149_v6  ;;  %v5584_v10 = vmul.f32 %v11035_v4, %v11023_v40  ;;  %v6483_v4 = vld [vmem:[%s14859_s22 + $0x28] sm:$0xff]  ;;  %v6482_v6 = vld [vmem:[%s14859_s22 + $0x20] sm:$0xff] }
0x22b6   :  { %10462 = vmatprep.mubr.msk.f32.mxu1 %vm2001_vm9, %v5584_v10 }
0x22b7   :  { %10463 = vmatmul.mubr.msk.f32.vlgmr.msra.gmra.mxu1 %vm2001_vm9, %v5586_v46 }
0x22b8   :  { %10471 = vmatpush3.msk.msra.mxu1 %vm2005_vm6, %v14164_v49 }
0x22b9   :  { %10480 = vmatprep.subr.msk.mxu1 %vm2005_vm6, %v6159_v48 }
0x2337   :  { %v5962_v11 = vpop.xlane.xlu0 %5961 }
0x2338   :  { %11036 = vrcp.f32 %v5962_v11 }
0x2339   :  { %v5959_v29 = vpop.xlane.xlu1 %5958 }
0x233a   :  { %11038 = vrcp.f32 %v5959_v29 }
0x233b   :  { %v6154_v13 = vpop.xlane.xlu0 %6153 }
0x233c   :  { %11040 = vrcp.f32 %v6154_v13 }
0x233d   :  { %v6151_v15 = vpop.xlane.xlu1 %6150 }
0x233e   :  { %11042 = vrcp.f32 %v6151_v15 }
0x2345   :  { %v11037_v34 = vpop.eup %11036 }
0x2346   :  { %v5966_v49 = vmul.f32 %v11037_v34, %v11025_v57  ;;  %v9622_v34 = vld [vmem:[#allocation16] ss:$0 sm:$0xff] }
0x2347   :  { %v11039_v58 = vpop.eup %11038 }
0x2348   :  { %v5964_v17 = vmul.f32 %v11039_v58, %v11027_v31  ;;  %v6387_v31 = vld [vmem:[%s14858_s3 + $0x18] sm:$0xff] }
0x2349   :  { %v11041_v18 = vpop.eup %11040 }
0x234a   :  { %10472 = vmatprep.mubr.msk.f32.mxu1 %vm2001_vm9, %v5964_v17  ;;  %v6158_v22 = vmul.f32 %v11041_v18, %v11029_v63  ;;  %v6385_v63 = vld [vmem:[%s14858_s3 + $0x8] sm:$0xff] }
0x234b   :  { %v11043_v26 = vpop.eup %11042  ;;  %10473 = vmatmul.mubr.msk.f32.vlgmr.msra.gmra.mxu1 %vm2001_vm9, %v5966_v49 }
0x234c   :  { %10481 = vmatpush3.msk.msra.mxu1 %vm2005_vm6, %v6159_v48  ;;  %v6156_v19 = vmul.f32 %v11043_v26, %v11033_v1  ;;  %v6484_v1 = vld [vmem:[%s14859_s22 + $0x30] sm:$0xff] }
0x234d   :  { %10496 = vmatprep.subr.mxu1 %v6387_v31  ;;  %v9623_v26 = vld [vmem:[#allocation15] ss:$0 sm:$0xff] }
0x234e   :  { %10482 = vmatprep.mubr.msk.f32.mxu1 %vm2001_vm9, %v6156_v19 }
0x234f   :  { %10483 = vmatmul.mubr.msk.f32.vlgmr.msra.gmra.mxu1 %vm2001_vm9, %v6158_v22 }
0x2350   :  { %10497 = vmatpush3.msra.mxu1 %v6387_v31  ;;  %v6621_v31 = vld [vmem:[#allocation55 + $0x8] sm:$0xff] }
0x2351   :  { %10498 = vmatprep.subr.mxu1 %v6386_v62 }
0x2352   :  { %10499 = vmatpush3.msra.mxu1 %v6386_v62  ;;  %v6799_v62 = vld [vmem:[#allocation57 + $0x8] sm:$0xff] }
0x2353   :  { %10500 = vmatprep.subr.mxu1 %v6385_v63 }
0x2354   :  { %10501 = vmatpush3.msra.mxu1 %v6385_v63  ;;  %v6620_v63 = vld [vmem:[#allocation55] sm:$0xff] }
0x2355   :  { %10502 = vmatprep.subr.mxu1 %v6384_v8 }
0x2356   :  { %10503 = vmatpush3.msra.mxu1 %v6384_v8  ;;  %v6798_v8 = vld [vmem:[#allocation57] sm:$0xff] }
0x2377   :  { %v10464_v27 = vpop.f32.mrf.mxu1 }
0x2378   :  { %v5859_v33 = vadd.f32 %v10464_v27, %v14210_v21  ;;  %v6478_v27 = vld [vmem:[%s14859_s22] sm:$0xff] }
0x2379   :  { %v5853_v28 = vpop.f32.mrf.mxu1 }
0x237a   :  { %v5854_v32 = vadd.f32 %v5853_v28, %v14212_v24  ;;  %v9624_v28 = vld [vmem:[#allocation9] ss:$0 sm:$0xff] }
0x240b   :  { %v10474_v61 = vpop.f32.mrf.mxu1 }
0x240c   :  { %v6053_v40 = vadd.f32 %v10474_v61, %v5859_v33 }
0x240d   :  { %v6043_v30 = vpop.f32.mrf.mxu1 }
0x240e   :  { %v6052_v53 = vadd.f32 %v6043_v30, %v5854_v32 }
0x240f   :  { %v10484_v35 = vpop.f32.mrf.mxu1 }
0x2410   :  { %v6245_v36 = vadd.f32 %v10484_v35, %v6053_v40  ;;  %v9627_v40 = vld [vmem:[#allocation10] ss:$0 sm:$0xff] }
0x2411   :  { %v6235_v51 = vpop.f32.mrf.mxu1 }
0x2412   :  { %v6244_v41 = vadd.f32 %v6235_v51, %v6052_v53 }
0x2414   :  { %10493 = vmatprep.mubr.msk.f32.mxu0 %vm1582_vm10, %v6244_v41 }
0x2415   :  { %10494 = vmatmul.mubr.msk.f32.vlgmr.msra.gmra.mxu0 %vm1582_vm10, %v6245_v36 }
0x2416   :  { %10508 = vmatpush3.msra.mxu0 %v6485_v0  ;;  %v6715_v0 = vld [vmem:[%s14860_s12 + $0x18] sm:$0xff] }
0x2417   :  { %10509 = vmatprep.subr.mxu0 %v6484_v1 }
0x2418   :  { %10510 = vmatpush3.msra.mxu0 %v6484_v1 }
0x2419   :  { %10511 = vmatprep.subr.mxu0 %v6483_v4 }
0x241a   :  { %10512 = vmatpush3.msra.mxu0 %v6483_v4 }
0x241b   :  { %10513 = vmatprep.subr.mxu0 %v6482_v6 }
0x241c   :  { %10514 = vmatpush3.msra.mxu0 %v6482_v6 }
0x241d   :  { %10515 = vmatprep.subr.mxu0 %v6481_v5 }
0x241e   :  { %10516 = vmatpush3.msra.mxu0 %v6481_v5 }
0x241f   :  { %10517 = vmatprep.subr.mxu0 %v6480_v37 }
0x2420   :  { %10518 = vmatpush3.msra.mxu0 %v6480_v37  ;;  %v9632_v37 = vld [vmem:[#allocation51] ss:$0 sm:$0xff] }
0x2421   :  { %10519 = vmatprep.subr.mxu0 %v6479_v25 }
0x2422   :  { %10520 = vmatpush3.msra.mxu0 %v6479_v25 }
0x2423   :  { %10521 = vmatprep.subr.mxu0 %v6478_v27 }
0x2424   :  { %10522 = vmatpush3.msra.mxu0 %v6478_v27 }
0x24d5   :  { %v10495_v44 = vpop.f32.mrf.mxu0 }
0x24d6   :  { %v6335_v42 = vadd.f32 %v10495_v44, %v9619_v43 }
0x24d7   :  { %v6329_v45 = vpop.f32.mrf.mxu0 }
0x24d8   :  { %v6330_v39 = vadd.f32 %v9619_v43, %v6329_v45  ;;  %v6339_v47 = vadd.f32 %v6335_v42, %v14097_v9 }
0x24da   :  { %v6345_v24 = vsel %vm1582_vm10, %v6339_v47, 0.0  ;;  %v6338_v21 = vadd.f32 %v6330_v39, %v14095_v7 }
0x24db   :  { %6346 = vadd.xlane.f32.xlu0 %v6345_v24 }
0x24dc   :  { %v6342_v50 = vsel %vm1582_vm10, %v6338_v21, 0.0 }
0x24dd   :  { %6343 = vadd.xlane.f32.xlu1 %v6342_v50 }
0x2564   :  { %v6347_v52 = vpop.xlane.xlu0 %6346 }
0x2565   :  { %v6349_v60 = vmul.f32 0.03125, %v6347_v52 }
0x2566   :  { %v6344_v54 = vpop.xlane.xlu1 %6343 }
0x2567   :  { %v6351_v55 = vsub.f32 %v6339_v47, %v6349_v60  ;;  %v6348_v2 = vmul.f32 0.03125, %v6344_v54 }
0x2569   :  { %v6350_v56 = vsub.f32 %v6338_v21, %v6348_v2  ;;  %v6353_v57 = vmul.f32 %v6351_v55, %v6351_v55 }
0x256b   :  { %v6357_v9 = vsel %vm1582_vm10, %v6353_v57, 0.0  ;;  %v6352_v59 = vmul.f32 %v6350_v56, %v6350_v56  ;;  %v6623_v57 = vld [vmem:[#allocation55 + $0x18] sm:$0xff] }
0x256c   :  { %6358 = vadd.xlane.f32.xlu0 %v6357_v9  ;;  %v6801_v9 = vld [vmem:[#allocation57 + $0x18] sm:$0xff]  ;;  %10526 = vmatprep.subr.mxu1 %v6623_v57 }
0x256d   :  { %v6354_v7 = vsel %vm1582_vm10, %v6352_v59, 0.0  ;;  %v6622_v59 = vld [vmem:[#allocation55 + $0x10] sm:$0xff]  ;;  %10548 = vmatprep.subr.mxu0 %v6801_v9 }
0x256e   :  { %6355 = vadd.xlane.f32.xlu1 %v6354_v7  ;;  %v6800_v7 = vld [vmem:[#allocation57 + $0x10] sm:$0xff] }
0x25f5   :  { %v6359_v10 = vpop.xlane.xlu0 %6358 }
0x25f6   :  { %v6361_v46 = vmul.f32 0.03125, %v6359_v10 }
0x25f7   :  { %v6356_v48 = vpop.xlane.xlu1 %6355 }
0x25f8   :  { %v6363_v11 = vadd.f32 1e-05, %v6361_v46  ;;  %v6360_v29 = vmul.f32 0.03125, %v6356_v48 }
0x25fa   :  { %11044 = vrsqrt.f32 %v6363_v11  ;;  %v6362_v13 = vadd.f32 1e-05, %v6360_v29  ;;  %v9630_v29 = vld [vmem:[#allocation19] ss:$0 sm:$0xff] }
0x25fc   :  { %11046 = vrsqrt.f32 %v6362_v13 }
0x2607   :  { %v11045_v15 = vpop.eup %11044 }
0x2608   :  { %v6367_v58 = vmul.f32 %v11045_v15, %v6351_v55 }
0x2609   :  { %v11047_v17 = vpop.eup %11046 }
0x260a   :  { %v6366_v49 = vmul.f32 %v11047_v17, %v6350_v56  ;;  %v6375_v18 = vmul.f32 %v9622_v34, %v6367_v58  ;;  %v9631_v17 = vld [vmem:[#allocation18] ss:$0 sm:$0xff] }
0x260c   :  { %v6374_v19 = vmul.f32 %v9622_v34, %v6366_v49  ;;  %v6383_v38 = vadd.f32 %v9623_v26, %v6375_v18 }
0x260e   :  { %v6382_v22 = vadd.f32 %v9623_v26, %v6374_v19  ;;  %v6714_v19 = vld [vmem:[%s14860_s12 + $0x10] sm:$0xff] }
0x2610   :  { %10504 = vmatprep.mubr.msk.f32.mxu1 %vm1582_vm10, %v6382_v22 }
0x2611   :  { %10505 = vmatmul.mubr.msk.f32.vlgmr.msra.gmra.mxu1 %vm1582_vm10, %v6383_v38 }
0x2612   :  { %10527 = vmatpush3.msra.mxu1 %v6623_v57  ;;  %v14389_v57 = vld [vmem:[%s14849_s29] sm:$0xff] }
0x2613   :  { %10528 = vmatprep.subr.mxu1 %v6622_v59 }
0x2614   :  { %10529 = vmatpush3.msra.mxu1 %v6622_v59 }
0x2615   :  { %10530 = vmatprep.subr.mxu1 %v6621_v31 }
0x2616   :  { %10531 = vmatpush3.msra.mxu1 %v6621_v31 }
0x2617   :  { %10532 = vmatprep.subr.mxu1 %v6620_v63 }
0x2618   :  { %10533 = vmatpush3.msra.mxu1 %v6620_v63 }
0x2619   :  { %10537 = vmatprep.subr.mxu1 %v6715_v0 }
0x26d1   :  { %v10506_v61 = vpop.f32.mrf.mxu1 }
0x26d2   :  { %v6473_v30 = vadd.f32 %v10506_v61, %v9624_v28  ;;  %v9635_v61 = vld [vmem:[#allocation48] ss:$0 sm:$0xff] }
0x26d3   :  { %v6467_v32 = vpop.f32.mrf.mxu1 }
0x26d4   :  { %v6468_v33 = vadd.f32 %v9624_v28, %v6467_v32  ;;  %v6477_v53 = vmax.f32 %v6473_v30, 0.0 }
0x26d6   :  { %v6476_v35 = vmax.f32 %v6468_v33, 0.0 }
0x26d8   :  { %10523 = vmatprep.mubr.msk.f32.mxu0 %vm2703_vm12, %v6476_v35 }
0x26d9   :  { %10524 = vmatmul.mubr.msk.f32.vlgmr.msra.gmra.mxu0 %vm2703_vm12, %v6477_v53 }
0x26da   :  { %10549 = vmatpush3.msra.mxu0 %v6801_v9 }
0x26db   :  { %10550 = vmatprep.subr.mxu0 %v6800_v7 }
0x26dc   :  { %10551 = vmatpush3.msra.mxu0 %v6800_v7 }
0x26dd   :  { %10552 = vmatprep.subr.mxu0 %v6799_v62 }
0x26de   :  { %10553 = vmatpush3.msra.mxu0 %v6799_v62 }
0x26df   :  { %10554 = vmatprep.subr.mxu0 %v6798_v8 }
0x26e0   :  { %10555 = vmatpush3.msra.mxu0 %v6798_v8 }
0x2799   :  { %v10525_v51 = vpop.f32.mrf.mxu0 }
0x279a   :  { %v6571_v41 = vadd.f32 %v10525_v51, %v9627_v40 }
0x279b   :  { %v6565_v36 = vpop.f32.mrf.mxu0 }
0x279c   :  { %v6566_v43 = vadd.f32 %v9627_v40, %v6565_v36  ;;  %v6575_v44 = vadd.f32 %v6571_v41, %v6383_v38  ;;  %v6712_v38 = vld [vmem:[%s14860_s12] sm:$0xff] }
0x279d   :  { %v9638_v36 = vld [vmem:[#allocation52] ss:$0 sm:$0xff] }
0x279e   :  { %v6581_v42 = vsel %vm1582_vm10, %v6575_v44, 0.0  ;;  %v6574_v45 = vadd.f32 %v6566_v43, %v6382_v22  ;;  %v6713_v22 = vld [vmem:[%s14860_s12 + $0x8] sm:$0xff] }
0x279f   :  { %6582 = vadd.xlane.f32.xlu0 %v6581_v42 }
0x27a0   :  { %v6578_v39 = vsel %vm1582_vm10, %v6574_v45, 0.0 }
0x27a1   :  { %6579 = vadd.xlane.f32.xlu1 %v6578_v39 }
0x2828   :  { %v6583_v47 = vpop.xlane.xlu0 %6582 }
0x2829   :  { %v6585_v24 = vmul.f32 0.03125, %v6583_v47 }
0x282a   :  { %v6580_v21 = vpop.xlane.xlu1 %6579 }
0x282b   :  { %v6587_v50 = vsub.f32 %v6575_v44, %v6585_v24  ;;  %v6584_v52 = vmul.f32 0.03125, %v6580_v21 }
0x282d   :  { %v6586_v60 = vsub.f32 %v6574_v45, %v6584_v52  ;;  %v6589_v54 = vmul.f32 %v6587_v50, %v6587_v50 }
0x282f   :  { %v6593_v55 = vsel %vm1582_vm10, %v6589_v54, 0.0  ;;  %v6588_v2 = vmul.f32 %v6586_v60, %v6586_v60 }
0x2830   :  { %6594 = vadd.xlane.f32.xlu0 %v6593_v55 }
0x2831   :  { %v6590_v56 = vsel %vm1582_vm10, %v6588_v2, 0.0 }
0x2832   :  { %6591 = vadd.xlane.f32.xlu1 %v6590_v56 }
0x28b9   :  { %v6595_v1 = vpop.xlane.xlu0 %6594 }
0x28ba   :  { %v6597_v4 = vmul.f32 0.03125, %v6595_v1 }
0x28bb   :  { %v6592_v6 = vpop.xlane.xlu1 %6591 }
0x28bc   :  { %v6599_v10 = vadd.f32 1e-05, %v6597_v4  ;;  %v6596_v46 = vmul.f32 0.03125, %v6592_v6 }
0x28be   :  { %11048 = vrsqrt.f32 %v6599_v10  ;;  %v6598_v48 = vadd.f32 1e-05, %v6596_v46 }
0x28c0   :  { %11050 = vrsqrt.f32 %v6598_v48 }
0x28cb   :  { %v11049_v11 = vpop.eup %11048 }
0x28cc   :  { %v6603_v13 = vmul.f32 %v11049_v11, %v6587_v50 }
0x28cd   :  { %v11051_v15 = vpop.eup %11050 }
0x28ce   :  { %v6602_v34 = vmul.f32 %v11051_v15, %v6586_v60  ;;  %v6611_v58 = vmul.f32 %v9630_v29, %v6603_v13  ;;  %v14384_v60 = vld [vmem:[%s14849_s29 + $0x8] sm:$0xff] }
0x28d0   :  { %v6610_v49 = vmul.f32 %v9630_v29, %v6602_v34  ;;  %v14279_v26 = vadd.f32 %v9631_v17, %v6611_v58 }
0x28d2   :  { %v14277_v18 = vadd.f32 %v9631_v17, %v6610_v49 }
0x28d4   :  { %10534 = vmatprep.mubr.msk.f32.mxu1 %vm1582_vm10, %v14277_v18  ;;  %10556 = vmatprep.mubr.msk.f32.mxu0 %vm1582_vm10, %v14277_v18 }
0x28d5   :  { %10535 = vmatmul.mubr.msk.f32.vlgmr.msra.gmra.mxu1 %vm1582_vm10, %v14279_v26  ;;  %10557 = vmatmul.mubr.msk.f32.vlgmr.msra.gmra.mxu0 %vm1582_vm10, %v14279_v26 }
0x28d6   :  { %10538 = vmatpush3.msra.mxu1 %v6715_v0  ;;  %10545 = vmatprep.mubr.msk.f32.mxu1 %vm1582_vm10, %v14277_v18 }
0x28d7   :  { %10539 = vmatprep.subr.mxu1 %v6714_v19 }
0x28d8   :  { %10540 = vmatpush3.msra.mxu1 %v6714_v19 }
0x28d9   :  { %10541 = vmatprep.subr.mxu1 %v6713_v22 }
0x28da   :  { %10542 = vmatpush3.msra.mxu1 %v6713_v22 }
0x28db   :  { %10543 = vmatprep.subr.mxu1 %v6712_v38 }
0x28dc   :  { %10544 = vmatpush3.msra.mxu1 %v6712_v38 }
0x28dd   :  { %10546 = vmatmul.mubr.msk.f32.vlgmr.msra.gmra.mxu1 %vm1582_vm10, %v14279_v26 }
0x2995   :  { %v10536_v5 = vpop.f32.mrf.mxu1  ;;  %v10558_v41 = vpop.f32.mrf.mxu0 }
0x2996   :  { %v6709_v53 = vadd.f32 %v10536_v5, %v9632_v37  ;;  %v14324_v44 = vadd.f32 %v10558_v41, %v9638_v36 }
0x2997   :  { %v6703_v25 = vpop.f32.mrf.mxu1  ;;  %v6875_v42 = vpop.f32.mrf.mxu0 }
0x2998   :  { %v6704_v27 = vadd.f32 %v9632_v37, %v6703_v25  ;;  %v14322_v43 = vmul.f32 0.35355338, %v6709_v53  ;;  %v14341_v47 = vadd.f32 %v9638_v36, %v6875_v42 }
0x299a   :  { %v14296_v28 = vmul.f32 0.35355338, %v6704_v27  ;;  %v6887_v45 = vsel %vm1820_vm13, %v14322_v43, 0.0  ;;  %v7000_v39 = vsel %vm13608_vm4, %v14322_v43, 0.0  ;;  %v7269_v21 = vsel %vm13598_vm0, %v14322_v43, 0.0 }
0x299c   :  { %v6886_v30 = vsel %vm1820_vm13, %v14296_v28, 0.0  ;;  %v6999_v32 = vsel %vm13608_vm4, %v14296_v28, 0.0  ;;  %v7268_v24 = vsel %vm13598_vm0, %v14296_v28, 0.0 }
0x299d   :  { %v10547_v33 = vpop.f32.mrf.mxu1  ;;  %10563 = vmatprep.mubr.msk.f32.mxu1 %vm1582_vm10, %v6886_v30  ;;  %10570 = vmatprep.mubr.msk.f32.mxu0 %vm1582_vm10, %v6999_v32 }
0x299e   :  { %v14306_v35 = vadd.f32 %v10547_v33, %v9635_v61 }
0x299f   :  { %v6789_v40 = vpop.f32.mrf.mxu1 }
0x29a0   :  { %v14308_v51 = vadd.f32 %v9635_v61, %v6789_v40  ;;  %10559 = vmatprep.subr.msk.mxu1 %vm1582_vm10, %v14306_v35  ;;  %10566 = vmatprep.subr.msk.mxu0 %vm1582_vm10, %v14306_v35 }
0x29a1   :  { %10560 = vmatpush3.xpose.msk.msra.mxu1 %vm1582_vm10, %v14306_v35  ;;  %10567 = vmatpush3.xpose.msk.msra.mxu0 %vm1582_vm10, %v14306_v35 }
0x29a2   :  { %10561 = vmatprep.subr.msk.mxu1 %vm1582_vm10, %v14308_v51  ;;  %10568 = vmatprep.subr.msk.mxu0 %vm1582_vm10, %v14308_v51 }
0x29a5   :  { %10562 = vmatpush3.xpose.msk.msra.mxu1 %vm1582_vm10, %v14308_v51  ;;  %10569 = vmatpush3.xpose.msk.msra.mxu0 %vm1582_vm10, %v14308_v51 }
0x29a6   :  { %10573 = vmatprep.subr.msk.mxu1 %vm13608_vm4, %v14324_v44  ;;  %10587 = vmatprep.subr.msk.mxu0 %vm1582_vm10, %v14306_v35 }
0x29a8   :  { %10564 = vmatmul.mubr.msk.f32.vlgmr.msra.gmra.mxu1 %vm1582_vm10, %v6887_v45  ;;  %10571 = vmatmul.mubr.msk.f32.vlgmr.msra.gmra.mxu0 %vm1582_vm10, %v7000_v39 }
0x29a9   :  { %10574 = vmatpush3.msk.msra.mxu1 %vm13608_vm4, %v14324_v44  ;;  %10588 = vmatpush3.xpose.msk.msra.mxu0 %vm1582_vm10, %v14306_v35 }
0x29aa   :  { %10591 = vmatprep.mubr.msk.f32.mxu0 %vm1582_vm10, %v7268_v24  ;;  %10575 = vmatprep.subr.msk.mxu1 %vm13608_vm4, %v14341_v47 }
0x29ab   :  { %10589 = vmatprep.subr.msk.mxu0 %vm1582_vm10, %v14308_v51  ;;  %10576 = vmatpush3.msk.msra.mxu1 %vm13608_vm4, %v14341_v47 }
0x29ac   :  { %10580 = vmatprep.subr.msk.mxu1 %vm1820_vm13, %v14324_v44 }
0x29ad   :  { %10590 = vmatpush3.xpose.msk.msra.mxu0 %vm1582_vm10, %v14308_v51 }
0x29ae   :  { %10608 = vmatprep.subr.msk.mxu0 %vm13616_vm5, %v14324_v44 }
0x29b0   :  { %10592 = vmatmul.mubr.msk.f32.vlgmr.msra.gmra.mxu0 %vm1582_vm10, %v7269_v21 }
0x29b1   :  { %10609 = vmatpush3.msk.msra.mxu0 %vm13616_vm5, %v14324_v44 }
0x29b2   :  { %10610 = vmatprep.subr.msk.mxu0 %vm13616_vm5, %v14341_v47 }
0x29b3   :  { %10611 = vmatpush3.msk.msra.mxu0 %vm13616_vm5, %v14341_v47 }
0x2a68   :  { %v10565_v50 = vpop.f32.mrf.mxu1  ;;  %v10572_v52 = vpop.f32.mrf.mxu0 }
0x2a69   :  { %v7079_v54 = vadd.f32 %v14384_v60, %v10572_v52  ;;  %v6972_v56 = vadd.f32 %v14384_v60, %v10565_v50 }
0x2a6a   :  { %v6966_v55 = vpop.f32.mrf.mxu1  ;;  %v7073_v2 = vpop.f32.mrf.mxu0 }
0x2a6b   :  { %v7074_v9 = vadd.f32 %v14389_v57, %v7073_v2  ;;  %v7085_v59 = vsel %vm4408_vm14, %v7079_v54, -inf  ;;  %v6967_v7 = vadd.f32 %v14389_v57, %v6966_v55  ;;  %v6978_v62 = vsel %vm4408_vm14, %v6972_v56, -inf }
0x2a6c   :  { %7086 = vmax.xlane.f32.xlu0 %v7085_v59 }
0x2a6d   :  { %v7082_v31 = vsel %vm4408_vm14, %v7074_v9, -inf  ;;  %v6975_v0 = vsel %vm4408_vm14, %v6967_v7, -inf }
0x2a6e   :  { %7083 = vmax.xlane.f32.xlu1 %v7082_v31 }
0x2a70   :  { %v10593_v63 = vpop.f32.mrf.mxu0  ;;  %6979 = vmax.xlane.f32.xlu0 %v6978_v62 }
0x2a71   :  { %v7348_v8 = vadd.f32 %v14384_v60, %v10593_v63 }
0x2a72   :  { %v7342_v1 = vpop.f32.mrf.mxu0  ;;  %6976 = vmax.xlane.f32.xlu1 %v6975_v0 }
0x2a73   :  { %v7343_v4 = vadd.f32 %v14389_v57, %v7342_v1  ;;  %v7354_v6 = vsel %vm4408_vm14, %v7348_v8, -inf }
0x2a74   :  { %7355 = vmax.xlane.f32.xlu0 %v7354_v6 }
0x2a75   :  { %v7351_v10 = vsel %vm4408_vm14, %v7343_v4, -inf }
0x2a76   :  { %7352 = vmax.xlane.f32.xlu1 %v7351_v10 }
0x2af5   :  { %v7087_v46 = vpop.xlane.xlu0 %7086 }
0x2af6   :  { %v7089_v48 = vsub.f32 %v7079_v54, %v7087_v46 }
0x2af7   :  { %v7084_v11 = vpop.xlane.xlu1 %7083 }
0x2af8   :  { %v7092_v29 = vmul.f32 1.442695, %v7089_v48  ;;  %v7088_v13 = vsub.f32 %v7074_v9, %v7084_v11 }
0x2af9   :  { %v6980_v15 = vpop.xlane.xlu0 %6979 }
0x2afa   :  { %11052 = vpow2.f32 %v7092_v29  ;;  %v7090_v34 = vmul.f32 1.442695, %v7088_v13  ;;  %v6982_v58 = vsub.f32 %v6972_v56, %v6980_v15 }
0x2afb   :  { %v6977_v17 = vpop.xlane.xlu1 %6976 }
0x2afc   :  { %11054 = vpow2.f32 %v7090_v34  ;;  %v6985_v49 = vmul.f32 1.442695, %v6982_v58  ;;  %v6981_v19 = vsub.f32 %v6967_v7, %v6977_v17 }
0x2afd   :  { %v7356_v22 = vpop.xlane.xlu0 %7355 }
0x2afe   :  { %11056 = vpow2.f32 %v6985_v49  ;;  %v6983_v38 = vmul.f32 1.442695, %v6981_v19  ;;  %v7358_v5 = vsub.f32 %v7348_v8, %v7356_v22 }
0x2aff   :  { %v7353_v37 = vpop.xlane.xlu1 %7352 }
0x2b00   :  { %11058 = vpow2.f32 %v6983_v38  ;;  %v7361_v25 = vmul.f32 1.442695, %v7358_v5  ;;  %v7357_v27 = vsub.f32 %v7343_v4, %v7353_v37 }
0x2b02   :  { %11060 = vpow2.f32 %v7361_v25  ;;  %v7359_v61 = vmul.f32 1.442695, %v7357_v27 }
0x2b04   :  { %11062 = vpow2.f32 %v7359_v61 }
0x2b07   :  { %v11053_v30 = vpop.eup %11052 }
0x2b08   :  { %v7097_v32 = vsel %vm4408_vm14, %v11053_v30, 0.0 }
0x2b09   :  { %v11055_v33 = vpop.eup %11054  ;;  %7098 = vadd.xlane.f32.xlu0 %v7097_v32 }
0x2b0a   :  { %v7094_v53 = vsel %vm4408_vm14, %v11055_v33, 0.0 }
0x2b0b   :  { %v11057_v40 = vpop.eup %11056  ;;  %7095 = vadd.xlane.f32.xlu1 %v7094_v53 }
0x2b0c   :  { %v6990_v41 = vsel %vm4408_vm14, %v11057_v40, 0.0 }
0x2b0d   :  { %v11059_v36 = vpop.eup %11058  ;;  %6991 = vadd.xlane.f32.xlu0 %v6990_v41 }
0x2b0e   :  { %v6987_v42 = vsel %vm4408_vm14, %v11059_v36, 0.0 }
0x2b0f   :  { %v11061_v45 = vpop.eup %11060  ;;  %6988 = vadd.xlane.f32.xlu1 %v6987_v42 }
0x2b10   :  { %v7366_v39 = vsel %vm4408_vm14, %v11061_v45, 0.0 }
0x2b11   :  { %v11063_v24 = vpop.eup %11062  ;;  %7367 = vadd.xlane.f32.xlu0 %v7366_v39  ;;  %v7650_v39 = vld [vmem:[#allocation54 + $0x10] sm:$0xff] }
0x2b12   :  { %v7363_v21 = vsel %vm4408_vm14, %v11063_v24, 0.0 }
0x2b13   :  { %7364 = vadd.xlane.f32.xlu1 %v7363_v21  ;;  %v7648_v21 = vld [vmem:[#allocation54] sm:$0xff] }
0x2b92   :  { %v7099_v50 = vpop.xlane.xlu0 %7098 }
0x2b93   :  { %11064 = vrcp.f32 %v7099_v50 }
0x2b94   :  { %v7096_v52 = vpop.xlane.xlu1 %7095 }
0x2b95   :  { %11066 = vrcp.f32 %v7096_v52 }
0x2b96   :  { %v6992_v54 = vpop.xlane.xlu0 %6991 }
0x2b97   :  { %11068 = vrcp.f32 %v6992_v54 }
0x2b98   :  { %v6989_v55 = vpop.xlane.xlu1 %6988 }
0x2b99   :  { %11070 = vrcp.f32 %v6989_v55 }
0x2b9a   :  { %v7368_v2 = vpop.xlane.xlu0 %7367 }
0x2b9b   :  { %11072 = vrcp.f32 %v7368_v2  ;;  %v7881_v2 = vld [vmem:[%s14861_s23 + $0x18] sm:$0xff] }
0x2b9c   :  { %v7365_v56 = vpop.xlane.xlu1 %7364 }
0x2b9d   :  { %11074 = vrcp.f32 %v7365_v56  ;;  %v7880_v56 = vld [vmem:[%s14861_s23 + $0x10] sm:$0xff] }
0x2ba0   :  { %v11065_v9 = vpop.eup %11064 }
0x2ba1   :  { %v7103_v31 = vmul.f32 %v11065_v9, %v11053_v30  ;;  %v7879_v9 = vld [vmem:[%s14861_s23 + $0x8] sm:$0xff] }
0x2ba2   :  { %v11067_v59 = vpop.eup %11066 }
0x2ba3   :  { %v7101_v7 = vmul.f32 %v11067_v59, %v11055_v33  ;;  %v7651_v33 = vld [vmem:[#allocation54 + $0x18] sm:$0xff] }
0x2ba4   :  { %v11069_v62 = vpop.eup %11068  ;;  %10615 = vmatprep.subr.mxu0 %v7651_v33  ;;  %v7878_v59 = vld [vmem:[%s14861_s23] sm:$0xff] }
0x2ba5   :  { %10577 = vmatprep.mubr.msk.f32.mxu1 %vm4408_vm14, %v7101_v7  ;;  %v6996_v0 = vmul.f32 %v11069_v62, %v11057_v40  ;;  %v9673_v7 = vld [vmem:[#allocation49] ss:$0 sm:$0xff] }
0x2ba6   :  { %v11071_v63 = vpop.eup %11070  ;;  %10578 = vmatmul.mubr.msk.f32.vlgmr.msra.gmra.mxu1 %vm4408_vm14, %v7103_v31 }
0x2ba7   :  { %10581 = vmatpush3.msk.msra.mxu1 %vm1820_vm13, %v14324_v44  ;;  %v6994_v8 = vmul.f32 %v11071_v63, %v11059_v36 }
0x2ba8   :  { %10582 = vmatprep.subr.msk.mxu1 %vm1820_vm13, %v14341_v47  ;;  %v11073_v1 = vpop.eup %11072 }
0x2ba9   :  { %10583 = vmatpush3.msk.msra.mxu1 %vm1820_vm13, %v14341_v47  ;;  %10584 = vmatprep.mubr.msk.f32.mxu1 %vm4408_vm14, %v6994_v8  ;;  %v7372_v10 = vmul.f32 %v11073_v1, %v11061_v45 }
0x2baa   :  { %v11075_v4 = vpop.eup %11074  ;;  %10594 = vmatprep.subr.msk.mxu1 %vm13598_vm0, %v14324_v44  ;;  %10585 = vmatmul.mubr.msk.f32.vlgmr.msra.gmra.mxu1 %vm4408_vm14, %v6996_v0 }
0x2bab   :  { %10595 = vmatpush3.msk.msra.mxu1 %vm13598_vm0, %v14324_v44  ;;  %v7370_v6 = vmul.f32 %v11075_v4, %v11063_v24  ;;  %v7458_v44 = vsel %vm13616_vm5, %v14296_v28, 0.0  ;;  %v7649_v24 = vld [vmem:[#allocation54 + $0x8] sm:$0xff] }
0x2bac   :  { %10596 = vmatprep.subr.msk.mxu1 %vm13598_vm0, %v14341_v47 }
0x2bad   :  { %10597 = vmatpush3.msk.msra.mxu1 %vm13598_vm0, %v14341_v47  ;;  %10598 = vmatprep.mubr.msk.f32.mxu1 %vm4408_vm14, %v7370_v6  ;;  %v7459_v47 = vsel %vm13616_vm5, %v14322_v43, 0.0  ;;  %v9681_v6 = vld [vmem:[#allocation27] ss:$0 sm:$0xff] }
0x2bae   :  { %10601 = vmatprep.subr.msk.mxu1 %vm1582_vm10, %v14306_v35  ;;  %10599 = vmatmul.mubr.msk.f32.vlgmr.msra.gmra.mxu1 %vm4408_vm14, %v7372_v10 }
0x2baf   :  { %10602 = vmatpush3.xpose.msk.msra.mxu1 %vm1582_vm10, %v14306_v35  ;;  %10605 = vmatprep.mubr.msk.f32.mxu1 %vm1582_vm10, %v7458_v44 }
0x2bb0   :  { %10603 = vmatprep.subr.msk.mxu1 %vm1582_vm10, %v14308_v51 }
0x2bb3   :  { %10604 = vmatpush3.xpose.msk.msra.mxu1 %vm1582_vm10, %v14308_v51 }
0x2bb6   :  { %10606 = vmatmul.mubr.msk.f32.vlgmr.msra.gmra.mxu1 %vm1582_vm10, %v7459_v47 }
0x2c66   :  { %v10579_v46 = vpop.f32.mrf.mxu1 }
0x2c68   :  { %v7178_v48 = vpop.f32.mrf.mxu1 }
0x2c6a   :  { %v10586_v28 = vpop.f32.mrf.mxu1 }
0x2c6b   :  { %v7265_v11 = vadd.f32 %v10586_v28, %v10579_v46 }
0x2c6c   :  { %v7259_v29 = vpop.f32.mrf.mxu1 }
0x2c6d   :  { %v7260_v35 = vadd.f32 %v7259_v29, %v7178_v48 }
0x2c6e   :  { %v10600_v13 = vpop.f32.mrf.mxu1 }
0x2c6f   :  { %v7457_v15 = vadd.f32 %v10600_v13, %v7265_v11 }
0x2c70   :  { %v7447_v34 = vpop.f32.mrf.mxu1 }
0x2c71   :  { %v7456_v58 = vadd.f32 %v7447_v34, %v7260_v35 }
0x2c76   :  { %v10607_v17 = vpop.f32.mrf.mxu1 }
0x2c77   :  { %v7538_v49 = vadd.f32 %v14384_v60, %v10607_v17  ;;  %v7788_v17 = vld [vmem:[%s14862_s25 + $0x10] sm:$0xff] }
0x2c78   :  { %v7532_v51 = vpop.f32.mrf.mxu1 }
0x2c79   :  { %v7533_v19 = vadd.f32 %v14389_v57, %v7532_v51  ;;  %v7544_v43 = vsel %vm4408_vm14, %v7538_v49, -inf  ;;  %v7786_v51 = vld [vmem:[%s14862_s25] sm:$0xff] }
0x2c7a   :  { %7545 = vmax.xlane.f32.xlu0 %v7544_v43 }
0x2c7b   :  { %v7541_v22 = vsel %vm4408_vm14, %v7533_v19, -inf }
0x2c7c   :  { %7542 = vmax.xlane.f32.xlu1 %v7541_v22 }
0x2d03   :  { %v7546_v38 = vpop.xlane.xlu0 %7545 }
0x2d04   :  { %v7548_v5 = vsub.f32 %v7538_v49, %v7546_v38  ;;  %v7787_v49 = vld [vmem:[%s14862_s25 + $0x8] sm:$0xff] }
0x2d05   :  { %v7543_v37 = vpop.xlane.xlu1 %7542 }
0x2d06   :  { %v7551_v25 = vmul.f32 1.442695, %v7548_v5  ;;  %v7547_v27 = vsub.f32 %v7533_v19, %v7543_v37 }
0x2d08   :  { %11076 = vpow2.f32 %v7551_v25  ;;  %v7549_v61 = vmul.f32 1.442695, %v7547_v27  ;;  %v9676_v27 = vld [vmem:[#allocation40] ss:$0 sm:$0xff] }
0x2d0a   :  { %11078 = vpow2.f32 %v7549_v61 }
0x2d15   :  { %v11077_v30 = vpop.eup %11076 }
0x2d16   :  { %v7556_v60 = vsel %vm4408_vm14, %v11077_v30, 0.0 }
0x2d17   :  { %v11079_v32 = vpop.eup %11078  ;;  %7557 = vadd.xlane.f32.xlu0 %v7556_v60 }
0x2d18   :  { %v7553_v57 = vsel %vm4408_vm14, %v11079_v32, 0.0 }
0x2d19   :  { %7554 = vadd.xlane.f32.xlu1 %v7553_v57  ;;  %v9677_v57 = vld [vmem:[#allocation39] ss:$0 sm:$0xff] }
0x2da0   :  { %v7558_v53 = vpop.xlane.xlu0 %7557 }
0x2da1   :  { %11080 = vrcp.f32 %v7558_v53 }
0x2da2   :  { %v7555_v40 = vpop.xlane.xlu1 %7554 }
0x2da3   :  { %11082 = vrcp.f32 %v7555_v40 }
0x2dae   :  { %v11081_v41 = vpop.eup %11080 }
0x2daf   :  { %v7562_v45 = vmul.f32 %v11081_v41, %v11077_v30  ;;  %v7962_v41 = vld [vmem:[#allocation33 + $0x18] sm:$0xff] }
0x2db0   :  { %v11083_v36 = vpop.eup %11082 }
0x2db1   :  { %v7560_v42 = vmul.f32 %v11083_v36, %v11079_v32  ;;  %v7961_v36 = vld [vmem:[#allocation33 + $0x10] sm:$0xff] }
0x2db3   :  { %10612 = vmatprep.mubr.msk.f32.mxu0 %vm4408_vm14, %v7560_v42  ;;  %v7960_v42 = vld [vmem:[#allocation33 + $0x8] sm:$0xff] }
0x2db4   :  { %10613 = vmatmul.mubr.msk.f32.vlgmr.msra.gmra.mxu0 %vm4408_vm14, %v7562_v45  ;;  %v7959_v45 = vld [vmem:[#allocation33] sm:$0xff] }
0x2db5   :  { %10616 = vmatpush3.msra.mxu0 %v7651_v33 }
0x2db6   :  { %10617 = vmatprep.subr.mxu0 %v7650_v39 }
0x2db7   :  { %10618 = vmatpush3.msra.mxu0 %v7650_v39  ;;  %v9678_v39 = vld [vmem:[#allocation30] ss:$0 sm:$0xff] }
0x2db8   :  { %10619 = vmatprep.subr.mxu0 %v7649_v24 }
0x2db9   :  { %10620 = vmatpush3.msra.mxu0 %v7649_v24 }
0x2dba   :  { %10621 = vmatprep.subr.mxu0 %v7648_v21 }
0x2dbb   :  { %10622 = vmatpush3.msra.mxu0 %v7648_v21 }
0x2dbc   :  { %10637 = vmatprep.subr.mxu0 %v12886_v14 }
0x2e74   :  { %v10614_v50 = vpop.f32.mrf.mxu0 }
0x2e75   :  { %v7647_v55 = vadd.f32 %v10614_v50, %v7457_v15 }
0x2e76   :  { %v7637_v52 = vpop.f32.mrf.mxu0 }
0x2e77   :  { %v7646_v54 = vadd.f32 %v7637_v52, %v7456_v58  ;;  %v7789_v58 = vld [vmem:[%s14862_s25 + $0x18] sm:$0xff] }
0x2e78   :  { %10626 = vmatprep.subr.mxu1 %v7789_v58 }
0x2e79   :  { %10623 = vmatprep.mubr.msk.f32.mxu0 %vm1582_vm10, %v7646_v54  ;;  %10627 = vmatpush3.msra.mxu1 %v7789_v58 }
0x2e7a   :  { %10624 = vmatmul.mubr.msk.f32.vlgmr.msra.gmra.mxu0 %vm1582_vm10, %v7647_v55  ;;  %10628 = vmatprep.subr.mxu1 %v7788_v17 }
0x2e7b   :  { %10638 = vmatpush3.msra.mxu0 %v7881_v2  ;;  %10645 = vmatprep.mubr.msk.f32.mxu0 %vm12887_vm3, %v12886_v14 }
0x2e7c   :  { %10639 = vmatprep.subr.mxu0 %v12886_v14  ;;  %10629 = vmatpush3.msra.mxu1 %v7788_v17 }
0x2e7d   :  { %10640 = vmatpush3.msra.mxu0 %v7880_v56  ;;  %10630 = vmatprep.subr.mxu1 %v7787_v49 }
0x2e7e   :  { %10641 = vmatprep.subr.mxu0 %v12886_v14  ;;  %10631 = vmatpush3.msra.mxu1 %v7787_v49 }
0x2e7f   :  { %10642 = vmatpush3.msra.mxu0 %v7879_v9  ;;  %10632 = vmatprep.subr.mxu1 %v7786_v51 }
0x2e80   :  { %10643 = vmatprep.subr.mxu0 %v12886_v14  ;;  %10633 = vmatpush3.msra.mxu1 %v7786_v51 }
0x2e81   :  { %10644 = vmatpush3.msra.mxu0 %v7878_v59  ;;  %10648 = vmatprep.subr.mxu1 %v12886_v14 }
0x2e82   :  { %10646 = vmatmul.mubr.msk.f32.vlgmr.msra.gmra.mxu0 %vm1582_vm10, %v14105_v12 }
0x2f3a   :  { %v10625_v31 = vpop.f32.mrf.mxu0 }
0x2f3b   :  { %v7737_v62 = vadd.f32 %v10625_v31, %v9673_v7 }
0x2f3c   :  { %v7731_v63 = vpop.f32.mrf.mxu0 }
0x2f3d   :  { %v7732_v8 = vadd.f32 %v9673_v7, %v7731_v63  ;;  %v7741_v0 = vadd.f32 %v7737_v62, %v14279_v26 }
0x2f3f   :  { %v7747_v1 = vsel %vm1582_vm10, %v7741_v0, 0.0  ;;  %v7740_v4 = vadd.f32 %v7732_v8, %v14277_v18 }
0x2f40   :  { %7748 = vadd.xlane.f32.xlu0 %v7747_v1 }
0x2f41   :  { %v7744_v10 = vsel %vm1582_vm10, %v7740_v4, 0.0 }
0x2f42   :  { %v7955_v44 = vpop.f32.mrf.mxu0  ;;  %7745 = vadd.xlane.f32.xlu1 %v7744_v10 }
0x2f43   :  { %v14476_v47 = vadd.f32 %v9681_v6, %v7955_v44 }
0x2f44   :  { %v10647_v46 = vpop.f32.mrf.mxu0 }
0x2f45   :  { %10659 = vmatprep.subr.msk.mxu0 %vm1582_vm10, %v14476_v47 }
0x2f46   :  { %10660 = vmatpush3.xpose.msk.msra.mxu0 %vm1582_vm10, %v14476_v47 }
0x2fc9   :  { %v7749_v26 = vpop.xlane.xlu0 %7748 }
0x2fca   :  { %v7751_v18 = vmul.f32 0.03125, %v7749_v26 }
0x2fcb   :  { %v7746_v48 = vpop.xlane.xlu1 %7745 }
0x2fcc   :  { %v7753_v28 = vsub.f32 %v7741_v0, %v7751_v18  ;;  %v7750_v11 = vmul.f32 0.03125, %v7746_v48 }
0x2fce   :  { %v7752_v29 = vsub.f32 %v7740_v4, %v7750_v11  ;;  %v7755_v35 = vmul.f32 %v7753_v28, %v7753_v28  ;;  %v14554_v4 = vld [vmem:[%s14855_s24] sm:$0xff] }
0x2fd0   :  { %v7759_v13 = vsel %vm1582_vm10, %v7755_v35, 0.0  ;;  %v7754_v15 = vmul.f32 %v7752_v29, %v7752_v29 }
0x2fd1   :  { %7760 = vadd.xlane.f32.xlu0 %v7759_v13 }
0x2fd2   :  { %v7756_v34 = vsel %vm1582_vm10, %v7754_v15, 0.0 }
0x2fd3   :  { %7757 = vadd.xlane.f32.xlu1 %v7756_v34 }
0x305a   :  { %v7761_v19 = vpop.xlane.xlu0 %7760 }
0x305b   :  { %v7763_v43 = vmul.f32 0.03125, %v7761_v19 }
0x305c   :  { %v7758_v22 = vpop.xlane.xlu1 %7757 }
0x305d   :  { %v7765_v38 = vadd.f32 1e-05, %v7763_v43  ;;  %v7762_v5 = vmul.f32 0.03125, %v7758_v22 }
0x305f   :  { %11084 = vrsqrt.f32 %v7765_v38  ;;  %v7764_v37 = vadd.f32 1e-05, %v7762_v5 }
0x3061   :  { %11086 = vrsqrt.f32 %v7764_v37 }
0x306c   :  { %v11085_v25 = vpop.eup %11084 }
0x306d   :  { %v7769_v61 = vmul.f32 %v11085_v25, %v7753_v28 }
0x306e   :  { %v11087_v30 = vpop.eup %11086 }
0x306f   :  { %v7768_v60 = vmul.f32 %v11087_v30, %v7752_v29  ;;  %v7777_v32 = vmul.f32 %v9676_v27, %v7769_v61 }
0x3071   :  { %v7776_v33 = vmul.f32 %v9676_v27, %v7768_v60  ;;  %v14491_v40 = vadd.f32 %v9677_v57, %v7777_v32 }
0x3073   :  { %v14489_v53 = vadd.f32 %v9677_v57, %v7776_v33 }
0x3075   :  { %10634 = vmatprep.mubr.msk.f32.mxu1 %vm1582_vm10, %v14489_v53 }
0x3076   :  { %10635 = vmatmul.mubr.msk.f32.vlgmr.msra.gmra.mxu1 %vm1582_vm10, %v14491_v40 }
0x3077   :  { %10649 = vmatpush3.msra.mxu1 %v7962_v41  ;;  %10656 = vmatprep.mubr.msk.f32.mxu1 %vm12887_vm3, %v12886_v14 }
0x3078   :  { %10650 = vmatprep.subr.mxu1 %v12886_v14 }
0x3079   :  { %10651 = vmatpush3.msra.mxu1 %v7961_v36 }
0x307a   :  { %10652 = vmatprep.subr.mxu1 %v12886_v14 }
0x307b   :  { %10653 = vmatpush3.msra.mxu1 %v7960_v42 }
0x307c   :  { %10654 = vmatprep.subr.mxu1 %v12886_v14  ;;  %v9683_v14 = vld [vmem:[#allocation31] ss:$0 sm:$0xff] }
0x307d   :  { %10655 = vmatpush3.msra.mxu1 %v7959_v45 }
0x307e   :  { %10657 = vmatmul.mubr.msk.f32.vlgmr.msra.gmra.mxu1 %vm1582_vm10, %v14105_v12  ;;  %10664 = vmatprep.subr.msk.mxu1 %vm1582_vm10, %v14476_v47 }
0x307f   :  { %10665 = vmatpush3.xpose.msk.msra.mxu1 %vm1582_vm10, %v14476_v47 }
0x3136   :  { %v10636_v24 = vpop.f32.mrf.mxu1 }
0x3137   :  { %v7875_v21 = vadd.f32 %v10636_v24, %v9678_v39 }
0x3138   :  { %v7869_v50 = vpop.f32.mrf.mxu1 }
0x3139   :  { %v7870_v52 = vadd.f32 %v9678_v39, %v7869_v50  ;;  %v14508_v54 = vmul.f32 0.35355338, %v7875_v21 }
0x313b   :  { %v14510_v55 = vmul.f32 0.35355338, %v7870_v52  ;;  %v8043_v9 = vsel %vm1820_vm13, %v14508_v54, 0.0  ;;  %v8152_v59 = vsel %vm13608_vm4, %v14508_v54, 0.0  ;;  %v8426_v61 = vsel %vm13598_vm0, %v14508_v54, 0.0 }
0x313c   :  { %v8618_v60 = vsel %vm13616_vm5, %v14508_v54, 0.0 }
0x313d   :  { %v8042_v12 = vsel %vm1820_vm13, %v14510_v55, 0.0  ;;  %v8151_v2 = vsel %vm13608_vm4, %v14510_v55, 0.0  ;;  %v8425_v27 = vsel %vm13598_vm0, %v14510_v55, 0.0  ;;  %v8617_v30 = vsel %vm13616_vm5, %v14510_v55, 0.0 }
0x313e   :  { %v8036_v56 = vpop.f32.mrf.mxu1  ;;  %10661 = vmatprep.mubr.msk.f32.mxu0 %vm1582_vm10, %v8042_v12  ;;  %10666 = vmatprep.mubr.msk.f32.mxu1 %vm1582_vm10, %v8151_v2 }
0x313f   :  { %v14526_v7 = vadd.f32 %v9683_v14, %v8036_v56  ;;  %10662 = vmatmul.mubr.msk.f32.vlgmr.msra.gmra.mxu0 %vm1582_vm10, %v8043_v9  ;;  %10667 = vmatmul.mubr.msk.f32.vlgmr.msra.gmra.mxu1 %vm1582_vm10, %v8152_v59 }
0x3140   :  { %v10658_v31 = vpop.f32.mrf.mxu1 }
0x3141   :  { %v8256_v62 = vsel %vm13608_vm4, %v14526_v7, 0.0  ;;  %v8150_v63 = vsel %vm1820_vm13, %v14526_v7, 0.0  ;;  %v14543_v8 = vsel %vm13598_vm0, %v14526_v7, 0.0 }
0x3142   :  { %10669 = vmatprep.subr.msk.mxu0 %vm2005_vm6, %v8256_v62  ;;  %10674 = vmatprep.subr.msk.mxu1 %vm2005_vm6, %v8150_v63 }
0x3143   :  { %10670 = vmatpush3.msk.msra.mxu0 %vm2005_vm6, %v8256_v62  ;;  %10675 = vmatpush3.msk.msra.mxu1 %vm2005_vm6, %v8150_v63 }
0x3144   :  { %10679 = vmatprep.subr.msk.mxu0 %vm1582_vm10, %v14476_v47  ;;  %10684 = vmatprep.subr.msk.mxu1 %vm2005_vm6, %v14543_v8 }
0x31ff   :  { %v10668_v3 = vpop.f32.mrf.mxu1  ;;  %v10663_v29 = vpop.f32.mrf.mxu0 }
0x3200   :  { %v8231_v0 = vadd.f32 %v14550_v20, %v10668_v3  ;;  %v8125_v15 = vadd.f32 %v14550_v20, %v10663_v29 }
0x3201   :  { %v8225_v1 = vpop.f32.mrf.mxu1  ;;  %v8119_v13 = vpop.f32.mrf.mxu0 }
0x3202   :  { %v8226_v6 = vadd.f32 %v14554_v4, %v8225_v1  ;;  %v8237_v10 = vsel %vm2001_vm9, %v8231_v0, -inf  ;;  %v8120_v17 = vadd.f32 %v14554_v4, %v8119_v13  ;;  %v8131_v51 = vsel %vm2001_vm9, %v8125_v15, -inf }
0x3203   :  { %8238 = vmax.xlane.f32.xlu0 %v8237_v10 }
0x3204   :  { %v8234_v44 = vsel %vm2001_vm9, %v8226_v6, -inf  ;;  %v8128_v19 = vsel %vm2001_vm9, %v8120_v17, -inf }
0x3205   :  { %8235 = vmax.xlane.f32.xlu1 %v8234_v44 }
0x328c   :  { %v8239_v46 = vpop.xlane.xlu0 %8238 }
0x328d   :  { %v8241_v26 = vsub.f32 %v8231_v0, %v8239_v46 }
0x328e   :  { %v8236_v18 = vpop.xlane.xlu1 %8235 }
0x328f   :  { %v8244_v48 = vmul.f32 1.442695, %v8241_v26  ;;  %v8240_v28 = vsub.f32 %v8226_v6, %v8236_v18 }
0x3291   :  { %11088 = vpow2.f32 %v8244_v48  ;;  %v8242_v11 = vmul.f32 1.442695, %v8240_v28 }
0x3293   :  { %11090 = vpow2.f32 %v8242_v11 }
0x329e   :  { %v11089_v35 = vpop.eup %11088 }
0x329f   :  { %v8249_v34 = vsel %vm2001_vm9, %v11089_v35, 0.0 }
0x32a0   :  { %v11091_v58 = vpop.eup %11090  ;;  %8250 = vadd.xlane.f32.xlu0 %v8249_v34 }
0x32a1   :  { %v8246_v49 = vsel %vm2001_vm9, %v11091_v58, 0.0 }
0x32a2   :  { %8247 = vadd.xlane.f32.xlu1 %v8246_v49 }
0x32a4   :  { %8132 = vmax.xlane.f32.xlu0 %v8131_v51 }
0x32a6   :  { %8129 = vmax.xlane.f32.xlu1 %v8128_v19 }
0x3329   :  { %v8251_v43 = vpop.xlane.xlu0 %8250 }
0x332a   :  { %11092 = vrcp.f32 %v8251_v43 }
0x332b   :  { %v8248_v22 = vpop.xlane.xlu1 %8247 }
0x332c   :  { %11094 = vrcp.f32 %v8248_v22  ;;  %v8722_v22 = vsel %vm13616_vm5, %v14526_v7, 0.0 }
0x332d   :  { %v8133_v32 = vpop.xlane.xlu0 %8132 }
0x332e   :  { %v8135_v57 = vsub.f32 %v8125_v15, %v8133_v32 }
0x332f   :  { %v8130_v16 = vpop.xlane.xlu1 %8129 }
0x3330   :  { %v8134_v33 = vsub.f32 %v8120_v17, %v8130_v16  ;;  %v8138_v41 = vmul.f32 1.442695, %v8135_v57  ;;  %v8812_v16 = vld [vmem:[%s14863_s26 + $0x18] sm:$0xff]  ;;  %v8811_v57 = vld [vmem:[%s14863_s26 + $0x10] sm:$0xff] }
0x3332   :  { %v8136_v36 = vmul.f32 1.442695, %v8134_v33  ;;  %11096 = vpow2.f32 %v8138_v41  ;;  %v8810_v33 = vld [vmem:[%s14863_s26 + $0x8] sm:$0xff]  ;;  %v8809_v41 = vld [vmem:[%s14863_s26] sm:$0xff] }
0x3334   :  { %11098 = vpow2.f32 %v8136_v36 }
0x3337   :  { %v11093_v38 = vpop.eup %11092 }
0x3338   :  { %v8255_v25 = vmul.f32 %v11093_v38, %v11089_v35 }
0x3339   :  { %v11095_v5 = vpop.eup %11094 }
0x333a   :  { %v8253_v37 = vmul.f32 %v11095_v5, %v11091_v58 }
0x333c   :  { %10671 = vmatprep.mubr.msk.f32.mxu0 %vm2001_vm9, %v8253_v37 }
0x333d   :  { %10672 = vmatmul.mubr.msk.f32.vlgmr.msra.gmra.mxu0 %vm2001_vm9, %v8255_v25 }
0x333e   :  { %10680 = vmatpush3.xpose.msk.msra.mxu0 %vm1582_vm10, %v14476_v47  ;;  %10681 = vmatprep.mubr.msk.f32.mxu0 %vm1582_vm10, %v8425_v27 }
0x333f   :  { %10689 = vmatprep.subr.msk.mxu0 %vm1582_vm10, %v14476_v47  ;;  %v11097_v56 = vpop.eup %11096 }
0x3340   :  { %v8143_v31 = vsel %vm2001_vm9, %v11097_v56, 0.0 }
0x3341   :  { %10682 = vmatmul.mubr.msk.f32.vlgmr.msra.gmra.mxu0 %vm1582_vm10, %v8426_v61  ;;  %v11099_v59 = vpop.eup %11098 }
0x3342   :  { %10690 = vmatpush3.xpose.msk.msra.mxu0 %vm1582_vm10, %v14476_v47  ;;  %10691 = vmatprep.mubr.msk.f32.mxu0 %vm1582_vm10, %v8617_v30  ;;  %v8140_v62 = vsel %vm2001_vm9, %v11099_v59, 0.0 }
0x3343   :  { %10699 = vmatprep.subr.mxu0 %v8812_v16 }
0x3345   :  { %10692 = vmatmul.mubr.msk.f32.vlgmr.msra.gmra.mxu0 %vm1582_vm10, %v8618_v60 }
0x3346   :  { %10700 = vmatpush3.msra.mxu0 %v8812_v16 }
0x3347   :  { %10701 = vmatprep.subr.mxu0 %v8811_v57 }
0x3348   :  { %10702 = vmatpush3.msra.mxu0 %v8811_v57 }
0x3349   :  { %10703 = vmatprep.subr.mxu0 %v8810_v33 }
0x334a   :  { %10704 = vmatpush3.msra.mxu0 %v8810_v33 }
0x334b   :  { %10705 = vmatprep.subr.mxu0 %v8809_v41 }
0x334c   :  { %10706 = vmatpush3.msra.mxu0 %v8809_v41 }
0x33fd   :  { %v14589_v42 = vpop.f32.mrf.mxu0 }
0x33ff   :  { %v14591_v45 = vpop.f32.mrf.mxu0 }
0x3401   :  { %v10683_v47 = vpop.f32.mrf.mxu0 }
0x3402   :  { %v8505_v39 = vadd.f32 %v14550_v20, %v10683_v47 }
0x3403   :  { %v8499_v24 = vpop.f32.mrf.mxu0 }
0x3404   :  { %v8500_v21 = vadd.f32 %v14554_v4, %v8499_v24  ;;  %v8511_v50 = vsel %vm2001_vm9, %v8505_v39, -inf }
0x3405   :  { %8512 = vmax.xlane.f32.xlu0 %v8511_v50  ;;  %v10693_v52 = vpop.f32.mrf.mxu0 }
0x3406   :  { %v8697_v54 = vadd.f32 %v14550_v20, %v10693_v52  ;;  %v8508_v55 = vsel %vm2001_vm9, %v8500_v21, -inf }
0x3407   :  { %v8691_v14 = vpop.f32.mrf.mxu0  ;;  %8509 = vmax.xlane.f32.xlu1 %v8508_v55 }
0x3408   :  { %v8692_v12 = vadd.f32 %v14554_v4, %v8691_v14  ;;  %v8703_v2 = vsel %vm2001_vm9, %v8697_v54, -inf }
0x3409   :  { %8704 = vmax.xlane.f32.xlu0 %v8703_v2 }
0x340a   :  { %v8700_v9 = vsel %vm2001_vm9, %v8692_v12, -inf }
0x340b   :  { %8701 = vmax.xlane.f32.xlu1 %v8700_v9 }
0x340d   :  { %8144 = vadd.xlane.f32.xlu0 %v8143_v31 }
0x340f   :  { %8141 = vadd.xlane.f32.xlu1 %v8140_v62 }
0x348e   :  { %v8513_v63 = vpop.xlane.xlu0 %8512 }
0x348f   :  { %v8515_v3 = vsub.f32 %v8505_v39, %v8513_v63 }
0x3490   :  { %v8510_v20 = vpop.xlane.xlu1 %8509 }
0x3491   :  { %v8518_v0 = vmul.f32 1.442695, %v8515_v3  ;;  %v8514_v1 = vsub.f32 %v8500_v21, %v8510_v20 }
0x3492   :  { %v8705_v4 = vpop.xlane.xlu0 %8704 }
0x3493   :  { %11100 = vpow2.f32 %v8518_v0  ;;  %v8516_v6 = vmul.f32 1.442695, %v8514_v1  ;;  %v8707_v10 = vsub.f32 %v8697_v54, %v8705_v4 }
0x3494   :  { %v8702_v44 = vpop.xlane.xlu1 %8701 }
0x3495   :  { %11102 = vpow2.f32 %v8516_v6  ;;  %v8710_v46 = vmul.f32 1.442695, %v8707_v10  ;;  %v8706_v26 = vsub.f32 %v8692_v12, %v8702_v44 }
0x3496   :  { %v8145_v18 = vpop.xlane.xlu0 %8144 }
0x3497   :  { %11104 = vpow2.f32 %v8710_v46  ;;  %v8708_v48 = vmul.f32 1.442695, %v8706_v26 }
0x3498   :  { %11106 = vrcp.f32 %v8145_v18  ;;  %v8142_v28 = vpop.xlane.xlu1 %8141  ;;  %v8949_v18 = vld [vmem:[#allocation36 + $0x10] sm:$0xff] }
0x3499   :  { %11108 = vpow2.f32 %v8708_v48  ;;  %v8948_v48 = vld [vmem:[#allocation36 + $0x8] sm:$0xff] }
0x349a   :  { %11110 = vrcp.f32 %v8142_v28  ;;  %v8947_v28 = vld [vmem:[#allocation36] sm:$0xff] }
0x34a0   :  { %v11101_v11 = vpop.eup %11100 }
0x34a1   :  { %v8523_v29 = vsel %vm2001_vm9, %v11101_v11, 0.0 }
0x34a2   :  { %v11103_v35 = vpop.eup %11102  ;;  %8524 = vadd.xlane.f32.xlu0 %v8523_v29  ;;  %v9047_v29 = vld [vmem:[%s14864_s8 + $0x30] sm:$0xff] }
0x34a3   :  { %v8520_v13 = vsel %vm2001_vm9, %v11103_v35, 0.0 }
0x34a4   :  { %v11105_v15 = vpop.eup %11104  ;;  %8521 = vadd.xlane.f32.xlu1 %v8520_v13  ;;  %v9045_v13 = vld [vmem:[%s14864_s8 + $0x20] sm:$0xff] }
0x34a5   :  { %v11107_v34 = vpop.eup %11106  ;;  %v8715_v58 = vsel %vm2001_vm9, %v11105_v15, 0.0 }
0x34a6   :  { %v11109_v17 = vpop.eup %11108  ;;  %8716 = vadd.xlane.f32.xlu0 %v8715_v58  ;;  %v8149_v43 = vmul.f32 %v11107_v34, %v11097_v56  ;;  %v9709_v56 = vld [vmem:[#allocation28] ss:$0 sm:$0xff] }
0x34a7   :  { %v11111_v49 = vpop.eup %11110  ;;  %v8712_v51 = vsel %vm2001_vm9, %v11109_v17, 0.0 }
0x34a8   :  { %8713 = vadd.xlane.f32.xlu1 %v8712_v51  ;;  %v8147_v19 = vmul.f32 %v11111_v49, %v11099_v59 }
0x34aa   :  { %10676 = vmatprep.mubr.msk.f32.mxu1 %vm2001_vm9, %v8147_v19 }
0x34ab   :  { %10677 = vmatmul.mubr.msk.f32.vlgmr.msra.gmra.mxu1 %vm2001_vm9, %v8149_v43  ;;  %v9712_v43 = vld [vmem:[#allocation43] ss:$0 sm:$0xff] }
0x34ac   :  { %10685 = vmatpush3.msk.msra.mxu1 %vm2005_vm6, %v14543_v8 }
0x34ad   :  { %10694 = vmatprep.subr.msk.mxu1 %vm2005_vm6, %v8722_v22 }
0x352b   :  { %v8525_v38 = vpop.xlane.xlu0 %8524 }
0x352c   :  { %11112 = vrcp.f32 %v8525_v38 }
0x352d   :  { %v8522_v5 = vpop.xlane.xlu1 %8521 }
0x352e   :  { %11114 = vrcp.f32 %v8522_v5 }
0x352f   :  { %v8717_v37 = vpop.xlane.xlu0 %8716 }
0x3530   :  { %11116 = vrcp.f32 %v8717_v37 }
0x3531   :  { %v8714_v25 = vpop.xlane.xlu1 %8713 }
0x3532   :  { %11118 = vrcp.f32 %v8714_v25  ;;  %v9713_v25 = vld [vmem:[#allocation42] ss:$0 sm:$0xff] }
0x3539   :  { %v11113_v27 = vpop.eup %11112 }
0x353a   :  { %v8529_v8 = vmul.f32 %v11113_v27, %v11101_v11  ;;  %v9048_v11 = vld [vmem:[%s14864_s8 + $0x38] sm:$0xff] }
0x353b   :  { %v11115_v61 = vpop.eup %11114  ;;  %10721 = vmatprep.subr.mxu0 %v9048_v11 }
0x353c   :  { %v8527_v30 = vmul.f32 %v11115_v61, %v11103_v35  ;;  %v9046_v35 = vld [vmem:[%s14864_s8 + $0x28] sm:$0xff] }
0x353d   :  { %v11117_v60 = vpop.eup %11116 }
0x353e   :  { %10686 = vmatprep.mubr.msk.f32.mxu1 %vm2001_vm9, %v8527_v30  ;;  %v8721_v32 = vmul.f32 %v11117_v60, %v11105_v15  ;;  %v9043_v60 = vld [vmem:[%s14864_s8 + $0x10] sm:$0xff] }
0x353f   :  { %v11119_v23 = vpop.eup %11118  ;;  %10687 = vmatmul.mubr.msk.f32.vlgmr.msra.gmra.mxu1 %vm2001_vm9, %v8529_v8  ;;  %v9044_v8 = vld [vmem:[%s14864_s8 + $0x18] sm:$0xff] }
0x3540   :  { %10695 = vmatpush3.msk.msra.mxu1 %vm2005_vm6, %v8722_v22  ;;  %v8719_v7 = vmul.f32 %v11119_v23, %v11109_v17  ;;  %v9042_v23 = vld [vmem:[%s14864_s8 + $0x8] sm:$0xff] }
0x3542   :  { %10696 = vmatprep.mubr.msk.f32.mxu1 %vm2001_vm9, %v8719_v7  ;;  %v9041_v7 = vld [vmem:[%s14864_s8] sm:$0xff] }
0x3543   :  { %10697 = vmatmul.mubr.msk.f32.vlgmr.msra.gmra.mxu1 %vm2001_vm9, %v8721_v32  ;;  %v9714_v32 = vld [vmem:[#allocation34] ss:$0 sm:$0xff] }
0x356b   :  { %v10678_v36 = vpop.f32.mrf.mxu1 }
0x356c   :  { %v8422_v50 = vadd.f32 %v10678_v36, %v14589_v42 }
0x356d   :  { %v8416_v47 = vpop.f32.mrf.mxu1 }
0x356e   :  { %v8417_v21 = vadd.f32 %v8416_v47, %v14591_v45 }
0x35ff   :  { %v10688_v39 = vpop.f32.mrf.mxu1 }
0x3600   :  { %v8616_v55 = vadd.f32 %v10688_v39, %v8422_v50  ;;  %v9717_v39 = vld [vmem:[#allocation37] ss:$0 sm:$0xff] }
0x3601   :  { %v8606_v24 = vpop.f32.mrf.mxu1 }
0x3602   :  { %v8615_v54 = vadd.f32 %v8606_v24, %v8417_v21 }
0x3603   :  { %v10698_v52 = vpop.f32.mrf.mxu1 }
0x3604   :  { %v8808_v2 = vadd.f32 %v10698_v52, %v8616_v55 }
0x3605   :  { %v8798_v14 = vpop.f32.mrf.mxu1 }
0x3606   :  { %v8807_v12 = vadd.f32 %v8798_v14, %v8615_v54 }
0x3608   :  { %10707 = vmatprep.mubr.msk.f32.mxu0 %vm1582_vm10, %v8807_v12 }
0x3609   :  { %10708 = vmatmul.mubr.msk.f32.vlgmr.msra.gmra.mxu0 %vm1582_vm10, %v8808_v2 }
0x360a   :  { %10722 = vmatpush3.msra.mxu0 %v9048_v11 }
0x360b   :  { %10723 = vmatprep.subr.mxu0 %v9047_v29 }
0x360c   :  { %10724 = vmatpush3.msra.mxu0 %v9047_v29 }
0x360d   :  { %10725 = vmatprep.subr.mxu0 %v9046_v35 }
0x360e   :  { %10726 = vmatpush3.msra.mxu0 %v9046_v35 }
0x360f   :  { %10727 = vmatprep.subr.mxu0 %v9045_v13 }
0x3610   :  { %10728 = vmatpush3.msra.mxu0 %v9045_v13 }
0x3611   :  { %10729 = vmatprep.subr.mxu0 %v9044_v8 }
0x3612   :  { %10730 = vmatpush3.msra.mxu0 %v9044_v8 }
0x3613   :  { %10731 = vmatprep.subr.mxu0 %v9043_v60 }
0x3614   :  { %10732 = vmatpush3.msra.mxu0 %v9043_v60 }
0x3615   :  { %10733 = vmatprep.subr.mxu0 %v9042_v23 }
0x3616   :  { %10734 = vmatpush3.msra.mxu0 %v9042_v23 }
0x3617   :  { %10735 = vmatprep.subr.mxu0 %v9041_v7 }
0x3618   :  { %10736 = vmatpush3.msra.mxu0 %v9041_v7 }
0x36c9   :  { %v10709_v9 = vpop.f32.mrf.mxu0 }
0x36ca   :  { %v8898_v59 = vadd.f32 %v10709_v9, %v9709_v56 }
0x36cb   :  { %v8892_v31 = vpop.f32.mrf.mxu0 }
0x36cc   :  { %v8902_v62 = vadd.f32 %v8898_v59, %v14491_v40  ;;  %v8893_v63 = vadd.f32 %v9709_v56, %v8892_v31  ;;  %v8950_v40 = vld [vmem:[#allocation36 + $0x18] sm:$0xff] }
0x36cd   :  { %10710 = vmatprep.subr.mxu1 %v8950_v40 }
0x36ce   :  { %v8901_v45 = vadd.f32 %v8893_v63, %v14489_v53  ;;  %v8908_v42 = vsel %vm1582_vm10, %v8902_v62, 0.0  ;;  %10711 = vmatpush3.msra.mxu1 %v8950_v40  ;;  %v9721_v40 = vld [vmem:[#allocation45] ss:$0 sm:$0xff] }
0x36cf   :  { %8909 = vadd.xlane.f32.xlu0 %v8908_v42  ;;  %10712 = vmatprep.subr.mxu1 %v8949_v18 }
0x36d0   :  { %v8905_v3 = vsel %vm1582_vm10, %v8901_v45, 0.0  ;;  %10713 = vmatpush3.msra.mxu1 %v8949_v18 }
0x36d1   :  { %8906 = vadd.xlane.f32.xlu1 %v8905_v3  ;;  %10714 = vmatprep.subr.mxu1 %v8948_v48 }
0x36d2   :  { %10715 = vmatpush3.msra.mxu1 %v8948_v48 }
0x36d3   :  { %10716 = vmatprep.subr.mxu1 %v8947_v28 }
0x36d4   :  { %10717 = vmatpush3.msra.mxu1 %v8947_v28 }
0x3758   :  { %v8910_v20 = vpop.xlane.xlu0 %8909 }
0x3759   :  { %v8912_v0 = vmul.f32 0.03125, %v8910_v20 }
0x375a   :  { %v8907_v1 = vpop.xlane.xlu1 %8906 }
0x375b   :  { %v8914_v4 = vsub.f32 %v8902_v62, %v8912_v0  ;;  %v8911_v6 = vmul.f32 0.03125, %v8907_v1 }
0x375d   :  { %v8913_v10 = vsub.f32 %v8901_v45, %v8911_v6  ;;  %v8916_v44 = vmul.f32 %v8914_v4, %v8914_v4 }
0x375f   :  { %v8920_v46 = vsel %vm1582_vm10, %v8916_v44, 0.0  ;;  %v8915_v26 = vmul.f32 %v8913_v10, %v8913_v10 }
0x3760   :  { %8921 = vadd.xlane.f32.xlu0 %v8920_v46  ;;  %v9720_v46 = vld [vmem:[#allocation46] ss:$0 sm:$0xff] }
0x3761   :  { %v8917_v53 = vsel %vm1582_vm10, %v8915_v26, 0.0 }
0x3762   :  { %8918 = vadd.xlane.f32.xlu1 %v8917_v53 }
0x37e9   :  { %v8922_v15 = vpop.xlane.xlu0 %8921 }
0x37ea   :  { %v8924_v34 = vmul.f32 0.03125, %v8922_v15 }
0x37eb   :  { %v8919_v58 = vpop.xlane.xlu1 %8918 }
0x37ec   :  { %v8926_v17 = vadd.f32 1e-05, %v8924_v34  ;;  %v8923_v49 = vmul.f32 0.03125, %v8919_v58 }
0x37ee   :  { %11120 = vrsqrt.f32 %v8926_v17  ;;  %v8925_v51 = vadd.f32 1e-05, %v8923_v49 }
0x37f0   :  { %11122 = vrsqrt.f32 %v8925_v51 }
0x37fb   :  { %v11121_v19 = vpop.eup %11120 }
0x37fc   :  { %v8930_v22 = vmul.f32 %v11121_v19, %v8914_v4 }
0x37fd   :  { %v11123_v38 = vpop.eup %11122 }
0x37fe   :  { %v8929_v5 = vmul.f32 %v11123_v38, %v8913_v10  ;;  %v8938_v37 = vmul.f32 %v9712_v43, %v8930_v22 }
0x3800   :  { %v8937_v27 = vmul.f32 %v9712_v43, %v8929_v5  ;;  %v8946_v30 = vadd.f32 %v9713_v25, %v8938_v37  ;;  %v9230_v5 = vld [vmem:[%s13397_s27 + $0x18] sm:$0xff]  ;;  %v9229_v37 = vld [vmem:[%s13397_s27 + $0x10] sm:$0xff] }
0x3801   :  { %10740 = vmatprep.subr.mxu1 %v9230_v5 }
0x3802   :  { %v8945_v61 = vadd.f32 %v9713_v25, %v8937_v27  ;;  %v9228_v25 = vld [vmem:[%s13397_s27 + $0x8] sm:$0xff]  ;;  %v9227_v27 = vld [vmem:[%s13397_s27] sm:$0xff] }
0x3804   :  { %10718 = vmatprep.mubr.msk.f32.mxu1 %vm1582_vm10, %v8945_v61 }
0x3805   :  { %10719 = vmatmul.mubr.msk.f32.vlgmr.msra.gmra.mxu1 %vm1582_vm10, %v8946_v30 }
0x3806   :  { %10741 = vmatpush3.msra.mxu1 %v9230_v5 }
0x3807   :  { %10742 = vmatprep.subr.mxu1 %v9229_v37 }
0x3808   :  { %10743 = vmatpush3.msra.mxu1 %v9229_v37 }
0x3809   :  { %10744 = vmatprep.subr.mxu1 %v9228_v25 }
0x380a   :  { %10745 = vmatpush3.msra.mxu1 %v9228_v25 }
0x380b   :  { %10746 = vmatprep.subr.mxu1 %v9227_v27 }
0x380c   :  { %10747 = vmatpush3.msra.mxu1 %v9227_v27 }
0x38c5   :  { %v10720_v16 = vpop.f32.mrf.mxu1 }
0x38c6   :  { %v9036_v57 = vadd.f32 %v10720_v16, %v9714_v32  ;;  %v9722_v16 = vld [vmem:[#allocation60] ss:$0 sm:$0xff] }
0x38c7   :  { %v9030_v33 = vpop.f32.mrf.mxu1 }
0x38c8   :  { %v9031_v41 = vadd.f32 %v9714_v32, %v9030_v33  ;;  %v9040_v47 = vmax.f32 %v9036_v57, 0.0 }
0x38ca   :  { %v9039_v36 = vmax.f32 %v9031_v41, 0.0 }
0x38cc   :  { %10737 = vmatprep.mubr.msk.f32.mxu0 %vm2703_vm12, %v9039_v36 }
0x38cd   :  { %10738 = vmatmul.mubr.msk.f32.vlgmr.msra.gmra.mxu0 %vm2703_vm12, %v9040_v47  ;;  %v9723_v47 = vld [vmem:[#allocation58] ss:$0 sm:$0xff] }
0x398d   :  { %v10739_v24 = vpop.f32.mrf.mxu0 }
0x398e   :  { %v9134_v21 = vadd.f32 %v10739_v24, %v9717_v39 }
0x398f   :  { %v9128_v50 = vpop.f32.mrf.mxu0 }
0x3990   :  { %v9138_v52 = vadd.f32 %v9134_v21, %v8946_v30  ;;  %v9129_v54 = vadd.f32 %v9717_v39, %v9128_v50  ;;  %v9724_v50 = vld [vmem:[%s14865_s6] ss:$0 sm:$0xff] }
0x3992   :  { %v9137_v55 = vadd.f32 %v9129_v54, %v8945_v61  ;;  %v9144_v14 = vsel %vm1582_vm10, %v9138_v52, 0.0 }
0x3993   :  { %9145 = vadd.xlane.f32.xlu0 %v9144_v14 }
0x3994   :  { %v9141_v12 = vsel %vm1582_vm10, %v9137_v55, 0.0 }
0x3995   :  { %9142 = vadd.xlane.f32.xlu1 %v9141_v12 }
0x3a1c   :  { %v9146_v2 = vpop.xlane.xlu0 %9145 }
0x3a1d   :  { %v9148_v56 = vmul.f32 0.03125, %v9146_v2 }
0x3a1e   :  { %v9143_v9 = vpop.xlane.xlu1 %9142 }
0x3a1f   :  { %v9150_v59 = vsub.f32 %v9138_v52, %v9148_v56  ;;  %v9147_v31 = vmul.f32 0.03125, %v9143_v9 }
0x3a21   :  { %v9149_v62 = vsub.f32 %v9137_v55, %v9147_v31  ;;  %v9152_v63 = vmul.f32 %v9150_v59, %v9150_v59 }
0x3a23   :  { %v9156_v45 = vsel %vm1582_vm10, %v9152_v63, 0.0  ;;  %v9151_v42 = vmul.f32 %v9149_v62, %v9149_v62 }
0x3a24   :  { %9157 = vadd.xlane.f32.xlu0 %v9156_v45 }
0x3a25   :  { %v9153_v3 = vsel %vm1582_vm10, %v9151_v42, 0.0 }
0x3a26   :  { %9154 = vadd.xlane.f32.xlu1 %v9153_v3 }
0x3aad   :  { %v9158_v20 = vpop.xlane.xlu0 %9157 }
0x3aae   :  { %v9160_v0 = vmul.f32 0.03125, %v9158_v20 }
0x3aaf   :  { %v9155_v1 = vpop.xlane.xlu1 %9154 }
0x3ab0   :  { %v9162_v4 = vadd.f32 1e-05, %v9160_v0  ;;  %v9159_v6 = vmul.f32 0.03125, %v9155_v1 }
0x3ab2   :  { %11124 = vrsqrt.f32 %v9162_v4  ;;  %v9161_v10 = vadd.f32 1e-05, %v9159_v6 }
0x3ab4   :  { %11126 = vrsqrt.f32 %v9161_v10 }
0x3abf   :  { %v11125_v44 = vpop.eup %11124 }
0x3ac0   :  { %v9166_v26 = vmul.f32 %v11125_v44, %v9150_v59 }
0x3ac1   :  { %v11127_v53 = vpop.eup %11126 }
0x3ac2   :  { %v9174_v18 = vmul.f32 %v9720_v46, %v9166_v26  ;;  %v9165_v48 = vmul.f32 %v11127_v53, %v9149_v62 }
0x3ac4   :  { %v9182_v28 = vadd.f32 %v9721_v40, %v9174_v18  ;;  %v9173_v11 = vmul.f32 %v9720_v46, %v9165_v48 }
0x3ac6   :  { %v9188_v29 = vsel %vm1582_vm10, %v9182_v28, 0.0  ;;  %v9181_v35 = vadd.f32 %v9721_v40, %v9173_v11 }
0x3ac7   :  { %9189 = vadd.xlane.f32.xlu0 %v9188_v29 }
0x3ac8   :  { %v9185_v13 = vsel %vm1582_vm10, %v9181_v35, 0.0 }
0x3ac9   :  { %9186 = vadd.xlane.f32.xlu1 %v9185_v13 }
0x3b50   :  { %v9190_v15 = vpop.xlane.xlu0 %9189 }
0x3b51   :  { %v9192_v34 = vmul.f32 0.03125, %v9190_v15 }
0x3b52   :  { %v9187_v58 = vpop.xlane.xlu1 %9186 }
0x3b53   :  { %v9194_v17 = vsub.f32 %v9182_v28, %v9192_v34  ;;  %v9191_v49 = vmul.f32 0.03125, %v9187_v58 }
0x3b55   :  { %v9193_v51 = vsub.f32 %v9181_v35, %v9191_v49  ;;  %v9196_v19 = vmul.f32 %v9194_v17, %v9194_v17 }
0x3b57   :  { %v9200_v43 = vsel %vm1582_vm10, %v9196_v19, 0.0  ;;  %v9195_v22 = vmul.f32 %v9193_v51, %v9193_v51 }
0x3b58   :  { %9201 = vadd.xlane.f32.xlu0 %v9200_v43 }
0x3b59   :  { %v9197_v38 = vsel %vm1582_vm10, %v9195_v22, 0.0 }
0x3b5a   :  { %9198 = vadd.xlane.f32.xlu1 %v9197_v38 }
0x3be1   :  { %v9202_v61 = vpop.xlane.xlu0 %9201 }
0x3be2   :  { %v9204_v30 = vmul.f32 0.03125, %v9202_v61 }
0x3be3   :  { %v9199_v8 = vpop.xlane.xlu1 %9198 }
0x3be4   :  { %v9206_v60 = vadd.f32 1e-05, %v9204_v30  ;;  %v9203_v23 = vmul.f32 0.03125, %v9199_v8 }
0x3be6   :  { %11128 = vrsqrt.f32 %v9206_v60  ;;  %v9205_v7 = vadd.f32 1e-05, %v9203_v23 }
0x3be8   :  { %11130 = vrsqrt.f32 %v9205_v7 }
0x3bf3   :  { %v11129_v32 = vpop.eup %11128 }
0x3bf4   :  { %v9210_v57 = vmul.f32 %v11129_v32, %v9194_v17 }
0x3bf5   :  { %v11131_v33 = vpop.eup %11130 }
0x3bf6   :  { %v9209_v41 = vmul.f32 %v11131_v33, %v9193_v51  ;;  %v9218_v36 = vmul.f32 %v9722_v16, %v9210_v57 }
0x3bf8   :  { %v9217_v39 = vmul.f32 %v9722_v16, %v9209_v41  ;;  %v9226_v21 = vadd.f32 %v9723_v47, %v9218_v36 }
0x3bfa   :  { %v9225_v24 = vadd.f32 %v9723_v47, %v9217_v39 }
0x3bfc   :  { %10748 = vmatprep.mubr.msk.f32.mxu1 %vm1582_vm10, %v9225_v24 }
0x3bfd   :  { %10749 = vmatmul.mubr.msk.f32.vlgmr.msra.gmra.mxu1 %vm1582_vm10, %v9226_v21 }
0x3cbd   :  { %v10750_v52 = vpop.f32.mrf.mxu1 }
0x3cbe   :  { %v9316_v54 = vadd.f32 %v10750_v52, %v9724_v50 }
0x3cbf   :  { %v9310_v55 = vpop.f32.mrf.mxu1 }
0x3cc0   :  { %9320 = vst.msk [vmem:[%s13412_s9 + $0x8] sm:$0xff] %vm1319_vm8, %v9316_v54  ;;  %v9311_v14 = vadd.f32 %v9724_v50, %v9310_v55 }
0x3cc2   :  { %9319 = vst.msk [vmem:[%s13412_s9] sm:$0xff] %vm1319_vm8, %v9311_v14 }
0x3cc3   :  { %9325 = vsyncpa [#allocation4], 1 }
0x3cc4   :  { %9326 = vsyncpa [#allocation8], 1 }
0x3cc5   :  { %9327 = vsyncpa [#allocation11], 1 }
0x3cc6   :  { %9328 = vsyncpa [#allocation14], 1 }
0x3cc7   :  { %9329 = vsyncpa [#allocation17], 1 }
0x3cc8   :  { %9330 = vsyncpa [#allocation20], 1 }
0x3cc9   :  { %9331 = vsyncpa [#allocation23], 1 }
0x3cca   :  { %9332 = vsyncpa [#allocation26], 1 }
0x3ccb   :  { %9333 = vsyncpa [#allocation29], 1 }
0x3ccc   :  { %9334 = vsyncpa [#allocation32], 1 }
0x3ccd   :  { %9335 = vsyncpa [#allocation35], 1 }
0x3cce   :  { %9336 = vsyncpa [#allocation38], 1 }
0x3ccf   :  { %9337 = vsyncpa [#allocation41], 1 }
0x3cd0   :  { %9338 = vsyncpa [#allocation44], 1 }
0x3cd1   :  { %9339 = vsyncpa [#allocation47], 1 }
0x3cd2   :  { %9340 = vsyncpa [#allocation50], 1 }
0x3cd3   :  { %9341 = vsyncpa [#allocation53], 1 }
0x3cd4   :  { %9342 = vsyncpa [#allocation56], 1 }
0x3cd5   :  { %9343 = vsyncpa [#allocation59], 1 }
0x3cd6   :  { %9344 = vsyncpa [#allocation62], 1 }
0x3cd7   :  { %9345 = vsyncpa [#allocation65], 1 }
0x3cd8   :  { %9346 = vsyncpa [#allocation68], 1 }
0x3cd9   :  { %9347 = vsyncpa [#allocation71], 1 }
0x3cda   :  { %9348 = vsyncpa [#allocation74], 1 }
0x3cdb   :  { %9349 = vsyncpa [#allocation77], 1 }
0x3cdc   :  { %9350 = vsyncpa [#allocation80], 1 }
0x3cdd   :  { %9351 = vsyncpa [#allocation83], 1 }
0x3cde   :  { %9352 = vsyncpa [#allocation86], 1 }
0x3cdf   :  { %9353 = vsyncpa [#allocation89], 1 }
0x3ce0   :  { %9354 = vsyncpa [#allocation92], 1 }
0x3ce1   :  { %9355 = vsyncpa [#allocation95], 1 }
0x3ce2   :  { %9356 = vsyncpa [#allocation98], 1 }
0x3ce3   :  { %9357 = vsyncpa [#allocation101], 1 }
0x3ce4   :  { %9358 = vsyncpa [#allocation104], 1 }
0x3ce5   :  { %9359 = vsyncpa [#allocation107], 1 }
0x3ce6   :  { %9360 = vsyncpa [#allocation110], 1 }
0x3ce7   :  { %9361 = vsyncpa [#allocation113], 1 }
0x3ce8   :  { %9362 = vsyncpa [#allocation116], 1 }
0x3ce9   :  { %9363 = vsyncpa [#allocation5], 1 }

</bundles_post_ra>
